<compile_context>
chip_gen: v5e
topology: v5e:2x2
jax: 0.10.0
libtpu: 0.0.40
codegen_flags: <defaults>
</compile_context>

<pallas_src>
import functools

import numpy as np

import jax
import jax.numpy as jnp
from jax.experimental import pallas as pl
from jax.experimental.pallas import tpu as pltpu

LEAKY_SLOPE = 0.01    # nn.LeakyReLU default
BN_EPS = 1e-5         # nn.BatchNorm2d default


# ------------------------------ Pallas kernels -------------------------------

def _convt_kernel(*refs, cin, cout, h, w, m, apply_prologue):
    """Sub-pixel ConvTranspose2d(k=3, s=2, p=1, op=1) + bias.

    inputs : x [Cin, Mbuf]      raw (pre-BN) activation, zero lane padding
             coords [2, M]      per-column (x, y) image coordinates (int32)
             w [4*Cout, 4*Cin]  folded sub-pixel weight (bf16)
             b [4*Cout, 1]      bias tiled over the 4 output phases
             gb [2*Cout, 1]     gamma ; beta of the BN following this conv
            (ss [2*Cin, 1]      scale ; shift of the BN preceding this conv)
    outputs: y [4*Cout, M]      raw conv output, rows = (phase, channel)
             ss_out [2*Cout, 1] folded affine for the next layer's prologue
    """
    if apply_prologue:
        (x_ref, coord_ref, w_ref, b_ref, gb_ref, ss_ref, y_ref, ss_out_ref) = refs
    else:
        (x_ref, coord_ref, w_ref, b_ref, gb_ref, y_ref, ss_out_ref) = refs

    x = x_ref[...]                                            # [Cin, Mbuf] f32
    if apply_prologue:                                        # prev BN affine + LeakyReLU,
        x = x * ss_ref[0:cin, :] + ss_ref[cin:2 * cin, :]     # applied once per channel row
        x = jnp.where(x >= 0, x, LEAKY_SLOPE * x)
    xb = x.astype(jnp.bfloat16)                               # MXU operand dtype

    cx = coord_ref[0:1, :]                                    # [1, M]
    cy = coord_ref[1:2, :]

    acc = jnp.zeros((4 * cout, m), jnp.float32)
    for di in (0, 1):
        for dj in (0, 1):
            t = 2 * di + dj
            off = di * w + dj
            tap = xb[:, off:off + m]                          # in-kernel tap gather
            if di or dj:                                      # implicit zero padding
                ok = (cx + dj < w) & (cy + di < h)
                tap = jnp.where(ok, tap, 0.0)
            acc = acc + jnp.dot(w_ref[:, t * cin:(t + 1) * cin], tap,
                                preferred_element_type=jnp.float32)
    y = acc + b_ref[...]
    y_ref[...] = y

    # Training-mode BN batch statistics over the 4 phase rows of each channel,
    # two-pass (centred) for numerical robustness, folded to (scale, shift).
    cnt = 4.0 * m
    s1 = jnp.sum(y, axis=1, keepdims=True)                    # [4*Cout, 1]
    mean = (s1[0:cout] + s1[cout:2 * cout]
            + s1[2 * cout:3 * cout] + s1[3 * cout:4 * cout]) / cnt
    d = y - jnp.concatenate([mean, mean, mean, mean], axis=0)
    s2 = jnp.sum(d * d, axis=1, keepdims=True)
    var = (s2[0:cout] + s2[cout:2 * cout]
           + s2[2 * cout:3 * cout] + s2[3 * cout:4 * cout]) / cnt
    gamma = gb_ref[0:cout, :]
    beta = gb_ref[cout:2 * cout, :]
    scale = gamma * jax.lax.rsqrt(var + BN_EPS)
    shift = beta - mean * scale
    ss_out_ref[...] = jnp.concatenate([scale, shift], axis=0)


def _conv3x3_tanh_kernel(x_ref, coord_ref, w_ref, b_ref, ss_ref, y_ref,
                         *, cin, cout, h, w, m, lead):
    """Conv2d(k=3, s=1, p=1) + bias + tanh, with the previous layer's BN affine +
    LeakyReLU fused into the prologue and taps gathered in-kernel."""
    x = x_ref[...]                                            # [Cin, Mbuf] f32
    x = x * ss_ref[0:cin, :] + ss_ref[cin:2 * cin, :]
    x = jnp.where(x >= 0, x, LEAKY_SLOPE * x)
    xb = x.astype(jnp.bfloat16)

    cx = coord_ref[0:1, :]
    cy = coord_ref[1:2, :]

    acc = jnp.zeros((cout, m), jnp.float32)
    for ky in range(3):
        for kx in range(3):
            t = 3 * ky + kx
            off = lead + (ky - 1) * w + (kx - 1)
            tap = xb[:, off:off + m]
            if ky != 1 or kx != 1:                            # implicit zero padding
                ok = ((cx + (kx - 1) >= 0) & (cx + (kx - 1) < w)
                      & (cy + (ky - 1) >= 0) & (cy + (ky - 1) < h))
                tap = jnp.where(ok, tap, 0.0)
            acc = acc + jnp.dot(w_ref[:, t * cin:(t + 1) * cin], tap,
                                preferred_element_type=jnp.float32)
    y_ref[...] = jnp.tanh(acc + b_ref[...])                   # EUP slot, effectively free


# ------------------------------ layer wrappers --------------------------------

def _round_up(v, d):
    return -(-v // d) * d


def _col_coords(n, h, w):
    """Static per-column (x, y) image coordinates for raster order (n, y, x)."""
    idx = np.arange(n * h * w, dtype=np.int32)
    return jnp.asarray(np.stack([idx % w, (idx // w) % h], axis=0).astype(np.int32))


def convt_layer(x2d, coords, w_fold, bias4, gb, ss_in, *, h, w):
    """One ConvT layer on a channels-first activation x2d [Cin, Mbuf]."""
    cin, mbuf = x2d.shape
    m = coords.shape[1]
    cout = w_fold.shape[0] // 4
    apply_prologue = ss_in is not None

    inputs = [x2d, coords, w_fold, bias4, gb]
    in_specs = [
        pl.BlockSpec((cin, mbuf), lambda i: (0, 0)),
        pl.BlockSpec((2, m), lambda i: (0, 0)),
        pl.BlockSpec((4 * cout, 4 * cin), lambda i: (0, 0)),
        pl.BlockSpec((4 * cout, 1), lambda i: (0, 0)),
        pl.BlockSpec((2 * cout, 1), lambda i: (0, 0)),
    ]
    if apply_prologue:
        inputs.append(ss_in)
        in_specs.append(pl.BlockSpec((2 * cin, 1), lambda i: (0, 0)))

    kernel = functools.partial(_convt_kernel, cin=cin, cout=cout, h=h, w=w, m=m,
                               apply_prologue=apply_prologue)
    # TODO(synk): tile the lane axis (grid >= 2) for very large activations so the
    # pipeline overlaps DMA and v7x can shard across both TensorCores.
    y, ss_out = pl.pallas_call(
        kernel,
        out_shape=(jax.ShapeDtypeStruct((4 * cout, m), jnp.float32),
                   jax.ShapeDtypeStruct((2 * cout, 1), jnp.float32)),
        grid=(1,),
        in_specs=in_specs,
        out_specs=(pl.BlockSpec((4 * cout, m), lambda i: (0, 0)),
                   pl.BlockSpec((2 * cout, 1), lambda i: (0, 0))),
        compiler_params=pltpu.CompilerParams(dimension_semantics=("arbitrary",)),
    )(*inputs)
    return y, ss_out


def conv3x3_tanh_layer(x2d, coords, w_mat, bias, ss_in, *, h, w, lead):
    cin, mbuf = x2d.shape
    m = coords.shape[1]
    cout = w_mat.shape[0]
    kernel = functools.partial(_conv3x3_tanh_kernel, cin=cin, cout=cout,
                               h=h, w=w, m=m, lead=lead)
    return pl.pallas_call(
        kernel,
        out_shape=jax.ShapeDtypeStruct((cout, m), jnp.float32),
        grid=(1,),
        in_specs=[
            pl.BlockSpec((cin, mbuf), lambda i: (0, 0)),
            pl.BlockSpec((2, m), lambda i: (0, 0)),
            pl.BlockSpec((cout, 9 * cin), lambda i: (0, 0)),
            pl.BlockSpec((cout, 1), lambda i: (0, 0)),
            pl.BlockSpec((2 * cin, 1), lambda i: (0, 0)),
        ],
        out_specs=pl.BlockSpec((cout, m), lambda i: (0, 0)),
        compiler_params=pltpu.CompilerParams(dimension_semantics=("arbitrary",)),
    )(x2d, coords, w_mat, bias, ss_in)


# --------------------------- parameter preparation ----------------------------

def _fold_convt_weight(w_ct):
    """Fold a PyTorch ConvTranspose2d weight [Cin, Cout, 3, 3] (k=3,s=2,p=1,op=1)
    into the sub-pixel matrix [4*Cout, 4*Cin]:
       row = (2a + b)*Cout + co   (output phase (a, b))
       col = (2di + dj)*Cin + ci  (input tap offset (di, dj))."""
    cin, cout = w_ct.shape[0], w_ct.shape[1]
    kidx = {(0, 0): 1, (1, 0): 2, (1, 1): 0}   # (output parity, tap offset) -> kernel index
    wf = np.zeros((4 * cout, 4 * cin), np.float32)
    for a in (0, 1):
        for b in (0, 1):
            p = 2 * a + b
            for di in (0, 1):
                for dj in (0, 1):
                    if (a, di) not in kidx or (b, dj) not in kidx:
                        continue
                    t = 2 * di + dj
                    wf[p * cout:(p + 1) * cout, t * cin:(t + 1) * cin] = \
                        w_ct[:, :, kidx[(a, di)], kidx[(b, dj)]].T
    return wf


def prepare_params(params):
    """One-time packing (outside jit): folded bf16 weight matrices, f32 columns."""
    prepared = {"convt": []}
    for (w_ct, b, gamma, beta) in list(params["decoder"]) + [params["final_ct"]]:
        w_np = np.asarray(w_ct, np.float32)
        prepared["convt"].append((
            jnp.asarray(_fold_convt_weight(w_np), jnp.bfloat16),
            jnp.asarray(np.tile(np.asarray(b, np.float32), 4).reshape(-1, 1)),
            jnp.asarray(np.concatenate([np.asarray(gamma, np.float32),
                                        np.asarray(beta, np.float32)]).reshape(-1, 1)),
        ))
    w_c, b_c = params["final_conv"]
    w_np = np.asarray(w_c, np.float32)
    cf, cin = w_np.shape[0], w_np.shape[1]
    prepared["final_conv"] = (
        jnp.asarray(w_np.transpose(0, 2, 3, 1).reshape(cf, 9 * cin), jnp.bfloat16),
        jnp.asarray(np.asarray(b_c, np.float32).reshape(-1, 1)),
    )
    return prepared


# --------------------------------- forward ------------------------------------

def decoder_v1_forward(x_nchw, kparams):
    n, c, h, w = x_nchw.shape
    # channels-first, spatial positions on the lane axis
    x2d = jnp.transpose(x_nchw, (1, 0, 2, 3)).reshape(c, n * h * w).astype(jnp.float32)
    ss = None
    for (w_fold, bias4, gb) in kparams["convt"]:
        m = n * h * w
        mbuf = _round_up(m + w + 1, 128)          # room for the (+1, +W, +W+1) tap slices
        xp = jnp.pad(x2d, ((0, 0), (0, mbuf - m)))
        y, ss = convt_layer(xp, _col_coords(n, h, w), w_fold, bias4, gb, ss, h=h, w=w)
        cout = w_fold.shape[0] // 4
        # sub-pixel interleave (phase-major -> raster): one small fused XLA transpose.
        # TODO(synk): fold this pixel shuffle into the next kernel's tap gather and fuse
        # all four layers into a single pallas_call to remove the remaining glue/launches.
        x2d = (y.reshape(2, 2, cout, n, h, w)
                 .transpose(2, 3, 4, 0, 5, 1)
                 .reshape(cout, n * 2 * h * 2 * w))
        c, h, w = cout, 2 * h, 2 * w

    w_mat, bias = kparams["final_conv"]
    m = n * h * w
    lead = 128                                    # room for the negative tap offsets
    mbuf = lead + _round_up(m + w + 1, 128)
    xp = jnp.pad(x2d, ((0, 0), (lead, mbuf - lead - m)))
    y = conv3x3_tanh_layer(xp, _col_coords(n, h, w), w_mat, bias, ss, h=h, w=w, lead=lead)
    cf = w_mat.shape[0]
    return jnp.transpose(y.reshape(cf, n, h, w), (1, 0, 2, 3))   # -> NCHW


# ------------------------- deterministic parameters ---------------------------

def init_params(key, in_channels, hidden_dims):
    hd = list(reversed(hidden_dims))              # DecoderV1 reverses hidden_dims
    keys = iter(jax.random.split(key, 64))
    params = {"decoder": []}
    for i in range(len(hd) - 1):
        cin, cout = hd[i], hd[i + 1]
        w = 0.1 * jax.random.normal(next(keys), (cin, cout, 3, 3), jnp.float32)
        b = 0.1 * jax.random.normal(next(keys), (cout,), jnp.float32)
        gamma = 1.0 + 0.1 * jax.random.normal(next(keys), (cout,), jnp.float32)
        beta = 0.1 * jax.random.normal(next(keys), (cout,), jnp.float32)
        params["decoder"].append((w, b, gamma, beta))
    c = hd[-1]
    w = 0.1 * jax.random.normal(next(keys), (c, c, 3, 3), jnp.float32)
    b = 0.1 * jax.random.normal(next(keys), (c,), jnp.float32)
    gamma = 1.0 + 0.1 * jax.random.normal(next(keys), (c,), jnp.float32)
    beta = 0.1 * jax.random.normal(next(keys), (c,), jnp.float32)
    params["final_ct"] = (w, b, gamma, beta)
    wc = 0.1 * jax.random.normal(next(keys), (in_channels, c, 3, 3), jnp.float32)
    bc = 0.1 * jax.random.normal(next(keys), (in_channels,), jnp.float32)
    params["final_conv"] = (wc, bc)
    return params


# ------------------------------ pure-JAX reference ----------------------------

def _ref_forward(x_nchw, params):
    def conv_t(x, w, b):
        w_eff = jnp.transpose(w, (1, 0, 2, 3))[:, :, ::-1, ::-1]
        y = jax.lax.conv_general_dilated(
            x, w_eff, window_strides=(1, 1), padding=((1, 2), (1, 2)),
            lhs_dilation=(2, 2), dimension_numbers=("NCHW", "OIHW", "NCHW"))
        return y + b.reshape(1, -1, 1, 1)

    def conv(x, w, b):
        y = jax.lax.conv_general_dilated(
            x, w, window_strides=(1, 1), padding=((1, 1), (1, 1)),
            dimension_numbers=("NCHW", "OIHW", "NCHW"))
        return y + b.reshape(1, -1, 1, 1)

    def bn_lrelu(x, gamma, beta):
        mean = jnp.mean(x, axis=(0, 2, 3), keepdims=True)
        var = jnp.mean(jnp.square(x - mean), axis=(0, 2, 3), keepdims=True)
        y = (x - mean) / jnp.sqrt(var + BN_EPS)
        y = y * gamma.reshape(1, -1, 1, 1) + beta.reshape(1, -1, 1, 1)
        return jnp.where(y >= 0, y, LEAKY_SLOPE * y)

    x = x_nchw
    for (w, b, g, be) in params["decoder"]:
        x = bn_lrelu(conv_t(x, w, b), g, be)
    w, b, g, be = params["final_ct"]
    x = bn_lrelu(conv_t(x, w, b), g, be)
    wc, bc = params["final_conv"]
    return jnp.tanh(conv(x, wc, bc))


# ----------------------------------- main --------------------------------------

if __name__ == "__main__":
    key = jax.random.PRNGKey(0)
    in_channels = 4
    hidden_dims = [8, 16, 32]             # small config; module reverses -> [32, 16, 8]
    k_x, k_p = jax.random.split(key)
    # input has reversed(hidden_dims)[0] = 32 channels (NCHW, like PyTorch)
    x = jax.random.normal(k_x, (2, 32, 4, 4), jnp.float32)
    params = init_params(k_p, in_channels, hidden_dims)

    kparams = prepare_params(params)      # one-time weight folding / bf16 cast, outside jit
    out = jax.jit(decoder_v1_forward)(x, kparams)
    out = jax.block_until_ready(out)

    assert out.shape == (2, in_channels, 32, 32), out.shape
    ref = _ref_forward(x, params)
    max_err = float(jnp.max(jnp.abs(out - ref)))
    # bf16 MXU operands with f32 accumulation/stats: typical max abs error ~1e-2.
    assert max_err < 1e-1, f"max abs err {max_err}"
    print("KERNEL_OK")
</pallas_src>

<mosaic_0001>
module attributes {stable_mosaic.version = 11 : i64} {
  func.func @_convt_kernel(%arg0: i32, %arg1: memref<32x128xf32, #tpu.memory_space<vmem>>, %arg2: memref<2x32xi32, #tpu.memory_space<vmem>>, %arg3: memref<64x128xbf16, #tpu.memory_space<vmem>>, %arg4: memref<64x1xf32, #tpu.memory_space<vmem>>, %arg5: memref<32x1xf32, #tpu.memory_space<vmem>>, %arg6: memref<64x32xf32, #tpu.memory_space<vmem>>, %arg7: memref<32x1xf32, #tpu.memory_space<vmem>>) attributes {dimension_semantics = [#tpu.dimension_semantics<arbitrary>], iteration_bounds = array<i64: 1>, scalar_prefetch = 0 : i64, scratch_operands = 0 : i64, tpu.core_type = #tpu.core_type<tc>, window_params = [{pipeline_mode = #tpu.pipeline_mode<synchronous>, transform_indices = @transform_0, window_bounds = array<i64: 32, 128>}, {pipeline_mode = #tpu.pipeline_mode<synchronous>, transform_indices = @transform_1, window_bounds = array<i64: 2, 32>}, {pipeline_mode = #tpu.pipeline_mode<synchronous>, transform_indices = @transform_2, window_bounds = array<i64: 64, 128>}, {pipeline_mode = #tpu.pipeline_mode<synchronous>, transform_indices = @transform_3, window_bounds = array<i64: 64, 1>}, {pipeline_mode = #tpu.pipeline_mode<synchronous>, transform_indices = @transform_4, window_bounds = array<i64: 32, 1>}, {pipeline_mode = #tpu.pipeline_mode<synchronous>, transform_indices = @transform_5, window_bounds = array<i64: 64, 32>}, {pipeline_mode = #tpu.pipeline_mode<synchronous>, transform_indices = @transform_6, window_bounds = array<i64: 32, 1>}]} {
    %c0 = arith.constant 0 : index
    %c0_0 = arith.constant 0 : index
    %0 = vector.load %arg1[%c0, %c0_0] : memref<32x128xf32, #tpu.memory_space<vmem>>, vector<32x128xf32>
    %1 = arith.truncf %0 : vector<32x128xf32> to vector<32x128xbf16>
    %c0_1 = arith.constant 0 : index
    %c0_2 = arith.constant 0 : index
    %2 = vector.load %arg2[%c0_1, %c0_2] : memref<2x32xi32, #tpu.memory_space<vmem>>, vector<1x32xi32>
    %c1 = arith.constant 1 : index
    %c0_3 = arith.constant 0 : index
    %3 = vector.load %arg2[%c1, %c0_3] : memref<2x32xi32, #tpu.memory_space<vmem>>, vector<1x32xi32>
    %cst = arith.constant 0.000000e+00 : f32
    %4 = vector.broadcast %cst : f32 to vector<64x32xf32>
    %5 = vector.extract_strided_slice %1 {offsets = [0, 0], sizes = [32, 32], strides = [1, 1]} : vector<32x128xbf16> to vector<32x32xbf16>
    %c0_4 = arith.constant 0 : index
    %c0_5 = arith.constant 0 : index
    %6 = vector.load %arg3[%c0_4, %c0_5] : memref<64x128xbf16, #tpu.memory_space<vmem>>, vector<64x32xbf16>
    %cst_6 = arith.constant dense<0.000000e+00> : vector<64x32xf32>
    %7 = tpu.matmul %6, %5, %cst_6 {dimension_numbers = #tpu.dot_dimension_numbers<[1], [0], [0], [1], [0, 0, 1, 1], [], []>} : vector<64x32xbf16>, vector<32x32xbf16>, vector<64x32xf32> -> vector<64x32xf32>
    %8 = arith.addf %4, %7 : vector<64x32xf32>
    %9 = vector.extract_strided_slice %1 {offsets = [0, 1], sizes = [32, 32], strides = [1, 1]} : vector<32x128xbf16> to vector<32x32xbf16>
    %c1_i32 = arith.constant 1 : i32
    %10 = vector.broadcast %c1_i32 : i32 to vector<1x32xi32>
    %11 = arith.addi %2, %10 : vector<1x32xi32>
    %c4_i32 = arith.constant 4 : i32
    %12 = vector.broadcast %c4_i32 : i32 to vector<1x32xi32>
    %13 = arith.cmpi slt, %11, %12 : vector<1x32xi32>
    %c0_i32 = arith.constant 0 : i32
    %14 = vector.broadcast %c0_i32 : i32 to vector<1x32xi32>
    %15 = arith.addi %3, %14 : vector<1x32xi32>
    %c4_i32_7 = arith.constant 4 : i32
    %16 = vector.broadcast %c4_i32_7 : i32 to vector<1x32xi32>
    %17 = arith.cmpi slt, %15, %16 : vector<1x32xi32>
    %18 = arith.andi %13, %17 : vector<1x32xi1>
    %cst_8 = arith.constant 0.000000e+00 : f32
    %19 = arith.truncf %cst_8 : f32 to bf16
    %20 = vector.shape_cast %18 : vector<1x32xi1> to vector<1x32xi1>
    %21 = vector.broadcast %20 : vector<1x32xi1> to vector<32x32xi1>
    %22 = vector.broadcast %19 : bf16 to vector<32x32xbf16>
    %23 = arith.select %21, %9, %22 : vector<32x32xi1>, vector<32x32xbf16>
    %c0_9 = arith.constant 0 : index
    %c32 = arith.constant 32 : index
    %24 = vector.load %arg3[%c0_9, %c32] : memref<64x128xbf16, #tpu.memory_space<vmem>>, vector<64x32xbf16>
    %cst_10 = arith.constant dense<0.000000e+00> : vector<64x32xf32>
    %25 = tpu.matmul %24, %23, %cst_10 {dimension_numbers = #tpu.dot_dimension_numbers<[1], [0], [0], [1], [0, 0, 1, 1], [], []>} : vector<64x32xbf16>, vector<32x32xbf16>, vector<64x32xf32> -> vector<64x32xf32>
    %26 = arith.addf %8, %25 : vector<64x32xf32>
    %27 = vector.extract_strided_slice %1 {offsets = [0, 4], sizes = [32, 32], strides = [1, 1]} : vector<32x128xbf16> to vector<32x32xbf16>
    %c0_i32_11 = arith.constant 0 : i32
    %28 = vector.broadcast %c0_i32_11 : i32 to vector<1x32xi32>
    %29 = arith.addi %2, %28 : vector<1x32xi32>
    %c4_i32_12 = arith.constant 4 : i32
    %30 = vector.broadcast %c4_i32_12 : i32 to vector<1x32xi32>
    %31 = arith.cmpi slt, %29, %30 : vector<1x32xi32>
    %c1_i32_13 = arith.constant 1 : i32
    %32 = vector.broadcast %c1_i32_13 : i32 to vector<1x32xi32>
    %33 = arith.addi %3, %32 : vector<1x32xi32>
    %c4_i32_14 = arith.constant 4 : i32
    %34 = vector.broadcast %c4_i32_14 : i32 to vector<1x32xi32>
    %35 = arith.cmpi slt, %33, %34 : vector<1x32xi32>
    %36 = arith.andi %31, %35 : vector<1x32xi1>
    %cst_15 = arith.constant 0.000000e+00 : f32
    %37 = arith.truncf %cst_15 : f32 to bf16
    %38 = vector.shape_cast %36 : vector<1x32xi1> to vector<1x32xi1>
    %39 = vector.broadcast %38 : vector<1x32xi1> to vector<32x32xi1>
    %40 = vector.broadcast %37 : bf16 to vector<32x32xbf16>
    %41 = arith.select %39, %27, %40 : vector<32x32xi1>, vector<32x32xbf16>
    %c0_16 = arith.constant 0 : index
    %c64 = arith.constant 64 : index
    %42 = vector.load %arg3[%c0_16, %c64] : memref<64x128xbf16, #tpu.memory_space<vmem>>, vector<64x32xbf16>
    %cst_17 = arith.constant dense<0.000000e+00> : vector<64x32xf32>
    %43 = tpu.matmul %42, %41, %cst_17 {dimension_numbers = #tpu.dot_dimension_numbers<[1], [0], [0], [1], [0, 0, 1, 1], [], []>} : vector<64x32xbf16>, vector<32x32xbf16>, vector<64x32xf32> -> vector<64x32xf32>
    %44 = arith.addf %26, %43 : vector<64x32xf32>
    %45 = vector.extract_strided_slice %1 {offsets = [0, 5], sizes = [32, 32], strides = [1, 1]} : vector<32x128xbf16> to vector<32x32xbf16>
    %c1_i32_18 = arith.constant 1 : i32
    %46 = vector.broadcast %c1_i32_18 : i32 to vector<1x32xi32>
    %47 = arith.addi %2, %46 : vector<1x32xi32>
    %c4_i32_19 = arith.constant 4 : i32
    %48 = vector.broadcast %c4_i32_19 : i32 to vector<1x32xi32>
    %49 = arith.cmpi slt, %47, %48 : vector<1x32xi32>
    %c1_i32_20 = arith.constant 1 : i32
    %50 = vector.broadcast %c1_i32_20 : i32 to vector<1x32xi32>
    %51 = arith.addi %3, %50 : vector<1x32xi32>
    %c4_i32_21 = arith.constant 4 : i32
    %52 = vector.broadcast %c4_i32_21 : i32 to vector<1x32xi32>
    %53 = arith.cmpi slt, %51, %52 : vector<1x32xi32>
    %54 = arith.andi %49, %53 : vector<1x32xi1>
    %cst_22 = arith.constant 0.000000e+00 : f32
    %55 = arith.truncf %cst_22 : f32 to bf16
    %56 = vector.shape_cast %54 : vector<1x32xi1> to vector<1x32xi1>
    %57 = vector.broadcast %56 : vector<1x32xi1> to vector<32x32xi1>
    %58 = vector.broadcast %55 : bf16 to vector<32x32xbf16>
    %59 = arith.select %57, %45, %58 : vector<32x32xi1>, vector<32x32xbf16>
    %c0_23 = arith.constant 0 : index
    %c96 = arith.constant 96 : index
    %60 = vector.load %arg3[%c0_23, %c96] : memref<64x128xbf16, #tpu.memory_space<vmem>>, vector<64x32xbf16>
    %cst_24 = arith.constant dense<0.000000e+00> : vector<64x32xf32>
    %61 = tpu.matmul %60, %59, %cst_24 {dimension_numbers = #tpu.dot_dimension_numbers<[1], [0], [0], [1], [0, 0, 1, 1], [], []>} : vector<64x32xbf16>, vector<32x32xbf16>, vector<64x32xf32> -> vector<64x32xf32>
    %62 = arith.addf %44, %61 : vector<64x32xf32>
    %c0_25 = arith.constant 0 : index
    %c0_26 = arith.constant 0 : index
    %63 = vector.load %arg4[%c0_25, %c0_26] : memref<64x1xf32, #tpu.memory_space<vmem>>, vector<64x1xf32>
    %64 = vector.broadcast %63 : vector<64x1xf32> to vector<64x32xf32>
    %65 = arith.addf %62, %64 : vector<64x32xf32>
    %c0_27 = arith.constant 0 : index
    %c0_28 = arith.constant 0 : index
    %66 = vector.load %arg6[%c0_27, %c0_28] : memref<64x32xf32, #tpu.memory_space<vmem>>, vector<64x32xf32>
    tpu.vector_store %arg6[%c0_27, %c0_28], %65 {strides = array<i32>} : memref<64x32xf32, #tpu.memory_space<vmem>>, vector<64x32xf32>,
    %cst_29 = arith.constant dense<0.000000e+00> : vector<64xf32>
    %67 = vector.multi_reduction <add>, %65, %cst_29 [1] : vector<64x32xf32> to vector<64xf32>
    %68 = vector.shape_cast %67 : vector<64xf32> to vector<64x1xf32>
    %69 = vector.extract_strided_slice %68 {offsets = [0, 0], sizes = [16, 1], strides = [1, 1]} : vector<64x1xf32> to vector<16x1xf32>
    %70 = vector.extract_strided_slice %68 {offsets = [16, 0], sizes = [16, 1], strides = [1, 1]} : vector<64x1xf32> to vector<16x1xf32>
    %71 = arith.addf %69, %70 : vector<16x1xf32>
    %72 = vector.extract_strided_slice %68 {offsets = [32, 0], sizes = [16, 1], strides = [1, 1]} : vector<64x1xf32> to vector<16x1xf32>
    %73 = arith.addf %71, %72 : vector<16x1xf32>
    %74 = vector.extract_strided_slice %68 {offsets = [48, 0], sizes = [16, 1], strides = [1, 1]} : vector<64x1xf32> to vector<16x1xf32>
    %75 = arith.addf %73, %74 : vector<16x1xf32>
    %cst_30 = arith.constant 1.280000e+02 : f32
    %76 = vector.broadcast %cst_30 : f32 to vector<16x1xf32>
    %77 = arith.divf %75, %76 : vector<16x1xf32>
    %78 = tpu.concatenate %77, %77, %77, %77 in 0 : vector<16x1xf32>, vector<16x1xf32>, vector<16x1xf32>, vector<16x1xf32> -> vector<64x1xf32>
    %79 = vector.broadcast %78 : vector<64x1xf32> to vector<64x32xf32>
    %80 = arith.subf %65, %79 : vector<64x32xf32>
    %81 = arith.mulf %80, %80 : vector<64x32xf32>
    %cst_31 = arith.constant dense<0.000000e+00> : vector<64xf32>
    %82 = vector.multi_reduction <add>, %81, %cst_31 [1] : vector<64x32xf32> to vector<64xf32>
    %83 = vector.shape_cast %82 : vector<64xf32> to vector<64x1xf32>
    %84 = vector.extract_strided_slice %83 {offsets = [0, 0], sizes = [16, 1], strides = [1, 1]} : vector<64x1xf32> to vector<16x1xf32>
    %85 = vector.extract_strided_slice %83 {offsets = [16, 0], sizes = [16, 1], strides = [1, 1]} : vector<64x1xf32> to vector<16x1xf32>
    %86 = arith.addf %84, %85 : vector<16x1xf32>
    %87 = vector.extract_strided_slice %83 {offsets = [32, 0], sizes = [16, 1], strides = [1, 1]} : vector<64x1xf32> to vector<16x1xf32>
    %88 = arith.addf %86, %87 : vector<16x1xf32>
    %89 = vector.extract_strided_slice %83 {offsets = [48, 0], sizes = [16, 1], strides = [1, 1]} : vector<64x1xf32> to vector<16x1xf32>
    %90 = arith.addf %88, %89 : vector<16x1xf32>
    %cst_32 = arith.constant 1.280000e+02 : f32
    %91 = vector.broadcast %cst_32 : f32 to vector<16x1xf32>
    %92 = arith.divf %90, %91 : vector<16x1xf32>
    %c0_33 = arith.constant 0 : index
    %c0_34 = arith.constant 0 : index
    %93 = vector.load %arg5[%c0_33, %c0_34] : memref<32x1xf32, #tpu.memory_space<vmem>>, vector<16x1xf32>
    %c16 = arith.constant 16 : index
    %c0_35 = arith.constant 0 : index
    %94 = vector.load %arg5[%c16, %c0_35] : memref<32x1xf32, #tpu.memory_space<vmem>>, vector<16x1xf32>
    %cst_36 = arith.constant 9.99999974E-6 : f32
    %95 = vector.broadcast %cst_36 : f32 to vector<16x1xf32>
    %96 = arith.addf %92, %95 : vector<16x1xf32>
    %97 = math.rsqrt %96 : vector<16x1xf32>
    %98 = arith.mulf %93, %97 : vector<16x1xf32>
    %99 = arith.mulf %77, %98 : vector<16x1xf32>
    %100 = arith.subf %94, %99 : vector<16x1xf32>
    %101 = tpu.concatenate %98, %100 in 0 : vector<16x1xf32>, vector<16x1xf32> -> vector<32x1xf32>
    %c0_37 = arith.constant 0 : index
    %c0_38 = arith.constant 0 : index
    %102 = vector.load %arg7[%c0_37, %c0_38] : memref<32x1xf32, #tpu.memory_space<vmem>>, vector<32x1xf32>
    tpu.vector_store %arg7[%c0_37, %c0_38], %101 {strides = array<i32>} : memref<32x1xf32, #tpu.memory_space<vmem>>, vector<32x1xf32>,
    return
  }
  func.func @transform_0(%arg0: i32) -> (i32, i32) {
    %c0_i32 = arith.constant 0 : i32
    %c0_i32_0 = arith.constant 0 : i32
    %c0_i32_1 = arith.constant 0 : i32
    return %c0_i32, %c0_i32_0 : i32, i32
  }
  func.func @transform_1(%arg0: i32) -> (i32, i32) {
    %c0_i32 = arith.constant 0 : i32
    %c0_i32_0 = arith.constant 0 : i32
    %c0_i32_1 = arith.constant 0 : i32
    return %c0_i32, %c0_i32_0 : i32, i32
  }
  func.func @transform_2(%arg0: i32) -> (i32, i32) {
    %c0_i32 = arith.constant 0 : i32
    %c0_i32_0 = arith.constant 0 : i32
    %c0_i32_1 = arith.constant 0 : i32
    return %c0_i32, %c0_i32_0 : i32, i32
  }
  func.func @transform_3(%arg0: i32) -> (i32, i32) {
    %c0_i32 = arith.constant 0 : i32
    %c0_i32_0 = arith.constant 0 : i32
    %c0_i32_1 = arith.constant 0 : i32
    return %c0_i32, %c0_i32_0 : i32, i32
  }
  func.func @transform_4(%arg0: i32) -> (i32, i32) {
    %c0_i32 = arith.constant 0 : i32
    %c0_i32_0 = arith.constant 0 : i32
    %c0_i32_1 = arith.constant 0 : i32
    return %c0_i32, %c0_i32_0 : i32, i32
  }
  func.func @transform_5(%arg0: i32) -> (i32, i32) {
    %c0_i32 = arith.constant 0 : i32
    %c0_i32_0 = arith.constant 0 : i32
    %c0_i32_1 = arith.constant 0 : i32
    return %c0_i32, %c0_i32_0 : i32, i32
  }
  func.func @transform_6(%arg0: i32) -> (i32, i32) {
    %c0_i32 = arith.constant 0 : i32
    %c0_i32_0 = arith.constant 0 : i32
    %c0_i32_1 = arith.constant 0 : i32
    return %c0_i32, %c0_i32_0 : i32, i32
  }
}

module attributes {stable_mosaic.version = 11 : i64} {
  func.func @_convt_kernel(%arg0: i32, %arg1: memref<16x256xf32, #tpu.memory_space<vmem>>, %arg2: memref<2x128xi32, #tpu.memory_space<vmem>>, %arg3: memref<32x64xbf16, #tpu.memory_space<vmem>>, %arg4: memref<32x1xf32, #tpu.memory_space<vmem>>, %arg5: memref<16x1xf32, #tpu.memory_space<vmem>>, %arg6: memref<32x1xf32, #tpu.memory_space<vmem>>, %arg7: memref<32x128xf32, #tpu.memory_space<vmem>>, %arg8: memref<16x1xf32, #tpu.memory_space<vmem>>) attributes {dimension_semantics = [#tpu.dimension_semantics<arbitrary>], iteration_bounds = array<i64: 1>, scalar_prefetch = 0 : i64, scratch_operands = 0 : i64, tpu.core_type = #tpu.core_type<tc>, window_params = [{pipeline_mode = #tpu.pipeline_mode<synchronous>, transform_indices = @transform_0, window_bounds = array<i64: 16, 256>}, {pipeline_mode = #tpu.pipeline_mode<synchronous>, transform_indices = @transform_1, window_bounds = array<i64: 2, 128>}, {pipeline_mode = #tpu.pipeline_mode<synchronous>, transform_indices = @transform_2, window_bounds = array<i64: 32, 64>}, {pipeline_mode = #tpu.pipeline_mode<synchronous>, transform_indices = @transform_3, window_bounds = array<i64: 32, 1>}, {pipeline_mode = #tpu.pipeline_mode<synchronous>, transform_indices = @transform_4, window_bounds = array<i64: 16, 1>}, {pipeline_mode = #tpu.pipeline_mode<synchronous>, transform_indices = @transform_5, window_bounds = array<i64: 32, 1>}, {pipeline_mode = #tpu.pipeline_mode<synchronous>, transform_indices = @transform_6, window_bounds = array<i64: 32, 128>}, {pipeline_mode = #tpu.pipeline_mode<synchronous>, transform_indices = @transform_7, window_bounds = array<i64: 16, 1>}]} {
    %c0 = arith.constant 0 : index
    %c0_0 = arith.constant 0 : index
    %0 = vector.load %arg1[%c0, %c0_0] : memref<16x256xf32, #tpu.memory_space<vmem>>, vector<16x256xf32>
    %c0_1 = arith.constant 0 : index
    %c0_2 = arith.constant 0 : index
    %1 = vector.load %arg6[%c0_1, %c0_2] : memref<32x1xf32, #tpu.memory_space<vmem>>, vector<16x1xf32>
    %2 = vector.broadcast %1 : vector<16x1xf32> to vector<16x256xf32>
    %3 = arith.mulf %0, %2 : vector<16x256xf32>
    %c16 = arith.constant 16 : index
    %c0_3 = arith.constant 0 : index
    %4 = vector.load %arg6[%c16, %c0_3] : memref<32x1xf32, #tpu.memory_space<vmem>>, vector<16x1xf32>
    %5 = vector.broadcast %4 : vector<16x1xf32> to vector<16x256xf32>
    %6 = arith.addf %3, %5 : vector<16x256xf32>
    %cst = arith.constant 0.000000e+00 : f32
    %7 = vector.broadcast %cst : f32 to vector<16x256xf32>
    %8 = arith.cmpf oge, %6, %7 : vector<16x256xf32>
    %cst_4 = arith.constant 0.00999999977 : f32
    %9 = vector.broadcast %cst_4 : f32 to vector<16x256xf32>
    %10 = arith.mulf %9, %6 : vector<16x256xf32>
    %11 = arith.select %8, %6, %10 : vector<16x256xi1>, vector<16x256xf32>
    %12 = arith.truncf %11 : vector<16x256xf32> to vector<16x256xbf16>
    %c0_5 = arith.constant 0 : index
    %c0_6 = arith.constant 0 : index
    %13 = vector.load %arg2[%c0_5, %c0_6] : memref<2x128xi32, #tpu.memory_space<vmem>>, vector<1x128xi32>
    %c1 = arith.constant 1 : index
    %c0_7 = arith.constant 0 : index
    %14 = vector.load %arg2[%c1, %c0_7] : memref<2x128xi32, #tpu.memory_space<vmem>>, vector<1x128xi32>
    %cst_8 = arith.constant 0.000000e+00 : f32
    %15 = vector.broadcast %cst_8 : f32 to vector<32x128xf32>
    %16 = vector.extract_strided_slice %12 {offsets = [0, 0], sizes = [16, 128], strides = [1, 1]} : vector<16x256xbf16> to vector<16x128xbf16>
    %c0_9 = arith.constant 0 : index
    %c0_10 = arith.constant 0 : index
    %17 = vector.load %arg3[%c0_9, %c0_10] : memref<32x64xbf16, #tpu.memory_space<vmem>>, vector<32x16xbf16>
    %cst_11 = arith.constant dense<0.000000e+00> : vector<32x128xf32>
    %18 = tpu.matmul %17, %16, %cst_11 {dimension_numbers = #tpu.dot_dimension_numbers<[1], [0], [0], [1], [0, 0, 1, 1], [], []>} : vector<32x16xbf16>, vector<16x128xbf16>, vector<32x128xf32> -> vector<32x128xf32>
    %19 = arith.addf %15, %18 : vector<32x128xf32>
    %20 = vector.extract_strided_slice %12 {offsets = [0, 1], sizes = [16, 128], strides = [1, 1]} : vector<16x256xbf16> to vector<16x128xbf16>
    %c1_i32 = arith.constant 1 : i32
    %21 = vector.broadcast %c1_i32 : i32 to vector<1x128xi32>
    %22 = arith.addi %13, %21 : vector<1x128xi32>
    %c8_i32 = arith.constant 8 : i32
    %23 = vector.broadcast %c8_i32 : i32 to vector<1x128xi32>
    %24 = arith.cmpi slt, %22, %23 : vector<1x128xi32>
    %c0_i32 = arith.constant 0 : i32
    %25 = vector.broadcast %c0_i32 : i32 to vector<1x128xi32>
    %26 = arith.addi %14, %25 : vector<1x128xi32>
    %c8_i32_12 = arith.constant 8 : i32
    %27 = vector.broadcast %c8_i32_12 : i32 to vector<1x128xi32>
    %28 = arith.cmpi slt, %26, %27 : vector<1x128xi32>
    %29 = arith.andi %24, %28 : vector<1x128xi1>
    %cst_13 = arith.constant 0.000000e+00 : f32
    %30 = arith.truncf %cst_13 : f32 to bf16
    %31 = vector.shape_cast %29 : vector<1x128xi1> to vector<1x128xi1>
    %32 = vector.broadcast %31 : vector<1x128xi1> to vector<16x128xi1>
    %33 = vector.broadcast %30 : bf16 to vector<16x128xbf16>
    %34 = arith.select %32, %20, %33 : vector<16x128xi1>, vector<16x128xbf16>
    %c0_14 = arith.constant 0 : index
    %c16_15 = arith.constant 16 : index
    %35 = vector.load %arg3[%c0_14, %c16_15] : memref<32x64xbf16, #tpu.memory_space<vmem>>, vector<32x16xbf16>
    %cst_16 = arith.constant dense<0.000000e+00> : vector<32x128xf32>
    %36 = tpu.matmul %35, %34, %cst_16 {dimension_numbers = #tpu.dot_dimension_numbers<[1], [0], [0], [1], [0, 0, 1, 1], [], []>} : vector<32x16xbf16>, vector<16x128xbf16>, vector<32x128xf32> -> vector<32x128xf32>
    %37 = arith.addf %19, %36 : vector<32x128xf32>
    %38 = vector.extract_strided_slice %12 {offsets = [0, 8], sizes = [16, 128], strides = [1, 1]} : vector<16x256xbf16> to vector<16x128xbf16>
    %c0_i32_17 = arith.constant 0 : i32
    %39 = vector.broadcast %c0_i32_17 : i32 to vector<1x128xi32>
    %40 = arith.addi %13, %39 : vector<1x128xi32>
    %c8_i32_18 = arith.constant 8 : i32
    %41 = vector.broadcast %c8_i32_18 : i32 to vector<1x128xi32>
    %42 = arith.cmpi slt, %40, %41 : vector<1x128xi32>
    %c1_i32_19 = arith.constant 1 : i32
    %43 = vector.broadcast %c1_i32_19 : i32 to vector<1x128xi32>
    %44 = arith.addi %14, %43 : vector<1x128xi32>
    %c8_i32_20 = arith.constant 8 : i32
    %45 = vector.broadcast %c8_i32_20 : i32 to vector<1x128xi32>
    %46 = arith.cmpi slt, %44, %45 : vector<1x128xi32>
    %47 = arith.andi %42, %46 : vector<1x128xi1>
    %cst_21 = arith.constant 0.000000e+00 : f32
    %48 = arith.truncf %cst_21 : f32 to bf16
    %49 = vector.shape_cast %47 : vector<1x128xi1> to vector<1x128xi1>
    %50 = vector.broadcast %49 : vector<1x128xi1> to vector<16x128xi1>
    %51 = vector.broadcast %48 : bf16 to vector<16x128xbf16>
    %52 = arith.select %50, %38, %51 : vector<16x128xi1>, vector<16x128xbf16>
    %c0_22 = arith.constant 0 : index
    %c32 = arith.constant 32 : index
    %53 = vector.load %arg3[%c0_22, %c32] : memref<32x64xbf16, #tpu.memory_space<vmem>>, vector<32x16xbf16>
    %cst_23 = arith.constant dense<0.000000e+00> : vector<32x128xf32>
    %54 = tpu.matmul %53, %52, %cst_23 {dimension_numbers = #tpu.dot_dimension_numbers<[1], [0], [0], [1], [0, 0, 1, 1], [], []>} : vector<32x16xbf16>, vector<16x128xbf16>, vector<32x128xf32> -> vector<32x128xf32>
    %55 = arith.addf %37, %54 : vector<32x128xf32>
    %56 = vector.extract_strided_slice %12 {offsets = [0, 9], sizes = [16, 128], strides = [1, 1]} : vector<16x256xbf16> to vector<16x128xbf16>
    %c1_i32_24 = arith.constant 1 : i32
    %57 = vector.broadcast %c1_i32_24 : i32 to vector<1x128xi32>
    %58 = arith.addi %13, %57 : vector<1x128xi32>
    %c8_i32_25 = arith.constant 8 : i32
    %59 = vector.broadcast %c8_i32_25 : i32 to vector<1x128xi32>
    %60 = arith.cmpi slt, %58, %59 : vector<1x128xi32>
    %c1_i32_26 = arith.constant 1 : i32
    %61 = vector.broadcast %c1_i32_26 : i32 to vector<1x128xi32>
    %62 = arith.addi %14, %61 : vector<1x128xi32>
    %c8_i32_27 = arith.constant 8 : i32
    %63 = vector.broadcast %c8_i32_27 : i32 to vector<1x128xi32>
    %64 = arith.cmpi slt, %62, %63 : vector<1x128xi32>
    %65 = arith.andi %60, %64 : vector<1x128xi1>
    %cst_28 = arith.constant 0.000000e+00 : f32
    %66 = arith.truncf %cst_28 : f32 to bf16
    %67 = vector.shape_cast %65 : vector<1x128xi1> to vector<1x128xi1>
    %68 = vector.broadcast %67 : vector<1x128xi1> to vector<16x128xi1>
    %69 = vector.broadcast %66 : bf16 to vector<16x128xbf16>
    %70 = arith.select %68, %56, %69 : vector<16x128xi1>, vector<16x128xbf16>
    %c0_29 = arith.constant 0 : index
    %c48 = arith.constant 48 : index
    %71 = vector.load %arg3[%c0_29, %c48] : memref<32x64xbf16, #tpu.memory_space<vmem>>, vector<32x16xbf16>
    %cst_30 = arith.constant dense<0.000000e+00> : vector<32x128xf32>
    %72 = tpu.matmul %71, %70, %cst_30 {dimension_numbers = #tpu.dot_dimension_numbers<[1], [0], [0], [1], [0, 0, 1, 1], [], []>} : vector<32x16xbf16>, vector<16x128xbf16>, vector<32x128xf32> -> vector<32x128xf32>
    %73 = arith.addf %55, %72 : vector<32x128xf32>
    %c0_31 = arith.constant 0 : index
    %c0_32 = arith.constant 0 : index
    %74 = vector.load %arg4[%c0_31, %c0_32] : memref<32x1xf32, #tpu.memory_space<vmem>>, vector<32x1xf32>
    %75 = vector.broadcast %74 : vector<32x1xf32> to vector<32x128xf32>
    %76 = arith.addf %73, %75 : vector<32x128xf32>
    %c0_33 = arith.constant 0 : index
    %c0_34 = arith.constant 0 : index
    %77 = vector.load %arg7[%c0_33, %c0_34] : memref<32x128xf32, #tpu.memory_space<vmem>>, vector<32x128xf32>
    tpu.vector_store %arg7[%c0_33, %c0_34], %76 {strides = array<i32>} : memref<32x128xf32, #tpu.memory_space<vmem>>, vector<32x128xf32>,
    %cst_35 = arith.constant dense<0.000000e+00> : vector<32xf32>
    %78 = vector.multi_reduction <add>, %76, %cst_35 [1] : vector<32x128xf32> to vector<32xf32>
    %79 = vector.shape_cast %78 : vector<32xf32> to vector<32x1xf32>
    %80 = vector.extract_strided_slice %79 {offsets = [0, 0], sizes = [8, 1], strides = [1, 1]} : vector<32x1xf32> to vector<8x1xf32>
    %81 = vector.extract_strided_slice %79 {offsets = [8, 0], sizes = [8, 1], strides = [1, 1]} : vector<32x1xf32> to vector<8x1xf32>
    %82 = arith.addf %80, %81 : vector<8x1xf32>
    %83 = vector.extract_strided_slice %79 {offsets = [16, 0], sizes = [8, 1], strides = [1, 1]} : vector<32x1xf32> to vector<8x1xf32>
    %84 = arith.addf %82, %83 : vector<8x1xf32>
    %85 = vector.extract_strided_slice %79 {offsets = [24, 0], sizes = [8, 1], strides = [1, 1]} : vector<32x1xf32> to vector<8x1xf32>
    %86 = arith.addf %84, %85 : vector<8x1xf32>
    %cst_36 = arith.constant 5.120000e+02 : f32
    %87 = vector.broadcast %cst_36 : f32 to vector<8x1xf32>
    %88 = arith.divf %86, %87 : vector<8x1xf32>
    %89 = tpu.concatenate %88, %88, %88, %88 in 0 : vector<8x1xf32>, vector<8x1xf32>, vector<8x1xf32>, vector<8x1xf32> -> vector<32x1xf32>
    %90 = vector.broadcast %89 : vector<32x1xf32> to vector<32x128xf32>
    %91 = arith.subf %76, %90 : vector<32x128xf32>
    %92 = arith.mulf %91, %91 : vector<32x128xf32>
    %cst_37 = arith.constant dense<0.000000e+00> : vector<32xf32>
    %93 = vector.multi_reduction <add>, %92, %cst_37 [1] : vector<32x128xf32> to vector<32xf32>
    %94 = vector.shape_cast %93 : vector<32xf32> to vector<32x1xf32>
    %95 = vector.extract_strided_slice %94 {offsets = [0, 0], sizes = [8, 1], strides = [1, 1]} : vector<32x1xf32> to vector<8x1xf32>
    %96 = vector.extract_strided_slice %94 {offsets = [8, 0], sizes = [8, 1], strides = [1, 1]} : vector<32x1xf32> to vector<8x1xf32>
    %97 = arith.addf %95, %96 : vector<8x1xf32>
    %98 = vector.extract_strided_slice %94 {offsets = [16, 0], sizes = [8, 1], strides = [1, 1]} : vector<32x1xf32> to vector<8x1xf32>
    %99 = arith.addf %97, %98 : vector<8x1xf32>
    %100 = vector.extract_strided_slice %94 {offsets = [24, 0], sizes = [8, 1], strides = [1, 1]} : vector<32x1xf32> to vector<8x1xf32>
    %101 = arith.addf %99, %100 : vector<8x1xf32>
    %cst_38 = arith.constant 5.120000e+02 : f32
    %102 = vector.broadcast %cst_38 : f32 to vector<8x1xf32>
    %103 = arith.divf %101, %102 : vector<8x1xf32>
    %c0_39 = arith.constant 0 : index
    %c0_40 = arith.constant 0 : index
    %104 = vector.load %arg5[%c0_39, %c0_40] : memref<16x1xf32, #tpu.memory_space<vmem>>, vector<8x1xf32>
    %c8 = arith.constant 8 : index
    %c0_41 = arith.constant 0 : index
    %105 = vector.load %arg5[%c8, %c0_41] : memref<16x1xf32, #tpu.memory_space<vmem>>, vector<8x1xf32>
    %cst_42 = arith.constant 9.99999974E-6 : f32
    %106 = vector.broadcast %cst_42 : f32 to vector<8x1xf32>
    %107 = arith.addf %103, %106 : vector<8x1xf32>
    %108 = math.rsqrt %107 : vector<8x1xf32>
    %109 = arith.mulf %104, %108 : vector<8x1xf32>
    %110 = arith.mulf %88, %109 : vector<8x1xf32>
    %111 = arith.subf %105, %110 : vector<8x1xf32>
    %112 = tpu.concatenate %109, %111 in 0 : vector<8x1xf32>, vector<8x1xf32> -> vector<16x1xf32>
    %c0_43 = arith.constant 0 : index
    %c0_44 = arith.constant 0 : index
    %113 = vector.load %arg8[%c0_43, %c0_44] : memref<16x1xf32, #tpu.memory_space<vmem>>, vector<16x1xf32>
    tpu.vector_store %arg8[%c0_43, %c0_44], %112 {strides = array<i32>} : memref<16x1xf32, #tpu.memory_space<vmem>>, vector<16x1xf32>,
    return
  }
  func.func @transform_0(%arg0: i32) -> (i32, i32) {
    %c0_i32 = arith.constant 0 : i32
    %c0_i32_0 = arith.constant 0 : i32
    %c0_i32_1 = arith.constant 0 : i32
    return %c0_i32, %c0_i32_0 : i32, i32
  }
  func.func @transform_1(%arg0: i32) -> (i32, i32) {
    %c0_i32 = arith.constant 0 : i32
    %c0_i32_0 = arith.constant 0 : i32
    %c0_i32_1 = arith.constant 0 : i32
    return %c0_i32, %c0_i32_0 : i32, i32
  }
  func.func @transform_2(%arg0: i32) -> (i32, i32) {
    %c0_i32 = arith.constant 0 : i32
    %c0_i32_0 = arith.constant 0 : i32
    %c0_i32_1 = arith.constant 0 : i32
    return %c0_i32, %c0_i32_0 : i32, i32
  }
  func.func @transform_3(%arg0: i32) -> (i32, i32) {
    %c0_i32 = arith.constant 0 : i32
    %c0_i32_0 = arith.constant 0 : i32
    %c0_i32_1 = arith.constant 0 : i32
    return %c0_i32, %c0_i32_0 : i32, i32
  }
  func.func @transform_4(%arg0: i32) -> (i32, i32) {
    %c0_i32 = arith.constant 0 : i32
    %c0_i32_0 = arith.constant 0 : i32
    %c0_i32_1 = arith.constant 0 : i32
    return %c0_i32, %c0_i32_0 : i32, i32
  }
  func.func @transform_5(%arg0: i32) -> (i32, i32) {
    %c0_i32 = arith.constant 0 : i32
    %c0_i32_0 = arith.constant 0 : i32
    %c0_i32_1 = arith.constant 0 : i32
    return %c0_i32, %c0_i32_0 : i32, i32
  }
  func.func @transform_6(%arg0: i32) -> (i32, i32) {
    %c0_i32 = arith.constant 0 : i32
    %c0_i32_0 = arith.constant 0 : i32
    %c0_i32_1 = arith.constant 0 : i32
    return %c0_i32, %c0_i32_0 : i32, i32
  }
  func.func @transform_7(%arg0: i32) -> (i32, i32) {
    %c0_i32 = arith.constant 0 : i32
    %c0_i32_0 = arith.constant 0 : i32
    %c0_i32_1 = arith.constant 0 : i32
    return %c0_i32, %c0_i32_0 : i32, i32
  }
}

module attributes {stable_mosaic.version = 11 : i64} {
  func.func @_convt_kernel(%arg0: i32, %arg1: memref<8x640xf32, #tpu.memory_space<vmem>>, %arg2: memref<2x512xi32, #tpu.memory_space<vmem>>, %arg3: memref<32x32xbf16, #tpu.memory_space<vmem>>, %arg4: memref<32x1xf32, #tpu.memory_space<vmem>>, %arg5: memref<16x1xf32, #tpu.memory_space<vmem>>, %arg6: memref<16x1xf32, #tpu.memory_space<vmem>>, %arg7: memref<32x512xf32, #tpu.memory_space<vmem>>, %arg8: memref<16x1xf32, #tpu.memory_space<vmem>>) attributes {dimension_semantics = [#tpu.dimension_semantics<arbitrary>], iteration_bounds = array<i64: 1>, scalar_prefetch = 0 : i64, scratch_operands = 0 : i64, tpu.core_type = #tpu.core_type<tc>, window_params = [{pipeline_mode = #tpu.pipeline_mode<synchronous>, transform_indices = @transform_0, window_bounds = array<i64: 8, 640>}, {pipeline_mode = #tpu.pipeline_mode<synchronous>, transform_indices = @transform_1, window_bounds = array<i64: 2, 512>}, {pipeline_mode = #tpu.pipeline_mode<synchronous>, transform_indices = @transform_2, window_bounds = array<i64: 32, 32>}, {pipeline_mode = #tpu.pipeline_mode<synchronous>, transform_indices = @transform_3, window_bounds = array<i64: 32, 1>}, {pipeline_mode = #tpu.pipeline_mode<synchronous>, transform_indices = @transform_4, window_bounds = array<i64: 16, 1>}, {pipeline_mode = #tpu.pipeline_mode<synchronous>, transform_indices = @transform_5, window_bounds = array<i64: 16, 1>}, {pipeline_mode = #tpu.pipeline_mode<synchronous>, transform_indices = @transform_6, window_bounds = array<i64: 32, 512>}, {pipeline_mode = #tpu.pipeline_mode<synchronous>, transform_indices = @transform_7, window_bounds = array<i64: 16, 1>}]} {
    %c0 = arith.constant 0 : index
    %c0_0 = arith.constant 0 : index
    %0 = vector.load %arg1[%c0, %c0_0] : memref<8x640xf32, #tpu.memory_space<vmem>>, vector<8x640xf32>
    %c0_1 = arith.constant 0 : index
    %c0_2 = arith.constant 0 : index
    %1 = vector.load %arg6[%c0_1, %c0_2] : memref<16x1xf32, #tpu.memory_space<vmem>>, vector<8x1xf32>
    %2 = vector.broadcast %1 : vector<8x1xf32> to vector<8x640xf32>
    %3 = arith.mulf %0, %2 : vector<8x640xf32>
    %c8 = arith.constant 8 : index
    %c0_3 = arith.constant 0 : index
    %4 = vector.load %arg6[%c8, %c0_3] : memref<16x1xf32, #tpu.memory_space<vmem>>, vector<8x1xf32>
    %5 = vector.broadcast %4 : vector<8x1xf32> to vector<8x640xf32>
    %6 = arith.addf %3, %5 : vector<8x640xf32>
    %cst = arith.constant 0.000000e+00 : f32
    %7 = vector.broadcast %cst : f32 to vector<8x640xf32>
    %8 = arith.cmpf oge, %6, %7 : vector<8x640xf32>
    %cst_4 = arith.constant 0.00999999977 : f32
    %9 = vector.broadcast %cst_4 : f32 to vector<8x640xf32>
    %10 = arith.mulf %9, %6 : vector<8x640xf32>
    %11 = arith.select %8, %6, %10 : vector<8x640xi1>, vector<8x640xf32>
    %12 = arith.truncf %11 : vector<8x640xf32> to vector<8x640xbf16>
    %c0_5 = arith.constant 0 : index
    %c0_6 = arith.constant 0 : index
    %13 = vector.load %arg2[%c0_5, %c0_6] : memref<2x512xi32, #tpu.memory_space<vmem>>, vector<1x512xi32>
    %c1 = arith.constant 1 : index
    %c0_7 = arith.constant 0 : index
    %14 = vector.load %arg2[%c1, %c0_7] : memref<2x512xi32, #tpu.memory_space<vmem>>, vector<1x512xi32>
    %cst_8 = arith.constant 0.000000e+00 : f32
    %15 = vector.broadcast %cst_8 : f32 to vector<32x512xf32>
    %16 = vector.extract_strided_slice %12 {offsets = [0, 0], sizes = [8, 512], strides = [1, 1]} : vector<8x640xbf16> to vector<8x512xbf16>
    %c0_9 = arith.constant 0 : index
    %c0_10 = arith.constant 0 : index
    %17 = vector.load %arg3[%c0_9, %c0_10] : memref<32x32xbf16, #tpu.memory_space<vmem>>, vector<32x8xbf16>
    %cst_11 = arith.constant dense<0.000000e+00> : vector<32x512xf32>
    %18 = tpu.matmul %17, %16, %cst_11 {dimension_numbers = #tpu.dot_dimension_numbers<[1], [0], [0], [1], [0, 0, 1, 1], [], []>} : vector<32x8xbf16>, vector<8x512xbf16>, vector<32x512xf32> -> vector<32x512xf32>
    %19 = arith.addf %15, %18 : vector<32x512xf32>
    %20 = vector.extract_strided_slice %12 {offsets = [0, 1], sizes = [8, 512], strides = [1, 1]} : vector<8x640xbf16> to vector<8x512xbf16>
    %c1_i32 = arith.constant 1 : i32
    %21 = vector.broadcast %c1_i32 : i32 to vector<1x512xi32>
    %22 = arith.addi %13, %21 : vector<1x512xi32>
    %c16_i32 = arith.constant 16 : i32
    %23 = vector.broadcast %c16_i32 : i32 to vector<1x512xi32>
    %24 = arith.cmpi slt, %22, %23 : vector<1x512xi32>
    %c0_i32 = arith.constant 0 : i32
    %25 = vector.broadcast %c0_i32 : i32 to vector<1x512xi32>
    %26 = arith.addi %14, %25 : vector<1x512xi32>
    %c16_i32_12 = arith.constant 16 : i32
    %27 = vector.broadcast %c16_i32_12 : i32 to vector<1x512xi32>
    %28 = arith.cmpi slt, %26, %27 : vector<1x512xi32>
    %29 = arith.andi %24, %28 : vector<1x512xi1>
    %cst_13 = arith.constant 0.000000e+00 : f32
    %30 = arith.truncf %cst_13 : f32 to bf16
    %31 = vector.shape_cast %29 : vector<1x512xi1> to vector<1x512xi1>
    %32 = vector.broadcast %31 : vector<1x512xi1> to vector<8x512xi1>
    %33 = vector.broadcast %30 : bf16 to vector<8x512xbf16>
    %34 = arith.select %32, %20, %33 : vector<8x512xi1>, vector<8x512xbf16>
    %c0_14 = arith.constant 0 : index
    %c8_15 = arith.constant 8 : index
    %35 = vector.load %arg3[%c0_14, %c8_15] : memref<32x32xbf16, #tpu.memory_space<vmem>>, vector<32x8xbf16>
    %cst_16 = arith.constant dense<0.000000e+00> : vector<32x512xf32>
    %36 = tpu.matmul %35, %34, %cst_16 {dimension_numbers = #tpu.dot_dimension_numbers<[1], [0], [0], [1], [0, 0, 1, 1], [], []>} : vector<32x8xbf16>, vector<8x512xbf16>, vector<32x512xf32> -> vector<32x512xf32>
    %37 = arith.addf %19, %36 : vector<32x512xf32>
    %38 = vector.extract_strided_slice %12 {offsets = [0, 16], sizes = [8, 512], strides = [1, 1]} : vector<8x640xbf16> to vector<8x512xbf16>
    %c0_i32_17 = arith.constant 0 : i32
    %39 = vector.broadcast %c0_i32_17 : i32 to vector<1x512xi32>
    %40 = arith.addi %13, %39 : vector<1x512xi32>
    %c16_i32_18 = arith.constant 16 : i32
    %41 = vector.broadcast %c16_i32_18 : i32 to vector<1x512xi32>
    %42 = arith.cmpi slt, %40, %41 : vector<1x512xi32>
    %c1_i32_19 = arith.constant 1 : i32
    %43 = vector.broadcast %c1_i32_19 : i32 to vector<1x512xi32>
    %44 = arith.addi %14, %43 : vector<1x512xi32>
    %c16_i32_20 = arith.constant 16 : i32
    %45 = vector.broadcast %c16_i32_20 : i32 to vector<1x512xi32>
    %46 = arith.cmpi slt, %44, %45 : vector<1x512xi32>
    %47 = arith.andi %42, %46 : vector<1x512xi1>
    %cst_21 = arith.constant 0.000000e+00 : f32
    %48 = arith.truncf %cst_21 : f32 to bf16
    %49 = vector.shape_cast %47 : vector<1x512xi1> to vector<1x512xi1>
    %50 = vector.broadcast %49 : vector<1x512xi1> to vector<8x512xi1>
    %51 = vector.broadcast %48 : bf16 to vector<8x512xbf16>
    %52 = arith.select %50, %38, %51 : vector<8x512xi1>, vector<8x512xbf16>
    %c0_22 = arith.constant 0 : index
    %c16 = arith.constant 16 : index
    %53 = vector.load %arg3[%c0_22, %c16] : memref<32x32xbf16, #tpu.memory_space<vmem>>, vector<32x8xbf16>
    %cst_23 = arith.constant dense<0.000000e+00> : vector<32x512xf32>
    %54 = tpu.matmul %53, %52, %cst_23 {dimension_numbers = #tpu.dot_dimension_numbers<[1], [0], [0], [1], [0, 0, 1, 1], [], []>} : vector<32x8xbf16>, vector<8x512xbf16>, vector<32x512xf32> -> vector<32x512xf32>
    %55 = arith.addf %37, %54 : vector<32x512xf32>
    %56 = vector.extract_strided_slice %12 {offsets = [0, 17], sizes = [8, 512], strides = [1, 1]} : vector<8x640xbf16> to vector<8x512xbf16>
    %c1_i32_24 = arith.constant 1 : i32
    %57 = vector.broadcast %c1_i32_24 : i32 to vector<1x512xi32>
    %58 = arith.addi %13, %57 : vector<1x512xi32>
    %c16_i32_25 = arith.constant 16 : i32
    %59 = vector.broadcast %c16_i32_25 : i32 to vector<1x512xi32>
    %60 = arith.cmpi slt, %58, %59 : vector<1x512xi32>
    %c1_i32_26 = arith.constant 1 : i32
    %61 = vector.broadcast %c1_i32_26 : i32 to vector<1x512xi32>
    %62 = arith.addi %14, %61 : vector<1x512xi32>
    %c16_i32_27 = arith.constant 16 : i32
    %63 = vector.broadcast %c16_i32_27 : i32 to vector<1x512xi32>
    %64 = arith.cmpi slt, %62, %63 : vector<1x512xi32>
    %65 = arith.andi %60, %64 : vector<1x512xi1>
    %cst_28 = arith.constant 0.000000e+00 : f32
    %66 = arith.truncf %cst_28 : f32 to bf16
    %67 = vector.shape_cast %65 : vector<1x512xi1> to vector<1x512xi1>
    %68 = vector.broadcast %67 : vector<1x512xi1> to vector<8x512xi1>
    %69 = vector.broadcast %66 : bf16 to vector<8x512xbf16>
    %70 = arith.select %68, %56, %69 : vector<8x512xi1>, vector<8x512xbf16>
    %c0_29 = arith.constant 0 : index
    %c24 = arith.constant 24 : index
    %71 = vector.load %arg3[%c0_29, %c24] : memref<32x32xbf16, #tpu.memory_space<vmem>>, vector<32x8xbf16>
    %cst_30 = arith.constant dense<0.000000e+00> : vector<32x512xf32>
    %72 = tpu.matmul %71, %70, %cst_30 {dimension_numbers = #tpu.dot_dimension_numbers<[1], [0], [0], [1], [0, 0, 1, 1], [], []>} : vector<32x8xbf16>, vector<8x512xbf16>, vector<32x512xf32> -> vector<32x512xf32>
    %73 = arith.addf %55, %72 : vector<32x512xf32>
    %c0_31 = arith.constant 0 : index
    %c0_32 = arith.constant 0 : index
    %74 = vector.load %arg4[%c0_31, %c0_32] : memref<32x1xf32, #tpu.memory_space<vmem>>, vector<32x1xf32>
    %75 = vector.broadcast %74 : vector<32x1xf32> to vector<32x512xf32>
    %76 = arith.addf %73, %75 : vector<32x512xf32>
    %c0_33 = arith.constant 0 : index
    %c0_34 = arith.constant 0 : index
    %77 = vector.load %arg7[%c0_33, %c0_34] : memref<32x512xf32, #tpu.memory_space<vmem>>, vector<32x512xf32>
    tpu.vector_store %arg7[%c0_33, %c0_34], %76 {strides = array<i32>} : memref<32x512xf32, #tpu.memory_space<vmem>>, vector<32x512xf32>,
    %cst_35 = arith.constant dense<0.000000e+00> : vector<32xf32>
    %78 = vector.multi_reduction <add>, %76, %cst_35 [1] : vector<32x512xf32> to vector<32xf32>
    %79 = vector.shape_cast %78 : vector<32xf32> to vector<32x1xf32>
    %80 = vector.extract_strided_slice %79 {offsets = [0, 0], sizes = [8, 1], strides = [1, 1]} : vector<32x1xf32> to vector<8x1xf32>
    %81 = vector.extract_strided_slice %79 {offsets = [8, 0], sizes = [8, 1], strides = [1, 1]} : vector<32x1xf32> to vector<8x1xf32>
    %82 = arith.addf %80, %81 : vector<8x1xf32>
    %83 = vector.extract_strided_slice %79 {offsets = [16, 0], sizes = [8, 1], strides = [1, 1]} : vector<32x1xf32> to vector<8x1xf32>
    %84 = arith.addf %82, %83 : vector<8x1xf32>
    %85 = vector.extract_strided_slice %79 {offsets = [24, 0], sizes = [8, 1], strides = [1, 1]} : vector<32x1xf32> to vector<8x1xf32>
    %86 = arith.addf %84, %85 : vector<8x1xf32>
    %cst_36 = arith.constant 2.048000e+03 : f32
    %87 = vector.broadcast %cst_36 : f32 to vector<8x1xf32>
    %88 = arith.divf %86, %87 : vector<8x1xf32>
    %89 = tpu.concatenate %88, %88, %88, %88 in 0 : vector<8x1xf32>, vector<8x1xf32>, vector<8x1xf32>, vector<8x1xf32> -> vector<32x1xf32>
    %90 = vector.broadcast %89 : vector<32x1xf32> to vector<32x512xf32>
    %91 = arith.subf %76, %90 : vector<32x512xf32>
    %92 = arith.mulf %91, %91 : vector<32x512xf32>
    %cst_37 = arith.constant dense<0.000000e+00> : vector<32xf32>
    %93 = vector.multi_reduction <add>, %92, %cst_37 [1] : vector<32x512xf32> to vector<32xf32>
    %94 = vector.shape_cast %93 : vector<32xf32> to vector<32x1xf32>
    %95 = vector.extract_strided_slice %94 {offsets = [0, 0], sizes = [8, 1], strides = [1, 1]} : vector<32x1xf32> to vector<8x1xf32>
    %96 = vector.extract_strided_slice %94 {offsets = [8, 0], sizes = [8, 1], strides = [1, 1]} : vector<32x1xf32> to vector<8x1xf32>
    %97 = arith.addf %95, %96 : vector<8x1xf32>
    %98 = vector.extract_strided_slice %94 {offsets = [16, 0], sizes = [8, 1], strides = [1, 1]} : vector<32x1xf32> to vector<8x1xf32>
    %99 = arith.addf %97, %98 : vector<8x1xf32>
    %100 = vector.extract_strided_slice %94 {offsets = [24, 0], sizes = [8, 1], strides = [1, 1]} : vector<32x1xf32> to vector<8x1xf32>
    %101 = arith.addf %99, %100 : vector<8x1xf32>
    %cst_38 = arith.constant 2.048000e+03 : f32
    %102 = vector.broadcast %cst_38 : f32 to vector<8x1xf32>
    %103 = arith.divf %101, %102 : vector<8x1xf32>
    %c0_39 = arith.constant 0 : index
    %c0_40 = arith.constant 0 : index
    %104 = vector.load %arg5[%c0_39, %c0_40] : memref<16x1xf32, #tpu.memory_space<vmem>>, vector<8x1xf32>
    %c8_41 = arith.constant 8 : index
    %c0_42 = arith.constant 0 : index
    %105 = vector.load %arg5[%c8_41, %c0_42] : memref<16x1xf32, #tpu.memory_space<vmem>>, vector<8x1xf32>
    %cst_43 = arith.constant 9.99999974E-6 : f32
    %106 = vector.broadcast %cst_43 : f32 to vector<8x1xf32>
    %107 = arith.addf %103, %106 : vector<8x1xf32>
    %108 = math.rsqrt %107 : vector<8x1xf32>
    %109 = arith.mulf %104, %108 : vector<8x1xf32>
    %110 = arith.mulf %88, %109 : vector<8x1xf32>
    %111 = arith.subf %105, %110 : vector<8x1xf32>
    %112 = tpu.concatenate %109, %111 in 0 : vector<8x1xf32>, vector<8x1xf32> -> vector<16x1xf32>
    %c0_44 = arith.constant 0 : index
    %c0_45 = arith.constant 0 : index
    %113 = vector.load %arg8[%c0_44, %c0_45] : memref<16x1xf32, #tpu.memory_space<vmem>>, vector<16x1xf32>
    tpu.vector_store %arg8[%c0_44, %c0_45], %112 {strides = array<i32>} : memref<16x1xf32, #tpu.memory_space<vmem>>, vector<16x1xf32>,
    return
  }
  func.func @transform_0(%arg0: i32) -> (i32, i32) {
    %c0_i32 = arith.constant 0 : i32
    %c0_i32_0 = arith.constant 0 : i32
    %c0_i32_1 = arith.constant 0 : i32
    return %c0_i32, %c0_i32_0 : i32, i32
  }
  func.func @transform_1(%arg0: i32) -> (i32, i32) {
    %c0_i32 = arith.constant 0 : i32
    %c0_i32_0 = arith.constant 0 : i32
    %c0_i32_1 = arith.constant 0 : i32
    return %c0_i32, %c0_i32_0 : i32, i32
  }
  func.func @transform_2(%arg0: i32) -> (i32, i32) {
    %c0_i32 = arith.constant 0 : i32
    %c0_i32_0 = arith.constant 0 : i32
    %c0_i32_1 = arith.constant 0 : i32
    return %c0_i32, %c0_i32_0 : i32, i32
  }
  func.func @transform_3(%arg0: i32) -> (i32, i32) {
    %c0_i32 = arith.constant 0 : i32
    %c0_i32_0 = arith.constant 0 : i32
    %c0_i32_1 = arith.constant 0 : i32
    return %c0_i32, %c0_i32_0 : i32, i32
  }
  func.func @transform_4(%arg0: i32) -> (i32, i32) {
    %c0_i32 = arith.constant 0 : i32
    %c0_i32_0 = arith.constant 0 : i32
    %c0_i32_1 = arith.constant 0 : i32
    return %c0_i32, %c0_i32_0 : i32, i32
  }
  func.func @transform_5(%arg0: i32) -> (i32, i32) {
    %c0_i32 = arith.constant 0 : i32
    %c0_i32_0 = arith.constant 0 : i32
    %c0_i32_1 = arith.constant 0 : i32
    return %c0_i32, %c0_i32_0 : i32, i32
  }
  func.func @transform_6(%arg0: i32) -> (i32, i32) {
    %c0_i32 = arith.constant 0 : i32
    %c0_i32_0 = arith.constant 0 : i32
    %c0_i32_1 = arith.constant 0 : i32
    return %c0_i32, %c0_i32_0 : i32, i32
  }
  func.func @transform_7(%arg0: i32) -> (i32, i32) {
    %c0_i32 = arith.constant 0 : i32
    %c0_i32_0 = arith.constant 0 : i32
    %c0_i32_1 = arith.constant 0 : i32
    return %c0_i32, %c0_i32_0 : i32, i32
  }
}

module attributes {stable_mosaic.version = 11 : i64} {
  func.func @_conv3x3_tanh_kernel(%arg0: i32, %arg1: memref<8x2304xf32, #tpu.memory_space<vmem>>, %arg2: memref<2x2048xi32, #tpu.memory_space<vmem>>, %arg3: memref<4x72xbf16, #tpu.memory_space<vmem>>, %arg4: memref<4x1xf32, #tpu.memory_space<vmem>>, %arg5: memref<16x1xf32, #tpu.memory_space<vmem>>, %arg6: memref<4x2048xf32, #tpu.memory_space<vmem>>) attributes {dimension_semantics = [#tpu.dimension_semantics<arbitrary>], iteration_bounds = array<i64: 1>, scalar_prefetch = 0 : i64, scratch_operands = 0 : i64, tpu.core_type = #tpu.core_type<tc>, window_params = [{pipeline_mode = #tpu.pipeline_mode<synchronous>, transform_indices = @transform_0, window_bounds = array<i64: 8, 2304>}, {pipeline_mode = #tpu.pipeline_mode<synchronous>, transform_indices = @transform_1, window_bounds = array<i64: 2, 2048>}, {pipeline_mode = #tpu.pipeline_mode<synchronous>, transform_indices = @transform_2, window_bounds = array<i64: 4, 72>}, {pipeline_mode = #tpu.pipeline_mode<synchronous>, transform_indices = @transform_3, window_bounds = array<i64: 4, 1>}, {pipeline_mode = #tpu.pipeline_mode<synchronous>, transform_indices = @transform_4, window_bounds = array<i64: 16, 1>}, {pipeline_mode = #tpu.pipeline_mode<synchronous>, transform_indices = @transform_5, window_bounds = array<i64: 4, 2048>}]} {
    %c0 = arith.constant 0 : index
    %c0_0 = arith.constant 0 : index
    %0 = vector.load %arg1[%c0, %c0_0] : memref<8x2304xf32, #tpu.memory_space<vmem>>, vector<8x2304xf32>
    %c0_1 = arith.constant 0 : index
    %c0_2 = arith.constant 0 : index
    %1 = vector.load %arg5[%c0_1, %c0_2] : memref<16x1xf32, #tpu.memory_space<vmem>>, vector<8x1xf32>
    %2 = vector.broadcast %1 : vector<8x1xf32> to vector<8x2304xf32>
    %3 = arith.mulf %0, %2 : vector<8x2304xf32>
    %c8 = arith.constant 8 : index
    %c0_3 = arith.constant 0 : index
    %4 = vector.load %arg5[%c8, %c0_3] : memref<16x1xf32, #tpu.memory_space<vmem>>, vector<8x1xf32>
    %5 = vector.broadcast %4 : vector<8x1xf32> to vector<8x2304xf32>
    %6 = arith.addf %3, %5 : vector<8x2304xf32>
    %cst = arith.constant 0.000000e+00 : f32
    %7 = vector.broadcast %cst : f32 to vector<8x2304xf32>
    %8 = arith.cmpf oge, %6, %7 : vector<8x2304xf32>
    %cst_4 = arith.constant 0.00999999977 : f32
    %9 = vector.broadcast %cst_4 : f32 to vector<8x2304xf32>
    %10 = arith.mulf %9, %6 : vector<8x2304xf32>
    %11 = arith.select %8, %6, %10 : vector<8x2304xi1>, vector<8x2304xf32>
    %12 = arith.truncf %11 : vector<8x2304xf32> to vector<8x2304xbf16>
    %c0_5 = arith.constant 0 : index
    %c0_6 = arith.constant 0 : index
    %13 = vector.load %arg2[%c0_5, %c0_6] : memref<2x2048xi32, #tpu.memory_space<vmem>>, vector<1x2048xi32>
    %c1 = arith.constant 1 : index
    %c0_7 = arith.constant 0 : index
    %14 = vector.load %arg2[%c1, %c0_7] : memref<2x2048xi32, #tpu.memory_space<vmem>>, vector<1x2048xi32>
    %cst_8 = arith.constant 0.000000e+00 : f32
    %15 = vector.broadcast %cst_8 : f32 to vector<4x2048xf32>
    %16 = vector.extract_strided_slice %12 {offsets = [0, 95], sizes = [8, 2048], strides = [1, 1]} : vector<8x2304xbf16> to vector<8x2048xbf16>
    %c-1_i32 = arith.constant -1 : i32
    %17 = vector.broadcast %c-1_i32 : i32 to vector<1x2048xi32>
    %18 = arith.addi %13, %17 : vector<1x2048xi32>
    %c0_i32 = arith.constant 0 : i32
    %19 = vector.broadcast %c0_i32 : i32 to vector<1x2048xi32>
    %20 = arith.cmpi sge, %18, %19 : vector<1x2048xi32>
    %c-1_i32_9 = arith.constant -1 : i32
    %21 = vector.broadcast %c-1_i32_9 : i32 to vector<1x2048xi32>
    %22 = arith.addi %13, %21 : vector<1x2048xi32>
    %c32_i32 = arith.constant 32 : i32
    %23 = vector.broadcast %c32_i32 : i32 to vector<1x2048xi32>
    %24 = arith.cmpi slt, %22, %23 : vector<1x2048xi32>
    %25 = arith.andi %20, %24 : vector<1x2048xi1>
    %c-1_i32_10 = arith.constant -1 : i32
    %26 = vector.broadcast %c-1_i32_10 : i32 to vector<1x2048xi32>
    %27 = arith.addi %14, %26 : vector<1x2048xi32>
    %c0_i32_11 = arith.constant 0 : i32
    %28 = vector.broadcast %c0_i32_11 : i32 to vector<1x2048xi32>
    %29 = arith.cmpi sge, %27, %28 : vector<1x2048xi32>
    %30 = arith.andi %25, %29 : vector<1x2048xi1>
    %c-1_i32_12 = arith.constant -1 : i32
    %31 = vector.broadcast %c-1_i32_12 : i32 to vector<1x2048xi32>
    %32 = arith.addi %14, %31 : vector<1x2048xi32>
    %c32_i32_13 = arith.constant 32 : i32
    %33 = vector.broadcast %c32_i32_13 : i32 to vector<1x2048xi32>
    %34 = arith.cmpi slt, %32, %33 : vector<1x2048xi32>
    %35 = arith.andi %30, %34 : vector<1x2048xi1>
    %cst_14 = arith.constant 0.000000e+00 : f32
    %36 = arith.truncf %cst_14 : f32 to bf16
    %37 = vector.shape_cast %35 : vector<1x2048xi1> to vector<1x2048xi1>
    %38 = vector.broadcast %37 : vector<1x2048xi1> to vector<8x2048xi1>
    %39 = vector.broadcast %36 : bf16 to vector<8x2048xbf16>
    %40 = arith.select %38, %16, %39 : vector<8x2048xi1>, vector<8x2048xbf16>
    %c0_15 = arith.constant 0 : index
    %c0_16 = arith.constant 0 : index
    %41 = vector.load %arg3[%c0_15, %c0_16] : memref<4x72xbf16, #tpu.memory_space<vmem>>, vector<4x8xbf16>
    %cst_17 = arith.constant dense<0.000000e+00> : vector<4x2048xf32>
    %42 = tpu.matmul %41, %40, %cst_17 {dimension_numbers = #tpu.dot_dimension_numbers<[1], [0], [0], [1], [0, 0, 1, 1], [], []>} : vector<4x8xbf16>, vector<8x2048xbf16>, vector<4x2048xf32> -> vector<4x2048xf32>
    %43 = arith.addf %15, %42 : vector<4x2048xf32>
    %44 = vector.extract_strided_slice %12 {offsets = [0, 96], sizes = [8, 2048], strides = [1, 1]} : vector<8x2304xbf16> to vector<8x2048xbf16>
    %c0_i32_18 = arith.constant 0 : i32
    %45 = vector.broadcast %c0_i32_18 : i32 to vector<1x2048xi32>
    %46 = arith.addi %13, %45 : vector<1x2048xi32>
    %c0_i32_19 = arith.constant 0 : i32
    %47 = vector.broadcast %c0_i32_19 : i32 to vector<1x2048xi32>
    %48 = arith.cmpi sge, %46, %47 : vector<1x2048xi32>
    %c0_i32_20 = arith.constant 0 : i32
    %49 = vector.broadcast %c0_i32_20 : i32 to vector<1x2048xi32>
    %50 = arith.addi %13, %49 : vector<1x2048xi32>
    %c32_i32_21 = arith.constant 32 : i32
    %51 = vector.broadcast %c32_i32_21 : i32 to vector<1x2048xi32>
    %52 = arith.cmpi slt, %50, %51 : vector<1x2048xi32>
    %53 = arith.andi %48, %52 : vector<1x2048xi1>
    %c-1_i32_22 = arith.constant -1 : i32
    %54 = vector.broadcast %c-1_i32_22 : i32 to vector<1x2048xi32>
    %55 = arith.addi %14, %54 : vector<1x2048xi32>
    %c0_i32_23 = arith.constant 0 : i32
    %56 = vector.broadcast %c0_i32_23 : i32 to vector<1x2048xi32>
    %57 = arith.cmpi sge, %55, %56 : vector<1x2048xi32>
    %58 = arith.andi %53, %57 : vector<1x2048xi1>
    %c-1_i32_24 = arith.constant -1 : i32
    %59 = vector.broadcast %c-1_i32_24 : i32 to vector<1x2048xi32>
    %60 = arith.addi %14, %59 : vector<1x2048xi32>
    %c32_i32_25 = arith.constant 32 : i32
    %61 = vector.broadcast %c32_i32_25 : i32 to vector<1x2048xi32>
    %62 = arith.cmpi slt, %60, %61 : vector<1x2048xi32>
    %63 = arith.andi %58, %62 : vector<1x2048xi1>
    %cst_26 = arith.constant 0.000000e+00 : f32
    %64 = arith.truncf %cst_26 : f32 to bf16
    %65 = vector.shape_cast %63 : vector<1x2048xi1> to vector<1x2048xi1>
    %66 = vector.broadcast %65 : vector<1x2048xi1> to vector<8x2048xi1>
    %67 = vector.broadcast %64 : bf16 to vector<8x2048xbf16>
    %68 = arith.select %66, %44, %67 : vector<8x2048xi1>, vector<8x2048xbf16>
    %c0_27 = arith.constant 0 : index
    %c8_28 = arith.constant 8 : index
    %69 = vector.load %arg3[%c0_27, %c8_28] : memref<4x72xbf16, #tpu.memory_space<vmem>>, vector<4x8xbf16>
    %cst_29 = arith.constant dense<0.000000e+00> : vector<4x2048xf32>
    %70 = tpu.matmul %69, %68, %cst_29 {dimension_numbers = #tpu.dot_dimension_numbers<[1], [0], [0], [1], [0, 0, 1, 1], [], []>} : vector<4x8xbf16>, vector<8x2048xbf16>, vector<4x2048xf32> -> vector<4x2048xf32>
    %71 = arith.addf %43, %70 : vector<4x2048xf32>
    %72 = vector.extract_strided_slice %12 {offsets = [0, 97], sizes = [8, 2048], strides = [1, 1]} : vector<8x2304xbf16> to vector<8x2048xbf16>
    %c1_i32 = arith.constant 1 : i32
    %73 = vector.broadcast %c1_i32 : i32 to vector<1x2048xi32>
    %74 = arith.addi %13, %73 : vector<1x2048xi32>
    %c0_i32_30 = arith.constant 0 : i32
    %75 = vector.broadcast %c0_i32_30 : i32 to vector<1x2048xi32>
    %76 = arith.cmpi sge, %74, %75 : vector<1x2048xi32>
    %c1_i32_31 = arith.constant 1 : i32
    %77 = vector.broadcast %c1_i32_31 : i32 to vector<1x2048xi32>
    %78 = arith.addi %13, %77 : vector<1x2048xi32>
    %c32_i32_32 = arith.constant 32 : i32
    %79 = vector.broadcast %c32_i32_32 : i32 to vector<1x2048xi32>
    %80 = arith.cmpi slt, %78, %79 : vector<1x2048xi32>
    %81 = arith.andi %76, %80 : vector<1x2048xi1>
    %c-1_i32_33 = arith.constant -1 : i32
    %82 = vector.broadcast %c-1_i32_33 : i32 to vector<1x2048xi32>
    %83 = arith.addi %14, %82 : vector<1x2048xi32>
    %c0_i32_34 = arith.constant 0 : i32
    %84 = vector.broadcast %c0_i32_34 : i32 to vector<1x2048xi32>
    %85 = arith.cmpi sge, %83, %84 : vector<1x2048xi32>
    %86 = arith.andi %81, %85 : vector<1x2048xi1>
    %c-1_i32_35 = arith.constant -1 : i32
    %87 = vector.broadcast %c-1_i32_35 : i32 to vector<1x2048xi32>
    %88 = arith.addi %14, %87 : vector<1x2048xi32>
    %c32_i32_36 = arith.constant 32 : i32
    %89 = vector.broadcast %c32_i32_36 : i32 to vector<1x2048xi32>
    %90 = arith.cmpi slt, %88, %89 : vector<1x2048xi32>
    %91 = arith.andi %86, %90 : vector<1x2048xi1>
    %cst_37 = arith.constant 0.000000e+00 : f32
    %92 = arith.truncf %cst_37 : f32 to bf16
    %93 = vector.shape_cast %91 : vector<1x2048xi1> to vector<1x2048xi1>
    %94 = vector.broadcast %93 : vector<1x2048xi1> to vector<8x2048xi1>
    %95 = vector.broadcast %92 : bf16 to vector<8x2048xbf16>
    %96 = arith.select %94, %72, %95 : vector<8x2048xi1>, vector<8x2048xbf16>
    %c0_38 = arith.constant 0 : index
    %c16 = arith.constant 16 : index
    %97 = vector.load %arg3[%c0_38, %c16] : memref<4x72xbf16, #tpu.memory_space<vmem>>, vector<4x8xbf16>
    %cst_39 = arith.constant dense<0.000000e+00> : vector<4x2048xf32>
    %98 = tpu.matmul %97, %96, %cst_39 {dimension_numbers = #tpu.dot_dimension_numbers<[1], [0], [0], [1], [0, 0, 1, 1], [], []>} : vector<4x8xbf16>, vector<8x2048xbf16>, vector<4x2048xf32> -> vector<4x2048xf32>
    %99 = arith.addf %71, %98 : vector<4x2048xf32>
    %100 = vector.extract_strided_slice %12 {offsets = [0, 127], sizes = [8, 2048], strides = [1, 1]} : vector<8x2304xbf16> to vector<8x2048xbf16>
    %c-1_i32_40 = arith.constant -1 : i32
    %101 = vector.broadcast %c-1_i32_40 : i32 to vector<1x2048xi32>
    %102 = arith.addi %13, %101 : vector<1x2048xi32>
    %c0_i32_41 = arith.constant 0 : i32
    %103 = vector.broadcast %c0_i32_41 : i32 to vector<1x2048xi32>
    %104 = arith.cmpi sge, %102, %103 : vector<1x2048xi32>
    %c-1_i32_42 = arith.constant -1 : i32
    %105 = vector.broadcast %c-1_i32_42 : i32 to vector<1x2048xi32>
    %106 = arith.addi %13, %105 : vector<1x2048xi32>
    %c32_i32_43 = arith.constant 32 : i32
    %107 = vector.broadcast %c32_i32_43 : i32 to vector<1x2048xi32>
    %108 = arith.cmpi slt, %106, %107 : vector<1x2048xi32>
    %109 = arith.andi %104, %108 : vector<1x2048xi1>
    %c0_i32_44 = arith.constant 0 : i32
    %110 = vector.broadcast %c0_i32_44 : i32 to vector<1x2048xi32>
    %111 = arith.addi %14, %110 : vector<1x2048xi32>
    %c0_i32_45 = arith.constant 0 : i32
    %112 = vector.broadcast %c0_i32_45 : i32 to vector<1x2048xi32>
    %113 = arith.cmpi sge, %111, %112 : vector<1x2048xi32>
    %114 = arith.andi %109, %113 : vector<1x2048xi1>
    %c0_i32_46 = arith.constant 0 : i32
    %115 = vector.broadcast %c0_i32_46 : i32 to vector<1x2048xi32>
    %116 = arith.addi %14, %115 : vector<1x2048xi32>
    %c32_i32_47 = arith.constant 32 : i32
    %117 = vector.broadcast %c32_i32_47 : i32 to vector<1x2048xi32>
    %118 = arith.cmpi slt, %116, %117 : vector<1x2048xi32>
    %119 = arith.andi %114, %118 : vector<1x2048xi1>
    %cst_48 = arith.constant 0.000000e+00 : f32
    %120 = arith.truncf %cst_48 : f32 to bf16
    %121 = vector.shape_cast %119 : vector<1x2048xi1> to vector<1x2048xi1>
    %122 = vector.broadcast %121 : vector<1x2048xi1> to vector<8x2048xi1>
    %123 = vector.broadcast %120 : bf16 to vector<8x2048xbf16>
    %124 = arith.select %122, %100, %123 : vector<8x2048xi1>, vector<8x2048xbf16>
    %c0_49 = arith.constant 0 : index
    %c24 = arith.constant 24 : index
    %125 = vector.load %arg3[%c0_49, %c24] : memref<4x72xbf16, #tpu.memory_space<vmem>>, vector<4x8xbf16>
    %cst_50 = arith.constant dense<0.000000e+00> : vector<4x2048xf32>
    %126 = tpu.matmul %125, %124, %cst_50 {dimension_numbers = #tpu.dot_dimension_numbers<[1], [0], [0], [1], [0, 0, 1, 1], [], []>} : vector<4x8xbf16>, vector<8x2048xbf16>, vector<4x2048xf32> -> vector<4x2048xf32>
    %127 = arith.addf %99, %126 : vector<4x2048xf32>
    %128 = vector.extract_strided_slice %12 {offsets = [0, 128], sizes = [8, 2048], strides = [1, 1]} : vector<8x2304xbf16> to vector<8x2048xbf16>
    %c0_51 = arith.constant 0 : index
    %c32 = arith.constant 32 : index
    %129 = vector.load %arg3[%c0_51, %c32] : memref<4x72xbf16, #tpu.memory_space<vmem>>, vector<4x8xbf16>
    %cst_52 = arith.constant dense<0.000000e+00> : vector<4x2048xf32>
    %130 = tpu.matmul %129, %128, %cst_52 {dimension_numbers = #tpu.dot_dimension_numbers<[1], [0], [0], [1], [0, 0, 1, 1], [], []>} : vector<4x8xbf16>, vector<8x2048xbf16>, vector<4x2048xf32> -> vector<4x2048xf32>
    %131 = arith.addf %127, %130 : vector<4x2048xf32>
    %132 = vector.extract_strided_slice %12 {offsets = [0, 129], sizes = [8, 2048], strides = [1, 1]} : vector<8x2304xbf16> to vector<8x2048xbf16>
    %c1_i32_53 = arith.constant 1 : i32
    %133 = vector.broadcast %c1_i32_53 : i32 to vector<1x2048xi32>
    %134 = arith.addi %13, %133 : vector<1x2048xi32>
    %c0_i32_54 = arith.constant 0 : i32
    %135 = vector.broadcast %c0_i32_54 : i32 to vector<1x2048xi32>
    %136 = arith.cmpi sge, %134, %135 : vector<1x2048xi32>
    %c1_i32_55 = arith.constant 1 : i32
    %137 = vector.broadcast %c1_i32_55 : i32 to vector<1x2048xi32>
    %138 = arith.addi %13, %137 : vector<1x2048xi32>
    %c32_i32_56 = arith.constant 32 : i32
    %139 = vector.broadcast %c32_i32_56 : i32 to vector<1x2048xi32>
    %140 = arith.cmpi slt, %138, %139 : vector<1x2048xi32>
    %141 = arith.andi %136, %140 : vector<1x2048xi1>
    %c0_i32_57 = arith.constant 0 : i32
    %142 = vector.broadcast %c0_i32_57 : i32 to vector<1x2048xi32>
    %143 = arith.addi %14, %142 : vector<1x2048xi32>
    %c0_i32_58 = arith.constant 0 : i32
    %144 = vector.broadcast %c0_i32_58 : i32 to vector<1x2048xi32>
    %145 = arith.cmpi sge, %143, %144 : vector<1x2048xi32>
    %146 = arith.andi %141, %145 : vector<1x2048xi1>
    %c0_i32_59 = arith.constant 0 : i32
    %147 = vector.broadcast %c0_i32_59 : i32 to vector<1x2048xi32>
    %148 = arith.addi %14, %147 : vector<1x2048xi32>
    %c32_i32_60 = arith.constant 32 : i32
    %149 = vector.broadcast %c32_i32_60 : i32 to vector<1x2048xi32>
    %150 = arith.cmpi slt, %148, %149 : vector<1x2048xi32>
    %151 = arith.andi %146, %150 : vector<1x2048xi1>
    %cst_61 = arith.constant 0.000000e+00 : f32
    %152 = arith.truncf %cst_61 : f32 to bf16
    %153 = vector.shape_cast %151 : vector<1x2048xi1> to vector<1x2048xi1>
    %154 = vector.broadcast %153 : vector<1x2048xi1> to vector<8x2048xi1>
    %155 = vector.broadcast %152 : bf16 to vector<8x2048xbf16>
    %156 = arith.select %154, %132, %155 : vector<8x2048xi1>, vector<8x2048xbf16>
    %c0_62 = arith.constant 0 : index
    %c40 = arith.constant 40 : index
    %157 = vector.load %arg3[%c0_62, %c40] : memref<4x72xbf16, #tpu.memory_space<vmem>>, vector<4x8xbf16>
    %cst_63 = arith.constant dense<0.000000e+00> : vector<4x2048xf32>
    %158 = tpu.matmul %157, %156, %cst_63 {dimension_numbers = #tpu.dot_dimension_numbers<[1], [0], [0], [1], [0, 0, 1, 1], [], []>} : vector<4x8xbf16>, vector<8x2048xbf16>, vector<4x2048xf32> -> vector<4x2048xf32>
    %159 = arith.addf %131, %158 : vector<4x2048xf32>
    %160 = vector.extract_strided_slice %12 {offsets = [0, 159], sizes = [8, 2048], strides = [1, 1]} : vector<8x2304xbf16> to vector<8x2048xbf16>
    %c-1_i32_64 = arith.constant -1 : i32
    %161 = vector.broadcast %c-1_i32_64 : i32 to vector<1x2048xi32>
    %162 = arith.addi %13, %161 : vector<1x2048xi32>
    %c0_i32_65 = arith.constant 0 : i32
    %163 = vector.broadcast %c0_i32_65 : i32 to vector<1x2048xi32>
    %164 = arith.cmpi sge, %162, %163 : vector<1x2048xi32>
    %c-1_i32_66 = arith.constant -1 : i32
    %165 = vector.broadcast %c-1_i32_66 : i32 to vector<1x2048xi32>
    %166 = arith.addi %13, %165 : vector<1x2048xi32>
    %c32_i32_67 = arith.constant 32 : i32
    %167 = vector.broadcast %c32_i32_67 : i32 to vector<1x2048xi32>
    %168 = arith.cmpi slt, %166, %167 : vector<1x2048xi32>
    %169 = arith.andi %164, %168 : vector<1x2048xi1>
    %c1_i32_68 = arith.constant 1 : i32
    %170 = vector.broadcast %c1_i32_68 : i32 to vector<1x2048xi32>
    %171 = arith.addi %14, %170 : vector<1x2048xi32>
    %c0_i32_69 = arith.constant 0 : i32
    %172 = vector.broadcast %c0_i32_69 : i32 to vector<1x2048xi32>
    %173 = arith.cmpi sge, %171, %172 : vector<1x2048xi32>
    %174 = arith.andi %169, %173 : vector<1x2048xi1>
    %c1_i32_70 = arith.constant 1 : i32
    %175 = vector.broadcast %c1_i32_70 : i32 to vector<1x2048xi32>
    %176 = arith.addi %14, %175 : vector<1x2048xi32>
    %c32_i32_71 = arith.constant 32 : i32
    %177 = vector.broadcast %c32_i32_71 : i32 to vector<1x2048xi32>
    %178 = arith.cmpi slt, %176, %177 : vector<1x2048xi32>
    %179 = arith.andi %174, %178 : vector<1x2048xi1>
    %cst_72 = arith.constant 0.000000e+00 : f32
    %180 = arith.truncf %cst_72 : f32 to bf16
    %181 = vector.shape_cast %179 : vector<1x2048xi1> to vector<1x2048xi1>
    %182 = vector.broadcast %181 : vector<1x2048xi1> to vector<8x2048xi1>
    %183 = vector.broadcast %180 : bf16 to vector<8x2048xbf16>
    %184 = arith.select %182, %160, %183 : vector<8x2048xi1>, vector<8x2048xbf16>
    %c0_73 = arith.constant 0 : index
    %c48 = arith.constant 48 : index
    %185 = vector.load %arg3[%c0_73, %c48] : memref<4x72xbf16, #tpu.memory_space<vmem>>, vector<4x8xbf16>
    %cst_74 = arith.constant dense<0.000000e+00> : vector<4x2048xf32>
    %186 = tpu.matmul %185, %184, %cst_74 {dimension_numbers = #tpu.dot_dimension_numbers<[1], [0], [0], [1], [0, 0, 1, 1], [], []>} : vector<4x8xbf16>, vector<8x2048xbf16>, vector<4x2048xf32> -> vector<4x2048xf32>
    %187 = arith.addf %159, %186 : vector<4x2048xf32>
    %188 = vector.extract_strided_slice %12 {offsets = [0, 160], sizes = [8, 2048], strides = [1, 1]} : vector<8x2304xbf16> to vector<8x2048xbf16>
    %c0_i32_75 = arith.constant 0 : i32
    %189 = vector.broadcast %c0_i32_75 : i32 to vector<1x2048xi32>
    %190 = arith.addi %13, %189 : vector<1x2048xi32>
    %c0_i32_76 = arith.constant 0 : i32
    %191 = vector.broadcast %c0_i32_76 : i32 to vector<1x2048xi32>
    %192 = arith.cmpi sge, %190, %191 : vector<1x2048xi32>
    %c0_i32_77 = arith.constant 0 : i32
    %193 = vector.broadcast %c0_i32_77 : i32 to vector<1x2048xi32>
    %194 = arith.addi %13, %193 : vector<1x2048xi32>
    %c32_i32_78 = arith.constant 32 : i32
    %195 = vector.broadcast %c32_i32_78 : i32 to vector<1x2048xi32>
    %196 = arith.cmpi slt, %194, %195 : vector<1x2048xi32>
    %197 = arith.andi %192, %196 : vector<1x2048xi1>
    %c1_i32_79 = arith.constant 1 : i32
    %198 = vector.broadcast %c1_i32_79 : i32 to vector<1x2048xi32>
    %199 = arith.addi %14, %198 : vector<1x2048xi32>
    %c0_i32_80 = arith.constant 0 : i32
    %200 = vector.broadcast %c0_i32_80 : i32 to vector<1x2048xi32>
    %201 = arith.cmpi sge, %199, %200 : vector<1x2048xi32>
    %202 = arith.andi %197, %201 : vector<1x2048xi1>
    %c1_i32_81 = arith.constant 1 : i32
    %203 = vector.broadcast %c1_i32_81 : i32 to vector<1x2048xi32>
    %204 = arith.addi %14, %203 : vector<1x2048xi32>
    %c32_i32_82 = arith.constant 32 : i32
    %205 = vector.broadcast %c32_i32_82 : i32 to vector<1x2048xi32>
    %206 = arith.cmpi slt, %204, %205 : vector<1x2048xi32>
    %207 = arith.andi %202, %206 : vector<1x2048xi1>
    %cst_83 = arith.constant 0.000000e+00 : f32
    %208 = arith.truncf %cst_83 : f32 to bf16
    %209 = vector.shape_cast %207 : vector<1x2048xi1> to vector<1x2048xi1>
    %210 = vector.broadcast %209 : vector<1x2048xi1> to vector<8x2048xi1>
    %211 = vector.broadcast %208 : bf16 to vector<8x2048xbf16>
    %212 = arith.select %210, %188, %211 : vector<8x2048xi1>, vector<8x2048xbf16>
    %c0_84 = arith.constant 0 : index
    %c56 = arith.constant 56 : index
    %213 = vector.load %arg3[%c0_84, %c56] : memref<4x72xbf16, #tpu.memory_space<vmem>>, vector<4x8xbf16>
    %cst_85 = arith.constant dense<0.000000e+00> : vector<4x2048xf32>
    %214 = tpu.matmul %213, %212, %cst_85 {dimension_numbers = #tpu.dot_dimension_numbers<[1], [0], [0], [1], [0, 0, 1, 1], [], []>} : vector<4x8xbf16>, vector<8x2048xbf16>, vector<4x2048xf32> -> vector<4x2048xf32>
    %215 = arith.addf %187, %214 : vector<4x2048xf32>
    %216 = vector.extract_strided_slice %12 {offsets = [0, 161], sizes = [8, 2048], strides = [1, 1]} : vector<8x2304xbf16> to vector<8x2048xbf16>
    %c1_i32_86 = arith.constant 1 : i32
    %217 = vector.broadcast %c1_i32_86 : i32 to vector<1x2048xi32>
    %218 = arith.addi %13, %217 : vector<1x2048xi32>
    %c0_i32_87 = arith.constant 0 : i32
    %219 = vector.broadcast %c0_i32_87 : i32 to vector<1x2048xi32>
    %220 = arith.cmpi sge, %218, %219 : vector<1x2048xi32>
    %c1_i32_88 = arith.constant 1 : i32
    %221 = vector.broadcast %c1_i32_88 : i32 to vector<1x2048xi32>
    %222 = arith.addi %13, %221 : vector<1x2048xi32>
    %c32_i32_89 = arith.constant 32 : i32
    %223 = vector.broadcast %c32_i32_89 : i32 to vector<1x2048xi32>
    %224 = arith.cmpi slt, %222, %223 : vector<1x2048xi32>
    %225 = arith.andi %220, %224 : vector<1x2048xi1>
    %c1_i32_90 = arith.constant 1 : i32
    %226 = vector.broadcast %c1_i32_90 : i32 to vector<1x2048xi32>
    %227 = arith.addi %14, %226 : vector<1x2048xi32>
    %c0_i32_91 = arith.constant 0 : i32
    %228 = vector.broadcast %c0_i32_91 : i32 to vector<1x2048xi32>
    %229 = arith.cmpi sge, %227, %228 : vector<1x2048xi32>
    %230 = arith.andi %225, %229 : vector<1x2048xi1>
    %c1_i32_92 = arith.constant 1 : i32
    %231 = vector.broadcast %c1_i32_92 : i32 to vector<1x2048xi32>
    %232 = arith.addi %14, %231 : vector<1x2048xi32>
    %c32_i32_93 = arith.constant 32 : i32
    %233 = vector.broadcast %c32_i32_93 : i32 to vector<1x2048xi32>
    %234 = arith.cmpi slt, %232, %233 : vector<1x2048xi32>
    %235 = arith.andi %230, %234 : vector<1x2048xi1>
    %cst_94 = arith.constant 0.000000e+00 : f32
    %236 = arith.truncf %cst_94 : f32 to bf16
    %237 = vector.shape_cast %235 : vector<1x2048xi1> to vector<1x2048xi1>
    %238 = vector.broadcast %237 : vector<1x2048xi1> to vector<8x2048xi1>
    %239 = vector.broadcast %236 : bf16 to vector<8x2048xbf16>
    %240 = arith.select %238, %216, %239 : vector<8x2048xi1>, vector<8x2048xbf16>
    %c0_95 = arith.constant 0 : index
    %c64 = arith.constant 64 : index
    %241 = vector.load %arg3[%c0_95, %c64] : memref<4x72xbf16, #tpu.memory_space<vmem>>, vector<4x8xbf16>
    %cst_96 = arith.constant dense<0.000000e+00> : vector<4x2048xf32>
    %242 = tpu.matmul %241, %240, %cst_96 {dimension_numbers = #tpu.dot_dimension_numbers<[1], [0], [0], [1], [0, 0, 1, 1], [], []>} : vector<4x8xbf16>, vector<8x2048xbf16>, vector<4x2048xf32> -> vector<4x2048xf32>
    %243 = arith.addf %215, %242 : vector<4x2048xf32>
    %c0_97 = arith.constant 0 : index
    %c0_98 = arith.constant 0 : index
    %244 = vector.load %arg4[%c0_97, %c0_98] : memref<4x1xf32, #tpu.memory_space<vmem>>, vector<4x1xf32>
    %245 = vector.broadcast %244 : vector<4x1xf32> to vector<4x2048xf32>
    %246 = arith.addf %243, %245 : vector<4x2048xf32>
    %247 = math.tanh %246 : vector<4x2048xf32>
    %c0_99 = arith.constant 0 : index
    %c0_100 = arith.constant 0 : index
    %248 = vector.load %arg6[%c0_99, %c0_100] : memref<4x2048xf32, #tpu.memory_space<vmem>>, vector<4x2048xf32>
    tpu.vector_store %arg6[%c0_99, %c0_100], %247 {strides = array<i32>} : memref<4x2048xf32, #tpu.memory_space<vmem>>, vector<4x2048xf32>,
    return
  }
  func.func @transform_0(%arg0: i32) -> (i32, i32) {
    %c0_i32 = arith.constant 0 : i32
    %c0_i32_0 = arith.constant 0 : i32
    %c0_i32_1 = arith.constant 0 : i32
    return %c0_i32, %c0_i32_0 : i32, i32
  }
  func.func @transform_1(%arg0: i32) -> (i32, i32) {
    %c0_i32 = arith.constant 0 : i32
    %c0_i32_0 = arith.constant 0 : i32
    %c0_i32_1 = arith.constant 0 : i32
    return %c0_i32, %c0_i32_0 : i32, i32
  }
  func.func @transform_2(%arg0: i32) -> (i32, i32) {
    %c0_i32 = arith.constant 0 : i32
    %c0_i32_0 = arith.constant 0 : i32
    %c0_i32_1 = arith.constant 0 : i32
    return %c0_i32, %c0_i32_0 : i32, i32
  }
  func.func @transform_3(%arg0: i32) -> (i32, i32) {
    %c0_i32 = arith.constant 0 : i32
    %c0_i32_0 = arith.constant 0 : i32
    %c0_i32_1 = arith.constant 0 : i32
    return %c0_i32, %c0_i32_0 : i32, i32
  }
  func.func @transform_4(%arg0: i32) -> (i32, i32) {
    %c0_i32 = arith.constant 0 : i32
    %c0_i32_0 = arith.constant 0 : i32
    %c0_i32_1 = arith.constant 0 : i32
    return %c0_i32, %c0_i32_0 : i32, i32
  }
  func.func @transform_5(%arg0: i32) -> (i32, i32) {
    %c0_i32 = arith.constant 0 : i32
    %c0_i32_0 = arith.constant 0 : i32
    %c0_i32_1 = arith.constant 0 : i32
    return %c0_i32, %c0_i32_0 : i32, i32
  }
}

</mosaic_0001>

<bundles_post_ra>
// kernel: decoder_v1_forward.4
= control target key start
LH: loop header
LB: loop body
LE: loop exit
PB: predicated region body
PF: predicated region fallthrough
CT: control target
= control target key end

     0   :  { %v653_v2 = vmov 0   ;;  %s655_s25 = smov 1   ;;  %s656_s26 = smov 5   ;;  %s935_s1 = inlined_call_operand.vmem [shape: s32[2,32], index: 1, kind: input, shape index: {}]   ;;  %s936_s2 = inlined_call_operand.vmem [shape: bf16[64,128], index: 2, kind: input, shape index: {}]   ;;  %s937_s0 = inlined_call_operand.vmem [shape: f32[32,128], index: 0, kind: input, shape index: {}]   ;;  %s938_s3 = inlined_call_operand.vmem [shape: f32[64,1], index: 3, kind: input, shape index: {}]   ;;  %s939_s5 = inlined_call_operand.vmem [shape: f32[64,32], index: 5, kind: output, shape index: {0}]   ;;  %s940_s4 = inlined_call_operand.vmem [shape: f32[32,1], index: 4, kind: input, shape index: {}]   ;;  %s941_s6 = inlined_call_operand.vmem [shape: f32[32,1], index: 6, kind: output, shape index: {1}]  }
   0x1   :  { %v33_v0 = vld [vmem:[%s935_s1] sm:$0x1]  ;;  %v34_v1 = vld [vmem:[%s935_s1 + $0x1] sm:$0x1]  ;;  %644 = vset.pattern.permute.xlu0 %v653_v2  ;;  %645 = vset.pattern.permute.xlu1 %v653_v2  ;;  %s654_s1 = smov 4   ;;  %s657_s29 = smov 64   ;;  %v56_v17 = vunpack.c.l.b16 %v653_v2  ;;  %v57_v18 = vunpack.c.h.b16 %v653_v2 }
   0x2   :  { %vm204_vm0 = vcmp.lt.s32.totalorder %v33_v0, 4  ;;  %v205_v3 = vadd.s32 1, %v34_v1  ;;  %v43_v4 = vadd.s32 1, %v33_v0  ;;  %646 = vset.pattern.permute.xlu2 %v653_v2  ;;  %vm45_vm3 = vcmp.lt.s32.totalorder %v34_v1, 4  ;;  %v708_v14 = vld [vmem:[%s936_s2] sm:$0xff]  ;;  %v27_v15 = vld [vmem:[%s937_s0 + $0x10] sm:$0xff] }
   0x3   :  { %226 = vrot.lane.b32.xlu2 %v708_v14, %s657_s29  ;;  %v28_v16 = vld [vmem:[%s937_s0 + $0x18] sm:$0xff]  ;;  %v25_v19 = vld [vmem:[%s937_s0] sm:$0xff]  ;;  %v26_v20 = vld [vmem:[%s937_s0 + $0x8] sm:$0xff]  ;;  %v724_v24 = vpack.c.bf16 %v27_v15, %v27_v15  ;;  %s658_s0 = smov 124   ;;  %s659_s14 = smov 123  }
   0x4   :  { %vm206_vm1 = vcmp.lt.s32.totalorder %v205_v3, 4  ;;  %vm44_vm2 = vcmp.lt.s32.totalorder %v43_v4, 4  ;;  %v726_v25 = vpack.c.bf16 %v28_v16, %v28_v16  ;;  %v728_v27 = vpack.c.bf16 %v25_v19, %v25_v19  ;;  %s660_s15 = smov 127   ;;  %v630_v1 = vld [vmem:[%s936_s2 + $0x8] sm:$0xff]  ;;  %s661_s18 = smov 32   ;;  %v632_v3 = vld [vmem:[%s936_s2 + $0x18] sm:$0xff] }
   0x5   :  { %vm207_vm4 = vmand %vm204_vm0, %vm206_vm1  ;;  %v730_v28 = vpack.c.bf16 %v26_v20, %v26_v20  ;;  %s662_s21 = smov 96   ;;  %v157_v4 = vunpack.c.l.b16 %v724_v24  ;;  %v391_v16 = vld [vmem:[%s938_s3] sm:$0xff] }
   0x6   :  { %v208_v5 = vsel %vm207_vm4, 1, %v653_v2  ;;  %vm299_vm5 = vmand %vm44_vm2, %vm206_vm1 }
   0x7   :  { %v209_v6 = vperm.slane %v208_v5, 0  ;;  %v300_v7 = vsel %vm299_vm5, 1, %v653_v2  ;;  %vm46_vm6 = vmand %vm44_vm2, %vm45_vm3  ;;  %v158_v5 = vunpack.c.l.b16 %v726_v25 }
   0x8   :  { %v301_v8 = vperm.slane %v300_v7, 0  ;;  %v47_v9 = vsel %vm46_vm6, 1, %v653_v2  ;;  %v155_v7 = vunpack.c.l.b16 %v728_v27  ;;  %vm109_vm6 = vcmask 261120  }
   0x9   :  { %vm210_vm7 = vcmp.eq.s32.totalorder %v209_v6, 1  ;;  %v48_v10 = vperm.slane %v47_v9, 0  ;;  %v160_v6 = vpack.c.b16 %v158_v5, %v157_v4 }
   0xa   :  { %vm211_vm8 = vmpackc.low %vm210_vm7, %vm210_vm7  ;;  %vm302_vm9 = vcmp.eq.s32.totalorder %v301_v8, 1  ;;  %v156_v8 = vunpack.c.l.b16 %v730_v28 }
   0xb   :  { %v212_v11 = vsel %vm211_vm8, 65537, %v653_v2  ;;  %vm49_vm10 = vcmp.eq.s32.totalorder %v48_v10, 1  ;;  %vm303_vm12 = vmpackc.low %vm302_vm9, %vm302_vm9  ;;  %181 = vmatpush.bf16.msra.mxu1 %v160_v6 }
   0xc   :  { %213 = vrot.lane.b32.xlu0 %v212_v11, %s654_s1  ;;  %vm50_vm11 = vmpackc.low %vm49_vm10, %vm49_vm10  ;;  %v304_v13 = vsel %vm303_vm12, 65537, %v653_v2  ;;  %v159_v10 = vpack.c.b16 %v156_v8, %v155_v7 }
   0xd   :  { %v51_v12 = vsel %vm50_vm11, 65537, %v653_v2  ;;  %v631_v2 = vld [vmem:[%s936_s2 + $0x10] sm:$0xff]  ;;  %vm584_vm11 = vcmask 7168  }
   0xe   :  { %52 = vrot.lane.b32.xlu1 %v51_v12, %s655_s25 }
   0xf   :  { %182 = vmatpush.bf16.msra.mxu1 %v159_v10 }
  0x12   :  { %617 = vmatmul.msk.bf16.vlgmr.msra.gmra.mxu1 %vm109_vm6, %v708_v14 }
  0x14   :  { %305 = vrot.lane.b32.xlu0 %v304_v13, %s656_s26 }
  0x22   :  { %618 = vmatmul.msk.bf16.gmra.mxu1 %vm109_vm6, %v630_v1 }
  0x32   :  { %619 = vmatmul.msk.bf16.gmra.mxu1 %vm109_vm6, %v631_v2 }
  0x42   :  { %620 = vmatmul.msk.bf16.gmra.mxu1 %vm109_vm6, %v632_v3 }
  0x5d   :  { %v227_v9 = vpop.permute.xlu2 %226 }
  0x7e   :  { %v214_v21 = vpop.permute.xlu0 %213 }
  0x7f   :  { %v215_v22 = vunpack.c.l.b16 %v214_v21  ;;  %v216_v23 = vunpack.c.h.b16 %v214_v21 }
  0x80   :  { %v53_v26 = vpop.permute.xlu1 %52 }
  0x81   :  { %vm219_vm13 = vcmp.ne.s32.totalorder %v215_v22, %v56_v17  ;;  %vm220_vm14 = vcmp.ne.s32.totalorder %v216_v23, %v57_v18  ;;  %v54_v29 = vunpack.c.l.b16 %v53_v26  ;;  %v55_v30 = vunpack.c.h.b16 %v53_v26  ;;  %v394_v22 = vld [vmem:[%s938_s3 + $0x18] sm:$0xff]  ;;  %v396_v26 = vld [vmem:[%s938_s3 + $0x28] sm:$0xff] }
  0x82   :  { %vm221_vm15 = vmpackc.low %vm220_vm14, %vm219_vm13 }
  0x83   :  { %vm58_vm0 = vcmp.ne.s32.totalorder %v54_v29, %v56_v17  ;;  %vm59_vm1 = vcmp.ne.s32.totalorder %v55_v30, %v57_v18  ;;  %v224_v31 = vsel %vm221_vm15, %v724_v24, 0  ;;  %v225_v32 = vsel %vm221_vm15, %v726_v25, 0  ;;  %v395_v29 = vld [vmem:[%s938_s3 + $0x20] sm:$0xff] }
  0x84   :  { %vm734_vm2 = vmpackc.low %vm59_vm1, %vm58_vm0  ;;  %v240_v34 = vunpack.c.l.b16 %v224_v31  ;;  %v241_v35 = vunpack.c.l.b16 %v225_v32  ;;  %v222_v36 = vsel %vm221_vm15, %v728_v27, 0  ;;  %v223_v37 = vsel %vm221_vm15, %v730_v28, 0  ;;  %v398_v32 = vld [vmem:[%s938_s3 + $0x38] sm:$0xff] }
  0x85   :  { %v238_v38 = vunpack.c.l.b16 %v222_v36  ;;  %v239_v39 = vunpack.c.l.b16 %v223_v37  ;;  %v61_v42 = vsel %vm734_vm2, %v728_v27, 0  ;;  %v62_v43 = vsel %vm734_vm2, %v730_v28, 0 }
  0x86   :  { %v306_v40 = vpop.permute.xlu0 %305  ;;  %v243_v41 = vpack.c.b16 %v241_v35, %v240_v34  ;;  %v97_v47 = vunpack.c.l.b16 %v61_v42  ;;  %v98_v48 = vunpack.c.l.b16 %v62_v43  ;;  %v63_v58 = vsel %vm734_vm2, %v724_v24, 0 }
  0x87   :  { %v307_v44 = vunpack.c.l.b16 %v306_v40  ;;  %v308_v45 = vunpack.c.h.b16 %v306_v40  ;;  %v242_v46 = vpack.c.b16 %v239_v39, %v238_v38  ;;  %v64_v59 = vsel %vm734_vm2, %v726_v25, 0 }
  0x88   :  { %246 = vrot.lane.b32.xlu1 %v243_v41, %s658_s0  ;;  %v101_v57 = vpack.c.b16 %v98_v48, %v97_v47  ;;  %v99_v62 = vunpack.c.l.b16 %v63_v58  ;;  %v100_v63 = vunpack.c.l.b16 %v64_v59 }
  0x89   :  { %vm311_vm3 = vcmp.ne.s32.totalorder %v307_v44, %v56_v17  ;;  %vm312_vm4 = vcmp.ne.s32.totalorder %v308_v45, %v57_v18  ;;  %244 = vrot.lane.b32.xlu0 %v242_v46, %s658_s0 }
  0x8a   :  { %vm313_vm5 = vmpackc.low %vm312_vm4, %vm311_vm3  ;;  %v102_v0 = vpack.c.b16 %v100_v63, %v99_v62 }
  0x8b   :  { %v316_v49 = vsel %vm313_vm5, %v724_v24, 0  ;;  %v317_v50 = vsel %vm313_vm5, %v726_v25, 0  ;;  %v314_v51 = vsel %vm313_vm5, %v728_v27, 0  ;;  %v315_v52 = vsel %vm313_vm5, %v730_v28, 0  ;;  %v397_v25 = vld [vmem:[%s938_s3 + $0x30] sm:$0xff] }
  0x8c   :  { %v332_v53 = vunpack.c.l.b16 %v316_v49  ;;  %v333_v54 = vunpack.c.l.b16 %v317_v50  ;;  %v330_v55 = vunpack.c.l.b16 %v314_v51  ;;  %v331_v56 = vunpack.c.l.b16 %v315_v52  ;;  %v393_v27 = vld [vmem:[%s938_s3 + $0x10] sm:$0xff] }
  0x8e   :  { %v335_v60 = vpack.c.b16 %v333_v54, %v332_v53  ;;  %v334_v61 = vpack.c.b16 %v331_v56, %v330_v55 }
  0x8f   :  { %v184_v36 = vpop.f32.mrf.mxu1 }
  0x90   :  { %338 = vrot.lane.b32.xlu2 %v335_v60, %s659_s14  ;;  %336 = vrot.lane.b32.xlu1 %v334_v61, %s659_s14 }
  0x91   :  { %103 = vrot.lane.b32.xlu0 %v101_v57, %s660_s15 }
  0x97   :  { %v186_v37 = vpop.f32.mrf.mxu1 }
  0x98   :  { %105 = vrot.lane.b32.xlu2 %v102_v0, %s660_s15  ;;  %318 = vrot.lane.b32.xlu1 %v708_v14, %s661_s18 }
  0x99   :  { %228 = vrot.lane.b32.xlu0 %v630_v1, %s657_s29 }
  0x9f   :  { %v189_v41 = vpop.f32.mrf.mxu1 }
  0xa0   :  { %320 = vrot.lane.b32.xlu1 %v630_v1, %s661_s18  ;;  %85 = vrot.lane.b32.xlu2 %v708_v14, %s662_s21  ;;  %v392_v14 = vld [vmem:[%s938_s3 + $0x8] sm:$0xff] }
  0xa1   :  { %230 = vrot.lane.b32.xlu0 %v631_v2, %s657_s29 }
  0xa7   :  { %v191_v54 = vpop.f32.mrf.mxu1 }
  0xa8   :  { %322 = vrot.lane.b32.xlu1 %v631_v2, %s661_s18  ;;  %87 = vrot.lane.b32.xlu2 %v630_v1, %s662_s21 }
  0xa9   :  { %232 = vrot.lane.b32.xlu0 %v632_v3, %s657_s29 }
  0xb0   :  { %324 = vrot.lane.b32.xlu1 %v632_v3, %s661_s18  ;;  %89 = vrot.lane.b32.xlu2 %v631_v2, %s662_s21 }
  0xb1   :  { %401 = vperm.xlu0 %644, %v391_v16  }
  0xb8   :  { %91 = vrot.lane.b32.xlu2 %v632_v3, %s662_s21  ;;  %406 = vperm.xlu1 %645, %v392_v14   ;;  %v194_v3 = vpop.f32.mrf.mxu1 }
  0xb9   :  { %426 = vperm.xlu0 %644, %v396_v26  }
  0xc0   :  { %416 = vperm.xlu1 %645, %v394_v22   ;;  %411 = vperm.xlu2 %646, %v393_v27   ;;  %v196_v16 = vpop.f32.mrf.mxu1 }
  0xc8   :  { %431 = vperm.xlu1 %645, %v397_v25   ;;  %421 = vperm.xlu2 %646, %v395_v29   ;;  %v199_v25 = vpop.f32.mrf.mxu1 }
  0xd0   :  { %436 = vperm.xlu2 %646, %v398_v32  }
  0xea   :  { %v339_v11 = vpop.permute.xlu2 %338 }
  0xeb   :  { %360 = vmatpush.bf16.msra.mxu3 %v339_v11 }
  0xf2   :  { %v106_v12 = vpop.permute.xlu2 %105 }
  0xf3   :  { %128 = vmatpush.bf16.msra.mxu0 %v106_v12 }
  0xfa   :  { %v247_v13 = vpop.permute.xlu1 %246  ;;  %v86_v19 = vpop.permute.xlu2 %85 }
  0xfb   :  { %v245_v15 = vpop.permute.xlu0 %244  ;;  %268 = vmatpush.bf16.msra.mxu2 %v247_v13 }
  0xff   :  { %269 = vmatpush.bf16.msra.mxu2 %v245_v15 }
 0x102   :  { %v337_v17 = vpop.permute.xlu1 %336  ;;  %621 = vmatmul.msk.bf16.vlgmr.msra.gmra.mxu2 %vm109_vm6, %v227_v9  ;;  %v88_v23 = vpop.permute.xlu2 %87 }
 0x103   :  { %v104_v18 = vpop.permute.xlu0 %103  ;;  %361 = vmatpush.bf16.msra.mxu3 %v337_v17 }
 0x104   :  { %129 = vmatpush.bf16.msra.mxu0 %v104_v18 }
 0x107   :  { %613 = vmatmul.msk.bf16.vlgmr.msra.gmra.mxu0 %vm109_vm6, %v86_v19 }
 0x10a   :  { %v319_v20 = vpop.permute.xlu1 %318  ;;  %v90_v30 = vpop.permute.xlu2 %89 }
 0x10b   :  { %625 = vmatmul.msk.bf16.vlgmr.msra.gmra.mxu3 %vm109_vm6, %v319_v20  ;;  %v229_v21 = vpop.permute.xlu0 %228 }
 0x112   :  { %622 = vmatmul.msk.bf16.gmra.mxu2 %vm109_vm6, %v229_v21  ;;  %v321_v24 = vpop.permute.xlu1 %320  ;;  %v92_v34 = vpop.permute.xlu2 %91 }
 0x113   :  { %v231_v28 = vpop.permute.xlu0 %230 }
 0x117   :  { %614 = vmatmul.msk.bf16.gmra.mxu0 %vm109_vm6, %v88_v23 }
 0x11a   :  { %v323_v31 = vpop.permute.xlu1 %322  ;;  %v412_v1 = vpop.permute.xlu2 %411 }
 0x11b   :  { %626 = vmatmul.msk.bf16.gmra.mxu3 %vm109_vm6, %v321_v24  ;;  %v233_v33 = vpop.permute.xlu0 %232 }
 0x122   :  { %623 = vmatmul.msk.bf16.gmra.mxu2 %vm109_vm6, %v231_v28  ;;  %v325_v35 = vpop.permute.xlu1 %324  ;;  %v422_v22 = vpop.permute.xlu2 %421 }
 0x123   :  { %v402_v46 = vpop.permute.xlu0 %401 }
 0x127   :  { %615 = vmatmul.msk.bf16.gmra.mxu0 %vm109_vm6, %v90_v30 }
 0x12a   :  { %v407_v56 = vpop.permute.xlu1 %406 }
 0x12b   :  { %627 = vmatmul.msk.bf16.gmra.mxu3 %vm109_vm6, %v323_v31 }
 0x132   :  { %624 = vmatmul.msk.bf16.gmra.mxu2 %vm109_vm6, %v233_v33  ;;  %v417_v11 = vpop.permute.xlu1 %416  ;;  %v427_v33 = vpop.permute.xlu0 %426 }
 0x137   :  { %616 = vmatmul.msk.bf16.gmra.mxu0 %vm109_vm6, %v92_v34 }
 0x13b   :  { %628 = vmatmul.msk.bf16.gmra.mxu3 %vm109_vm6, %v325_v35 }
 0x184   :  { %v131_v38 = vpop.f32.mrf.mxu0 }
 0x185   :  { %v271_v39 = vpop.f32.mrf.mxu2  ;;  %v185_v40 = vadd.f32 %v184_v36, %v131_v38 }
 0x187   :  { %v291_v43 = vadd.f32 %v271_v39, %v185_v40 }
 0x18c   :  { %v133_v42 = vpop.f32.mrf.mxu0 }
 0x18d   :  { %v273_v44 = vpop.f32.mrf.mxu2  ;;  %v187_v48 = vadd.f32 %v186_v37, %v133_v42  ;;  %v201_v37 = vpop.f32.mrf.mxu1 }
 0x18e   :  { %v363_v45 = vpop.f32.mrf.mxu3 }
 0x18f   :  { %v383_v47 = vadd.f32 %v363_v45, %v291_v43  ;;  %v292_v52 = vadd.f32 %v273_v44, %v187_v48 }
 0x191   :  { %v815_v49 = vadd.f32 %v402_v46, %v383_v47 }
 0x193   :  { %447 = vst.msk [vmem:[%s939_s5] sm:$0xff] %vm109_vm6, %v815_v49  ;;  %v455_v50 = vsel %vm109_vm6, %v815_v49, 0.0 }
 0x194   :  { %v136_v51 = vpop.f32.mrf.mxu0  ;;  %456 = vadd.xlane.f32.xlu0 %v455_v50  ;;  %v437_v50 = vpop.permute.xlu2 %436 }
 0x195   :  { %v276_v53 = vpop.f32.mrf.mxu2  ;;  %v190_v57 = vadd.f32 %v189_v41, %v136_v51  ;;  %v432_v41 = vpop.permute.xlu1 %431 }
 0x196   :  { %v365_v55 = vpop.f32.mrf.mxu3 }
 0x197   :  { %v384_v58 = vadd.f32 %v365_v55, %v292_v52  ;;  %v293_v60 = vadd.f32 %v276_v53, %v190_v57  ;;  %v663_v53 = vmov 128.0  }
 0x198   :  { %647 = vrcp.f32 %v663_v53 }
 0x199   :  { %v824_v59 = vadd.f32 %v407_v56, %v384_v58 }
 0x19b   :  { %448 = vst.msk [vmem:[%s939_s5 + $0x8] sm:$0xff] %vm109_vm6, %v824_v59  ;;  %v458_v61 = vsel %vm109_vm6, %v824_v59, 0.0 }
 0x19c   :  { %v138_v62 = vpop.f32.mrf.mxu0  ;;  %459 = vadd.xlane.f32.xlu1 %v458_v61 }
 0x19d   :  { %v278_v63 = vpop.f32.mrf.mxu2  ;;  %v192_v4 = vadd.f32 %v191_v54, %v138_v62 }
 0x19e   :  { %v368_v0 = vpop.f32.mrf.mxu3  ;;  %v648_v54 = vpop.eup %647 }
 0x19f   :  { %v385_v2 = vadd.f32 %v368_v0, %v293_v60  ;;  %v294_v8 = vadd.f32 %v278_v63, %v192_v4  ;;  %v486_v56 = vmul.f32 128.0, %v648_v54  ;;  %vm490_vm7 = vweird.f32 %v648_v54 }
 0x1a1   :  { %v833_v5 = vadd.f32 %v412_v1, %v385_v2  ;;  %v487_v58 = vsub.f32 1.0, %v486_v56 }
 0x1a3   :  { %449 = vst.msk [vmem:[%s939_s5 + $0x10] sm:$0xff] %vm109_vm6, %v833_v5  ;;  %v461_v6 = vsel %vm109_vm6, %v833_v5, 0.0  ;;  %v488_v61 = vmul.f32 %v648_v54, %v487_v58 }
 0x1a4   :  { %v141_v7 = vpop.f32.mrf.mxu0  ;;  %462 = vadd.xlane.f32.xlu2 %v461_v6 }
 0x1a5   :  { %v281_v9 = vpop.f32.mrf.mxu2  ;;  %v195_v12 = vadd.f32 %v194_v3, %v141_v7  ;;  %v489_v0 = vadd.f32 %v648_v54, %v488_v61 }
 0x1a6   :  { %v370_v10 = vpop.f32.mrf.mxu3 }
 0x1a7   :  { %v386_v13 = vadd.f32 %v370_v10, %v294_v8  ;;  %v295_v17 = vadd.f32 %v281_v9, %v195_v12  ;;  %v879_v3 = vsel %vm490_vm7, %v648_v54, %v489_v0 }
 0x1a9   :  { %v842_v15 = vadd.f32 %v417_v11, %v386_v13 }
 0x1ab   :  { %450 = vst.msk [vmem:[%s939_s5 + $0x18] sm:$0xff] %vm109_vm6, %v842_v15  ;;  %v464_v14 = vsel %vm109_vm6, %v842_v15, 0.0 }
 0x1ac   :  { %v143_v18 = vpop.f32.mrf.mxu0  ;;  %465 = vadd.xlane.f32.xlu2 %v464_v14 }
 0x1ad   :  { %v283_v19 = vpop.f32.mrf.mxu2  ;;  %v197_v23 = vadd.f32 %v196_v16, %v143_v18 }
 0x1ae   :  { %v373_v20 = vpop.f32.mrf.mxu3 }
 0x1af   :  { %v387_v21 = vadd.f32 %v373_v20, %v295_v17  ;;  %v296_v28 = vadd.f32 %v283_v19, %v197_v23 }
 0x1b1   :  { %v851_v24 = vadd.f32 %v422_v22, %v387_v21 }
 0x1b3   :  { %451 = vst.msk [vmem:[%s939_s5 + $0x20] sm:$0xff] %vm109_vm6, %v851_v24  ;;  %v467_v26 = vsel %vm109_vm6, %v851_v24, 0.0 }
 0x1b4   :  { %v146_v27 = vpop.f32.mrf.mxu0  ;;  %468 = vadd.xlane.f32.xlu0 %v467_v26 }
 0x1b5   :  { %v200_v30 = vadd.f32 %v199_v25, %v146_v27  ;;  %v286_v32 = vpop.f32.mrf.mxu2 }
 0x1b6   :  { %v375_v29 = vpop.f32.mrf.mxu3 }
 0x1b7   :  { %v388_v31 = vadd.f32 %v375_v29, %v296_v28  ;;  %v297_v35 = vadd.f32 %v286_v32, %v200_v30 }
 0x1b9   :  { %v860_v34 = vadd.f32 %v427_v33, %v388_v31 }
 0x1bb   :  { %452 = vst.msk [vmem:[%s939_s5 + $0x28] sm:$0xff] %vm109_vm6, %v860_v34  ;;  %v470_v36 = vsel %vm109_vm6, %v860_v34, 0.0 }
 0x1bc   :  { %471 = vadd.xlane.f32.xlu1 %v470_v36  ;;  %v148_v38 = vpop.f32.mrf.mxu0 }
 0x1bd   :  { %v202_v42 = vadd.f32 %v201_v37, %v148_v38  ;;  %v288_v44 = vpop.f32.mrf.mxu2 }
 0x1be   :  { %v378_v39 = vpop.f32.mrf.mxu3 }
 0x1bf   :  { %v389_v40 = vadd.f32 %v378_v39, %v297_v35  ;;  %v298_v46 = vadd.f32 %v288_v44, %v202_v42 }
 0x1c1   :  { %v445_v43 = vadd.f32 %v432_v41, %v389_v40 }
 0x1c3   :  { %453 = vst.msk [vmem:[%s939_s5 + $0x30] sm:$0xff] %vm109_vm6, %v445_v43  ;;  %v473_v45 = vsel %vm109_vm6, %v445_v43, 0.0 }
 0x1c4   :  { %474 = vadd.xlane.f32.xlu2 %v473_v45 }
 0x1c6   :  { %v380_v47 = vpop.f32.mrf.mxu3 }
 0x1c7   :  { %v390_v48 = vadd.f32 %v380_v47, %v298_v46 }
 0x1c9   :  { %v446_v51 = vadd.f32 %v437_v50, %v390_v48 }
 0x1cb   :  { %454 = vst.msk [vmem:[%s939_s5 + $0x38] sm:$0xff] %vm109_vm6, %v446_v51  ;;  %v476_v52 = vsel %vm109_vm6, %v446_v51, 0.0 }
 0x1cc   :  { %477 = vadd.xlane.f32.xlu0 %v476_v52 }
 0x207   :  { %v457_v57 = vpop.xlane.xlu0 %456 }
 0x20f   :  { %v460_v62 = vpop.xlane.xlu1 %459 }
 0x217   :  { %v463_v55 = vpop.xlane.xlu2 %462 }
 0x218   :  { %v479_v1 = vadd.f32 %v463_v55, %v457_v57 }
 0x21f   :  { %v466_v60 = vpop.xlane.xlu2 %465 }
 0x220   :  { %v480_v9 = vadd.f32 %v466_v60, %v460_v62  ;;  %v552_v62 = vld [vmem:[%s940_s4] sm:$0xff] }
 0x227   :  { %v469_v63 = vpop.xlane.xlu0 %468 }
 0x228   :  { %v481_v2 = vadd.f32 %v479_v1, %v469_v63 }
 0x22f   :  { %v472_v8 = vpop.xlane.xlu1 %471 }
 0x230   :  { %v482_v10 = vadd.f32 %v480_v9, %v472_v8 }
 0x237   :  { %v475_v4 = vpop.xlane.xlu2 %474 }
 0x238   :  { %v483_v6 = vadd.f32 %v481_v2, %v475_v4  ;;  %v554_v2 = vld [vmem:[%s940_s4 + $0x10] sm:$0xff] }
 0x23a   :  { %v882_v7 = vmul.f32 %v879_v3, %v483_v6 }
 0x23c   :  { %496 = vperm.xlu1 %645, %v882_v7  }
 0x23f   :  { %v478_v11 = vpop.xlane.xlu0 %477 }
 0x240   :  { %v484_v12 = vadd.f32 %v482_v10, %v478_v11 }
 0x242   :  { %v886_v13 = vmul.f32 %v879_v3, %v484_v12 }
 0x244   :  { %501 = vperm.xlu2 %646, %v886_v13  }
 0x29e   :  { %v502_v16 = vpop.permute.xlu2 %501 }
 0x29f   :  { %v507_v17 = vsub.f32 %v842_v15, %v502_v16  ;;  %v505_v29 = vsub.f32 %v824_v59, %v502_v16  ;;  %v509_v33 = vsub.f32 %v860_v34, %v502_v16  ;;  %v511_v36 = vsub.f32 %v446_v51, %v502_v16 }
 0x2a1   :  { %v515_v14 = vmul.f32 %v507_v17, %v507_v17  ;;  %v513_v30 = vmul.f32 %v505_v29, %v505_v29  ;;  %v519_v37 = vmul.f32 %v511_v36, %v511_v36 }
 0x2a3   :  { %v529_v18 = vsel %vm109_vm6, %v515_v14, 0.0  ;;  %v541_v59 = vsel %vm109_vm6, %v519_v37, 0.0  ;;  %v555_v14 = vld [vmem:[%s940_s4 + $0x18] sm:$0xff] }
 0x2a4   :  { %530 = vadd.xlane.f32.xlu1 %v529_v18 }
 0x2ae   :  { %v497_v19 = vpop.permute.xlu1 %496 }
 0x2af   :  { %v504_v20 = vsub.f32 %v815_v49, %v497_v19  ;;  %v508_v21 = vsub.f32 %v851_v24, %v497_v19  ;;  %v506_v27 = vsub.f32 %v833_v5, %v497_v19  ;;  %v523_v49 = vsel %vm109_vm6, %v513_v30, 0.0 }
 0x2b0   :  { %v510_v24 = vsub.f32 %v445_v43, %v497_v19  ;;  %v517_v5 = vmul.f32 %v509_v33, %v509_v33 }
 0x2b1   :  { %v512_v22 = vmul.f32 %v504_v20, %v504_v20  ;;  %v516_v23 = vmul.f32 %v508_v21, %v508_v21  ;;  %v514_v15 = vmul.f32 %v506_v27, %v506_v27 }
 0x2b2   :  { %v518_v31 = vmul.f32 %v510_v24, %v510_v24  ;;  %v535_v35 = vsel %vm109_vm6, %v517_v5, 0.0 }
 0x2b3   :  { %v520_v25 = vsel %vm109_vm6, %v512_v22, 0.0  ;;  %v532_v26 = vsel %vm109_vm6, %v516_v23, 0.0  ;;  %v526_v28 = vsel %vm109_vm6, %v514_v15, 0.0 }
 0x2b4   :  { %521 = vadd.xlane.f32.xlu0 %v520_v25  ;;  %533 = vadd.xlane.f32.xlu2 %v532_v26  ;;  %v538_v32 = vsel %vm109_vm6, %v518_v31, 0.0 }
 0x2bc   :  { %527 = vadd.xlane.f32.xlu0 %v526_v28 }
 0x2c4   :  { %524 = vadd.xlane.f32.xlu0 %v523_v49 }
 0x2cc   :  { %539 = vadd.xlane.f32.xlu0 %v538_v32 }
 0x2d4   :  { %536 = vadd.xlane.f32.xlu0 %v535_v35 }
 0x2dc   :  { %542 = vadd.xlane.f32.xlu0 %v541_v59 }
 0x317   :  { %v531_v48 = vpop.xlane.xlu1 %530 }
 0x327   :  { %v522_v38 = vpop.xlane.xlu0 %521  ;;  %v534_v42 = vpop.xlane.xlu2 %533 }
 0x32f   :  { %v528_v39 = vpop.xlane.xlu0 %527 }
 0x330   :  { %v544_v41 = vadd.f32 %v528_v39, %v522_v38 }
 0x332   :  { %v546_v43 = vadd.f32 %v544_v41, %v534_v42 }
 0x337   :  { %v525_v40 = vpop.xlane.xlu0 %524 }
 0x338   :  { %v545_v51 = vadd.f32 %v531_v48, %v525_v40 }
 0x33f   :  { %v540_v44 = vpop.xlane.xlu0 %539 }
 0x340   :  { %v548_v45 = vadd.f32 %v546_v43, %v540_v44 }
 0x342   :  { %v550_v34 = vmul.f32 %v548_v45, %v879_v3 }
 0x344   :  { %v556_v46 = vadd.f32 1e-05, %v550_v34 }
 0x346   :  { %649 = vrsqrt.f32 %v556_v46  ;;  %vm564_vm9 = vweird.f32 %v556_v46 }
 0x347   :  { %v537_v47 = vpop.xlane.xlu0 %536 }
 0x348   :  { %v547_v53 = vadd.f32 %v545_v51, %v537_v47 }
 0x34c   :  { %v650_v50 = vpop.eup %649 }
 0x34d   :  { %v559_v52 = vmul.f32 %v650_v50, %v556_v46  ;;  %vm565_vm8 = vweird.f32 %v650_v50 }
 0x34e   :  { %vm566_vm10 = vmor %vm564_vm9, %vm565_vm8 }
 0x34f   :  { %v560_v54 = vmul.f32 %v650_v50, %v559_v52  ;;  %v543_v55 = vpop.xlane.xlu0 %542 }
 0x350   :  { %v549_v56 = vadd.f32 %v547_v53, %v543_v55 }
 0x351   :  { %v561_v57 = vmul.f32 0.5, %v560_v54 }
 0x352   :  { %v551_v58 = vmul.f32 %v549_v56, %v879_v3 }
 0x353   :  { %v562_v60 = vsub.f32 1.5, %v561_v57 }
 0x354   :  { %v557_v61 = vadd.f32 1e-05, %v551_v58 }
 0x355   :  { %v563_v63 = vmul.f32 %v650_v50, %v562_v60 }
 0x356   :  { %651 = vrsqrt.f32 %v557_v61  ;;  %vm574_vm13 = vweird.f32 %v557_v61 }
 0x357   :  { %v567_v0 = vsel %vm566_vm10, %v650_v50, %v563_v63 }
 0x358   :  { %v578_v1 = vmul.f32 %v567_v0, %v552_v62 }
 0x35a   :  { %v580_v3 = vmul.f32 %v578_v1, %v882_v7  ;;  %585 = vst.msk [vmem:[%s941_s6] sm:$0xff] %vm584_vm11, %v578_v1  ;;  %v553_v7 = vld [vmem:[%s940_s4 + $0x8] sm:$0xff] }
 0x35c   :  { %v652_v4 = vpop.eup %651  ;;  %v582_v6 = vsub.f32 %v554_v2, %v580_v3 }
 0x35d   :  { %v569_v8 = vmul.f32 %v652_v4, %v557_v61  ;;  %vm575_vm12 = vweird.f32 %v652_v4 }
 0x35e   :  { %587 = vst.msk [vmem:[%s941_s6 + $0x10] sm:$0xff] %vm584_vm11, %v582_v6  ;;  %vm576_vm14 = vmor %vm574_vm13, %vm575_vm12 }
 0x35f   :  { %v570_v9 = vmul.f32 %v652_v4, %v569_v8 }
 0x361   :  { %v571_v10 = vmul.f32 0.5, %v570_v9 }
 0x363   :  { %v572_v11 = vsub.f32 1.5, %v571_v10 }
 0x365   :  { %v573_v12 = vmul.f32 %v652_v4, %v572_v11 }
 0x367   :  { %v577_v16 = vsel %vm576_vm14, %v652_v4, %v573_v12 }
 0x368   :  { %v579_v17 = vmul.f32 %v577_v16, %v553_v7 }
 0x36a   :  { %v581_v18 = vmul.f32 %v579_v17, %v886_v13  ;;  %586 = vst.msk [vmem:[%s941_s6 + $0x8] sm:$0xff] %vm584_vm11, %v579_v17 }
 0x36c   :  { %v583_v19 = vsub.f32 %v555_v14, %v581_v18 }
 0x36e   :  { %588 = vst.msk [vmem:[%s941_s6 + $0x18] sm:$0xff] %vm584_vm11, %v583_v19 }

// kernel: decoder_v1_forward.5
= control target key start
LH: loop header
LB: loop body
LE: loop exit
PB: predicated region body
PF: predicated region fallthrough
CT: control target
= control target key end

     0   :  { %v471_v0 = vmov 0   ;;  %s474_s13 = smov 9   ;;  %vm205_vm13 = vcmask 64512   ;;  %vm273_vm14 = vcmask 72704   ;;  %s476_s22 = smov 120   ;;  %s649_s5 = inlined_call_operand.vmem [shape: f32[32,1], index: 5, kind: input, shape index: {}]   ;;  %s650_s1 = inlined_call_operand.vmem [shape: s32[2,128], index: 1, kind: input, shape index: {}]   ;;  %s651_s0 = inlined_call_operand.vmem [shape: f32[16,256], index: 0, kind: input, shape index: {}]   ;;  %s652_s2 = inlined_call_operand.vmem [shape: bf16[32,64], index: 2, kind: input, shape index: {}]   ;;  %s653_s3 = inlined_call_operand.vmem [shape: f32[32,1], index: 3, kind: input, shape index: {}]   ;;  %s654_s6 = inlined_call_operand.vmem [shape: f32[32,128], index: 6, kind: output, shape index: {0}]   ;;  %s655_s4 = inlined_call_operand.vmem [shape: f32[16,1], index: 4, kind: input, shape index: {}]   ;;  %s656_s7 = inlined_call_operand.vmem [shape: f32[16,1], index: 7, kind: output, shape index: {1}]  }
   0x1   :  { %465 = vset.pattern.permute.xlu1 %v471_v0  ;;  %464 = vset.pattern.permute.xlu0 %v471_v0  ;;  %v48_v1 = vld [vmem:[%s649_s5 + $0x10] sm:$0xff]  ;;  %v32_v2 = vld [vmem:[%s649_s5] sm:$0xff]  ;;  %v49_v7 = vld [vmem:[%s649_s5 + $0x18] sm:$0xff]  ;;  %v100_v30 = vunpack.c.l.b16 %v471_v0  ;;  %v101_v31 = vunpack.c.h.b16 %v471_v0  ;;  %s477_s23 = smov 127   ;;  %s478_s26 = smov 112  }
   0x2   :  { %52 = vperm.xlu1 %465, %v48_v1   ;;  %36 = vperm.xlu0 %464, %v32_v2   ;;  %v78_v3 = vld [vmem:[%s650_s1] sm:$0x1]  ;;  %v79_v4 = vld [vmem:[%s650_s1 + $0x1] sm:$0x1]  ;;  %v33_v8 = vld [vmem:[%s649_s5 + $0x8] sm:$0xff]  ;;  %s472_s1 = smov 8  }
   0x3   :  { %v84_v5 = vadd.s32 1, %v78_v3  ;;  %vm86_vm0 = vcmp.lt.s32.totalorder %v79_v4, 8  ;;  %v194_v6 = vadd.s32 1, %v79_v4  ;;  %466 = vset.pattern.permute.xlu2 %v471_v0  ;;  %vm193_vm1 = vcmp.lt.s32.totalorder %v78_v3, 8  ;;  %s473_s5 = smov 1   ;;  %v28_v22 = vld [vmem:[%s651_s0] sm:$0xff] }
   0x4   :  { %v29_v23 = vld [vmem:[%s651_s0 + $0x8] sm:$0xff]  ;;  %v30_v40 = vld [vmem:[%s651_s0 + $0x10] sm:$0xff]  ;;  %v31_v41 = vld [vmem:[%s651_s0 + $0x18] sm:$0xff]  ;;  %s475_s0 = smov 119   ;;  %s479_s27 = smov 80  }
   0x5   :  { %vm85_vm2 = vcmp.lt.s32.totalorder %v84_v5, 8  ;;  %vm195_vm3 = vcmp.lt.s32.totalorder %v194_v6, 8  ;;  %s480_s28 = smov 96  }
   0x6   :  { %vm87_vm4 = vmand %vm85_vm2, %vm86_vm0 }
   0x7   :  { %v88_v9 = vsel %vm87_vm4, 1, %v471_v0  ;;  %vm196_vm5 = vmand %vm193_vm1, %vm195_vm3 }
   0x8   :  { %v89_v10 = vperm.slane %v88_v9, 0  ;;  %v197_v11 = vsel %vm196_vm5, 1, %v471_v0  ;;  %vm264_vm6 = vmand %vm85_vm2, %vm195_vm3 }
   0x9   :  { %v198_v12 = vperm.slane %v197_v11, 0  ;;  %v265_v13 = vsel %vm264_vm6, 1, %v471_v0 }
   0xa   :  { %57 = vperm.xlu1 %465, %v49_v7   ;;  %41 = vperm.xlu0 %464, %v33_v8   ;;  %vm90_vm7 = vcmp.eq.s32.totalorder %v89_v10, 1  ;;  %v266_v14 = vperm.slane %v265_v13, 0 }
   0xb   :  { %vm91_vm8 = vmpackc.low %vm90_vm7, %vm90_vm7  ;;  %vm199_vm9 = vcmp.eq.s32.totalorder %v198_v12, 1 }
   0xc   :  { %vm200_vm10 = vmpackc.low %vm199_vm9, %vm199_vm9  ;;  %vm267_vm11 = vcmp.eq.s32.totalorder %v266_v14, 1  ;;  %v92_v16 = vsel %vm91_vm8, 65537, %v471_v0  ;;  %vm96_vm9 = vcmask 7168  }
   0xd   :  { %v201_v15 = vsel %vm200_vm10, 65537, %v471_v0  ;;  %vm268_vm12 = vmpackc.low %vm267_vm11, %vm267_vm11 }
   0xe   :  { %202 = vrot.lane.b32.xlu2 %v201_v15, %s472_s1  ;;  %v269_v17 = vsel %vm268_vm12, 65537, %v471_v0 }
  0x12   :  { %93 = vrot.lane.b32.xlu0 %v92_v16, %s473_s5 }
  0x16   :  { %270 = vrot.lane.b32.xlu2 %v269_v17, %s474_s13 }
  0x68   :  { %v203_v18 = vpop.permute.xlu2 %202 }
  0x69   :  { %v204_v19 = vrot.slane %v203_v18, 4 }
  0x6b   :  { %v206_v24 = vsel %vm205_vm13, %v204_v19, %v203_v18  ;;  %vm136_vm13 = vcmask 130048  }
  0x6c   :  { %v207_v32 = vunpack.c.l.b16 %v206_v24  ;;  %v208_v33 = vunpack.c.h.b16 %v206_v24 }
  0x6e   :  { %vm552_vm1 = vcmp.ne.s32.totalorder %v207_v32, %v100_v30  ;;  %vm556_vm2 = vcmp.ne.s32.totalorder %v208_v33, %v101_v31  ;;  %v335_v32 = vld [vmem:[%s653_s3 + $0x18] sm:$0xff] }
  0x6f   :  { %vm213_vm5 = vmpackc.low %vm556_vm2, %vm552_vm1 }
  0x70   :  { %v271_v20 = vpop.permute.xlu2 %270 }
  0x71   :  { %v272_v21 = vrot.slane %v271_v20, 4 }
  0x73   :  { %v274_v29 = vsel %vm273_vm14, %v272_v21, %v271_v20  ;;  %vm232_vm14 = vcmask 982016  }
  0x74   :  { %v53_v25 = vpop.permute.xlu1 %52  ;;  %v37_v26 = vpop.permute.xlu0 %36  ;;  %v275_v36 = vunpack.c.l.b16 %v274_v29  ;;  %v276_v37 = vunpack.c.h.b16 %v274_v29  ;;  %v452_v29 = vld [vmem:[%s652_s2 + $0x8] sm:$0xff] }
  0x75   :  { %v44_v27 = vmul.f32 %v37_v26, %v28_v22  ;;  %v45_v28 = vmul.f32 %v37_v26, %v29_v23 }
  0x76   :  { %vm560_vm3 = vcmp.ne.s32.totalorder %v275_v36, %v100_v30  ;;  %vm564_vm4 = vcmp.ne.s32.totalorder %v276_v37, %v101_v31 }
  0x77   :  { %v60_v34 = vadd.f32 %v53_v25, %v44_v27  ;;  %v61_v35 = vadd.f32 %v53_v25, %v45_v28  ;;  %vm281_vm6 = vmpackc.low %vm564_vm4, %vm560_vm3  ;;  %v451_v28 = vld [vmem:[%s652_s2] sm:$0xff] }
  0x79   :  { %vm64_vm15 = vcmp.ge.f32.partialorder %v60_v34, 0.0  ;;  %vm65_vm0 = vcmp.ge.f32.partialorder %v61_v35, 0.0  ;;  %v68_v38 = vmul.f32 0.01, %v60_v34  ;;  %v69_v39 = vmul.f32 0.01, %v61_v35 }
  0x7b   :  { %v72_v44 = vsel %vm64_vm15, %v60_v34, %v68_v38  ;;  %v73_v45 = vsel %vm65_vm0, %v61_v35, %v69_v39  ;;  %vm133_vm15 = vcmask 1039360   ;;  %vm300_vm0 = vcmask 973824  }
  0x7c   :  { %v42_v48 = vpop.permute.xlu0 %41  ;;  %v76_v51 = vpack.c.bf16 %v73_v45, %v72_v44  ;;  %v58_v52 = vpop.permute.xlu1 %57 }
  0x7d   :  { %v46_v49 = vmul.f32 %v42_v48, %v30_v40  ;;  %v47_v50 = vmul.f32 %v42_v48, %v31_v41  ;;  %v333_v41 = vld [vmem:[%s653_s3 + $0x8] sm:$0xff] }
  0x7e   :  { %v282_v57 = vsel %vm281_vm6, %v76_v51, 0  ;;  %v214_v58 = vsel %vm213_vm5, %v76_v51, 0  ;;  %v164_v0 = vunpack.c.l.b16 %v76_v51 }
  0x7f   :  { %v62_v53 = vadd.f32 %v58_v52, %v46_v49  ;;  %v63_v54 = vadd.f32 %v58_v52, %v47_v50  ;;  %v290_v1 = vunpack.c.l.b16 %v282_v57  ;;  %v223_v2 = vunpack.c.h.b16 %v214_v58 }
  0x80   :  { %v222_v6 = vunpack.c.l.b16 %v214_v58  ;;  %v291_v24 = vunpack.c.h.b16 %v282_v57 }
  0x81   :  { %vm66_vm7 = vcmp.ge.f32.partialorder %v62_v53, 0.0  ;;  %vm67_vm8 = vcmp.ge.f32.partialorder %v63_v54, 0.0  ;;  %v70_v55 = vmul.f32 0.01, %v62_v53  ;;  %v71_v56 = vmul.f32 0.01, %v63_v54 }
  0x83   :  { %v74_v59 = vsel %vm66_vm7, %v62_v53, %v70_v55  ;;  %v75_v60 = vsel %vm67_vm8, %v63_v54, %v71_v56 }
  0x84   :  { %v77_v61 = vpack.c.bf16 %v75_v60, %v74_v59  ;;  %v94_v62 = vpop.permute.xlu0 %93 }
  0x85   :  { %v95_v63 = vrot.slane %v94_v62, 4 }
  0x86   :  { %v165_v3 = vunpack.c.l.b16 %v77_v61  ;;  %v283_v4 = vsel %vm281_vm6, %v77_v61, 0  ;;  %v215_v5 = vsel %vm213_vm5, %v77_v61, 0 }
  0x87   :  { %v97_v7 = vsel %vm96_vm9, %v95_v63, %v94_v62  ;;  %v292_v8 = vunpack.c.l.b16 %v283_v4  ;;  %v225_v9 = vunpack.c.h.b16 %v215_v5  ;;  %v224_v10 = vunpack.c.l.b16 %v215_v5 }
  0x88   :  { %v98_v11 = vunpack.c.l.b16 %v97_v7  ;;  %v99_v12 = vunpack.c.h.b16 %v97_v7  ;;  %v166_v13 = vpack.c.b16 %v165_v3, %v164_v0  ;;  %v293_v23 = vunpack.c.h.b16 %v283_v4 }
  0x89   :  { %v294_v14 = vpack.c.b16 %v292_v8, %v290_v1  ;;  %v227_v15 = vpack.c.b16 %v225_v9, %v223_v2  ;;  %v226_v16 = vpack.c.b16 %v224_v10, %v222_v6 }
  0x8a   :  { %vm102_vm10 = vcmp.ne.s32.totalorder %v98_v11, %v100_v30  ;;  %vm103_vm11 = vcmp.ne.s32.totalorder %v99_v12, %v101_v31  ;;  %181 = vmatpush.bf16.msra.mxu1 %v166_v13  ;;  %v295_v27 = vpack.c.b16 %v293_v23, %v291_v24  ;;  %v334_v30 = vld [vmem:[%s653_s3 + $0x10] sm:$0xff]  ;;  %v332_v31 = vld [vmem:[%s653_s3] sm:$0xff] }
  0x8b   :  { %vm104_vm12 = vmpackc.low %vm103_vm11, %vm102_vm10  ;;  %296 = vrot.lane.b32.xlu0 %v294_v14, %s475_s0  ;;  %230 = vrot.lane.b32.xlu2 %v227_v15, %s476_s22 }
  0x8c   :  { %v105_v17 = vsel %vm104_vm12, %v76_v51, 0  ;;  %v106_v18 = vsel %vm104_vm12, %v77_v61, 0  ;;  %228 = vrot.lane.b32.xlu1 %v226_v16, %s476_s22 }
  0x8d   :  { %v124_v19 = vunpack.c.h.b16 %v105_v17  ;;  %v126_v20 = vunpack.c.h.b16 %v106_v18  ;;  %v123_v21 = vunpack.c.l.b16 %v105_v17  ;;  %v125_v22 = vunpack.c.l.b16 %v106_v18  ;;  %445 = vmatmul.msk.bf16.vlgmr.msra.gmra.mxu1 %vm136_vm13, %v451_v28 }
  0x8f   :  { %v128_v25 = vpack.c.b16 %v126_v20, %v124_v19  ;;  %v127_v26 = vpack.c.b16 %v125_v22, %v123_v21  ;;  %v481_v21 = vmov 512.0  }
  0x90   :  { %467 = vrcp.f32 %v481_v21 }
  0x93   :  { %131 = vrot.lane.b32.xlu0 %v128_v25, %s477_s23  ;;  %129 = vrot.lane.b32.xlu2 %v127_v26, %s477_s23 }
  0x94   :  { %298 = vrot.lane.b32.xlu1 %v295_v27, %s475_s0 }
  0x96   :  { %v468_v22 = vpop.eup %467 }
  0x97   :  { %v376_v23 = vmul.f32 512.0, %v468_v22  ;;  %vm380_vm1 = vweird.f32 %v468_v22 }
  0x99   :  { %v377_v24 = vsub.f32 1.0, %v376_v23 }
  0x9b   :  { %117 = vrot.lane.b32.xlu0 %v451_v28, %s478_s26  ;;  %284 = vrot.lane.b32.xlu2 %v451_v28, %s479_s27  ;;  %v378_v26 = vmul.f32 %v468_v22, %v377_v24 }
  0x9c   :  { %216 = vrot.lane.b32.xlu1 %v451_v28, %s480_s28 }
  0x9d   :  { %446 = vmatmul.msk.bf16.gmra.mxu1 %vm136_vm13, %v452_v29 }
  0xa3   :  { %119 = vrot.lane.b32.xlu0 %v452_v29, %s478_s26  ;;  %286 = vrot.lane.b32.xlu2 %v452_v29, %s479_s27 }
  0xa4   :  { %218 = vrot.lane.b32.xlu1 %v452_v29, %s480_s28  ;;  %v379_v29 = vadd.f32 %v468_v22, %v378_v26 }
  0xab   :  { %348 = vperm.xlu0 %464, %v334_v30   ;;  %343 = vperm.xlu2 %466, %v333_v41  }
  0xac   :  { %338 = vperm.xlu1 %465, %v332_v31  }
  0xb4   :  { %353 = vperm.xlu1 %465, %v335_v32   ;;  %v381_v32 = vsel %vm380_vm1, %v468_v22, %v379_v29 }
  0xe5   :  { %v231_v33 = vpop.permute.xlu2 %230 }
  0xed   :  { %v130_v37 = vpop.permute.xlu2 %129 }
  0xf5   :  { %v285_v43 = vpop.permute.xlu2 %284 }
  0xfd   :  { %v297_v34 = vpop.permute.xlu0 %296  ;;  %v287_v46 = vpop.permute.xlu2 %286 }
  0xfe   :  { %v229_v35 = vpop.permute.xlu1 %228 }
  0xff   :  { %v233_v36 = vsel %vm232_vm14, %v229_v35, %v231_v33 }
 0x100   :  { %248 = vmatpush.bf16.msra.mxu2 %v233_v36 }
 0x105   :  { %v132_v38 = vpop.permute.xlu0 %131  ;;  %v344_v1 = vpop.permute.xlu2 %343 }
 0x106   :  { %v299_v39 = vpop.permute.xlu1 %298  ;;  %v134_v40 = vsel %vm133_vm15, %v130_v37, %v132_v38 }
 0x107   :  { %150 = vmatpush.bf16.msra.mxu0 %v134_v40  ;;  %v301_v42 = vsel %vm300_vm0, %v297_v34, %v299_v39 }
 0x108   :  { %316 = vmatpush.bf16.msra.mxu3 %v301_v42 }
 0x10a   :  { %v183_v49 = vpop.f32.mrf.mxu1 }
 0x10b   :  { %449 = vmatmul.msk.bf16.vlgmr.msra.gmra.mxu3 %vm136_vm13, %v285_v43 }
 0x10d   :  { %v118_v44 = vpop.permute.xlu0 %117 }
 0x10e   :  { %v217_v45 = vpop.permute.xlu1 %216  ;;  %443 = vmatmul.msk.bf16.vlgmr.msra.gmra.mxu0 %vm136_vm13, %v118_v44 }
 0x10f   :  { %447 = vmatmul.msk.bf16.vlgmr.msra.gmra.mxu2 %vm136_vm13, %v217_v45 }
 0x112   :  { %v185_v56 = vpop.f32.mrf.mxu1 }
 0x115   :  { %v120_v47 = vpop.permute.xlu0 %119 }
 0x116   :  { %v219_v48 = vpop.permute.xlu1 %218 }
 0x11a   :  { %v188_v3 = vpop.f32.mrf.mxu1 }
 0x11b   :  { %450 = vmatmul.msk.bf16.gmra.mxu3 %vm136_vm13, %v287_v46 }
 0x11d   :  { %v349_v10 = vpop.permute.xlu0 %348 }
 0x11e   :  { %444 = vmatmul.msk.bf16.gmra.mxu0 %vm136_vm13, %v120_v47  ;;  %v339_v58 = vpop.permute.xlu1 %338 }
 0x11f   :  { %448 = vmatmul.msk.bf16.gmra.mxu2 %vm136_vm13, %v219_v48 }
 0x122   :  { %v190_v13 = vpop.f32.mrf.mxu1 }
 0x126   :  { %v354_v19 = vpop.permute.xlu1 %353 }
 0x18b   :  { %v152_v50 = vpop.f32.mrf.mxu0 }
 0x18c   :  { %v184_v52 = vadd.f32 %v183_v49, %v152_v50 }
 0x18e   :  { %v318_v51 = vpop.f32.mrf.mxu3 }
 0x192   :  { %v250_v53 = vpop.f32.mrf.mxu2 }
 0x193   :  { %v260_v54 = vadd.f32 %v250_v53, %v184_v52  ;;  %v154_v55 = vpop.f32.mrf.mxu0 }
 0x194   :  { %v186_v61 = vadd.f32 %v185_v56, %v154_v55 }
 0x195   :  { %v328_v57 = vadd.f32 %v318_v51, %v260_v54 }
 0x196   :  { %v320_v60 = vpop.f32.mrf.mxu3 }
 0x197   :  { %v356_v59 = vadd.f32 %v339_v58, %v328_v57 }
 0x199   :  { %364 = vadd.xlane.f32.xlu2 %v356_v59  ;;  %360 = vst [vmem:[%s654_s6] sm:$0xff] %v356_v59 }
 0x19a   :  { %v252_v62 = vpop.f32.mrf.mxu2 }
 0x19b   :  { %v261_v63 = vadd.f32 %v252_v62, %v186_v61  ;;  %v157_v0 = vpop.f32.mrf.mxu0 }
 0x19c   :  { %v189_v4 = vadd.f32 %v188_v3, %v157_v0 }
 0x19d   :  { %v329_v2 = vadd.f32 %v320_v60, %v261_v63  ;;  %v409_v63 = vld [vmem:[%s655_s4 + $0x8] sm:$0xff] }
 0x19e   :  { %v323_v6 = vpop.f32.mrf.mxu3 }
 0x19f   :  { %v357_v5 = vadd.f32 %v344_v1, %v329_v2 }
 0x1a1   :  { %361 = vst [vmem:[%s654_s6 + $0x8] sm:$0xff] %v357_v5  ;;  %366 = vadd.xlane.f32.xlu0 %v357_v5 }
 0x1a2   :  { %v255_v7 = vpop.f32.mrf.mxu2 }
 0x1a3   :  { %v262_v8 = vadd.f32 %v255_v7, %v189_v4  ;;  %v159_v11 = vpop.f32.mrf.mxu0 }
 0x1a4   :  { %v191_v14 = vadd.f32 %v190_v13, %v159_v11 }
 0x1a5   :  { %v330_v9 = vadd.f32 %v323_v6, %v262_v8 }
 0x1a6   :  { %v325_v17 = vpop.f32.mrf.mxu3 }
 0x1a7   :  { %v358_v12 = vadd.f32 %v349_v10, %v330_v9 }
 0x1a9   :  { %368 = vadd.xlane.f32.xlu1 %v358_v12  ;;  %362 = vst [vmem:[%s654_s6 + $0x10] sm:$0xff] %v358_v12 }
 0x1aa   :  { %v257_v15 = vpop.f32.mrf.mxu2 }
 0x1ab   :  { %v263_v16 = vadd.f32 %v257_v15, %v191_v14 }
 0x1ad   :  { %v331_v18 = vadd.f32 %v325_v17, %v263_v16 }
 0x1af   :  { %v359_v20 = vadd.f32 %v354_v19, %v331_v18 }
 0x1b1   :  { %370 = vadd.xlane.f32.xlu2 %v359_v20  ;;  %363 = vst [vmem:[%s654_s6 + $0x18] sm:$0xff] %v359_v20 }
 0x20c   :  { %v365_v25 = vpop.xlane.xlu2 %364 }
 0x214   :  { %v367_v27 = vpop.xlane.xlu0 %366 }
 0x215   :  { %v372_v30 = vadd.f32 %v367_v27, %v365_v25 }
 0x21c   :  { %v369_v28 = vpop.xlane.xlu1 %368 }
 0x21d   :  { %v373_v31 = vadd.f32 %v372_v30, %v369_v28 }
 0x224   :  { %v371_v33 = vpop.xlane.xlu2 %370 }
 0x225   :  { %v374_v34 = vadd.f32 %v373_v31, %v371_v33 }
 0x227   :  { %v382_v35 = vmul.f32 %v381_v32, %v374_v34 }
 0x229   :  { %385 = vperm.xlu2 %466, %v382_v35  }
 0x283   :  { %v386_v36 = vpop.permute.xlu2 %385 }
 0x284   :  { %v389_v37 = vsub.f32 %v357_v5, %v386_v36  ;;  %v388_v38 = vsub.f32 %v356_v59, %v386_v36  ;;  %v391_v41 = vsub.f32 %v359_v20, %v386_v36  ;;  %v390_v42 = vsub.f32 %v358_v12, %v386_v36  ;;  %v408_v59 = vld [vmem:[%s655_s4] sm:$0xff] }
 0x286   :  { %v393_v39 = vmul.f32 %v389_v37, %v389_v37  ;;  %v392_v40 = vmul.f32 %v388_v38, %v388_v38  ;;  %v395_v43 = vmul.f32 %v391_v41, %v391_v41  ;;  %v394_v44 = vmul.f32 %v390_v42, %v390_v42 }
 0x288   :  { %398 = vadd.xlane.f32.xlu1 %v393_v39  ;;  %396 = vadd.xlane.f32.xlu0 %v392_v40 }
 0x290   :  { %402 = vadd.xlane.f32.xlu1 %v395_v43  ;;  %400 = vadd.xlane.f32.xlu0 %v394_v44 }
 0x2fb   :  { %v399_v45 = vpop.xlane.xlu1 %398  ;;  %v397_v46 = vpop.xlane.xlu0 %396 }
 0x2fc   :  { %v404_v47 = vadd.f32 %v399_v45, %v397_v46 }
 0x303   :  { %v401_v48 = vpop.xlane.xlu0 %400  ;;  %v403_v50 = vpop.xlane.xlu1 %402 }
 0x304   :  { %v405_v49 = vadd.f32 %v404_v47, %v401_v48 }
 0x306   :  { %v406_v51 = vadd.f32 %v405_v49, %v403_v50 }
 0x308   :  { %v407_v52 = vmul.f32 %v406_v51, %v381_v32 }
 0x30a   :  { %v410_v53 = vadd.f32 1e-05, %v407_v52 }
 0x30c   :  { %469 = vrsqrt.f32 %v410_v53  ;;  %vm417_vm3 = vweird.f32 %v410_v53 }
 0x312   :  { %v470_v54 = vpop.eup %469 }
 0x313   :  { %v412_v55 = vmul.f32 %v470_v54, %v410_v53  ;;  %vm418_vm2 = vweird.f32 %v470_v54 }
 0x314   :  { %vm419_vm4 = vmor %vm417_vm3, %vm418_vm2 }
 0x315   :  { %v413_v56 = vmul.f32 %v470_v54, %v412_v55 }
 0x317   :  { %v414_v57 = vmul.f32 0.5, %v413_v56 }
 0x319   :  { %v415_v58 = vsub.f32 1.5, %v414_v57 }
 0x31b   :  { %v416_v60 = vmul.f32 %v470_v54, %v415_v58 }
 0x31d   :  { %v420_v61 = vsel %vm419_vm4, %v470_v54, %v416_v60 }
 0x31e   :  { %v421_v62 = vmul.f32 %v420_v61, %v408_v59 }
 0x320   :  { %v422_v0 = vmul.f32 %v421_v62, %v382_v35  ;;  %425 = vst.msk [vmem:[%s656_s7] sm:$0xff] %vm96_vm9, %v421_v62 }
 0x322   :  { %v423_v1 = vsub.f32 %v409_v63, %v422_v0 }
 0x324   :  { %426 = vst.msk [vmem:[%s656_s7 + $0x8] sm:$0xff] %vm96_vm9, %v423_v1 }

// kernel: decoder_v1_forward.6
= control target key start
LH: loop header
LB: loop body
LE: loop exit
PB: predicated region body
PF: predicated region fallthrough
CT: control target
= control target key end

     0   :  { %v992_v0 = vmov 0   ;;  %vm105_vm9 = vcmask 1043456   ;;  %vm1526_vm12 = vcmask 7168   ;;  %s995_s20 = smov 16   ;;  %s996_s21 = smov 120   ;;  %s1518_s5 = inlined_call_operand.vmem [shape: f32[16,1], index: 5, kind: input, shape index: {}]   ;;  %s1519_s1 = inlined_call_operand.vmem [shape: s32[2,512], index: 1, kind: input, shape index: {}]   ;;  %s1520_s0 = inlined_call_operand.vmem [shape: f32[8,640], index: 0, kind: input, shape index: {}]   ;;  %s1521_s2 = inlined_call_operand.vmem [shape: bf16[32,32], index: 2, kind: input, shape index: {}]   ;;  %s1522_s3 = inlined_call_operand.vmem [shape: f32[32,1], index: 3, kind: input, shape index: {}]   ;;  %s1523_s6 = inlined_call_operand.vmem [shape: f32[32,512], index: 6, kind: output, shape index: {0}]   ;;  %s1524_s4 = inlined_call_operand.vmem [shape: f32[16,1], index: 4, kind: input, shape index: {}]   ;;  %s1525_s7 = inlined_call_operand.vmem [shape: f32[16,1], index: 7, kind: output, shape index: {1}]  }
   0x1   :  { %985 = vset.pattern.permute.xlu0 %v992_v0  ;;  %v33_v1 = vld [vmem:[%s1518_s5] sm:$0xff]  ;;  %986 = vset.pattern.permute.xlu1 %v992_v0  ;;  %v44_v12 = vld [vmem:[%s1518_s5 + $0x8] sm:$0xff]  ;;  %v30_v21 = vld [vmem:[%s1520_s0 + $0x10] sm:$0xff]  ;;  %v1084_v25 = vunpack.c.l.b16 %v992_v0  ;;  %v1089_v28 = vunpack.c.h.b16 %v992_v0  ;;  %s997_s24 = smov 17   ;;  %s999_s25 = smov 111  }
   0x2   :  { %v73_v2 = vld [vmem:[%s1519_s1] ss:$2 sm:$0xf]  ;;  %36 = vperm.xlu0 %985, %v33_v1   ;;  %v932_v3 = vld [vmem:[%s1519_s1 + $0x1] ss:$2 sm:$0xf]  ;;  %987 = vset.pattern.permute.xlu2 %v992_v0 }
   0x3   :  { %v1053_v4 = vadd.s32 1, %v73_v2  ;;  %vm82_vm0 = vcmp.lt.s32.totalorder %v932_v3, 16  ;;  %s993_s1 = smov 1   ;;  %v1065_v14 = vadd.s32 1, %v932_v3  ;;  %vm374_vm10 = vcmp.lt.s32.totalorder %v73_v2, 16  ;;  %v28_v19 = vld [vmem:[%s1520_s0] sm:$0xff] }
   0x4   :  { %v29_v20 = vld [vmem:[%s1520_s0 + $0x8] sm:$0xff]  ;;  %v31_v22 = vld [vmem:[%s1520_s0 + $0x18] sm:$0xff]  ;;  %v32_v23 = vld [vmem:[%s1520_s0 + $0x20] sm:$0xff]  ;;  %s994_s0 = smov 127   ;;  %s1000_s26 = smov 104  }
   0x5   :  { %vm81_vm1 = vcmp.lt.s32.totalorder %v1053_v4, 16  ;;  %vm376_vm11 = vcmp.lt.s32.totalorder %v1065_v14, 16 }
   0x6   :  { %vm83_vm2 = vmand %vm81_vm1, %vm82_vm0 }
   0x7   :  { %v84_v5 = vsel %vm83_vm2, 1, %v992_v0  ;;  %vm377_vm13 = vmand %vm374_vm10, %vm376_vm11 }
   0x8   :  { %v87_v6 = vperm.slane %v84_v5, 2  ;;  %v88_v7 = vperm.slane %v84_v5, 3  ;;  %v85_v8 = vperm.slane %v84_v5, 0  ;;  %v86_v9 = vperm.slane %v84_v5, 1 }
   0x9   :  { %v1100_v41 = vsel %vm377_vm13, 1, %v992_v0 }
   0xa   :  { %vm91_vm3 = vcmp.eq.s32.totalorder %v87_v6, 1  ;;  %vm92_vm4 = vcmp.eq.s32.totalorder %v88_v7, 1  ;;  %vm89_vm5 = vcmp.eq.s32.totalorder %v85_v8, 1  ;;  %vm90_vm6 = vcmp.eq.s32.totalorder %v86_v9, 1 }
   0xb   :  { %vm94_vm7 = vmpackc.low %vm92_vm4, %vm91_vm3  ;;  %v379_v3 = vperm.slane %v1100_v41, 0  ;;  %v380_v5 = vperm.slane %v1100_v41, 1 }
   0xc   :  { %v96_v10 = vsel %vm94_vm7, 65537, %v992_v0  ;;  %vm93_vm8 = vmpackc.low %vm90_vm6, %vm89_vm5 }
   0xd   :  { %99 = vrot.lane.b32.xlu1 %v96_v10, %s993_s1  ;;  %v95_v11 = vsel %vm93_vm8, 65537, %v992_v0 }
   0xe   :  { %97 = vrot.lane.b32.xlu0 %v95_v11, %s993_s1 }
  0x15   :  { %47 = vperm.xlu1 %986, %v44_v12  }
  0x74   :  { %v37_v13 = vpop.permute.xlu0 %36 }
  0x75   :  { %v39_v29 = vmul.f32 %v37_v13, %v28_v19  ;;  %v40_v33 = vmul.f32 %v37_v13, %v29_v20  ;;  %v41_v34 = vmul.f32 %v37_v13, %v30_v21  ;;  %v42_v35 = vmul.f32 %v37_v13, %v31_v22 }
  0x76   :  { %v43_v36 = vmul.f32 %v37_v13, %v32_v23  ;;  %v381_v21 = vperm.slane %v1100_v41, 2  ;;  %v382_v22 = vperm.slane %v1100_v41, 3 }
  0x7f   :  { %v100_v15 = vpop.permute.xlu1 %99 }
  0x80   :  { %v102_v16 = vrot.slane %v100_v15, 4  ;;  %v98_v17 = vpop.permute.xlu0 %97 }
  0x81   :  { %v101_v18 = vrot.slane %v98_v17, 4 }
  0x82   :  { %v122_v24 = vunpack.c.l.b16 %v102_v16  ;;  %v123_v30 = vunpack.c.h.b16 %v102_v16 }
  0x83   :  { %v104_v26 = vsel %vm1526_vm12, %v101_v18, %v98_v17  ;;  %v106_v27 = vsel %vm105_vm9, %v101_v18, %v102_v16  ;;  %v1156_v18 = vld [vmem:[%s1521_s2] sm:$0xff] }
  0x84   :  { %v108_v31 = vunpack.c.l.b16 %v104_v26  ;;  %v107_v32 = vsel %vm1526_vm12, %v106_v27, %v100_v15  ;;  %v109_v37 = vunpack.c.h.b16 %v104_v26  ;;  %vm1095_vm14 = vcmp.ne.s32.totalorder %v122_v24, %v1084_v25  ;;  %v1166_v24 = vld [vmem:[%s1521_s2 + $0x8] sm:$0xff]  ;;  %s998_s2 = smov 112  }
  0x85   :  { %v115_v40 = vunpack.c.l.b16 %v107_v32  ;;  %vm1108_vm0 = vcmp.ne.s32.totalorder %v123_v30, %v1089_v28  ;;  %v116_v49 = vunpack.c.h.b16 %v107_v32 }
  0x86   :  { %vm1103_vm15 = vcmp.ne.s32.totalorder %v108_v31, %v1084_v25  ;;  %vm1113_vm6 = vcmp.ne.s32.totalorder %v109_v37, %v1089_v28  ;;  %vm128_vm13 = vmpackc.low %vm1108_vm0, %vm1095_vm14 }
  0x87   :  { %v48_v38 = vpop.permute.xlu1 %47  ;;  %vm1118_vm8 = vcmp.ne.s32.totalorder %v115_v40, %v1084_v25  ;;  %vm120_vm10 = vcmp.ne.s32.totalorder %v116_v49, %v1089_v28  ;;  %vm114_vm12 = vmpackc.low %vm1113_vm6, %vm1103_vm15  ;;  %vm384_vm15 = vcmp.eq.s32.totalorder %v380_v5, 1 }
  0x88   :  { %v50_v42 = vadd.f32 %v48_v38, %v39_v29  ;;  %v51_v43 = vadd.f32 %v48_v38, %v40_v33  ;;  %v52_v44 = vadd.f32 %v48_v38, %v41_v34  ;;  %v53_v45 = vadd.f32 %v48_v38, %v42_v35  ;;  %vm567_vm14 = vmand %vm81_vm1, %vm376_vm11 }
  0x89   :  { %v54_v47 = vadd.f32 %v48_v38, %v43_v36  ;;  %v568_v15 = vsel %vm567_vm14, 1, %v992_v0 }
  0x8a   :  { %vm55_vm2 = vcmp.ge.f32.partialorder %v50_v42, 0.0  ;;  %vm56_vm3 = vcmp.ge.f32.partialorder %v51_v43, 0.0  ;;  %vm57_vm4 = vcmp.ge.f32.partialorder %v52_v44, 0.0  ;;  %vm58_vm5 = vcmp.ge.f32.partialorder %v53_v45, 0.0 }
  0x8b   :  { %v60_v51 = vmul.f32 0.01, %v50_v42  ;;  %v61_v52 = vmul.f32 0.01, %v51_v43  ;;  %v62_v53 = vmul.f32 0.01, %v52_v44 }
  0x8c   :  { %v63_v54 = vmul.f32 0.01, %v53_v45  ;;  %v64_v55 = vmul.f32 0.01, %v54_v47  ;;  %vm59_vm7 = vcmp.ge.f32.partialorder %v54_v47, 0.0  ;;  %v569_v14 = vperm.slane %v568_v15, 0 }
  0x8d   :  { %v65_v57 = vsel %vm55_vm2, %v50_v42, %v60_v51  ;;  %v66_v58 = vsel %vm56_vm3, %v51_v43, %v61_v52  ;;  %v67_v59 = vsel %vm57_vm4, %v52_v44, %v62_v53  ;;  %vm121_vm2 = vmpackc.low %vm120_vm10, %vm1118_vm8  ;;  %v570_v17 = vperm.slane %v568_v15, 1 }
  0x8e   :  { %v68_v60 = vsel %vm58_vm5, %v53_v45, %v63_v54  ;;  %v1123_v61 = vpack.c.bf16 %v66_v58, %v65_v57  ;;  %v69_v62 = vsel %vm59_vm7, %v54_v47, %v64_v55  ;;  %vm573_vm1 = vcmp.eq.s32.totalorder %v569_v14, 1 }
  0x8f   :  { %v1133_v63 = vpack.c.bf16 %v68_v60, %v67_v59  ;;  %v1135_v1 = vpack.c.bf16 %v69_v62, %v69_v62  ;;  %vm574_vm11 = vcmp.eq.s32.totalorder %v570_v17, 1  ;;  %vm385_vm4 = vcmp.eq.s32.totalorder %v381_v21, 1 }
  0x90   :  { %v129_v2 = vsel %vm114_vm12, %v1123_v61, 0  ;;  %vm383_vm12 = vcmp.eq.s32.totalorder %v379_v3, 1  ;;  %vm577_vm3 = vmpackc.low %vm574_vm11, %vm573_vm1  ;;  %vm386_vm5 = vcmp.eq.s32.totalorder %v382_v22, 1  ;;  %v571_v27 = vperm.slane %v568_v15, 2 }
  0x91   :  { %v131_v6 = vsel %vm128_vm13, %v1135_v1, 0  ;;  %v130_v7 = vsel %vm121_vm2, %v1133_v63, 0  ;;  %v149_v8 = vunpack.c.l.b16 %v129_v2  ;;  %vm387_vm0 = vmpackc.low %vm384_vm15, %vm383_vm12  ;;  %v150_v20 = vunpack.c.h.b16 %v129_v2 }
  0x92   :  { %v153_v9 = vunpack.c.l.b16 %v131_v6  ;;  %v151_v10 = vunpack.c.l.b16 %v130_v7  ;;  %v152_v16 = vunpack.c.h.b16 %v130_v7  ;;  %v389_v4 = vsel %vm387_vm0, 65537, %v992_v0  ;;  %vm388_vm6 = vmpackc.low %vm386_vm5, %vm385_vm4 }
  0x93   :  { %v154_v11 = vpack.c.b16 %v149_v8, %v149_v8  ;;  %v579_v23 = vsel %vm577_vm3, 65537, %v992_v0  ;;  %v155_v26 = vpack.c.b16 %v150_v20, %v150_v20  ;;  %v572_v29 = vperm.slane %v568_v15, 3 }
  0x94   :  { %v158_v12 = vpack.c.b16 %v153_v9, %v153_v9  ;;  %v156_v13 = vpack.c.b16 %v151_v10, %v151_v10  ;;  %v157_v19 = vpack.c.b16 %v152_v16, %v152_v16  ;;  %v390_v30 = vsel %vm388_vm6, 65537, %v992_v0 }
  0x95   :  { %159 = vrot.lane.b32.xlu1 %v154_v11, %s994_s0  ;;  %vm575_vm7 = vcmp.eq.s32.totalorder %v571_v27, 1  ;;  %vm576_vm8 = vcmp.eq.s32.totalorder %v572_v29, 1  ;;  %v274_v33 = vunpack.c.l.b16 %v1133_v63  ;;  %vm169_vm13 = vcmask 1039360  }
  0x96   :  { %167 = vrot.lane.b32.xlu0 %v158_v12, %s994_s0  ;;  %163 = vrot.lane.b32.xlu2 %v156_v13, %s994_s0  ;;  %vm578_vm10 = vmpackc.low %vm576_vm8, %vm575_vm7  ;;  %v273_v39 = vunpack.c.h.b16 %v1123_v61  ;;  %v272_v43 = vunpack.c.l.b16 %v1123_v61  ;;  %v275_v45 = vunpack.c.h.b16 %v1133_v63  ;;  %vm397_vm15 = vcmask 130048  }
  0x97   :  { %v580_v31 = vsel %vm578_vm10, 65537, %v992_v0  ;;  %v278_v34 = vpack.c.b16 %v274_v33, %v274_v33  ;;  %vm174_vm0 = vcmask 64512   ;;  %vm587_vm5 = vcmask 138240  }
  0x98   :  { %v277_v40 = vpack.c.b16 %v273_v39, %v273_v39  ;;  %v276_v46 = vpack.c.b16 %v272_v43, %v272_v43  ;;  %v279_v48 = vpack.c.b16 %v275_v45, %v275_v45 }
  0x99   :  { %v293_v38 = vsel %vm105_vm9, %v278_v34, 0 }
  0x9a   :  { %v290_v44 = vsel %vm105_vm9, %v277_v40, 0  ;;  %v287_v56 = vsel %vm105_vm9, %v276_v46, 0  ;;  %v296_v59 = vsel %vm105_vm9, %v279_v48, 0 }
  0x9d   :  { %391 = vrot.lane.b32.xlu1 %v389_v4, %s995_s20 }
  0x9e   :  { %165 = vrot.lane.b32.xlu2 %v157_v19, %s994_s0  ;;  %142 = vrot.lane.b32.xlu0 %v1156_v18, %s996_s21 }
  0xa5   :  { %581 = vrot.lane.b32.xlu1 %v579_v23, %s997_s24 }
  0xa6   :  { %161 = vrot.lane.b32.xlu2 %v155_v26, %s994_s0  ;;  %144 = vrot.lane.b32.xlu0 %v1166_v24, %s996_s21 }
  0xae   :  { %393 = vrot.lane.b32.xlu2 %v390_v30, %s995_s20 }
  0xb6   :  { %583 = vrot.lane.b32.xlu2 %v580_v31, %s997_s24 }
  0xf0   :  { %v164_v32 = vpop.permute.xlu2 %163 }
  0xf8   :  { %v166_v35 = vpop.permute.xlu2 %165 }
  0xf9   :  { %v172_v36 = vsel %vm169_vm13, %v164_v32, %v166_v35 }
  0xfa   :  { %v189_v37 = vsel %vm105_vm9, %v172_v36, 0 }
  0xfb   :  { %239 = vmatpush.bf16.msra.mxu2 %v189_v37 }
  0xff   :  { %343 = vmatpush.bf16.msrb.mxu2 %v293_v38 }
 0x100   :  { %v162_v41 = vpop.permute.xlu2 %161 }
 0x101   :  { %v171_v0 = vsel %vm169_vm13, %v162_v41, %v164_v32 }
 0x102   :  { %v186_v42 = vsel %vm105_vm9, %v171_v0, 0 }
 0x103   :  { %220 = vmatpush.bf16.msra.mxu1 %v186_v42 }
 0x107   :  { %324 = vmatpush.bf16.msrb.mxu1 %v290_v44  ;;  %v160_v47 = vpop.permute.xlu1 %159 }
 0x108   :  { %v168_v49 = vpop.permute.xlu0 %167  ;;  %v394_v50 = vpop.permute.xlu2 %393  ;;  %v170_v51 = vsel %vm169_vm13, %v160_v47, %v162_v41 }
 0x109   :  { %v396_v52 = vrot.slane %v394_v50, 4  ;;  %v183_v53 = vsel %vm105_vm9, %v170_v51, 0  ;;  %v173_v54 = vsel %vm169_vm13, %v166_v35, %v168_v49 }
 0x10a   :  { %201 = vmatpush.bf16.msra.mxu0 %v183_v53  ;;  %v192_v55 = vsel %vm105_vm9, %v173_v54, 0  ;;  %v759_v53 = vld [vmem:[%s1522_s3 + $0x10] sm:$0xff] }
 0x10b   :  { %v415_v57 = vunpack.c.l.b16 %v396_v52  ;;  %v416_v58 = vunpack.c.h.b16 %v396_v52  ;;  %258 = vmatpush.bf16.msra.mxu3 %v192_v55 }
 0x10d   :  { %vm419_vm2 = vcmp.ne.s32.totalorder %v415_v57, %v1084_v25  ;;  %vm420_vm14 = vcmp.ne.s32.totalorder %v416_v58, %v1089_v28 }
 0x10e   :  { %305 = vmatpush.bf16.msrb.mxu0 %v287_v56  ;;  %vm421_vm12 = vmpackc.low %vm420_vm14, %vm419_vm2 }
 0x10f   :  { %362 = vmatpush.bf16.msrb.mxu3 %v296_v59  ;;  %v392_v60 = vpop.permute.xlu1 %391  ;;  %v424_v62 = vsel %vm421_vm12, %v1135_v1, 0 }
 0x110   :  { %v395_v2 = vrot.slane %v392_v60, 4  ;;  %v436_v3 = vunpack.c.l.b16 %v424_v62  ;;  %v584_v13 = vpop.permute.xlu2 %583  ;;  %v143_v15 = vpop.permute.xlu0 %142 }
 0x111   :  { %941 = vmatmul.msk.bf16.vlgmr.msra.gmra.mxu0 %vm174_vm0, %v143_v15  ;;  %943 = vmatmul.msk.bf16.vlgmr.msra.gmra.mxu1 %vm174_vm0, %v143_v15  ;;  %v586_v4 = vrot.slane %v584_v13, 4 }
 0x112   :  { %v398_v5 = vsel %vm397_vm15, %v395_v2, %v392_v60  ;;  %v399_v6 = vsel %vm105_vm9, %v395_v2, %v396_v52  ;;  %v441_v7 = vpack.c.b16 %v436_v3, %v436_v3  ;;  %945 = vmatmul.msk.bf16.vlgmr.msra.gmra.mxu2 %vm174_vm0, %v143_v15  ;;  %947 = vmatmul.msk.bf16.vlgmr.msra.gmra.mxu3 %vm174_vm0, %v143_v15 }
 0x113   :  { %v400_v8 = vsel %vm397_vm15, %v399_v6, %v394_v50  ;;  %v401_v9 = vunpack.c.l.b16 %v398_v5  ;;  %v402_v10 = vunpack.c.h.b16 %v398_v5  ;;  %v605_v0 = vunpack.c.l.b16 %v586_v4 }
 0x114   :  { %v408_v11 = vunpack.c.l.b16 %v400_v8  ;;  %v409_v12 = vunpack.c.h.b16 %v400_v8  ;;  %450 = vrot.lane.b32.xlu2 %v441_v7, %s998_s2  ;;  %v606_v42 = vunpack.c.h.b16 %v586_v4 }
 0x115   :  { %vm1198_vm3 = vcmp.ne.s32.totalorder %v401_v9, %v1084_v25  ;;  %vm1203_vm4 = vcmp.ne.s32.totalorder %v402_v10, %v1089_v28  ;;  %vm609_vm15 = vcmp.ne.s32.totalorder %v605_v0, %v1084_v25 }
 0x116   :  { %vm412_vm1 = vcmp.ne.s32.totalorder %v408_v11, %v1084_v25  ;;  %vm413_vm11 = vcmp.ne.s32.totalorder %v409_v12, %v1089_v28  ;;  %vm407_vm7 = vmpackc.low %vm1203_vm4, %vm1198_vm3  ;;  %vm452_vm3 = vcmask 916480   ;;  %vm642_vm4 = vcmask 908288  }
 0x117   :  { %v582_v17 = vpop.permute.xlu1 %581  ;;  %vm414_vm6 = vmpackc.low %vm413_vm11, %vm412_vm1  ;;  %v422_v36 = vsel %vm407_vm7, %v1123_v61, 0  ;;  %vm610_vm1 = vcmp.ne.s32.totalorder %v606_v42, %v1089_v28  ;;  %vm1549_vm7 = vcmask 7168  }
 0x118   :  { %v585_v19 = vrot.slane %v582_v17, 4  ;;  %v423_v20 = vsel %vm414_vm6, %v1133_v63, 0  ;;  %v433_v38 = vunpack.c.h.b16 %v422_v36  ;;  %v432_v39 = vunpack.c.l.b16 %v422_v36  ;;  %v145_v47 = vpop.permute.xlu0 %144  ;;  %vm611_vm11 = vmpackc.low %vm610_vm1, %vm609_vm15 }
 0x119   :  { %v435_v23 = vunpack.c.h.b16 %v423_v20  ;;  %v434_v26 = vunpack.c.l.b16 %v423_v20  ;;  %v614_v50 = vsel %vm611_vm11, %v1135_v1, 0  ;;  %v758_v1 = vld [vmem:[%s1522_s3 + $0x8] sm:$0xff] }
 0x11a   :  { %v588_v21 = vsel %vm587_vm5, %v585_v19, %v582_v17  ;;  %v589_v22 = vsel %vm105_vm9, %v585_v19, %v586_v4  ;;  %v438_v44 = vpack.c.b16 %v433_v38, %v433_v38  ;;  %v437_v45 = vpack.c.b16 %v432_v39, %v432_v39 }
 0x11b   :  { %v590_v27 = vsel %vm587_vm5, %v589_v22, %v584_v13  ;;  %v591_v29 = vunpack.c.l.b16 %v588_v21  ;;  %v592_v30 = vunpack.c.h.b16 %v588_v21  ;;  %v440_v33 = vpack.c.b16 %v435_v23, %v435_v23  ;;  %v757_v21 = vld [vmem:[%s1522_s3] sm:$0xff]  ;;  %v760_v22 = vld [vmem:[%s1522_s3 + $0x18] sm:$0xff] }
 0x11c   :  { %v598_v31 = vunpack.c.l.b16 %v590_v27  ;;  %v599_v32 = vunpack.c.h.b16 %v590_v27  ;;  %425 = vrot.lane.b32.xlu2 %v1156_v18, %s998_s2  ;;  %v439_v34 = vpack.c.b16 %v434_v26, %v434_v26 }
 0x11d   :  { %vm1218_vm8 = vcmp.ne.s32.totalorder %v591_v29, %v1084_v25  ;;  %vm1224_vm10 = vcmp.ne.s32.totalorder %v592_v30, %v1089_v28  ;;  %448 = vrot.lane.b32.xlu1 %v440_v33, %s998_s2 }
 0x11e   :  { %446 = vrot.lane.b32.xlu0 %v439_v34, %s998_s2  ;;  %vm602_vm13 = vcmp.ne.s32.totalorder %v598_v31, %v1084_v25  ;;  %vm603_vm2 = vcmp.ne.s32.totalorder %v599_v32, %v1089_v28  ;;  %vm597_vm12 = vmpackc.low %vm1224_vm10, %vm1218_vm8  ;;  %v626_v25 = vunpack.c.l.b16 %v614_v50 }
 0x11f   :  { %vm604_vm14 = vmpackc.low %vm603_vm2, %vm602_vm13  ;;  %v612_v46 = vsel %vm597_vm12, %v1123_v61, 0 }
 0x120   :  { %v613_v40 = vsel %vm604_vm14, %v1133_v63, 0  ;;  %v623_v63 = vunpack.c.h.b16 %v612_v46  ;;  %v622_v28 = vunpack.c.l.b16 %v612_v46  ;;  %v631_v51 = vpack.c.b16 %v626_v25, %v626_v25  ;;  %vm1550_vm8 = vmmov %vm1549_vm7 }
 0x121   :  { %v625_v41 = vunpack.c.h.b16 %v613_v40  ;;  %942 = vmatmul.msk.bf16.gmra.mxu0 %vm174_vm0, %v145_v47  ;;  %944 = vmatmul.msk.bf16.gmra.mxu1 %vm174_vm0, %v145_v47  ;;  %v624_v48 = vunpack.c.l.b16 %v613_v40 }
 0x122   :  { %946 = vmatmul.msk.bf16.gmra.mxu2 %vm174_vm0, %v145_v47  ;;  %948 = vmatmul.msk.bf16.gmra.mxu3 %vm174_vm0, %v145_v47  ;;  %v628_v61 = vpack.c.b16 %v623_v63, %v623_v63  ;;  %v627_v52 = vpack.c.b16 %v622_v28, %v622_v28 }
 0x123   :  { %v630_v43 = vpack.c.b16 %v625_v41, %v625_v41  ;;  %v629_v49 = vpack.c.b16 %v624_v48, %v624_v48 }
 0x125   :  { %638 = vrot.lane.b32.xlu2 %v630_v43, %s999_s25  ;;  %444 = vrot.lane.b32.xlu1 %v438_v44, %s998_s2 }
 0x126   :  { %442 = vrot.lane.b32.xlu0 %v437_v45, %s998_s2 }
 0x12d   :  { %634 = vrot.lane.b32.xlu2 %v628_v61, %s999_s25  ;;  %636 = vrot.lane.b32.xlu1 %v629_v49, %s999_s25 }
 0x12e   :  { %427 = vrot.lane.b32.xlu0 %v1166_v24, %s998_s2 }
 0x131   :  { %949 = vmatmul.msk.bf16.vlgmr.msrb.gmra.mxu0 %vm174_vm0, %v1156_v18  ;;  %951 = vmatmul.msk.bf16.vlgmr.msrb.gmra.mxu1 %vm174_vm0, %v1156_v18 }
 0x132   :  { %953 = vmatmul.msk.bf16.vlgmr.msrb.gmra.mxu2 %vm174_vm0, %v1156_v18  ;;  %955 = vmatmul.msk.bf16.vlgmr.msrb.gmra.mxu3 %vm174_vm0, %v1156_v18 }
 0x135   :  { %632 = vrot.lane.b32.xlu1 %v627_v52, %s999_s25  ;;  %763 = vperm.xlu2 %987, %v757_v21  }
 0x136   :  { %640 = vrot.lane.b32.xlu0 %v631_v51, %s999_s25 }
 0x13d   :  { %617 = vrot.lane.b32.xlu1 %v1166_v24, %s1000_s26  ;;  %778 = vperm.xlu2 %987, %v760_v22  }
 0x13e   :  { %615 = vrot.lane.b32.xlu0 %v1156_v18, %s1000_s26 }
 0x141   :  { %950 = vmatmul.msk.bf16.gmra.mxu0 %vm174_vm0, %v1166_v24  ;;  %952 = vmatmul.msk.bf16.gmra.mxu1 %vm174_vm0, %v1166_v24 }
 0x142   :  { %954 = vmatmul.msk.bf16.gmra.mxu2 %vm174_vm0, %v1166_v24  ;;  %956 = vmatmul.msk.bf16.gmra.mxu3 %vm174_vm0, %v1166_v24 }
 0x145   :  { %773 = vperm.xlu1 %986, %v759_v53  }
 0x146   :  { %768 = vperm.xlu0 %985, %v758_v1  }
 0x16e   :  { %v451_v18 = vpop.permute.xlu2 %450 }
 0x176   :  { %v426_v54 = vpop.permute.xlu2 %425 }
 0x17f   :  { %v639_v62 = vpop.permute.xlu2 %638 }
 0x187   :  { %v635_v8 = vpop.permute.xlu2 %634 }
 0x18e   :  { %v203_v30 = vpop.f32.mrf.mxu0  ;;  %v222_v31 = vpop.f32.mrf.mxu1 }
 0x18f   :  { %v449_v56 = vpop.permute.xlu1 %448 }
 0x190   :  { %v447_v55 = vpop.permute.xlu0 %446  ;;  %v456_v58 = vsel %vm452_vm3, %v449_v56, %v451_v18 }
 0x191   :  { %v455_v57 = vsel %vm452_vm3, %v447_v55, %v449_v56  ;;  %v473_v60 = vsel %vm105_vm9, %v456_v58, 0 }
 0x192   :  { %v470_v59 = vsel %vm105_vm9, %v455_v57, 0  ;;  %539 = vmatpush.bf16.msra.mxu3 %v473_v60 }
 0x193   :  { %520 = vmatpush.bf16.msra.mxu2 %v470_v59 }
 0x195   :  { %963 = vmatmul.msk.bf16.vlgmr.msra.gmra.mxu3 %vm174_vm0, %v426_v54  ;;  %v241_v27 = vpop.f32.mrf.mxu2  ;;  %v260_v29 = vpop.f32.mrf.mxu3 }
 0x196   :  { %961 = vmatmul.msk.bf16.vlgmr.msra.gmra.mxu2 %vm174_vm0, %v426_v54  ;;  %v1307_v34 = vpop.f32.mrf.mxu0  ;;  %v1309_v35 = vpop.f32.mrf.mxu1 }
 0x197   :  { %v445_v24 = vpop.permute.xlu1 %444 }
 0x198   :  { %v443_v2 = vpop.permute.xlu0 %442  ;;  %v454_v5 = vsel %vm452_vm3, %v445_v24, %v447_v55 }
 0x199   :  { %v453_v3 = vsel %vm452_vm3, %v443_v2, %v445_v24  ;;  %v467_v7 = vsel %vm105_vm9, %v454_v5, 0 }
 0x19a   :  { %v464_v6 = vsel %vm105_vm9, %v453_v3, 0  ;;  %501 = vmatpush.bf16.msra.mxu1 %v467_v7 }
 0x19b   :  { %482 = vmatpush.bf16.msra.mxu0 %v464_v6 }
 0x19d   :  { %959 = vmatmul.msk.bf16.vlgmr.msra.gmra.mxu1 %vm174_vm0, %v426_v54  ;;  %v1303_v32 = vpop.f32.mrf.mxu2  ;;  %v1305_v33 = vpop.f32.mrf.mxu3 }
 0x19e   :  { %957 = vmatmul.msk.bf16.vlgmr.msra.gmra.mxu0 %vm174_vm0, %v426_v54  ;;  %v1315_v38 = vpop.f32.mrf.mxu0  ;;  %v1317_v39 = vpop.f32.mrf.mxu1 }
 0x19f   :  { %v637_v10 = vpop.permute.xlu1 %636 }
 0x1a0   :  { %v428_v9 = vpop.permute.xlu0 %427  ;;  %v644_v11 = vsel %vm642_vm4, %v635_v8, %v637_v10  ;;  %v645_v12 = vsel %vm642_vm4, %v637_v10, %v639_v62 }
 0x1a1   :  { %v657_v13 = vsel %vm105_vm9, %v644_v11, 0  ;;  %v660_v15 = vsel %vm105_vm9, %v645_v12, 0 }
 0x1a2   :  { %691 = vmatpush.bf16.msrb.mxu1 %v657_v13  ;;  %710 = vmatpush.bf16.msrb.mxu2 %v660_v15 }
 0x1a5   :  { %964 = vmatmul.msk.bf16.gmra.mxu3 %vm174_vm0, %v428_v9  ;;  %v1311_v36 = vpop.f32.mrf.mxu2  ;;  %v1313_v37 = vpop.f32.mrf.mxu3 }
 0x1a6   :  { %962 = vmatmul.msk.bf16.gmra.mxu2 %vm174_vm0, %v428_v9  ;;  %v1323_v0 = vpop.f32.mrf.mxu0  ;;  %v1325_v42 = vpop.f32.mrf.mxu1 }
 0x1a7   :  { %v633_v14 = vpop.permute.xlu1 %632 }
 0x1a8   :  { %v641_v16 = vpop.permute.xlu0 %640  ;;  %v643_v4 = vsel %vm642_vm4, %v633_v14, %v635_v8 }
 0x1a9   :  { %v646_v17 = vsel %vm642_vm4, %v639_v62, %v641_v16  ;;  %v654_v20 = vsel %vm105_vm9, %v643_v4, 0  ;;  %v764_v16 = vpop.permute.xlu2 %763 }
 0x1aa   :  { %v663_v19 = vsel %vm105_vm9, %v646_v17, 0  ;;  %672 = vmatpush.bf16.msrb.mxu0 %v654_v20 }
 0x1ab   :  { %729 = vmatpush.bf16.msrb.mxu3 %v663_v19 }
 0x1ad   :  { %960 = vmatmul.msk.bf16.gmra.mxu1 %vm174_vm0, %v428_v9  ;;  %v1319_v40 = vpop.f32.mrf.mxu2  ;;  %v1321_v41 = vpop.f32.mrf.mxu3 }
 0x1ae   :  { %958 = vmatmul.msk.bf16.gmra.mxu0 %vm174_vm0, %v428_v9  ;;  %v307_v45 = vpop.f32.mrf.mxu0  ;;  %v326_v46 = vpop.f32.mrf.mxu1 }
 0x1af   :  { %v618_v26 = vpop.permute.xlu1 %617  ;;  %v308_v11 = vadd.f32 %v307_v45, %v203_v30  ;;  %v327_v12 = vadd.f32 %v326_v46, %v222_v31 }
 0x1b0   :  { %v616_v23 = vpop.permute.xlu0 %615 }
 0x1b5   :  { %971 = vmatmul.msk.bf16.vlgmr.msrb.gmra.mxu3 %vm174_vm0, %v616_v23  ;;  %v345_v43 = vpop.f32.mrf.mxu2  ;;  %v364_v44 = vpop.f32.mrf.mxu3 }
 0x1b6   :  { %969 = vmatmul.msk.bf16.vlgmr.msrb.gmra.mxu2 %vm174_vm0, %v616_v23  ;;  %v309_v48 = vpop.f32.mrf.mxu0  ;;  %v328_v61 = vpop.f32.mrf.mxu1  ;;  %v346_v9 = vadd.f32 %v345_v43, %v241_v27  ;;  %v365_v10 = vadd.f32 %v364_v44, %v260_v29 }
 0x1b7   :  { %v310_v44 = vadd.f32 %v309_v48, %v1307_v34 }
 0x1b8   :  { %v769_v48 = vpop.permute.xlu0 %768 }
 0x1bd   :  { %967 = vmatmul.msk.bf16.vlgmr.msrb.gmra.mxu1 %vm174_vm0, %v616_v23  ;;  %v347_v47 = vpop.f32.mrf.mxu2  ;;  %v366_v63 = vpop.f32.mrf.mxu3 }
 0x1be   :  { %965 = vmatmul.msk.bf16.vlgmr.msrb.gmra.mxu0 %vm174_vm0, %v616_v23  ;;  %v1331_v25 = vpop.f32.mrf.mxu0  ;;  %v1333_v28 = vpop.f32.mrf.mxu1  ;;  %v348_v29 = vadd.f32 %v347_v47, %v1303_v32  ;;  %v367_v30 = vadd.f32 %v366_v63, %v1305_v33  ;;  %v329_v32 = vadd.f32 %v328_v61, %v1309_v35 }
 0x1c5   :  { %972 = vmatmul.msk.bf16.gmra.mxu3 %vm174_vm0, %v618_v26  ;;  %v1327_v49 = vpop.f32.mrf.mxu2  ;;  %v1329_v50 = vpop.f32.mrf.mxu3 }
 0x1c6   :  { %970 = vmatmul.msk.bf16.gmra.mxu2 %vm174_vm0, %v618_v26  ;;  %v1339_v1 = vpop.f32.mrf.mxu0  ;;  %v1341_v53 = vpop.f32.mrf.mxu1 }
 0x1cd   :  { %968 = vmatmul.msk.bf16.gmra.mxu1 %vm174_vm0, %v618_v26  ;;  %v1335_v51 = vpop.f32.mrf.mxu2  ;;  %v1337_v52 = vpop.f32.mrf.mxu3 }
 0x1ce   :  { %966 = vmatmul.msk.bf16.gmra.mxu0 %vm174_vm0, %v618_v26 }
 0x218   :  { %v541_v54 = vpop.f32.mrf.mxu3 }
 0x219   :  { %v522_v18 = vpop.f32.mrf.mxu2  ;;  %v554_v15 = vadd.f32 %v541_v54, %v365_v10  ;;  %v351_v10 = vadd.f32 %v1327_v49, %v1311_v36  ;;  %v332_v36 = vadd.f32 %v1333_v28, %v1317_v39  ;;  %v774_v28 = vpop.permute.xlu1 %773 }
 0x21a   :  { %v503_v56 = vpop.f32.mrf.mxu1  ;;  %v553_v13 = vadd.f32 %v522_v18, %v346_v9 }
 0x21b   :  { %v484_v55 = vpop.f32.mrf.mxu0  ;;  %v552_v19 = vadd.f32 %v503_v56, %v327_v12 }
 0x21c   :  { %v551_v4 = vadd.f32 %v484_v55, %v308_v11 }
 0x220   :  { %v543_v58 = vpop.f32.mrf.mxu3 }
 0x221   :  { %v524_v57 = vpop.f32.mrf.mxu2  ;;  %v558_v33 = vadd.f32 %v543_v58, %v367_v30 }
 0x222   :  { %v505_v60 = vpop.f32.mrf.mxu1  ;;  %v557_v45 = vadd.f32 %v524_v57, %v348_v29  ;;  %v315_v29 = vadd.f32 %v1339_v1, %v1323_v0 }
 0x223   :  { %v486_v59 = vpop.f32.mrf.mxu0  ;;  %v556_v35 = vadd.f32 %v505_v60, %v329_v32  ;;  %v370_v60 = vadd.f32 %v1329_v50, %v1313_v37  ;;  %v779_v32 = vpop.permute.xlu2 %778 }
 0x224   :  { %v555_v47 = vadd.f32 %v486_v59, %v310_v44 }
 0x228   :  { %v1345_v2 = vpop.f32.mrf.mxu3 }
 0x229   :  { %v1343_v62 = vpop.f32.mrf.mxu2  ;;  %v562_v49 = vadd.f32 %v1345_v2, %v370_v60 }
 0x22a   :  { %v1349_v3 = vpop.f32.mrf.mxu1  ;;  %v561_v37 = vadd.f32 %v1343_v62, %v351_v10 }
 0x22b   :  { %v1347_v24 = vpop.f32.mrf.mxu0  ;;  %v560_v62 = vadd.f32 %v1349_v3, %v332_v36  ;;  %v372_v3 = vadd.f32 %v1337_v52, %v1321_v41 }
 0x230   :  { %v1353_v6 = vpop.f32.mrf.mxu3 }
 0x231   :  { %v1351_v5 = vpop.f32.mrf.mxu2 }
 0x232   :  { %v1357_v8 = vpop.f32.mrf.mxu1 }
 0x233   :  { %v1355_v7 = vpop.f32.mrf.mxu0  ;;  %1546 = vst [vmem:[#allocation3_spill] sm:$0xff] %v1357_v8 }
 0x234   :  { %1545 = vst [vmem:[#allocation2_spill] sm:$0xff] %v1355_v7 }
 0x238   :  { %v731_v17 = vpop.f32.mrf.mxu3 }
 0x239   :  { %v712_v14 = vpop.f32.mrf.mxu2  ;;  %v744_v21 = vadd.f32 %v731_v17, %v554_v15 }
 0x23a   :  { %v743_v20 = vadd.f32 %v712_v14, %v553_v13  ;;  %v693_v23 = vpop.f32.mrf.mxu1  ;;  %v313_v13 = vadd.f32 %v1331_v25, %v1315_v38 }
 0x23b   :  { %v674_v22 = vpop.f32.mrf.mxu0  ;;  %v1361_v7 = vadd.f32 %v764_v16, %v744_v21  ;;  %v742_v27 = vadd.f32 %v693_v23, %v552_v19  ;;  %v1547_v52 = vld [vmem:[#allocation2_spill] sm:$0xff] }
 0x23c   :  { %v1359_v26 = vadd.f32 %v764_v16, %v743_v20  ;;  %v741_v8 = vadd.f32 %v674_v22, %v551_v4  ;;  %v559_v50 = vadd.f32 %v1347_v24, %v313_v13  ;;  %v353_v22 = vadd.f32 %v1335_v51, %v1319_v40 }
 0x23d   :  { %v1371_v43 = vadd.f32 %v764_v16, %v742_v27  ;;  %800 = vst [vmem:[%s1523_s6 + $0x18] sm:$0xff] %v1361_v7  ;;  %v334_v40 = vadd.f32 %v1341_v53, %v1325_v42  ;;  %v566_v51 = vadd.f32 %v1353_v6, %v372_v3  ;;  %v563_v1 = vadd.f32 %v1547_v52, %v315_v29 }
 0x23e   :  { %799 = vst [vmem:[%s1523_s6 + $0x10] sm:$0xff] %v1359_v26  ;;  %v1369_v31 = vadd.f32 %v764_v16, %v741_v8  ;;  %v565_v41 = vadd.f32 %v1351_v5, %v353_v22  ;;  %v1548_v5 = vld [vmem:[#allocation3_spill] sm:$0xff] }
 0x23f   :  { %798 = vst [vmem:[%s1523_s6 + $0x8] sm:$0xff] %v1371_v43  ;;  %v564_v30 = vadd.f32 %v1548_v5, %v334_v40 }
 0x240   :  { %797 = vst [vmem:[%s1523_s6] sm:$0xff] %v1369_v31  ;;  %v813_v46 = vadd.f32 %v1371_v43, %v1369_v31  ;;  %v733_v63 = vpop.f32.mrf.mxu3 }
 0x241   :  { %v714_v34 = vpop.f32.mrf.mxu2  ;;  %v748_v18 = vadd.f32 %v733_v63, %v558_v33 }
 0x242   :  { %v747_v61 = vadd.f32 %v714_v34, %v557_v45  ;;  %v814_v54 = vadd.f32 %v813_v46, %v1359_v26  ;;  %v695_v56 = vpop.f32.mrf.mxu1 }
 0x243   :  { %v676_v55 = vpop.f32.mrf.mxu0  ;;  %v1392_v58 = vadd.f32 %v769_v48, %v748_v18  ;;  %v746_v8 = vadd.f32 %v695_v56, %v556_v35 }
 0x244   :  { %v1390_v57 = vadd.f32 %v769_v48, %v747_v61  ;;  %v745_v59 = vadd.f32 %v676_v55, %v555_v47  ;;  %v815_v9 = vadd.f32 %v814_v54, %v1361_v7 }
 0x245   :  { %v1405_v12 = vadd.f32 %v769_v48, %v746_v8  ;;  %804 = vst [vmem:[%s1523_s6 + $0x38] sm:$0xff] %v1392_v58 }
 0x246   :  { %803 = vst [vmem:[%s1523_s6 + $0x30] sm:$0xff] %v1390_v57  ;;  %v1403_v11 = vadd.f32 %v769_v48, %v745_v59  ;;  %816 = vadd.xlane.f32.xlu0 %v815_v9  ;;  %v1001_v59 = vmov 2048.0  }
 0x247   :  { %802 = vst [vmem:[%s1523_s6 + $0x28] sm:$0xff] %v1405_v12  ;;  %988 = vrcp.f32 %v1001_v59 }
 0x248   :  { %801 = vst [vmem:[%s1523_s6 + $0x20] sm:$0xff] %v1403_v11  ;;  %v818_v38 = vadd.f32 %v1405_v12, %v1403_v11  ;;  %v736_v25 = vpop.f32.mrf.mxu3 }
 0x249   :  { %v717_v39 = vpop.f32.mrf.mxu2  ;;  %v752_v15 = vadd.f32 %v736_v25, %v562_v49 }
 0x24a   :  { %v751_v2 = vadd.f32 %v717_v39, %v561_v37  ;;  %v819_v16 = vadd.f32 %v818_v38, %v1390_v57  ;;  %v698_v17 = vpop.f32.mrf.mxu1 }
 0x24b   :  { %v679_v14 = vpop.f32.mrf.mxu0  ;;  %v1432_v19 = vadd.f32 %v774_v28, %v752_v15  ;;  %v750_v20 = vadd.f32 %v698_v17, %v560_v62 }
 0x24c   :  { %v1430_v4 = vadd.f32 %v774_v28, %v751_v2  ;;  %v749_v24 = vadd.f32 %v679_v14, %v559_v50  ;;  %v820_v21 = vadd.f32 %v819_v16, %v1392_v58 }
 0x24d   :  { %v1445_v27 = vadd.f32 %v774_v28, %v750_v20  ;;  %808 = vst [vmem:[%s1523_s6 + $0x58] sm:$0xff] %v1432_v19  ;;  %v989_v8 = vpop.eup %988 }
 0x24e   :  { %807 = vst [vmem:[%s1523_s6 + $0x50] sm:$0xff] %v1430_v4  ;;  %v1443_v23 = vadd.f32 %v774_v28, %v749_v24  ;;  %821 = vadd.xlane.f32.xlu1 %v820_v21  ;;  %v837_v9 = vmul.f32 2048.0, %v989_v8  ;;  %vm841_vm9 = vweird.f32 %v989_v8 }
 0x24f   :  { %806 = vst [vmem:[%s1523_s6 + $0x48] sm:$0xff] %v1445_v27 }
 0x250   :  { %805 = vst [vmem:[%s1523_s6 + $0x40] sm:$0xff] %v1443_v23  ;;  %v823_v0 = vadd.f32 %v1445_v27, %v1443_v23  ;;  %v738_v53 = vpop.f32.mrf.mxu3  ;;  %v838_v10 = vsub.f32 1.0, %v837_v9 }
 0x251   :  { %v719_v42 = vpop.f32.mrf.mxu2  ;;  %v756_v44 = vadd.f32 %v738_v53, %v566_v51 }
 0x252   :  { %v755_v6 = vadd.f32 %v719_v42, %v565_v41  ;;  %v824_v45 = vadd.f32 %v823_v0, %v1430_v4  ;;  %v700_v46 = vpop.f32.mrf.mxu1  ;;  %v839_v13 = vmul.f32 %v989_v8, %v838_v10 }
 0x253   :  { %v681_v33 = vpop.f32.mrf.mxu0  ;;  %v1470_v34 = vadd.f32 %v779_v32, %v756_v44  ;;  %v754_v48 = vadd.f32 %v700_v46, %v564_v30 }
 0x254   :  { %v795_v47 = vadd.f32 %v779_v32, %v755_v6  ;;  %v753_v63 = vadd.f32 %v681_v33, %v563_v1  ;;  %v825_v35 = vadd.f32 %v824_v45, %v1432_v19  ;;  %v840_v49 = vadd.f32 %v989_v8, %v839_v13 }
 0x255   :  { %v794_v18 = vadd.f32 %v779_v32, %v754_v48  ;;  %812 = vst [vmem:[%s1523_s6 + $0x78] sm:$0xff] %v1470_v34 }
 0x256   :  { %811 = vst [vmem:[%s1523_s6 + $0x70] sm:$0xff] %v795_v47  ;;  %v793_v61 = vadd.f32 %v779_v32, %v753_v63  ;;  %826 = vadd.xlane.f32.xlu2 %v825_v35  ;;  %v842_v39 = vsel %vm841_vm9, %v989_v8, %v840_v49 }
 0x257   :  { %810 = vst [vmem:[%s1523_s6 + $0x68] sm:$0xff] %v794_v18 }
 0x258   :  { %809 = vst [vmem:[%s1523_s6 + $0x60] sm:$0xff] %v793_v61  ;;  %v828_v54 = vadd.f32 %v794_v18, %v793_v61 }
 0x25a   :  { %v829_v55 = vadd.f32 %v828_v54, %v795_v47 }
 0x25c   :  { %v830_v56 = vadd.f32 %v829_v55, %v1470_v34 }
 0x25e   :  { %831 = vadd.xlane.f32.xlu2 %v830_v56 }
 0x2b9   :  { %v817_v37 = vpop.xlane.xlu0 %816 }
 0x2c1   :  { %v822_v36 = vpop.xlane.xlu1 %821 }
 0x2c2   :  { %v833_v38 = vadd.f32 %v822_v36, %v817_v37 }
 0x2c9   :  { %v827_v60 = vpop.xlane.xlu2 %826 }
 0x2ca   :  { %v834_v50 = vadd.f32 %v833_v38, %v827_v60 }
 0x2d1   :  { %v832_v25 = vpop.xlane.xlu2 %831 }
 0x2d2   :  { %v835_v28 = vadd.f32 %v834_v50, %v832_v25  ;;  %v905_v50 = vld [vmem:[%s1524_s4] sm:$0xff] }
 0x2d4   :  { %v1487_v62 = vmul.f32 %v842_v39, %v835_v28 }
 0x2d6   :  { %846 = vperm.xlu0 %985, %v1487_v62  }
 0x348   :  { %v847_v2 = vpop.permute.xlu0 %846 }
 0x349   :  { %v853_v15 = vsub.f32 %v1403_v11, %v847_v2  ;;  %v854_v16 = vsub.f32 %v1405_v12, %v847_v2  ;;  %v855_v14 = vsub.f32 %v1390_v57, %v847_v2  ;;  %v856_v17 = vsub.f32 %v1392_v58, %v847_v2 }
 0x34a   :  { %v849_v24 = vsub.f32 %v1369_v31, %v847_v2  ;;  %v850_v20 = vsub.f32 %v1371_v43, %v847_v2  ;;  %v851_v21 = vsub.f32 %v1359_v26, %v847_v2  ;;  %v852_v40 = vsub.f32 %v1361_v7, %v847_v2 }
 0x34b   :  { %v869_v22 = vmul.f32 %v853_v15, %v853_v15  ;;  %v870_v3 = vmul.f32 %v854_v16, %v854_v16  ;;  %v871_v29 = vmul.f32 %v855_v14, %v855_v14  ;;  %v872_v11 = vmul.f32 %v856_v17, %v856_v17 }
 0x34c   :  { %v865_v41 = vmul.f32 %v849_v24, %v849_v24  ;;  %v866_v51 = vmul.f32 %v850_v20, %v850_v20  ;;  %v861_v12 = vsub.f32 %v793_v61, %v847_v2  ;;  %v862_v52 = vsub.f32 %v794_v18, %v847_v2 }
 0x34d   :  { %v886_v0 = vadd.f32 %v870_v3, %v869_v22  ;;  %v867_v57 = vmul.f32 %v851_v21, %v851_v21  ;;  %v857_v58 = vsub.f32 %v1443_v23, %v847_v2  ;;  %v858_v31 = vsub.f32 %v1445_v27, %v847_v2 }
 0x34e   :  { %v881_v1 = vadd.f32 %v866_v51, %v865_v41  ;;  %v863_v42 = vsub.f32 %v795_v47, %v847_v2  ;;  %v877_v26 = vmul.f32 %v861_v12, %v861_v12  ;;  %v878_v53 = vmul.f32 %v862_v52, %v862_v52 }
 0x34f   :  { %v887_v43 = vadd.f32 %v886_v0, %v871_v29  ;;  %v868_v5 = vmul.f32 %v852_v40, %v852_v40  ;;  %v859_v7 = vsub.f32 %v1430_v4, %v847_v2  ;;  %v873_v32 = vmul.f32 %v857_v58, %v857_v58 }
 0x350   :  { %v882_v30 = vadd.f32 %v881_v1, %v867_v57  ;;  %v896_v44 = vadd.f32 %v878_v53, %v877_v26  ;;  %v874_v45 = vmul.f32 %v858_v31, %v858_v31  ;;  %v864_v46 = vsub.f32 %v1470_v34, %v847_v2 }
 0x351   :  { %v888_v6 = vadd.f32 %v887_v43, %v872_v11  ;;  %v879_v63 = vmul.f32 %v863_v42, %v863_v42  ;;  %v860_v27 = vsub.f32 %v1432_v19, %v847_v2  ;;  %v875_v47 = vmul.f32 %v859_v7, %v859_v7 }
 0x352   :  { %v883_v33 = vadd.f32 %v882_v30, %v868_v5  ;;  %v891_v23 = vadd.f32 %v874_v45, %v873_v32  ;;  %v880_v61 = vmul.f32 %v864_v46, %v864_v46 }
 0x353   :  { %889 = vadd.xlane.f32.xlu2 %v888_v6  ;;  %v897_v48 = vadd.f32 %v896_v44, %v879_v63  ;;  %v876_v18 = vmul.f32 %v860_v27, %v860_v27 }
 0x354   :  { %884 = vadd.xlane.f32.xlu1 %v883_v33  ;;  %v892_v35 = vadd.f32 %v891_v23, %v875_v47 }
 0x355   :  { %v898_v54 = vadd.f32 %v897_v48, %v880_v61 }
 0x356   :  { %v893_v4 = vadd.f32 %v892_v35, %v876_v18 }
 0x35b   :  { %899 = vadd.xlane.f32.xlu2 %v898_v54 }
 0x35c   :  { %894 = vadd.xlane.f32.xlu1 %v893_v4 }
 0x3c6   :  { %v890_v55 = vpop.xlane.xlu2 %889 }
 0x3c7   :  { %v885_v56 = vpop.xlane.xlu1 %884 }
 0x3c8   :  { %v901_v59 = vadd.f32 %v890_v55, %v885_v56 }
 0x3ce   :  { %v900_v34 = vpop.xlane.xlu2 %899 }
 0x3cf   :  { %v895_v8 = vpop.xlane.xlu1 %894 }
 0x3d0   :  { %v902_v9 = vadd.f32 %v901_v59, %v895_v8 }
 0x3d2   :  { %v903_v10 = vadd.f32 %v902_v9, %v900_v34 }
 0x3d4   :  { %v904_v60 = vmul.f32 %v903_v10, %v842_v39  ;;  %v906_v39 = vld [vmem:[%s1524_s4 + $0x8] sm:$0xff] }
 0x3d6   :  { %v907_v13 = vadd.f32 1e-05, %v904_v60 }
 0x3d8   :  { %990 = vrsqrt.f32 %v907_v13  ;;  %vm914_vm5 = vweird.f32 %v907_v13 }
 0x3de   :  { %v991_v19 = vpop.eup %990 }
 0x3df   :  { %v909_v36 = vmul.f32 %v991_v19, %v907_v13  ;;  %vm915_vm0 = vweird.f32 %v991_v19 }
 0x3e0   :  { %vm916_vm6 = vmor %vm914_vm5, %vm915_vm0 }
 0x3e1   :  { %v910_v37 = vmul.f32 %v991_v19, %v909_v36 }
 0x3e3   :  { %v911_v49 = vmul.f32 0.5, %v910_v37 }
 0x3e5   :  { %v912_v38 = vsub.f32 1.5, %v911_v49 }
 0x3e7   :  { %v913_v25 = vmul.f32 %v991_v19, %v912_v38 }
 0x3e9   :  { %v917_v28 = vsel %vm916_vm6, %v991_v19, %v913_v25 }
 0x3ea   :  { %v918_v2 = vmul.f32 %v917_v28, %v905_v50 }
 0x3ec   :  { %v919_v15 = vmul.f32 %v918_v2, %v1487_v62  ;;  %922 = vst.msk [vmem:[%s1525_s7] sm:$0xff] %vm1549_vm7, %v918_v2 }
 0x3ee   :  { %v920_v16 = vsub.f32 %v906_v39, %v919_v15 }
 0x3f0   :  { %923 = vst.msk [vmem:[%s1525_s7 + $0x8] sm:$0xff] %vm1550_vm8, %v920_v16 }

// kernel: decoder_v1_forward.7
= control target key start
LH: loop header
LB: loop body
LE: loop exit
PB: predicated region body
PF: predicated region fallthrough
CT: control target
= control target key end

     0   :  { %v7706_v0 = vmov 0   ;;  %v7726_v6 = vmov 0  ;;  %v7729_v11 = vmov 0  ;;  %v7734_v21 = vmov 0  ;;  %s4652_s9 = smov 120   ;;  %s4653_s10 = smov 95   ;;  %s7685_s4 = inlined_call_operand.vmem [shape: f32[16,1], index: 4, kind: input, shape index: {}]   ;;  %s7686_s1 = inlined_call_operand.vmem [shape: s32[2,2048], index: 1, kind: input, shape index: {}]   ;;  %s7687_s2 = inlined_call_operand.vmem [shape: bf16[4,72], index: 2, kind: input, shape index: {}]   ;;  %s7688_s0 = inlined_call_operand.vmem [shape: f32[8,2304], index: 0, kind: input, shape index: {}]   ;;  %s7689_s3 = inlined_call_operand.vmem [shape: f32[4,1], index: 3, kind: input, shape index: {}]   ;;  %s7690_s5 = inlined_call_operand.vmem [shape: f32[4,2048], index: 5, kind: output, shape index: {}]  }
   0x1   :  { %4612 = vset.pattern.permute.xlu0 %v7706_v0  ;;  %v41_v1 = vld [vmem:[%s7685_s4] sm:$0xff]  ;;  %4613 = vset.pattern.permute.xlu2 %v7706_v0  ;;  %v4716_v5 = vld [vmem:[%s7686_s1 + $0x10] ss:$2 sm:$0xff]  ;;  %v4451_v7 = vld [vmem:[%s7686_s1 + $0x11] ss:$2 sm:$0xff]  ;;  %v4905_v32 = vunpack.c.h.b16 %v7706_v0  ;;  %s4654_s6 = smov 32  }
   0x2   :  { %v4703_v2 = vld [vmem:[%s7686_s1] ss:$2 sm:$0xff]  ;;  %v4450_v3 = vld [vmem:[%s7686_s1 + $0x1] ss:$2 sm:$0xff]  ;;  %44 = vperm.xlu0 %4612, %v41_v1   ;;  %vm342_vm3 = vcmp.ge.s32.totalorder %v4716_v5, 0  ;;  %vm344_vm4 = vcmp.lt.s32.totalorder %v4716_v5, 32 }
   0x3   :  { %v4709_v4 = vadd.s32 4294967295, %v4450_v3  ;;  %vm341_vm0 = vcmp.ge.s32.totalorder %v4703_v2, 0  ;;  %vm343_vm1 = vcmp.lt.s32.totalorder %v4703_v2, 32  ;;  %v65_v8 = vld [vmem:[%s7685_s4 + $0x8] sm:$0xff]  ;;  %v159_v9 = vadd.s32 4294967295, %v4703_v2  ;;  %vm4735_vm7 = vmand %vm342_vm3, %vm344_vm4  ;;  %s4651_s4 = smov 96  }
   0x4   :  { %vm4718_vm2 = vmand %vm341_vm0, %vm343_vm1  ;;  %v4733_v10 = vadd.s32 4294967295, %v4451_v7  ;;  %v7730_v11 = vsel %vm4735_vm7, 4294967295, %v7729_v11  ;;  %68 = vperm.xlu2 %4613, %v65_v8   ;;  %v4742_v12 = vld [vmem:[%s7687_s2] sm:$0x3]  ;;  %v24_v63 = vld [vmem:[%s7688_s0 + $0x8] sm:$0xff]  ;;  %s4656_s24 = smov 97  }
   0x5   :  { %v7727_v6 = vsel %vm4718_vm2, 4294967295, %v7726_v6  ;;  %vm7693_vm5 = vcmp.ge.s32.totalorder %v4709_v4, 0  ;;  %vm7691_vm6 = vcmp.lt.s32.totalorder %v4709_v4, 32  ;;  %7731 = vst [vmem:[#allocation3_spill] sm:$0xff] %v7730_v11  ;;  %vm161_vm12 = vcmp.ge.s32.totalorder %v159_v9, 0  ;;  %v23_v62 = vld [vmem:[%s7688_s0] sm:$0xff] }
   0x6   :  { %7728 = vst [vmem:[#allocation2_spill] sm:$0xff] %v7727_v6  ;;  %vm347_vm8 = vmand %vm4718_vm2, %vm7693_vm5  ;;  %vm7692_vm10 = vcmp.ge.s32.totalorder %v4733_v10, 0  ;;  %vm7694_vm11 = vcmp.lt.s32.totalorder %v4733_v10, 32  ;;  %vm163_vm13 = vcmp.lt.s32.totalorder %v159_v9, 32  ;;  %v1400_v31 = vld [vmem:[%s7687_s2] sm:$0x3] }
   0x7   :  { %514 = vst [vmem:[#allocation1] ss:$4 sm:$0xff] %v4742_v12  ;;  %vm349_vm9 = vmand %vm347_vm8, %vm7691_vm6  ;;  %v25_v1 = vld [vmem:[%s7688_s0 + $0x10] sm:$0xff]  ;;  %v26_v7 = vld [vmem:[%s7688_s0 + $0x18] sm:$0xff]  ;;  %s4657_s27 = smov 31   ;;  %s4658_s28 = smov 112  }
   0x8   :  { %v351_v13 = vsel %vm349_vm9, 1, %v7706_v0  ;;  %vm348_vm14 = vmand %vm4735_vm7, %vm7692_vm10  ;;  %s4659_s29 = smov 127   ;;  %s4660_s12 = smov 1  }
   0x9   :  { %v355_v14 = vperm.slane %v351_v13, 2  ;;  %v356_v15 = vperm.slane %v351_v13, 3  ;;  %v353_v16 = vperm.slane %v351_v13, 0  ;;  %v354_v17 = vperm.slane %v351_v13, 1  ;;  %vm350_vm15 = vmand %vm348_vm14, %vm7694_vm11  ;;  %s4661_s13 = smov 104   ;;  %s4662_s18 = smov 88  }
   0xa   :  { %v357_v18 = vperm.slane %v351_v13, 4  ;;  %v358_v19 = vperm.slane %v351_v13, 5  ;;  %vm4764_vm8 = vmand %vm161_vm12, %vm163_vm13  ;;  %v352_v24 = vsel %vm350_vm15, 1, %v7706_v0  ;;  %v359_v25 = vperm.slane %v351_v13, 6  ;;  %s4664_s23 = smov 72  }
   0xb   :  { %vm371_vm0 = vcmp.eq.s32.totalorder %v355_v14, 1  ;;  %vm372_vm1 = vcmp.eq.s32.totalorder %v356_v15, 1  ;;  %vm4760_vm3 = vcmp.eq.s32.totalorder %v353_v16, 1  ;;  %vm370_vm4 = vcmp.eq.s32.totalorder %v354_v17, 1  ;;  %v30_v15 = vld [vmem:[%s7688_s0 + $0x38] sm:$0xff] }
   0xc   :  { %v7735_v21 = vsel %vm4764_vm8, 4294967295, %v7734_v21  ;;  %vm386_vm9 = vmpackc.low %vm372_vm1, %vm371_vm0  ;;  %vm4768_vm6 = vcmp.eq.s32.totalorder %v357_v18, 1  ;;  %vm4772_vm10 = vcmp.eq.s32.totalorder %v358_v19, 1  ;;  %v361_v27 = vperm.slane %v352_v24, 0  ;;  %v27_v19 = vld [vmem:[%s7688_s0 + $0x20] sm:$0xff] }
   0xd   :  { %7736 = vst [vmem:[#allocation4_spill] sm:$0xff] %v7735_v21  ;;  %v394_v26 = vsel %vm386_vm9, 65537, %v7706_v0  ;;  %vm385_vm12 = vmpackc.low %vm370_vm4, %vm4760_vm3  ;;  %v362_v28 = vperm.slane %v352_v24, 1  ;;  %v360_v29 = vperm.slane %v351_v13, 7  ;;  %v363_v34 = vperm.slane %v352_v24, 2  ;;  %v29_v13 = vld [vmem:[%s7688_s0 + $0x30] sm:$0xff] }
   0xe   :  { %403 = vrot.lane.b32.xlu1 %v394_v26, %s4651_s4  ;;  %v393_v30 = vsel %vm385_vm12, 65537, %v7706_v0  ;;  %vm387_vm13 = vmpackc.low %vm4772_vm10, %vm4768_vm6  ;;  %vm4790_vm14 = vcmp.eq.s32.totalorder %v361_v27, 1  ;;  %v364_v35 = vperm.slane %v352_v24, 3  ;;  %v515_v36 = vld.sshfl [vmem:[#allocation1] sm:$0xff pattern:$0x73625140] }
   0xf   :  { %401 = vrot.lane.b32.xlu0 %v393_v30, %s4651_s4  ;;  %vm4794_vm15 = vcmp.eq.s32.totalorder %v362_v28, 1  ;;  %vm171_vm0 = vmand %vm4764_vm8, %vm7693_vm5  ;;  %1402 = vst [vmem:[#allocation1] ss:$4 sm:$0xff] %v1400_v31  ;;  %vm375_vm10 = vcmp.eq.s32.totalorder %v359_v25, 1  ;;  %vm376_vm1 = vcmp.eq.s32.totalorder %v360_v29, 1  ;;  %v365_v37 = vperm.slane %v352_v24, 4 }
  0x10   :  { %vm389_vm6 = vmpackc.low %vm4794_vm15, %vm4790_vm14  ;;  %v366_v38 = vperm.slane %v352_v24, 5  ;;  %v367_v39 = vperm.slane %v352_v24, 6  ;;  %v368_v40 = vperm.slane %v352_v24, 7  ;;  %v395_v41 = vsel %vm387_vm13, 65537, %v7706_v0  ;;  %v28_v29 = vld [vmem:[%s7688_s0 + $0x28] sm:$0xff] }
  0x11   :  { %vm7745_vm3 = vcmp.lt.s32.totalorder %v4709_v4, 32  ;;  %v397_v42 = vsel %vm389_vm6, 65537, %v7706_v0  ;;  %vm4810_vm9 = vcmp.eq.s32.totalorder %v363_v34, 1  ;;  %vm4814_vm12 = vcmp.eq.s32.totalorder %v364_v35, 1  ;;  %vm388_vm14 = vmpackc.low %vm376_vm1, %vm375_vm10 }
  0x12   :  { %vm175_vm4 = vmand %vm171_vm0, %vm7745_vm3  ;;  %v396_v45 = vsel %vm388_vm14, 65537, %v7706_v0  ;;  %vm4819_vm15 = vcmp.eq.s32.totalorder %v365_v37, 1  ;;  %vm4823_vm13 = vcmp.eq.s32.totalorder %v366_v38, 1  ;;  %vm383_vm0 = vcmp.eq.s32.totalorder %v367_v39, 1 }
  0x13   :  { %vm384_vm6 = vcmp.eq.s32.totalorder %v368_v40, 1  ;;  %407 = vrot.lane.b32.xlu2 %v396_v45, %s4651_s4  ;;  %vm390_vm10 = vmpackc.low %vm4814_vm12, %vm4810_vm9  ;;  %v4835_v48 = vsel %vm175_vm4, 1, %v7706_v0  ;;  %v4901_v30 = vunpack.c.l.b16 %v7706_v0  ;;  %v160_v38 = vadd.s32 4294967295, %v4716_v5 }
  0x14   :  { %vm391_vm1 = vmpackc.low %vm4823_vm13, %vm4819_vm15  ;;  %v181_v49 = vperm.slane %v4835_v48, 2  ;;  %v182_v50 = vperm.slane %v4835_v48, 3  ;;  %v183_v51 = vperm.slane %v4835_v48, 4  ;;  %v184_v52 = vperm.slane %v4835_v48, 5 }
  0x15   :  { %vm392_vm3 = vmpackc.low %vm384_vm6, %vm383_vm0  ;;  %v398_v53 = vsel %vm390_vm10, 65537, %v7706_v0  ;;  %v399_v54 = vsel %vm391_vm1, 65537, %v7706_v0  ;;  %v179_v56 = vperm.slane %v4835_v48, 0  ;;  %v180_v57 = vperm.slane %v4835_v48, 1 }
  0x16   :  { %405 = vrot.lane.b32.xlu1 %v395_v41, %s4651_s4  ;;  %v400_v55 = vsel %vm392_vm3, 65537, %v7706_v0  ;;  %vm197_vm4 = vcmp.eq.s32.totalorder %v181_v49, 1  ;;  %vm198_vm9 = vcmp.eq.s32.totalorder %v182_v50, 1  ;;  %vm199_vm12 = vcmp.eq.s32.totalorder %v183_v51, 1 }
  0x17   :  { %409 = vrot.lane.b32.xlu0 %v397_v42, %s4651_s4  ;;  %vm200_vm14 = vcmp.eq.s32.totalorder %v184_v52, 1  ;;  %vm212_vm15 = vmpackc.low %vm198_vm9, %vm197_vm4  ;;  %vm195_vm0 = vcmp.eq.s32.totalorder %v179_v56, 1  ;;  %vm196_vm6 = vcmp.eq.s32.totalorder %v180_v57, 1  ;;  %vm7696_vm1 = vcmask 1043456  }
  0x18   :  { %vm213_vm13 = vmpackc.low %vm200_vm14, %vm199_vm12  ;;  %v220_v58 = vsel %vm212_vm15, 65537, %v7706_v0  ;;  %vm7695_vm9 = vcmask 785408  }
  0x19   :  { %v221_v59 = vsel %vm213_vm13, 65537, %v7706_v0  ;;  %vm211_vm10 = vmpackc.low %vm196_vm6, %vm195_vm0  ;;  %vm162_vm13 = vcmp.ge.s32.totalorder %v160_v38, 0  ;;  %vm164_vm0 = vcmp.lt.s32.totalorder %v160_v38, 32 }
  0x1a   :  { %v219_v60 = vsel %vm211_vm10, 65537, %v7706_v0 }
  0x1b   :  { %413 = vrot.lane.b32.xlu2 %v399_v54, %s4651_s4 }
  0x1e   :  { %411 = vrot.lane.b32.xlu1 %v398_v53, %s4651_s4 }
  0x1f   :  { %415 = vrot.lane.b32.xlu0 %v400_v55, %s4651_s4  ;;  %v7754_v55 = vmov 0 }
  0x23   :  { %229 = vrot.lane.b32.xlu2 %v220_v58, %s4653_s10 }
  0x26   :  { %517 = vrot.lane.b32.xlu1 %v515_v36, %s4652_s9 }
  0x27   :  { %231 = vrot.lane.b32.xlu0 %v221_v59, %s4653_s10 }
  0x2e   :  { %227 = vrot.lane.b32.xlu1 %v219_v60, %s4653_s10 }
  0x5e   :  { %v4859_v61 = vpop.permute.xlu2 %68 }
  0x6d   :  { %v4892_v23 = vpop.permute.xlu2 %407 }
  0x6e   :  { %v420_v33 = vrot.slane %v4892_v23, 4 }
  0x74   :  { %v4870_v3 = vpop.permute.xlu0 %44 }
  0x75   :  { %v47_v8 = vmul.f32 %v4870_v3, %v23_v62  ;;  %v48_v9 = vmul.f32 %v4870_v3, %v24_v63  ;;  %v49_v14 = vmul.f32 %v4870_v3, %v25_v1  ;;  %v50_v18 = vmul.f32 %v4870_v3, %v26_v7 }
  0x76   :  { %v53_v20 = vmul.f32 %v4870_v3, %v29_v13  ;;  %v54_v22 = vmul.f32 %v4870_v3, %v30_v15  ;;  %v51_v25 = vmul.f32 %v4870_v3, %v27_v19  ;;  %v52_v36 = vmul.f32 %v4870_v3, %v28_v29  ;;  %v33_v13 = vld [vmem:[%s7688_s0 + $0x50] sm:$0xff] }
  0x77   :  { %v71_v16 = vadd.f32 %v4859_v61, %v47_v8  ;;  %v72_v17 = vadd.f32 %v4859_v61, %v48_v9  ;;  %v73_v24 = vadd.f32 %v4859_v61, %v49_v14  ;;  %v74_v28 = vadd.f32 %v4859_v61, %v50_v18 }
  0x78   :  { %v77_v31 = vadd.f32 %v4859_v61, %v53_v20  ;;  %v78_v34 = vadd.f32 %v4859_v61, %v54_v22  ;;  %v75_v37 = vadd.f32 %v4859_v61, %v51_v25  ;;  %v76_v51 = vadd.f32 %v4859_v61, %v52_v36 }
  0x79   :  { %v107_v26 = vmul.f32 0.01, %v71_v16  ;;  %v108_v27 = vmul.f32 0.01, %v72_v17  ;;  %vm89_vm3 = vcmp.ge.f32.partialorder %v71_v16, 0.0  ;;  %vm90_vm4 = vcmp.ge.f32.partialorder %v72_v17, 0.0 }
  0x7a   :  { %v109_v35 = vmul.f32 0.01, %v73_v24  ;;  %vm91_vm12 = vcmp.ge.f32.partialorder %v73_v24, 0.0  ;;  %v110_v42 = vmul.f32 0.01, %v74_v28  ;;  %vm92_vm14 = vcmp.ge.f32.partialorder %v74_v28, 0.0 }
  0x7b   :  { %v125_v40 = vsel %vm89_vm3, %v71_v16, %v107_v26  ;;  %v126_v41 = vsel %vm90_vm4, %v72_v17, %v108_v27  ;;  %vm95_vm15 = vcmp.ge.f32.partialorder %v77_v31, 0.0  ;;  %v113_v45 = vmul.f32 0.01, %v77_v31  ;;  %vm4917_vm3 = vmand %vm162_vm13, %vm164_vm0 }
  0x7c   :  { %v114_v47 = vmul.f32 0.01, %v78_v34  ;;  %v4912_v49 = vpack.c.bf16 %v126_v41, %v125_v40  ;;  %v127_v50 = vsel %vm91_vm12, %v73_v24, %v109_v35  ;;  %vm96_vm6 = vcmp.ge.f32.partialorder %v78_v34, 0.0 }
  0x7d   :  { %v128_v54 = vsel %vm92_vm14, %v74_v28, %v110_v42  ;;  %vm93_vm10 = vcmp.ge.f32.partialorder %v75_v37, 0.0  ;;  %v7755_v55 = vsel %vm4917_vm3, 4294967295, %v7754_v55  ;;  %v111_v59 = vmul.f32 0.01, %v75_v37 }
  0x7e   :  { %7756 = vst [vmem:[#allocation5_spill] sm:$0xff] %v7755_v55  ;;  %v131_v63 = vsel %vm95_vm15, %v77_v31, %v113_v45  ;;  %v132_v1 = vsel %vm96_vm6, %v78_v34, %v114_v47  ;;  %v4925_v7 = vpack.c.bf16 %v128_v54, %v127_v50  ;;  %v112_v8 = vmul.f32 0.01, %v76_v51  ;;  %v34_v34 = vld [vmem:[%s7688_s0 + $0x58] sm:$0xff] }
  0x7f   :  { %vm7757_vm14 = vcmp.ge.s32.totalorder %v4733_v10, 0  ;;  %vm94_vm5 = vcmp.ge.f32.partialorder %v76_v51, 0.0  ;;  %v185_v15 = vperm.slane %v4835_v48, 6  ;;  %v4942_v19 = vpack.c.bf16 %v132_v1, %v131_v63 }
  0x80   :  { %v404_v39 = vpop.permute.xlu1 %403  ;;  %vm4931_vm13 = vmand %vm4917_vm3, %vm7757_vm14  ;;  %v129_v20 = vsel %vm93_vm10, %v75_v37, %v111_v59  ;;  %v57_v26 = vmul.f32 %v4870_v3, %v33_v13  ;;  %v130_v31 = vsel %vm94_vm5, %v76_v51, %v112_v8  ;;  %v58_v45 = vmul.f32 %v4870_v3, %v34_v34  ;;  %v4981_v51 = vpop.permute.xlu2 %413 }
  0x81   :  { %v418_v43 = vrot.slane %v404_v39, 4  ;;  %v402_v44 = vpop.permute.xlu0 %401  ;;  %v186_v1 = vperm.slane %v4835_v48, 7 }
  0x82   :  { %v417_v46 = vrot.slane %v402_v44, 4 }
  0x84   :  { %v426_v52 = vsel %vm7695_vm9, %v417_v46, %v402_v44  ;;  %v427_v53 = vsel %vm7696_vm1, %v417_v46, %v418_v43  ;;  %v4966_v44 = vpack.c.bf16 %v130_v31, %v129_v20  ;;  %v81_v46 = vadd.f32 %v4859_v61, %v57_v26  ;;  %v32_v31 = vld [vmem:[%s7688_s0 + $0x48] sm:$0xff] }
  0x85   :  { %v428_v56 = vsel %vm7695_vm9, %v427_v53, %v404_v39  ;;  %v441_v57 = vunpack.c.l.b16 %v426_v52  ;;  %v442_v58 = vunpack.c.h.b16 %v426_v52 }
  0x86   :  { %v448_v60 = vunpack.c.l.b16 %v428_v56  ;;  %v449_v62 = vunpack.c.h.b16 %v428_v56  ;;  %v117_v26 = vmul.f32 0.01, %v81_v46 }
  0x87   :  { %vm445_vm4 = vcmp.ne.s32.totalorder %v441_v57, %v4901_v30  ;;  %vm446_vm12 = vcmp.ne.s32.totalorder %v442_v58, %v4905_v32 }
  0x88   :  { %vm447_vm15 = vmpackc.low %vm446_vm12, %vm445_vm4  ;;  %v406_v14 = vpop.permute.xlu1 %405  ;;  %vm452_vm0 = vcmp.ne.s32.totalorder %v448_v60, %v4901_v30  ;;  %vm453_vm6 = vcmp.ne.s32.totalorder %v449_v62, %v4905_v32 }
  0x89   :  { %v419_v16 = vrot.slane %v406_v14, 4  ;;  %v410_v17 = vpop.permute.xlu0 %409  ;;  %v504_v18 = vsel %vm447_vm15, %v4912_v49, 0  ;;  %vm454_vm14 = vmpackc.low %vm453_vm6, %vm452_vm0  ;;  %vm5007_vm6 = vcmp.eq.s32.totalorder %v185_v15, 1 }
  0x8a   :  { %v529_v22 = vunpack.c.h.b16 %v504_v18  ;;  %v528_v24 = vunpack.c.l.b16 %v504_v18  ;;  %v505_v25 = vsel %vm454_vm14, %v4925_v7, 0  ;;  %vm176_vm4 = vmand %vm4931_vm13, %vm7694_vm11  ;;  %v421_v37 = vrot.slane %v410_v17, 4 }
  0x8b   :  { %v429_v27 = vsel %vm7696_vm1, %v418_v43, %v419_v16  ;;  %v431_v28 = vsel %vm7696_vm1, %v419_v16, %v420_v33  ;;  %v531_v29 = vunpack.c.h.b16 %v505_v25  ;;  %v4963_v42 = vsel %vm176_vm4, 1, %v7706_v0 }
  0x8c   :  { %v430_v35 = vsel %vm7695_vm9, %v429_v27, %v406_v14  ;;  %v432_v36 = vsel %vm7695_vm9, %v431_v28, %v4892_v23  ;;  %v546_v38 = vpack.c.b16 %v529_v22, %v529_v22  ;;  %v545_v41 = vpack.c.b16 %v528_v24, %v528_v24  ;;  %v31_v23 = vld [vmem:[%s7688_s0 + $0x40] sm:$0xff] }
  0x8d   :  { %v455_v39 = vunpack.c.l.b16 %v430_v35  ;;  %v456_v40 = vunpack.c.h.b16 %v430_v35  ;;  %v548_v43 = vpack.c.b16 %v531_v29, %v531_v29  ;;  %v462_v52 = vunpack.c.l.b16 %v432_v36 }
  0x8e   :  { %564 = vrot.lane.b32.xlu2 %v546_v38, %s4654_s6  ;;  %562 = vrot.lane.b32.xlu0 %v545_v41, %s4654_s6  ;;  %v463_v53 = vunpack.c.h.b16 %v432_v36  ;;  %v433_v54 = vsel %vm7696_vm1, %v420_v33, %v421_v37  ;;  %v530_v57 = vunpack.c.l.b16 %v505_v25  ;;  %v187_v58 = vperm.slane %v4963_v42, 0 }
  0x8f   :  { %vm4971_vm5 = vcmp.ne.s32.totalorder %v455_v39, %v4901_v30  ;;  %vm4976_vm10 = vcmp.ne.s32.totalorder %v456_v40, %v4905_v32  ;;  %568 = vrot.lane.b32.xlu1 %v548_v43, %s4654_s6  ;;  %v188_v59 = vperm.slane %v4963_v42, 1  ;;  %vm466_vm13 = vcmp.ne.s32.totalorder %v462_v52, %v4901_v30 }
  0x90   :  { %vm461_vm12 = vmpackc.low %vm4976_vm10, %vm4971_vm5  ;;  %v4991_v56 = vpop.permute.xlu1 %411  ;;  %vm467_vm15 = vcmp.ne.s32.totalorder %v463_v53, %v4905_v32  ;;  %v423_v33 = vrot.slane %v4981_v51, 4  ;;  %v434_v9 = vsel %vm7695_vm9, %v433_v54, %v410_v17  ;;  %v82_v16 = vadd.f32 %v4859_v61, %v58_v45 }
  0x91   :  { %v422_v60 = vrot.slane %v4991_v56, 4  ;;  %v4999_v62 = vsel %vm461_vm12, %v4966_v44, 0  ;;  %vm468_vm0 = vmpackc.low %vm467_vm15, %vm466_vm13  ;;  %v416_v20 = vpop.permute.xlu0 %415  ;;  %vm5019_vm14 = vcmp.eq.s32.totalorder %v187_v58, 1  ;;  %vm5023_vm4 = vcmp.eq.s32.totalorder %v188_v59, 1  ;;  %v37_v59 = vld [vmem:[%s7688_s0 + $0x70] sm:$0xff] }
  0x92   :  { %v532_v63 = vunpack.c.l.b16 %v4999_v62  ;;  %v5014_v14 = vsel %vm468_vm0, %v4942_v19, 0  ;;  %v55_v15 = vmul.f32 %v4870_v3, %v31_v23  ;;  %v547_v25 = vpack.c.b16 %v530_v57, %v530_v57  ;;  %vm215_vm0 = vmpackc.low %vm5023_vm4, %vm5019_vm14 }
  0x93   :  { %v435_v13 = vsel %vm7696_vm1, %v421_v37, %v422_v60  ;;  %v469_v27 = vunpack.c.l.b16 %v434_v9  ;;  %v535_v28 = vunpack.c.h.b16 %v5014_v14  ;;  %vm99_vm5 = vcmp.ge.f32.partialorder %v81_v46, 0.0 }
  0x94   :  { %v436_v18 = vsel %vm7695_vm9, %v435_v13, %v4991_v56  ;;  %v549_v29 = vpack.c.b16 %v532_v63, %v532_v63  ;;  %v470_v34 = vunpack.c.h.b16 %v434_v9  ;;  %v5032_v35 = vrot.slane %v416_v20, 4  ;;  %v38_v63 = vld [vmem:[%s7688_s0 + $0x78] sm:$0xff] }
  0x95   :  { %v476_v17 = vunpack.c.l.b16 %v436_v18  ;;  %v477_v24 = vunpack.c.h.b16 %v436_v18  ;;  %vm5035_vm10 = vcmp.eq.s32.totalorder %v186_v1, 1  ;;  %vm100_vm12 = vcmp.ge.f32.partialorder %v82_v16, 0.0 }
  0x96   :  { %566 = vrot.lane.b32.xlu0 %v547_v25, %s4654_s6  ;;  %v552_v39 = vpack.c.b16 %v535_v28, %v535_v28  ;;  %570 = vrot.lane.b32.xlu2 %v549_v29, %s4654_s6  ;;  %v118_v40 = vmul.f32 0.01, %v82_v16  ;;  %v135_v41 = vsel %vm99_vm5, %v81_v46, %v117_v26  ;;  %v56_v43 = vmul.f32 %v4870_v3, %v32_v31  ;;  %vm214_vm9 = vmpackc.low %vm5035_vm10, %vm5007_vm6 }
  0x97   :  { %vm5040_vm13 = vcmp.ne.s32.totalorder %v476_v17, %v4901_v30  ;;  %vm5045_vm15 = vcmp.ne.s32.totalorder %v477_v24, %v4905_v32  ;;  %v79_v45 = vadd.f32 %v4859_v61, %v55_v15  ;;  %vm5057_vm11 = vcmp.ne.s32.totalorder %v469_v27, %v4901_v30  ;;  %v36_v24 = vld [vmem:[%s7688_s0 + $0x68] sm:$0xff] }
  0x98   :  { %576 = vrot.lane.b32.xlu1 %v552_v39, %s4654_s6  ;;  %v136_v50 = vsel %vm100_vm12, %v82_v16, %v118_v40  ;;  %vm482_vm14 = vmpackc.low %vm5045_vm15, %vm5040_vm13  ;;  %v533_v46 = vunpack.c.h.b16 %v4999_v62  ;;  %v80_v52 = vadd.f32 %v4859_v61, %v56_v43  ;;  %vm5073_vm5 = vcmp.ne.s32.totalorder %v470_v34, %v4905_v32 }
  0x99   :  { %vm97_vm4 = vcmp.ge.f32.partialorder %v79_v45, 0.0  ;;  %v115_v53 = vmul.f32 0.01, %v79_v45  ;;  %v439_v56 = vsel %vm7696_vm1, %v423_v33, %v5032_v35  ;;  %v223_v57 = vsel %vm215_vm0, 65537, %v7706_v0  ;;  %vm475_vm10 = vmpackc.low %vm5073_vm5, %vm5057_vm11  ;;  %v5226_v43 = vpop.permute.xlu0 %231 }
  0x9a   :  { %v5080_v58 = vpack.c.bf16 %v136_v50, %v135_v41  ;;  %v222_v62 = vsel %vm214_vm9, 65537, %v7706_v0  ;;  %vm98_vm6 = vcmp.ge.f32.partialorder %v80_v52, 0.0  ;;  %v116_v23 = vmul.f32 0.01, %v80_v52 }
  0x9b   :  { %v437_v1 = vsel %vm7696_vm1, %v422_v60, %v423_v33  ;;  %v133_v9 = vsel %vm97_vm4, %v79_v45, %v115_v53  ;;  %vm7780_vm12 = vcmask 785408   ;;  %v550_v16 = vpack.c.b16 %v533_v46, %v533_v46  ;;  %v35_v60 = vld [vmem:[%s7688_s0 + $0x60] sm:$0xff]  ;;  %v5103_v33 = vpop.permute.xlu1 %517 }
  0x9c   :  { %v5091_v8 = vsel %vm482_vm14, %v5080_v58, 0  ;;  %v440_v13 = vsel %vm7780_vm12, %v439_v56, %v416_v20  ;;  %v134_v18 = vsel %vm98_vm6, %v80_v52, %v116_v23  ;;  %v61_v22 = vmul.f32 %v4870_v3, %v37_v59  ;;  %vm7781_vm9 = vmmov %vm7780_vm12  ;;  %v39_v46 = vld [vmem:[%s7688_s0 + $0x80] sm:$0xff]  ;;  %v40_v23 = vld [vmem:[%s7688_s0 + $0x88] sm:$0xff]  ;;  %s4655_s0 = smov 33  }
  0x9d   :  { %v534_v48 = vunpack.c.l.b16 %v5014_v14  ;;  %v5107_v15 = vpack.c.bf16 %v134_v18, %v133_v9  ;;  %v191_v20 = vperm.slane %v4963_v42, 4  ;;  %v62_v17 = vmul.f32 %v4870_v3, %v38_v63 }
  0x9e   :  { %235 = vrot.lane.b32.xlu0 %v223_v57, %s4653_s10  ;;  %233 = vrot.lane.b32.xlu2 %v222_v62, %s4653_s10  ;;  %v539_v25 = vunpack.c.h.b16 %v5091_v8  ;;  %v192_v26 = vperm.slane %v4963_v42, 5  ;;  %v189_v27 = vperm.slane %v4963_v42, 2  ;;  %v190_v28 = vperm.slane %v4963_v42, 3 }
  0x9f   :  { %v5125_v14 = vsel %vm475_vm10, %v5107_v15, 0  ;;  %v85_v29 = vadd.f32 %v4859_v61, %v61_v22  ;;  %v59_v31 = vmul.f32 %v4870_v3, %v35_v60  ;;  %v438_v34 = vsel %vm7781_vm9, %v437_v1, %v4981_v51 }
  0xa0   :  { %572 = vrot.lane.b32.xlu1 %v550_v16, %s4654_s6  ;;  %v536_v36 = vunpack.c.l.b16 %v5125_v14  ;;  %v86_v37 = vadd.f32 %v4859_v61, %v62_v17  ;;  %v60_v38 = vmul.f32 %v4870_v3, %v36_v24  ;;  %v490_v39 = vunpack.c.l.b16 %v440_v13 }
  0xa1   :  { %v491_v40 = vunpack.c.h.b16 %v440_v13  ;;  %v551_v41 = vpack.c.b16 %v534_v48, %v534_v48  ;;  %vm5134_vm13 = vcmp.eq.s32.totalorder %v191_v20, 1  ;;  %v556_v45 = vpack.c.b16 %v539_v25, %v539_v25 }
  0xa2   :  { %vm5138_vm11 = vcmp.eq.s32.totalorder %v192_v26, 1  ;;  %vm5142_vm15 = vcmp.eq.s32.totalorder %v189_v27, 1  ;;  %vm5146_vm0 = vcmp.eq.s32.totalorder %v190_v28, 1  ;;  %v553_v52 = vpack.c.b16 %v536_v36, %v536_v36 }
  0xa3   :  { %vm103_vm14 = vcmp.ge.f32.partialorder %v85_v29, 0.0  ;;  %v121_v53 = vmul.f32 0.01, %v85_v29  ;;  %v83_v54 = vadd.f32 %v4859_v61, %v59_v31  ;;  %v122_v56 = vmul.f32 0.01, %v86_v37  ;;  %v228_v18 = vpop.permute.xlu1 %227 }
  0xa4   :  { %v84_v57 = vadd.f32 %v4859_v61, %v60_v38  ;;  %v483_v59 = vunpack.c.l.b16 %v438_v34  ;;  %v484_v62 = vunpack.c.h.b16 %v438_v34  ;;  %v63_v1 = vmul.f32 %v4870_v3, %v39_v46 }
  0xa5   :  { %vm101_vm5 = vcmp.ge.f32.partialorder %v83_v54, 0.0  ;;  %v119_v63 = vmul.f32 0.01, %v83_v54  ;;  %vm5162_vm6 = vcmp.ne.s32.totalorder %v490_v39, %v4901_v30  ;;  %v64_v48 = vmul.f32 %v4870_v3, %v40_v23  ;;  %v230_v39 = vpop.permute.xlu2 %229 }
  0xa6   :  { %574 = vrot.lane.b32.xlu0 %v551_v41, %s4654_s6  ;;  %578 = vrot.lane.b32.xlu2 %v553_v52, %s4654_s6  ;;  %vm102_vm12 = vcmp.ge.f32.partialorder %v84_v57, 0.0  ;;  %v120_v13 = vmul.f32 0.01, %v84_v57  ;;  %vm5171_vm9 = vcmp.ne.s32.totalorder %v483_v59, %v4901_v30  ;;  %vm5181_vm4 = vcmp.ne.s32.totalorder %v484_v62, %v4905_v32 }
  0xa7   :  { %v137_v22 = vsel %vm101_vm5, %v83_v54, %v119_v63  ;;  %v87_v20 = vadd.f32 %v4859_v61, %v63_v1  ;;  %vm5188_vm10 = vcmp.ne.s32.totalorder %v491_v40, %v4905_v32  ;;  %v139_v24 = vsel %vm103_vm14, %v85_v29, %v121_v53  ;;  %vm7799_vm5 = vmpackc.low %vm5138_vm11, %vm5134_vm13 }
  0xa8   :  { %584 = vrot.lane.b32.xlu1 %v556_v45, %s4654_s6  ;;  %vm7798_vm2 = vcmp.ge.f32.partialorder %v86_v37, 0.0  ;;  %v138_v26 = vsel %vm102_vm12, %v84_v57, %v120_v13  ;;  %v497_v27 = vunpack.c.l.b16 %v5032_v35  ;;  %v225_v3 = vsel %vm7799_vm5, 65537, %v7706_v0  ;;  %vm489_vm1 = vmpackc.low %vm5181_vm4, %vm5171_vm9 }
  0xa9   :  { %v140_v25 = vsel %vm7798_vm2, %v86_v37, %v122_v56  ;;  %v537_v28 = vunpack.c.h.b16 %v5125_v14  ;;  %v88_v29 = vadd.f32 %v4859_v61, %v64_v48  ;;  %v498_v31 = vunpack.c.h.b16 %v5032_v35  ;;  %vm7800_vm2 = vmpackc.low %vm5146_vm0, %vm5142_vm15 }
  0xaa   :  { %v243_v34 = vrot.slane %v228_v18, 4  ;;  %v224_v36 = vsel %vm7800_vm2, 65537, %v7706_v0  ;;  %v5214_v37 = vpack.c.bf16 %v138_v26, %v137_v22  ;;  %vm496_vm13 = vmpackc.low %vm5188_vm10, %vm5162_vm6  ;;  %v5220_v14 = vpack.c.bf16 %v140_v25, %v139_v24 }
  0xab   :  { %v123_v61 = vmul.f32 0.01, %v87_v20  ;;  %vm105_vm11 = vcmp.ge.f32.partialorder %v87_v20, 0.0  ;;  %vm106_vm14 = vcmp.ge.f32.partialorder %v88_v29, 0.0  ;;  %v124_v38 = vmul.f32 0.01, %v88_v29 }
  0xac   :  { %v510_v35 = vsel %vm489_vm1, %v5214_v37, 0  ;;  %vm7698_vm4 = vcmask 777216   ;;  %v554_v40 = vpack.c.b16 %v537_v28, %v537_v28  ;;  %v538_v41 = vunpack.c.l.b16 %v5091_v8 }
  0xad   :  { %v252_v45 = vsel %vm7698_vm4, %v243_v34, %v228_v18  ;;  %v511_v47 = vsel %vm496_vm13, %v5220_v14, 0  ;;  %vm5231_vm15 = vcmp.ne.s32.totalorder %v497_v27, %v4901_v30  ;;  %vm5236_vm1 = vcmp.ne.s32.totalorder %v498_v31, %v4905_v32 }
  0xae   :  { %239 = vrot.lane.b32.xlu0 %v225_v3, %s4653_s10  ;;  %237 = vrot.lane.b32.xlu2 %v224_v36, %s4653_s10  ;;  %v540_v46 = vunpack.c.l.b16 %v510_v35  ;;  %v141_v8 = vsel %vm105_vm11, %v87_v20, %v123_v61  ;;  %v142_v52 = vsel %vm106_vm14, %v88_v29, %v124_v38  ;;  %v244_v53 = vrot.slane %v230_v39, 4  ;;  %vm503_vm0 = vmpackc.low %vm5236_vm1, %vm5231_vm15 }
  0xaf   :  { %v1226_v54 = vadd.s32 1, %v4703_v2  ;;  %v245_v56 = vrot.slane %v5226_v43, 4  ;;  %v268_v57 = vunpack.c.l.b16 %v252_v45  ;;  %v269_v59 = vunpack.c.h.b16 %v252_v45 }
  0xb0   :  { %580 = vrot.lane.b32.xlu1 %v554_v40, %s4654_s6  ;;  %v543_v62 = vunpack.c.h.b16 %v511_v47  ;;  %v555_v23 = vpack.c.b16 %v538_v41, %v538_v41  ;;  %v5247_v63 = vpack.c.bf16 %v142_v52, %v141_v8  ;;  %vm7805_vm12 = vcmask 1043456  }
  0xb1   :  { %vm1228_vm6 = vcmp.ge.s32.totalorder %v1226_v54, 0  ;;  %vm1230_vm10 = vcmp.lt.s32.totalorder %v1226_v54, 32  ;;  %v254_v1 = vsel %vm7805_vm12, %v243_v34, %v244_v53  ;;  %v557_v9 = vpack.c.b16 %v540_v46, %v540_v46  ;;  %vm7813_vm13 = vmmov %vm7805_vm12 }
  0xb2   :  { %v512_v2 = vsel %vm503_vm0, %v5247_v63, 0  ;;  %vm5252_vm9 = vmand %vm1228_vm6, %vm1230_vm10  ;;  %v7806_v13 = vmov 0  ;;  %vm5257_vm5 = vcmp.ne.s32.totalorder %v268_v57, %v4901_v30  ;;  %vm5262_vm2 = vcmp.ne.s32.totalorder %v269_v59, %v4905_v32 }
  0xb3   :  { %v7807_v13 = vsel %vm5252_vm9, 4294967295, %v7806_v13  ;;  %v560_v22 = vpack.c.b16 %v543_v62, %v543_v62  ;;  %v256_v60 = vsel %vm7813_vm13, %v244_v53, %v245_v56  ;;  %v255_v48 = vsel %vm7698_vm4, %v254_v1, %v230_v39  ;;  %vm274_vm15 = vmpackc.low %vm5262_vm2, %vm5257_vm5 }
  0xb4   :  { %7808 = vst [vmem:[#allocation6_spill] sm:$0xff] %v7807_v13  ;;  %v542_v20 = vunpack.c.l.b16 %v511_v47  ;;  %v544_v17 = vunpack.c.l.b16 %v512_v2  ;;  %vm7814_vm11 = vcmp.ge.s32.totalorder %v4709_v4, 0  ;;  %v193_v24 = vperm.slane %v4963_v42, 6 }
  0xb5   :  { %vm1234_vm14 = vmand %vm5252_vm9, %vm7814_vm11  ;;  %v194_v25 = vperm.slane %v4963_v42, 7  ;;  %v257_v26 = vsel %vm7698_vm4, %v256_v60, %v5226_v43  ;;  %v541_v27 = vunpack.c.h.b16 %v510_v35  ;;  %v275_v3 = vunpack.c.l.b16 %v255_v48 }
  0xb6   :  { %582 = vrot.lane.b32.xlu0 %v555_v23, %s4654_s6  ;;  %586 = vrot.lane.b32.xlu2 %v557_v9, %s4654_s6  ;;  %v276_v28 = vunpack.c.h.b16 %v255_v48  ;;  %v559_v29 = vpack.c.b16 %v542_v20, %v542_v20  ;;  %vm7815_vm1 = vcmp.lt.s32.totalorder %v4709_v4, 32  ;;  %v561_v31 = vpack.c.b16 %v544_v17, %v544_v17 }
  0xb7   :  { %vm1236_vm0 = vmand %vm1234_vm14, %vm7815_vm1  ;;  %v331_v34 = vsel %vm274_vm15, %v4912_v49, 0  ;;  %vm5288_vm6 = vcmp.eq.s32.totalorder %v193_v24, 1  ;;  %vm5292_vm10 = vcmp.eq.s32.totalorder %v194_v25, 1  ;;  %v282_v61 = vunpack.c.l.b16 %v257_v26 }
  0xb8   :  { %592 = vrot.lane.b32.xlu1 %v560_v22, %s4654_s6  ;;  %v283_v35 = vunpack.c.h.b16 %v257_v26  ;;  %v558_v38 = vpack.c.b16 %v541_v27, %v541_v27  ;;  %vm279_vm12 = vcmp.ne.s32.totalorder %v275_v3, %v4901_v30  ;;  %vm280_vm5 = vcmp.ne.s32.totalorder %v276_v28, %v4905_v32  ;;  %vm218_vm2 = vmpackc.low %vm5292_vm10, %vm5288_vm6 }
  0xb9   :  { %v5300_v4 = vsel %vm1236_vm0, 1, %v7706_v0  ;;  %v884_v39 = vunpack.c.h.b16 %v331_v34  ;;  %vm281_vm13 = vmpackc.low %vm280_vm5, %vm279_vm12  ;;  %vm286_vm11 = vcmp.ne.s32.totalorder %v282_v61, %v4901_v30  ;;  %v883_v45 = vunpack.c.l.b16 %v331_v34 }
  0xba   :  { %v1240_v40 = vperm.slane %v5300_v4, 0  ;;  %v1241_v41 = vperm.slane %v5300_v4, 1  ;;  %vm287_vm14 = vcmp.ne.s32.totalorder %v283_v35, %v4905_v32  ;;  %v226_v51 = vsel %vm218_vm2, 65537, %v7706_v0 }
  0xbb   :  { %v901_v47 = vpack.c.b16 %v884_v39, %v884_v39  ;;  %v332_v50 = vsel %vm281_vm13, %v4925_v7, 0  ;;  %vm288_vm15 = vmpackc.low %vm287_vm14, %vm286_vm11  ;;  %v900_v46 = vpack.c.b16 %v883_v45, %v883_v45  ;;  %v1242_v53 = vperm.slane %v5300_v4, 2 }
  0xbc   :  { %vm1256_vm1 = vcmp.eq.s32.totalorder %v1240_v40, 1  ;;  %vm1257_vm0 = vcmp.eq.s32.totalorder %v1241_v41, 1  ;;  %v886_v8 = vunpack.c.h.b16 %v332_v50  ;;  %v5316_v52 = vsel %vm288_vm15, %v4966_v44, 0 }
  0xbd   :  { %vm1272_vm6 = vmpackc.low %vm1257_vm0, %vm1256_vm1  ;;  %v1243_v54 = vperm.slane %v5300_v4, 3  ;;  %v887_v57 = vunpack.c.l.b16 %v5316_v52  ;;  %v1244_v23 = vperm.slane %v5300_v4, 4  ;;  %v1245_v1 = vperm.slane %v5300_v4, 5 }
  0xbe   :  { %590 = vrot.lane.b32.xlu0 %v559_v29, %s4654_s6  ;;  %594 = vrot.lane.b32.xlu2 %v561_v31, %s4654_s6  ;;  %v903_v59 = vpack.c.b16 %v886_v8, %v886_v8  ;;  %v1280_v62 = vsel %vm1272_vm6, 65537, %v7706_v0  ;;  %vm1258_vm10 = vcmp.eq.s32.totalorder %v1242_v53, 1  ;;  %v885_v2 = vunpack.c.l.b16 %v332_v50 }
  0xbf   :  { %vm1259_vm12 = vcmp.eq.s32.totalorder %v1243_v54, 1  ;;  %v904_v9 = vpack.c.b16 %v887_v57, %v887_v57  ;;  %vm1260_vm2 = vcmp.eq.s32.totalorder %v1244_v23, 1  ;;  %vm1261_vm13 = vcmp.eq.s32.totalorder %v1245_v1, 1 }
  0xc0   :  { %588 = vrot.lane.b32.xlu1 %v558_v38, %s4654_s6  ;;  %vm1273_vm5 = vmpackc.low %vm1259_vm12, %vm1258_vm10  ;;  %v902_v18 = vpack.c.b16 %v885_v2, %v885_v2  ;;  %v1227_v20 = vadd.s32 1, %v4716_v5  ;;  %v7820_v25 = vmov 0  ;;  %vm7823_vm0 = vcmask 1043456  }
  0xc1   :  { %v1281_v16 = vsel %vm1273_vm5, 65537, %v7706_v0  ;;  %vm1274_vm11 = vmpackc.low %vm1261_vm13, %vm1260_vm2  ;;  %vm7824_vm6 = vcmp.ge.s32.totalorder %v4733_v10, 0  ;;  %vm7825_vm12 = vcmp.lt.s32.totalorder %v4733_v10, 32  ;;  %vm596_vm2 = vcmask 261120  }
  0xc2   :  { %v1282_v22 = vsel %vm1274_vm11, 65537, %v7706_v0  ;;  %vm1229_vm14 = vcmp.ge.s32.totalorder %v1227_v20, 0  ;;  %vm1231_vm15 = vcmp.lt.s32.totalorder %v1227_v20, 32  ;;  %v888_v53 = vunpack.c.h.b16 %v5316_v52 }
  0xc3   :  { %vm5339_vm1 = vmand %vm1229_vm14, %vm1231_vm15  ;;  %vm7701_vm15 = vcmask 64512  }
  0xc4   :  { %v7821_v25 = vsel %vm5339_vm1, 4294967295, %v7820_v25  ;;  %vm1235_vm10 = vmand %vm5339_vm1, %vm7824_vm6  ;;  %v905_v1 = vpack.c.b16 %v888_v53, %v888_v53 }
  0xc5   :  { %7822 = vst [vmem:[#allocation7_spill] sm:$0xff] %v7821_v25  ;;  %vm1237_vm5 = vmand %vm1235_vm10, %vm7825_vm12 }
  0xc6   :  { %919 = vrot.lane.b32.xlu0 %v901_v47, %s4655_s0  ;;  %241 = vrot.lane.b32.xlu2 %v226_v51, %s4653_s10  ;;  %v5357_v28 = vsel %vm1237_vm5, 1, %v7706_v0  ;;  %vm7826_vm6 = vmmov %vm7823_vm0 }
  0xc7   :  { %v1248_v42 = vperm.slane %v5357_v28, 0  ;;  %v1249_v39 = vperm.slane %v5357_v28, 1  ;;  %vm7831_vm5 = vmmov %vm7823_vm0  ;;  %v1251_v53 = vperm.slane %v5357_v28, 3 }
  0xc8   :  { %917 = vrot.lane.b32.xlu1 %v900_v46, %s4655_s0 }
  0xc9   :  { %vm5376_vm10 = vcmp.eq.s32.totalorder %v1248_v42, 1  ;;  %vm5380_vm12 = vcmp.eq.s32.totalorder %v1249_v39, 1  ;;  %v1252_v42 = vperm.slane %v5357_v28, 4 }
  0xce   :  { %923 = vrot.lane.b32.xlu0 %v903_v59, %s4655_s0  ;;  %1288 = vrot.lane.b32.xlu2 %v1280_v62, %s4656_s24 }
  0xd0   :  { %925 = vrot.lane.b32.xlu1 %v904_v9, %s4655_s0 }
  0xd6   :  { %1290 = vrot.lane.b32.xlu0 %v1281_v16, %s4656_s24  ;;  %921 = vrot.lane.b32.xlu2 %v902_v18, %s4655_s0 }
  0xd8   :  { %1292 = vrot.lane.b32.xlu1 %v1282_v22, %s4656_s24 }
  0xe8   :  { %v565_v60 = vpop.permute.xlu2 %564 }
  0xf0   :  { %v5333_v48 = vpop.permute.xlu2 %570 }
  0xf8   :  { %v5336_v17 = vpop.permute.xlu2 %233 }
  0xf9   :  { %v246_v24 = vrot.slane %v5336_v17, 4 }
  0xfb   :  { %v258_v26 = vsel %vm7823_vm0, %v245_v56, %v246_v24 }
  0xfc   :  { %v259_v5 = vsel %vm7698_vm4, %v258_v26, %v5336_v17 }
  0xfd   :  { %v289_v27 = vunpack.c.l.b16 %v259_v5  ;;  %v290_v3 = vunpack.c.h.b16 %v259_v5 }
  0xff   :  { %vm293_vm13 = vcmp.ne.s32.totalorder %v289_v27, %v4901_v30  ;;  %vm294_vm11 = vcmp.ne.s32.totalorder %v290_v3, %v4905_v32 }
 0x100   :  { %v563_v43 = vpop.permute.xlu0 %562  ;;  %vm295_vm14 = vmpackc.low %vm294_vm11, %vm293_vm13  ;;  %v5361_v29 = vpop.permute.xlu2 %578 }
 0x101   :  { %v569_v56 = vpop.permute.xlu1 %568  ;;  %v597_v31 = vsel %vm596_vm2, %v563_v43, %v565_v60  ;;  %v334_v36 = vsel %vm295_vm14, %v4942_v19, 0  ;;  %vm7832_vm13 = vmmov %vm7823_vm0 }
 0x102   :  { %v619_v10 = vsel %vm7823_vm0, %v597_v31, 0  ;;  %v600_v34 = vsel %vm596_vm2, %v569_v56, %v5333_v48  ;;  %v890_v35 = vunpack.c.h.b16 %v334_v36  ;;  %v889_v38 = vunpack.c.l.b16 %v334_v36  ;;  %vm1276_vm11 = vmpackc.low %vm5380_vm12, %vm5376_vm10 }
 0x103   :  { %673 = vmatpush.bf16.msra.mxu0 %v619_v10  ;;  %v628_v61 = vsel %vm7826_vm6, %v600_v34, 0  ;;  %vm7833_vm14 = vmmov %vm7823_vm0  ;;  %v1284_v52 = vsel %vm1276_vm11, 65537, %v7706_v0  ;;  %v1246_v10 = vperm.slane %v5300_v4, 6  ;;  %v1247_v36 = vperm.slane %v5300_v4, 7 }
 0x104   :  { %712 = vmatpush.bf16.msra.mxu3 %v628_v61  ;;  %v907_v40 = vpack.c.b16 %v890_v35, %v890_v35  ;;  %v906_v41 = vpack.c.b16 %v889_v38, %v889_v38  ;;  %vm7834_vm6 = vmmov %vm7823_vm0 }
 0x105   :  { %vm7835_vm10 = vmmov %vm7823_vm0 }
 0x106   :  { %4452 = vmatmul.msk.bf16.vlgmr.msra.gmra.mxu0 %vm7701_vm15, %v5103_v33  ;;  %931 = vrot.lane.b32.xlu2 %v907_v40, %s4655_s0  ;;  %v1253_v40 = vperm.slane %v5357_v28, 5 }
 0x107   :  { %4455 = vmatmul.msk.bf16.vlgmr.msra.gmra.mxu3 %vm7701_vm15, %v5103_v33  ;;  %929 = vrot.lane.b32.xlu1 %v906_v41, %s4655_s0 }
 0x108   :  { %v567_v51 = vpop.permute.xlu0 %566  ;;  %v5385_v50 = vpop.permute.xlu2 %237 }
 0x109   :  { %v598_v46 = vsel %vm596_vm2, %v565_v60, %v567_v51  ;;  %v599_v8 = vsel %vm596_vm2, %v567_v51, %v569_v56  ;;  %v248_v9 = vrot.slane %v5385_v50, 4 }
 0x10a   :  { %v622_v54 = vsel %vm7831_vm5, %v598_v46, 0  ;;  %v625_v57 = vsel %vm7832_vm13, %v599_v8, 0  ;;  %v577_v59 = vpop.permute.xlu1 %576 }
 0x10b   :  { %686 = vmatpush.bf16.msra.mxu1 %v622_v54  ;;  %699 = vmatpush.bf16.msra.mxu2 %v625_v57  ;;  %v604_v62 = vsel %vm596_vm2, %v577_v59, %v5361_v29 }
 0x10c   :  { %v640_v23 = vsel %vm7833_vm14, %v604_v62, 0 }
 0x10d   :  { %764 = vmatpush.bf16.msrb.mxu3 %v640_v23 }
 0x10e   :  { %4453 = vmatmul.msk.bf16.vlgmr.msra.gmra.mxu1 %vm7701_vm15, %v5103_v33  ;;  %4454 = vmatmul.msk.bf16.vlgmr.msra.gmra.mxu2 %vm7701_vm15, %v5103_v33 }
 0x10f   :  { %927 = vrot.lane.b32.xlu2 %v905_v1, %s4655_s0  ;;  %1296 = vrot.lane.b32.xlu1 %v1284_v52, %s4656_s24 }
 0x110   :  { %v236_v2 = vpop.permute.xlu0 %235  ;;  %v5407_v18 = vpop.permute.xlu2 %586 }
 0x111   :  { %v247_v16 = vrot.slane %v236_v2, 4 }
 0x112   :  { %v573_v20 = vpop.permute.xlu1 %572 }
 0x113   :  { %v260_v22 = vsel %vm7823_vm0, %v246_v24, %v247_v16  ;;  %v262_v60 = vsel %vm7834_vm6, %v247_v16, %v248_v9  ;;  %v601_v27 = vsel %vm596_vm2, %v5333_v48, %v573_v20 }
 0x114   :  { %v261_v26 = vsel %vm7698_vm4, %v260_v22, %v236_v2  ;;  %v263_v5 = vsel %vm7698_vm4, %v262_v60, %v5385_v50  ;;  %v631_v56 = vsel %vm7835_vm10, %v601_v27, 0  ;;  %vm7840_vm10 = vmmov %vm7834_vm6 }
 0x115   :  { %v296_v3 = vunpack.c.l.b16 %v261_v26  ;;  %v297_v43 = vunpack.c.h.b16 %v261_v26  ;;  %v303_v17 = vunpack.c.l.b16 %v263_v5  ;;  %725 = vmatpush.bf16.msrb.mxu0 %v631_v56  ;;  %v304_v24 = vunpack.c.h.b16 %v263_v5 }
 0x117   :  { %vm5422_vm12 = vcmp.ne.s32.totalorder %v296_v3, %v4901_v30  ;;  %vm301_vm5 = vcmp.ne.s32.totalorder %v297_v43, %v4905_v32  ;;  %4459 = vmatmul.msk.bf16.vlgmr.msrb.gmra.mxu3 %vm7701_vm15, %v5103_v33  ;;  %vm5430_vm13 = vcmp.ne.s32.totalorder %v303_v17, %v4901_v30  ;;  %vm308_vm14 = vcmp.ne.s32.totalorder %v304_v24, %v4905_v32 }
 0x118   :  { %vm302_vm11 = vmpackc.low %vm301_vm5, %vm5422_vm12  ;;  %v575_v34 = vpop.permute.xlu0 %574  ;;  %4456 = vmatmul.msk.bf16.vlgmr.msrb.gmra.mxu0 %vm7701_vm15, %v5103_v33  ;;  %v5442_v61 = vpop.permute.xlu2 %594  ;;  %vm5453_vm12 = vcmp.eq.s32.totalorder %v1246_v10, 1  ;;  %vm5459_vm5 = vcmp.eq.s32.totalorder %v1247_v36, 1 }
 0x119   :  { %v602_v35 = vsel %vm596_vm2, %v573_v20, %v575_v34  ;;  %v603_v38 = vsel %vm596_vm2, %v575_v34, %v577_v59  ;;  %vm309_vm0 = vmpackc.low %vm308_vm14, %vm5430_vm13  ;;  %v335_v39 = vsel %vm302_vm11, %v5107_v15, 0  ;;  %vm5463_vm13 = vcmp.eq.s32.totalorder %v1252_v42, 1 }
 0x11a   :  { %v634_v4 = vsel %vm7834_vm6, %v602_v35, 0  ;;  %v637_v41 = vsel %vm7840_vm10, %v603_v38, 0  ;;  %v336_v45 = vsel %vm309_vm0, %v5080_v58, 0  ;;  %v891_v47 = vunpack.c.l.b16 %v335_v39  ;;  %v585_v51 = vpop.permute.xlu1 %584  ;;  %vm7847_vm11 = vmmov %vm7834_vm6 }
 0x11b   :  { %738 = vmatpush.bf16.msrb.mxu1 %v634_v4  ;;  %751 = vmatpush.bf16.msrb.mxu2 %v637_v41  ;;  %v894_v46 = vunpack.c.h.b16 %v336_v45  ;;  %v893_v8 = vunpack.c.l.b16 %v336_v45  ;;  %v608_v54 = vsel %vm596_vm2, %v585_v51, %v5407_v18  ;;  %vm5468_vm14 = vcmp.eq.s32.totalorder %v1253_v40, 1  ;;  %vm1275_vm0 = vmpackc.low %vm5459_vm5, %vm5453_vm12 }
 0x11c   :  { %v908_v57 = vpack.c.b16 %v891_v47, %v891_v47  ;;  %v652_v23 = vsel %vm7847_vm11, %v608_v54, 0  ;;  %v892_v22 = vunpack.c.h.b16 %v335_v39  ;;  %vm1278_vm6 = vmpackc.low %vm5468_vm14, %vm5463_vm13  ;;  %v1283_v3 = vsel %vm1275_vm0, 65537, %v7706_v0 }
 0x11d   :  { %v911_v1 = vpack.c.b16 %v894_v46, %v894_v46  ;;  %v910_v52 = vpack.c.b16 %v893_v8, %v893_v8  ;;  %816 = vmatpush.bf16.msra.mxu3 %v652_v23  ;;  %v1286_v43 = vsel %vm1278_vm6, 65537, %v7706_v0  ;;  %vm7850_vm12 = vmmov %vm7840_vm10  ;;  %v1250_v8 = vperm.slane %v5357_v28, 2 }
 0x11e   :  { %4457 = vmatmul.msk.bf16.vlgmr.msrb.gmra.mxu1 %vm7701_vm15, %v5103_v33  ;;  %4458 = vmatmul.msk.bf16.vlgmr.msrb.gmra.mxu2 %vm7701_vm15, %v5103_v33  ;;  %v909_v31 = vpack.c.b16 %v892_v22, %v892_v22  ;;  %vm7851_vm5 = vmmov %vm7840_vm10 }
 0x11f   :  { %939 = vrot.lane.b32.xlu2 %v911_v1, %s4655_s0  ;;  %933 = vrot.lane.b32.xlu0 %v908_v57, %s4655_s0 }
 0x120   :  { %937 = vrot.lane.b32.xlu1 %v910_v52, %s4655_s0  ;;  %v240_v16 = vpop.permute.xlu0 %239  ;;  %v242_v20 = vpop.permute.xlu2 %241 }
 0x121   :  { %v249_v60 = vrot.slane %v240_v16, 4  ;;  %v250_v26 = vrot.slane %v242_v20, 4 }
 0x122   :  { %v581_v27 = vpop.permute.xlu1 %580 }
 0x123   :  { %v264_v5 = vsel %vm7840_vm10, %v248_v9, %v249_v60  ;;  %v605_v17 = vsel %vm596_vm2, %v5361_v29, %v581_v27  ;;  %v266_v24 = vsel %vm7850_vm12, %v249_v60, %v250_v26  ;;  %vm7856_vm12 = vmmov %vm7851_vm5  ;;  %v324_v59 = vunpack.c.l.b16 %v250_v26 }
 0x124   :  { %v265_v56 = vsel %vm7698_vm4, %v264_v5, %v240_v16  ;;  %v643_v34 = vsel %vm7851_vm5, %v605_v17, 0  ;;  %v267_v50 = vsel %vm7698_vm4, %v266_v24, %v242_v20  ;;  %v325_v62 = vunpack.c.h.b16 %v250_v26 }
 0x125   :  { %v310_v48 = vunpack.c.l.b16 %v265_v56  ;;  %v311_v10 = vunpack.c.h.b16 %v265_v56  ;;  %v317_v9 = vunpack.c.l.b16 %v267_v50  ;;  %v318_v36 = vunpack.c.h.b16 %v267_v50  ;;  %777 = vmatpush.bf16.msra.mxu0 %v643_v34 }
 0x127   :  { %vm314_vm13 = vcmp.ne.s32.totalorder %v310_v48, %v4901_v30  ;;  %vm315_vm11 = vcmp.ne.s32.totalorder %v311_v10, %v4905_v32  ;;  %935 = vrot.lane.b32.xlu2 %v909_v31, %s4655_s0  ;;  %4463 = vmatmul.msk.bf16.vlgmr.msra.gmra.mxu3 %vm7701_vm15, %v5103_v33  ;;  %vm5504_vm0 = vcmp.ne.s32.totalorder %v317_v9, %v4901_v30 }
 0x128   :  { %vm316_vm14 = vmpackc.low %vm315_vm11, %vm314_vm13  ;;  %vm5509_vm6 = vcmp.ne.s32.totalorder %v318_v36, %v4905_v32  ;;  %1294 = vrot.lane.b32.xlu0 %v1283_v3, %s4656_s24  ;;  %1300 = vrot.lane.b32.xlu1 %v1286_v43, %s4656_s24  ;;  %v583_v35 = vpop.permute.xlu0 %582  ;;  %v5532_v52 = vpop.permute.xlu2 %1288  ;;  %vm5538_vm11 = vcmp.eq.s32.totalorder %v1250_v8, 1 }
 0x129   :  { %vm323_vm10 = vmpackc.low %vm5509_vm6, %vm5504_vm0  ;;  %4460 = vmatmul.msk.bf16.vlgmr.msra.gmra.mxu0 %vm7701_vm15, %v5103_v33  ;;  %v606_v38 = vsel %vm596_vm2, %v581_v27, %v583_v35  ;;  %v607_v39 = vsel %vm596_vm2, %v583_v35, %v585_v51  ;;  %v337_v40 = vsel %vm316_vm14, %v5214_v37, 0  ;;  %vm5542_vm14 = vcmp.eq.s32.totalorder %v1251_v53, 1 }
 0x12a   :  { %v646_v4 = vsel %vm7856_vm12, %v606_v38, 0  ;;  %v649_v41 = vsel %vm7851_vm5, %v607_v39, 0  ;;  %v895_v45 = vunpack.c.l.b16 %v337_v40  ;;  %v593_v47 = vpop.permute.xlu1 %592  ;;  %v338_v46 = vsel %vm323_vm10, %v5220_v14, 0  ;;  %vm7857_vm13 = vmmov %vm7851_vm5 }
 0x12b   :  { %790 = vmatpush.bf16.msra.mxu1 %v646_v4  ;;  %803 = vmatpush.bf16.msra.mxu2 %v649_v41  ;;  %v612_v54 = vsel %vm596_vm2, %v593_v47, %v5442_v61  ;;  %v898_v57 = vunpack.c.h.b16 %v338_v46  ;;  %v897_v1 = vunpack.c.l.b16 %v338_v46  ;;  %vm5551_vm0 = vcmp.ne.s32.totalorder %v324_v59, %v4901_v30  ;;  %vm7866_vm10 = vmmov %vm7851_vm5 }
 0x12c   :  { %v912_v51 = vpack.c.b16 %v895_v45, %v895_v45  ;;  %v664_v23 = vsel %vm7857_vm13, %v612_v54, 0  ;;  %vm5556_vm6 = vcmp.ne.s32.totalorder %v325_v62, %v4905_v32  ;;  %vm1277_vm12 = vmpackc.low %vm5542_vm14, %vm5538_vm11  ;;  %v896_v3 = vunpack.c.h.b16 %v337_v40 }
 0x12d   :  { %868 = vmatpush.bf16.msrb.mxu3 %v664_v23  ;;  %v915_v2 = vpack.c.b16 %v898_v57, %v898_v57  ;;  %v914_v16 = vpack.c.b16 %v897_v1, %v897_v1  ;;  %vm330_vm5 = vmpackc.low %vm5556_vm6, %vm5551_vm0  ;;  %v1285_v48 = vsel %vm1277_vm12, 65537, %v7706_v0  ;;  %vm7699_vm11 = vcmask 269312  }
 0x12e   :  { %4461 = vmatmul.msk.bf16.vlgmr.msra.gmra.mxu1 %vm7701_vm15, %v5103_v33  ;;  %4462 = vmatmul.msk.bf16.vlgmr.msra.gmra.mxu2 %vm7701_vm15, %v5103_v33  ;;  %vm7867_vm13 = vmmov %vm7866_vm10  ;;  %v913_v10 = vpack.c.b16 %v896_v3, %v896_v3  ;;  %v1254_v35 = vperm.slane %v5357_v28, 6  ;;  %v1255_v38 = vperm.slane %v5357_v28, 7 }
 0x12f   :  { %947 = vrot.lane.b32.xlu2 %v915_v2, %s4655_s0 }
 0x130   :  { %941 = vrot.lane.b32.xlu0 %v912_v51, %s4655_s0  ;;  %v591_v60 = vpop.permute.xlu0 %590  ;;  %945 = vrot.lane.b32.xlu1 %v914_v16, %s4655_s0  ;;  %v922_v34 = vpop.permute.xlu2 %921  ;;  %vm1270_vm0 = vcmp.eq.s32.totalorder %v1254_v35, 1  ;;  %vm1271_vm6 = vcmp.eq.s32.totalorder %v1255_v38, 1  ;;  %v5617_v16 = vld [vmem:[%s7686_s1 + $0x1] ss:$2 sm:$0xff] }
 0x131   :  { %v611_v20 = vsel %vm596_vm2, %v591_v60, %v593_v47  ;;  %v1304_v47 = vrot.slane %v5532_v52, 4  ;;  %7872 = vst [vmem:[#allocation8_spill] sm:$0xff] %v5617_v16  ;;  %v1403_v38 = vld.sshfl [vmem:[#allocation1] sm:$0xff pattern:$0x73625140] }
 0x132   :  { %v661_v27 = vsel %vm7866_vm10, %v611_v20, 0  ;;  %v589_v43 = vpop.permute.xlu1 %588 }
 0x133   :  { %855 = vmatpush.bf16.msrb.mxu2 %v661_v27  ;;  %v609_v56 = vsel %vm596_vm2, %v5407_v18, %v589_v43  ;;  %v610_v17 = vsel %vm596_vm2, %v589_v43, %v591_v60  ;;  %v339_v18 = vsel %vm330_vm5, %v5247_v63, 0  ;;  %vm7868_vm2 = vmmov %vm7866_vm10 }
 0x134   :  { %v655_v24 = vsel %vm7867_vm13, %v609_v56, 0  ;;  %v658_v31 = vsel %vm7866_vm10, %v610_v17, 0  ;;  %v899_v29 = vunpack.c.l.b16 %v339_v18  ;;  %vm7869_vm14 = vmmov %vm7868_vm2  ;;  %vm7700_vm13 = vcmask 793600  }
 0x135   :  { %829 = vmatpush.bf16.msrb.mxu0 %v655_v24  ;;  %842 = vmatpush.bf16.msrb.mxu1 %v658_v31  ;;  %vm7870_vm12 = vmmov %vm7868_vm2  ;;  %v1313_v54 = vsel %vm7700_vm13, %v1304_v47, %v5532_v52 }
 0x136   :  { %v916_v4 = vpack.c.b16 %v899_v29, %v899_v29  ;;  %vm1279_vm5 = vmpackc.low %vm1271_vm6, %vm1270_vm0  ;;  %v1328_v59 = vunpack.c.l.b16 %v1313_v54  ;;  %v1329_v62 = vunpack.c.h.b16 %v1313_v54 }
 0x137   :  { %4467 = vmatmul.msk.bf16.vlgmr.msrb.gmra.mxu3 %vm7701_vm15, %v5103_v33  ;;  %943 = vrot.lane.b32.xlu2 %v913_v10, %s4655_s0  ;;  %vm7871_vm10 = vmmov %vm7868_vm2  ;;  %v1287_v53 = vsel %vm1279_vm5, 65537, %v7706_v0 }
 0x138   :  { %1298 = vrot.lane.b32.xlu0 %v1285_v48, %s4656_s24  ;;  %v920_v50 = vpop.permute.xlu0 %919  ;;  %vm5621_vm0 = vcmp.ne.s32.totalorder %v1328_v59, %v4901_v30  ;;  %vm5626_vm6 = vcmp.ne.s32.totalorder %v1329_v62, %v4905_v32 }
 0x139   :  { %4464 = vmatmul.msk.bf16.vlgmr.msrb.gmra.mxu0 %vm7701_vm15, %v5103_v33  ;;  %v953_v9 = vsel %vm7699_vm11, %v920_v50, %v922_v34 }
 0x13a   :  { %v974_v36 = vsel %vm7868_vm2, %v953_v9, 0  ;;  %v918_v42 = vpop.permute.xlu1 %917 }
 0x13b   :  { %1038 = vmatpush.bf16.msra.mxu1 %v974_v36  ;;  %v952_v39 = vsel %vm7699_vm11, %v918_v42, %v920_v50 }
 0x13c   :  { %v971_v40 = vsel %vm7869_vm14, %v952_v39, 0  ;;  %vm7702_vm14 = vcmp.ge.s32.totalorder %v5617_v16, 0 }
 0x13d   :  { %1025 = vmatpush.bf16.msra.mxu0 %v971_v40 }
 0x13e   :  { %4465 = vmatmul.msk.bf16.vlgmr.msrb.gmra.mxu1 %vm7701_vm15, %v5103_v33  ;;  %4466 = vmatmul.msk.bf16.vlgmr.msrb.gmra.mxu2 %vm7701_vm15, %v5103_v33 }
 0x140   :  { %949 = vrot.lane.b32.xlu0 %v916_v4, %s4655_s0  ;;  %v924_v41 = vpop.permute.xlu0 %923 }
 0x141   :  { %v954_v45 = vsel %vm7699_vm11, %v922_v34, %v924_v41 }
 0x142   :  { %v977_v28 = vsel %vm7870_vm12, %v954_v45, 0  ;;  %v5596_v46 = vpop.permute.xlu1 %925  ;;  %vm7877_vm12 = vmmov %vm7868_vm2 }
 0x143   :  { %1051 = vmatpush.bf16.msra.mxu2 %v977_v28  ;;  %v955_v8 = vsel %vm7699_vm11, %v924_v41, %v5596_v46  ;;  %vm1334_vm11 = vmpackc.low %vm5626_vm6, %vm5621_vm0 }
 0x144   :  { %v980_v33 = vsel %vm7871_vm10, %v955_v8, 0  ;;  %v1391_v18 = vsel %vm1334_vm11, %v4912_v49, 0 }
 0x145   :  { %1064 = vmatpush.bf16.msra.mxu3 %v980_v33  ;;  %v1416_v9 = vunpack.c.l.b16 %v1391_v18  ;;  %v1417_v39 = vunpack.c.h.b16 %v1391_v18 }
 0x147   :  { %v1433_v40 = vpack.c.b16 %v1416_v9, %v1416_v9  ;;  %v1434_v8 = vpack.c.b16 %v1417_v39, %v1417_v39  ;;  %v5732_v39 = vld [vmem:[%s7686_s1 + $0x11] ss:$2 sm:$0xff] }
 0x148   :  { %1302 = vrot.lane.b32.xlu0 %v1287_v53, %s4656_s24  ;;  %v1291_v51 = vpop.permute.xlu0 %1290  ;;  %4471 = vmatmul.msk.bf16.vlgmr.msra.gmra.mxu3 %vm7701_vm15, %v4742_v12  ;;  %7901 = vst [vmem:[#allocation9_spill] sm:$0xff] %v5732_v39 }
 0x149   :  { %4468 = vmatmul.msk.bf16.vlgmr.msra.gmra.mxu0 %vm7701_vm15, %v4742_v12  ;;  %v1305_v57 = vrot.slane %v1291_v51, 4 }
 0x14a   :  { %v5610_v1 = vpop.permute.xlu1 %1292 }
 0x14b   :  { %v1314_v23 = vsel %vm7868_vm2, %v1304_v47, %v1305_v57  ;;  %v1306_v52 = vrot.slane %v5610_v1, 4  ;;  %vm1778_vm2 = vmand %vm4764_vm8, %vm7702_vm14 }
 0x14c   :  { %v1315_v2 = vsel %vm7700_vm13, %v1314_v23, %v1291_v51 }
 0x14d   :  { %v1335_v61 = vunpack.c.l.b16 %v1315_v2  ;;  %v1336_v22 = vunpack.c.h.b16 %v1315_v2  ;;  %v1316_v26 = vsel %vm7877_vm12, %v1305_v57, %v1306_v52  ;;  %vm1780_vm12 = vcmp.lt.s32.totalorder %v5617_v16, 32 }
 0x14e   :  { %4469 = vmatmul.msk.bf16.vlgmr.msra.gmra.mxu1 %vm7701_vm15, %v4742_v12  ;;  %v1317_v5 = vsel %vm7700_vm13, %v1316_v26, %v5610_v1  ;;  %4470 = vmatmul.msk.bf16.vlgmr.msra.gmra.mxu2 %vm7701_vm15, %v4742_v12  ;;  %vm1782_vm14 = vmand %vm1778_vm2, %vm1780_vm12  ;;  %vm7885_vm2 = vcmask 1043456  }
 0x14f   :  { %vm1339_vm5 = vcmp.ne.s32.totalorder %v1335_v61, %v4901_v30  ;;  %vm1340_vm10 = vcmp.ne.s32.totalorder %v1336_v22, %v4905_v32  ;;  %v1342_v27 = vunpack.c.l.b16 %v1317_v5  ;;  %v1343_v3 = vunpack.c.h.b16 %v1317_v5 }
 0x150   :  { %vm1341_vm4 = vmpackc.low %vm1340_vm10, %vm1339_vm5  ;;  %v5661_v34 = vsel %vm1782_vm14, 1, %v7706_v0  ;;  %vm7884_vm10 = vcmask 269312  }
 0x151   :  { %v1392_v43 = vsel %vm1341_vm4, %v4925_v7, 0  ;;  %vm1346_vm13 = vcmp.ne.s32.totalorder %v1342_v27, %v4901_v30  ;;  %vm1347_vm15 = vcmp.ne.s32.totalorder %v1343_v3, %v4905_v32  ;;  %v1790_v36 = vperm.slane %v5661_v34, 4 }
 0x152   :  { %v1418_v56 = vunpack.c.l.b16 %v1392_v43  ;;  %v1419_v17 = vunpack.c.h.b16 %v1392_v43  ;;  %vm1348_vm8 = vmpackc.low %vm1347_vm15, %vm1346_vm13  ;;  %v1791_v29 = vperm.slane %v5661_v34, 5  ;;  %v1786_v42 = vperm.slane %v5661_v34, 0 }
 0x153   :  { %v5656_v48 = vsel %vm1348_vm8, %v4966_v44, 0  ;;  %v1787_v35 = vperm.slane %v5661_v34, 1  ;;  %vm5670_vm8 = vcmp.eq.s32.totalorder %v1790_v36, 1  ;;  %v1788_v28 = vperm.slane %v5661_v34, 2 }
 0x154   :  { %v1435_v24 = vpack.c.b16 %v1418_v56, %v1418_v56  ;;  %v1436_v31 = vpack.c.b16 %v1419_v17, %v1419_v17  ;;  %v1420_v10 = vunpack.c.l.b16 %v5656_v48  ;;  %vm5674_vm4 = vcmp.eq.s32.totalorder %v1791_v29, 1 }
 0x155   :  { %vm5678_vm15 = vcmp.eq.s32.totalorder %v1786_v42, 1  ;;  %vm1803_vm11 = vcmp.eq.s32.totalorder %v1787_v35, 1  ;;  %v1789_v47 = vperm.slane %v5661_v34, 3  ;;  %vm1820_vm13 = vmpackc.low %vm5674_vm4, %vm5670_vm8  ;;  %vm1804_vm0 = vcmp.eq.s32.totalorder %v1788_v28, 1 }
 0x156   :  { %1454 = vrot.lane.b32.xlu0 %v1435_v24, %s4657_s27  ;;  %1456 = vrot.lane.b32.xlu1 %v1436_v31, %s4657_s27  ;;  %v1437_v50 = vpack.c.b16 %v1420_v10, %v1420_v10  ;;  %vm1818_vm14 = vmpackc.low %vm1803_vm11, %vm5678_vm15  ;;  %v1828_v53 = vsel %vm1820_vm13, 65537, %v7706_v0  ;;  %vm7886_vm8 = vcmask 64512  }
 0x157   :  { %vm1805_vm6 = vcmp.eq.s32.totalorder %v1789_v47, 1  ;;  %v1826_v54 = vsel %vm1818_vm14, 65537, %v7706_v0  ;;  %vm7887_vm4 = vmmov %vm7884_vm10 }
 0x158   :  { %1458 = vrot.lane.b32.xlu2 %v1437_v50, %s4657_s27  ;;  %vm1819_vm5 = vmpackc.low %vm1805_vm6, %vm1804_vm0 }
 0x159   :  { %v1827_v51 = vsel %vm1819_vm5, 65537, %v7706_v0  ;;  %vm7888_vm15 = vmmov %vm7887_vm4 }
 0x15a   :  { %vm7889_vm11 = vmmov %vm7885_vm2 }
 0x15b   :  { %vm7890_vm13 = vmmov %vm7885_vm2 }
 0x15c   :  { %vm7891_vm14 = vmmov %vm7886_vm8 }
 0x15d   :  { %vm7892_vm0 = vmmov %vm7886_vm8 }
 0x15e   :  { %1450 = vrot.lane.b32.xlu0 %v1433_v40, %s4657_s27  ;;  %1405 = vrot.lane.b32.xlu1 %v1403_v38, %s4658_s28  ;;  %vm7893_vm6 = vmmov %vm7887_vm4 }
 0x15f   :  { %vm7894_vm5 = vmmov %vm7887_vm4 }
 0x160   :  { %1452 = vrot.lane.b32.xlu2 %v1434_v8, %s4657_s27  ;;  %v932_v33 = vpop.permute.xlu2 %931 }
 0x166   :  { %1838 = vrot.lane.b32.xlu0 %v1828_v53, %s4659_s29  ;;  %1834 = vrot.lane.b32.xlu1 %v1826_v54, %s4659_s29 }
 0x168   :  { %1836 = vrot.lane.b32.xlu2 %v1827_v51, %s4659_s29 }
 0x169   :  { %v928_v57 = vpop.permute.xlu2 %927 }
 0x16a   :  { %v956_v59 = vsel %vm7884_vm10, %v5596_v46, %v928_v57  ;;  %vm7895_vm10 = vmmov %vm7887_vm4 }
 0x16b   :  { %v983_v62 = vsel %vm7885_vm2, %v956_v59, 0  ;;  %vm7896_vm2 = vmmov %vm7887_vm4 }
 0x16c   :  { %1077 = vmatpush.bf16.msrb.mxu0 %v983_v62 }
 0x16f   :  { %4472 = vmatmul.msk.bf16.vlgmr.msrb.gmra.mxu0 %vm7886_vm8, %v4742_v12  ;;  %vm7897_vm8 = vmmov %vm7889_vm11 }
 0x179   :  { %v930_v23 = vpop.permute.xlu1 %929  ;;  %v940_v20 = vpop.permute.xlu2 %939 }
 0x17a   :  { %v957_v2 = vsel %vm7887_vm4, %v928_v57, %v930_v23  ;;  %v958_v61 = vsel %vm7888_vm15, %v930_v23, %v932_v33  ;;  %vm7898_vm4 = vmmov %vm7897_vm8 }
 0x17b   :  { %v986_v22 = vsel %vm7889_vm11, %v957_v2, 0  ;;  %v989_v60 = vsel %vm7890_vm13, %v958_v61, 0  ;;  %vm7899_vm15 = vmmov %vm7898_vm4  ;;  %vm7705_vm13 = vcmp.ge.s32.totalorder %v5732_v39, 0 }
 0x17c   :  { %1090 = vmatpush.bf16.msrb.mxu1 %v986_v22  ;;  %1103 = vmatpush.bf16.msrb.mxu2 %v989_v60  ;;  %vm7900_vm11 = vmmov %vm7898_vm4 }
 0x17f   :  { %4473 = vmatmul.msk.bf16.vlgmr.msrb.gmra.mxu1 %vm7891_vm14, %v4742_v12  ;;  %4474 = vmatmul.msk.bf16.vlgmr.msrb.gmra.mxu2 %vm7892_vm0, %v4742_v12  ;;  %vm7902_vm14 = vmmov %vm7892_vm0 }
 0x181   :  { %v5713_v26 = vpop.permute.xlu1 %1296  ;;  %v936_v43 = vpop.permute.xlu2 %935 }
 0x182   :  { %v1308_v41 = vrot.slane %v5713_v26, 4 }
 0x183   :  { %v5711_v46 = vpop.f32.mrf.mxu0 }
 0x189   :  { %v5737_v4 = vpop.permute.xlu2 %947 }
 0x18a   :  { %v5715_v5 = vpop.f32.mrf.mxu3 }
 0x18b   :  { %v677_v27 = vpop.f32.mrf.mxu0  ;;  %v5717_v3 = vpop.f32.mrf.mxu1 }
 0x191   :  { %v934_v56 = vpop.permute.xlu0 %933  ;;  %v5723_v50 = vpop.f32.mrf.mxu2 }
 0x192   :  { %v938_v17 = vpop.permute.xlu1 %937  ;;  %v959_v24 = vsel %vm7893_vm6, %v932_v33, %v934_v56  ;;  %v960_v31 = vsel %vm7894_vm5, %v934_v56, %v936_v43  ;;  %v716_v35 = vpop.f32.mrf.mxu3  ;;  %vm1779_vm6 = vmand %vm4917_vm3, %vm7705_vm13  ;;  %vm7704_vm5 = vcmp.lt.s32.totalorder %v5732_v39, 32 }
 0x193   :  { %v961_v10 = vsel %vm7895_vm10, %v936_v43, %v938_v17  ;;  %v962_v18 = vsel %vm7896_vm2, %v938_v17, %v940_v20  ;;  %v992_v9 = vsel %vm7897_vm8, %v959_v24, 0  ;;  %v995_v36 = vsel %vm7898_vm4, %v960_v31, 0  ;;  %v690_v38 = vpop.f32.mrf.mxu1  ;;  %vm7903_vm10 = vmmov %vm7892_vm0  ;;  %v944_v27 = vpop.permute.xlu2 %943 }
 0x194   :  { %v998_v29 = vsel %vm7899_vm15, %v961_v10, 0  ;;  %v1001_v42 = vsel %vm7900_vm11, %v962_v18, 0  ;;  %1116 = vmatpush.bf16.msrb.mxu3 %v992_v9  ;;  %1129 = vmatpush.bf16.msra.mxu0 %v995_v36  ;;  %vm7904_vm2 = vmmov %vm7892_vm0  ;;  %vm7906_vm11 = vcmask 793600  }
 0x195   :  { %1142 = vmatpush.bf16.msra.mxu1 %v998_v29  ;;  %1155 = vmatpush.bf16.msra.mxu2 %v1001_v42  ;;  %v5735_v40 = vpop.f32.mrf.mxu0  ;;  %vm1783_vm8 = vmand %vm1779_vm6, %vm7704_vm5 }
 0x196   :  { %vm7905_vm15 = vmmov %vm7898_vm4  ;;  %v5771_v23 = vsel %vm1783_vm8, 1, %v7706_v0 }
 0x197   :  { %4475 = vmatmul.msk.bf16.vlgmr.msrb.gmra.mxu3 %vm7902_vm14, %v4742_v12  ;;  %4476 = vmatmul.msk.bf16.vlgmr.msra.gmra.mxu0 %vm7892_vm0, %v4742_v12  ;;  %vm7907_vm14 = vmmov %vm7906_vm11  ;;  %v1794_v56 = vperm.slane %v5771_v23, 0  ;;  %v1795_v9 = vperm.slane %v5771_v23, 1 }
 0x198   :  { %4477 = vmatmul.msk.bf16.vlgmr.msra.gmra.mxu1 %vm7903_vm10, %v4742_v12  ;;  %4478 = vmatmul.msk.bf16.vlgmr.msra.gmra.mxu2 %vm7904_vm2, %v4742_v12 }
 0x199   :  { %v703_v8 = vpop.f32.mrf.mxu2 }
 0x19a   :  { %v1295_v45 = vpop.permute.xlu0 %1294  ;;  %v5753_v28 = vpop.permute.xlu1 %1300 }
 0x19b   :  { %v1307_v47 = vrot.slane %v1295_v45, 4  ;;  %v5757_v33 = vpop.f32.mrf.mxu3  ;;  %v5759_v53 = vpop.f32.mrf.mxu1 }
 0x19d   :  { %v1318_v54 = vsel %vm7898_vm4, %v1306_v52, %v1307_v47  ;;  %v1320_v51 = vsel %vm7905_vm15, %v1307_v47, %v1308_v41  ;;  %v729_v62 = vpop.f32.mrf.mxu0  ;;  %vm7912_vm4 = vcmask 269312  }
 0x19e   :  { %v1319_v57 = vsel %vm7906_vm11, %v1318_v54, %v1295_v45  ;;  %v1321_v59 = vsel %vm7907_vm14, %v1320_v51, %v5713_v26  ;;  %vm7913_vm15 = vmmov %vm7912_vm4  ;;  %vm7914_vm14 = vcmask 1043456   ;;  %v1793_v62 = vperm.slane %v5661_v34, 7 }
 0x19f   :  { %v1349_v2 = vunpack.c.l.b16 %v1319_v57  ;;  %v1350_v61 = vunpack.c.h.b16 %v1319_v57  ;;  %v1356_v22 = vunpack.c.l.b16 %v1321_v59  ;;  %v1357_v60 = vunpack.c.h.b16 %v1321_v59 }
 0x1a0   :  { %v1792_v59 = vperm.slane %v5661_v34, 6  ;;  %v1310_v34 = vrot.slane %v5753_v28, 4 }
 0x1a1   :  { %vm1353_vm0 = vcmp.ne.s32.totalorder %v1349_v2, %v4901_v30  ;;  %vm1354_vm6 = vcmp.ne.s32.totalorder %v1350_v61, %v4905_v32  ;;  %vm5776_vm10 = vcmp.ne.s32.totalorder %v1356_v22, %v4901_v30  ;;  %vm5781_vm2 = vcmp.ne.s32.totalorder %v1357_v60, %v4905_v32  ;;  %v5788_v31 = vpop.f32.mrf.mxu2 }
 0x1a2   :  { %vm1355_vm8 = vmpackc.low %vm1354_vm6, %vm1353_vm0  ;;  %v942_v43 = vpop.permute.xlu0 %941  ;;  %v946_v10 = vpop.permute.xlu1 %945  ;;  %v1799_v60 = vperm.slane %v5771_v23, 5 }
 0x1a3   :  { %v963_v17 = vsel %vm7912_vm4, %v940_v20, %v942_v43  ;;  %v964_v24 = vsel %vm7913_vm15, %v942_v43, %v944_v27  ;;  %v1394_v18 = vsel %vm1355_vm8, %v4942_v19, 0  ;;  %vm1362_vm11 = vmpackc.low %vm5781_vm2, %vm5776_vm10  ;;  %v966_v42 = vsel %vm7912_vm4, %v946_v10, %v5737_v4  ;;  %v768_v35 = vpop.f32.mrf.mxu3  ;;  %v742_v38 = vpop.f32.mrf.mxu1 }
 0x1a4   :  { %v1004_v36 = vsel %vm7914_vm14, %v963_v17, 0  ;;  %vm7915_vm0 = vmmov %vm7914_vm14  ;;  %v1423_v8 = vunpack.c.h.b16 %v1394_v18  ;;  %v1422_v54 = vunpack.c.l.b16 %v1394_v18  ;;  %v5811_v57 = vsel %vm1362_vm11, %v5107_v15, 0 }
 0x1a5   :  { %v1007_v29 = vsel %vm7915_vm0, %v964_v24, 0  ;;  %vm7916_vm6 = vmmov %vm7912_vm4  ;;  %1168 = vmatpush.bf16.msra.mxu3 %v1004_v36  ;;  %v1424_v22 = vunpack.c.l.b16 %v5811_v57  ;;  %vm7919_vm14 = vcmask 64512   ;;  %vm5824_vm10 = vcmp.eq.s32.totalorder %v1795_v9, 1 }
 0x1a6   :  { %v965_v20 = vsel %vm7916_vm6, %v944_v27, %v946_v10  ;;  %vm7917_vm15 = vmmov %vm7915_vm0  ;;  %1181 = vmatpush.bf16.msrb.mxu0 %v1007_v29  ;;  %v5803_v51 = vpop.f32.mrf.mxu0  ;;  %v1440_v2 = vpack.c.b16 %v1423_v8, %v1423_v8  ;;  %v1439_v61 = vpack.c.b16 %v1422_v54, %v1422_v54  ;;  %vm5820_vm6 = vcmp.eq.s32.totalorder %v1794_v56, 1 }
 0x1a7   :  { %v1010_v45 = vsel %vm7917_vm15, %v965_v20, 0  ;;  %vm7918_vm8 = vmmov %vm7915_vm0  ;;  %v1441_v52 = vpack.c.b16 %v1424_v22, %v1424_v22  ;;  %v1421_v43 = vunpack.c.h.b16 %v5656_v48  ;;  %vm5836_vm4 = vcmp.eq.s32.totalorder %v1792_v59, 1 }
 0x1a8   :  { %v1013_v47 = vsel %vm7918_vm8, %v966_v42, 0  ;;  %1194 = vmatpush.bf16.msrb.mxu1 %v1010_v45  ;;  %4479 = vmatmul.msk.bf16.vlgmr.msra.gmra.mxu3 %vm7919_vm14, %v4742_v12  ;;  %vm7920_vm0 = vmmov %vm7919_vm14  ;;  %vm5840_vm15 = vcmp.eq.s32.totalorder %v1793_v62, 1  ;;  %vm7931_vm14 = vcmask 1043456   ;;  %v1798_v22 = vperm.slane %v5771_v23, 4 }
 0x1a9   :  { %1207 = vmatpush.bf16.msrb.mxu2 %v1013_v47  ;;  %4480 = vmatmul.msk.bf16.vlgmr.msrb.gmra.mxu0 %vm7920_vm0, %v4742_v12  ;;  %vm7925_vm2 = vmmov %vm7920_vm0  ;;  %v755_v10 = vpop.f32.mrf.mxu2  ;;  %v1438_v26 = vpack.c.b16 %v1421_v43, %v1421_v43 }
 0x1aa   :  { %1464 = vrot.lane.b32.xlu1 %v1440_v2, %s4657_s27  ;;  %1462 = vrot.lane.b32.xlu0 %v1439_v61, %s4657_s27  ;;  %vm7926_vm11 = vmmov %vm7920_vm0  ;;  %v1299_v27 = vpop.permute.xlu0 %1298 }
 0x1ab   :  { %4481 = vmatmul.msk.bf16.vlgmr.msrb.gmra.mxu1 %vm7925_vm2, %v4742_v12  ;;  %1466 = vrot.lane.b32.xlu2 %v1441_v52, %s4657_s27  ;;  %v1309_v24 = vrot.slane %v1299_v27, 4  ;;  %vm1822_vm8 = vmpackc.low %vm5824_vm10, %vm5820_vm6  ;;  %v5849_v18 = vpop.f32.mrf.mxu3  ;;  %v5851_v48 = vpop.f32.mrf.mxu1 }
 0x1ac   :  { %4482 = vmatmul.msk.bf16.vlgmr.msrb.gmra.mxu2 %vm7926_vm11, %v4742_v12  ;;  %vm7932_vm0 = vmmov %vm7931_vm14  ;;  %vm7933_vm11 = vcmask 793600   ;;  %v1830_v35 = vsel %vm1822_vm8, 65537, %v7706_v0 }
 0x1ad   :  { %v1322_v9 = vsel %vm7931_vm14, %v1308_v41, %v1309_v24  ;;  %v1324_v36 = vsel %vm7932_vm0, %v1309_v24, %v1310_v34  ;;  %vm1821_vm2 = vmpackc.low %vm5840_vm15, %vm5836_vm4  ;;  %vm7937_vm0 = vcmask 269312  }
 0x1ae   :  { %v1323_v29 = vsel %vm7933_vm11, %v1322_v9, %v1299_v27  ;;  %vm7934_vm6 = vmmov %vm7933_vm11  ;;  %v781_v42 = vpop.f32.mrf.mxu0  ;;  %v1829_v8 = vsel %vm1821_vm2, 65537, %v7706_v0  ;;  %vm7938_vm11 = vcmask 1043456  }
 0x1af   :  { %v1325_v20 = vsel %vm7934_vm6, %v1324_v36, %v5753_v28  ;;  %v1363_v38 = vunpack.c.l.b16 %v1323_v29  ;;  %v1364_v41 = vunpack.c.h.b16 %v1323_v29  ;;  %v1796_v36 = vperm.slane %v5771_v23, 2 }
 0x1b0   :  { %v1370_v45 = vunpack.c.l.b16 %v1325_v20  ;;  %v1371_v47 = vunpack.c.h.b16 %v1325_v20  ;;  %v1797_v29 = vperm.slane %v5771_v23, 3  ;;  %vm7939_vm6 = vcmask 64512  }
 0x1b1   :  { %vm1367_vm10 = vcmp.ne.s32.totalorder %v1363_v38, %v4901_v30  ;;  %vm1368_vm14 = vcmp.ne.s32.totalorder %v1364_v41, %v4905_v32  ;;  %v5881_v2 = vpop.f32.mrf.mxu2  ;;  %v1425_v38 = vunpack.c.h.b16 %v5811_v57  ;;  %v1800_v42 = vperm.slane %v5771_v23, 6 }
 0x1b2   :  { %1842 = vrot.lane.b32.xlu0 %v1830_v35, %s4659_s29  ;;  %1460 = vrot.lane.b32.xlu1 %v1438_v26, %s4657_s27  ;;  %vm5873_vm4 = vcmp.ne.s32.totalorder %v1370_v45, %v4901_v30  ;;  %vm1369_vm15 = vmpackc.low %vm1368_vm14, %vm1367_vm10  ;;  %v950_v59 = vpop.permute.xlu0 %949  ;;  %vm1375_vm8 = vcmp.ne.s32.totalorder %v1371_v47, %v4905_v32  ;;  %vm5899_vm10 = vcmp.eq.s32.totalorder %v1798_v22, 1  ;;  %vm5903_vm14 = vcmp.eq.s32.totalorder %v1799_v60, 1  ;;  %v5927_v54 = vpop.permute.xlu2 %1458 }
 0x1b3   :  { %1840 = vrot.lane.b32.xlu2 %v1829_v8, %s4659_s29  ;;  %v967_v62 = vsel %vm7937_vm0, %v5737_v4, %v950_v59  ;;  %v1396_v61 = vsel %vm1369_vm15, %v5080_v58, 0  ;;  %vm1376_vm2 = vmpackc.low %vm1375_vm8, %vm5873_vm4  ;;  %v820_v52 = vpop.f32.mrf.mxu3  ;;  %v794_v27 = vpop.f32.mrf.mxu1  ;;  %vm5910_vm4 = vcmp.eq.s32.totalorder %v1796_v36, 1  ;;  %vm5914_vm15 = vcmp.eq.s32.totalorder %v1797_v29, 1 }
 0x1b4   :  { %v1016_v1 = vsel %vm7938_vm11, %v967_v62, 0  ;;  %v1427_v43 = vunpack.c.h.b16 %v1396_v61  ;;  %v1426_v56 = vunpack.c.l.b16 %v1396_v61  ;;  %v5890_v17 = vsel %vm1376_vm2, %v5214_v37, 0  ;;  %vm1824_vm8 = vmpackc.low %vm5903_vm14, %vm5899_vm10 }
 0x1b5   :  { %1220 = vmatpush.bf16.msrb.mxu3 %v1016_v1  ;;  %v1428_v4 = vunpack.c.l.b16 %v5890_v17  ;;  %vm7948_vm0 = vmmov %vm7938_vm11  ;;  %vm7949_vm11 = vcmask 793600   ;;  %v1832_v1 = vsel %vm1824_vm8, 65537, %v7706_v0  ;;  %v1442_v52 = vpack.c.b16 %v1425_v38, %v1425_v38 }
 0x1b6   :  { %v5893_v24 = vpop.f32.mrf.mxu0  ;;  %v1444_v10 = vpack.c.b16 %v1427_v43, %v1427_v43  ;;  %v1443_v9 = vpack.c.b16 %v1426_v56, %v1426_v56  ;;  %vm1823_vm2 = vmpackc.low %vm5914_vm15, %vm5910_vm4  ;;  %vm1484_vm15 = vcmask 252928   ;;  %v1801_v41 = vperm.slane %v5771_v23, 7 }
 0x1b7   :  { %v1445_v20 = vpack.c.b16 %v1428_v4, %v1428_v4  ;;  %v1831_v28 = vsel %vm1823_vm2, 65537, %v7706_v0  ;;  %vm7952_vm8 = vcmask 1043456  }
 0x1b8   :  { %4483 = vmatmul.msk.bf16.vlgmr.msrb.gmra.mxu3 %vm7939_vm6, %v4742_v12  ;;  %vm7953_vm2 = vmmov %vm7952_vm8 }
 0x1b9   :  { %v807_v47 = vpop.f32.mrf.mxu2 }
 0x1ba   :  { %1472 = vrot.lane.b32.xlu1 %v1444_v10, %s4657_s27  ;;  %1470 = vrot.lane.b32.xlu0 %v1443_v9, %s4657_s27  ;;  %v1303_v26 = vpop.permute.xlu0 %1302  ;;  %v1453_v12 = vpop.permute.xlu2 %1452 }
 0x1bb   :  { %1474 = vrot.lane.b32.xlu2 %v1445_v20, %s4657_s27  ;;  %v1311_v45 = vrot.slane %v1303_v26, 4  ;;  %v5923_v8 = vpop.f32.mrf.mxu3  ;;  %v5925_v57 = vpop.f32.mrf.mxu1 }
 0x1bd   :  { %v1326_v59 = vsel %vm7948_vm0, %v1310_v34, %v1311_v45  ;;  %v1384_v62 = vunpack.c.l.b16 %v1311_v45  ;;  %v1385_v61 = vunpack.c.h.b16 %v1311_v45 }
 0x1be   :  { %v1327_v22 = vsel %vm7949_vm11, %v1326_v59, %v1303_v26  ;;  %v833_v60 = vpop.f32.mrf.mxu0  ;;  %vm7954_vm11 = vmmov %vm7953_vm2 }
 0x1bf   :  { %v1377_v27 = vunpack.c.l.b16 %v1327_v22  ;;  %v1378_v43 = vunpack.c.h.b16 %v1327_v22  ;;  %vm1388_vm6 = vcmp.ne.s32.totalorder %v1384_v62, %v4901_v30  ;;  %vm1389_vm10 = vcmp.ne.s32.totalorder %v1385_v61, %v4905_v32 }
 0x1c0   :  { %vm1390_vm14 = vmpackc.low %vm1389_vm10, %vm1388_vm6  ;;  %vm5968_vm6 = vcmp.eq.s32.totalorder %v1801_v41, 1  ;;  %v2322_v41 = vld [vmem:[%s7687_s2] sm:$0x3] }
 0x1c1   :  { %vm1381_vm0 = vcmp.ne.s32.totalorder %v1377_v27, %v4901_v30  ;;  %vm1382_vm5 = vcmp.ne.s32.totalorder %v1378_v43, %v4905_v32  ;;  %v1399_v34 = vsel %vm1390_vm14, %v5247_v63, 0  ;;  %v5947_v56 = vpop.f32.mrf.mxu2  ;;  %vm7957_vm14 = vcmask 64512  }
 0x1c2   :  { %1846 = vrot.lane.b32.xlu0 %v1832_v1, %s4659_s29  ;;  %1468 = vrot.lane.b32.xlu1 %v1442_v52, %s4657_s27  ;;  %vm1383_vm4 = vmpackc.low %vm1382_vm5, %vm1381_vm0  ;;  %v1432_v20 = vunpack.c.l.b16 %v1399_v34  ;;  %vm5961_vm5 = vcmp.eq.s32.totalorder %v1800_v42, 1 }
 0x1c3   :  { %1844 = vrot.lane.b32.xlu2 %v1831_v28, %s4659_s29  ;;  %v1398_v4 = vsel %vm1383_vm4, %v5220_v14, 0  ;;  %v872_v10 = vpop.f32.mrf.mxu3  ;;  %v846_v9 = vpop.f32.mrf.mxu1  ;;  %v1429_v28 = vunpack.c.h.b16 %v5890_v17  ;;  %vm1825_vm10 = vmpackc.low %vm5968_vm6, %vm5961_vm5 }
 0x1c4   :  { %v1431_v36 = vunpack.c.h.b16 %v1398_v4  ;;  %v1430_v29 = vunpack.c.l.b16 %v1398_v4  ;;  %v1449_v47 = vpack.c.b16 %v1432_v20, %v1432_v20  ;;  %v1833_v20 = vsel %vm1825_vm10, 65537, %v7706_v0  ;;  %vm7958_vm0 = vmmov %vm7953_vm2 }
 0x1c5   :  { %vm7959_vm4 = vmmov %vm7957_vm14 }
 0x1c6   :  { %v1027_v35 = vpop.f32.mrf.mxu0  ;;  %v1448_v26 = vpack.c.b16 %v1431_v36, %v1431_v36  ;;  %v1447_v38 = vpack.c.b16 %v1430_v29, %v1430_v29  ;;  %v1946_v36 = vld [vmem:[%s7687_s2] sm:$0x3]  ;;  %v1446_v29 = vpack.c.b16 %v1429_v28, %v1429_v28  ;;  %vm7960_vm5 = vmmov %vm7959_vm4 }
 0x1c7   :  { %v5953_v45 = vadd.f32 %v1027_v35, %v5711_v46  ;;  %1948 = vst [vmem:[#allocation1] ss:$4 sm:$0xff] %v1946_v36  ;;  %vm7963_vm6 = vmmov %vm7958_vm0 }
 0x1c8   :  { %v1455_v59 = vpop.permute.xlu0 %1454  ;;  %v1457_v62 = vpop.permute.xlu1 %1456 }
 0x1c9   :  { %v1486_v61 = vsel %vm1484_vm15, %v1453_v12, %v1455_v59  ;;  %v1487_v22 = vsel %vm1484_vm15, %v1455_v59, %v1457_v62  ;;  %v1488_v60 = vsel %vm1484_vm15, %v1457_v62, %v5927_v54  ;;  %v859_v43 = vpop.f32.mrf.mxu2 }
 0x1ca   :  { %1480 = vrot.lane.b32.xlu1 %v1448_v26, %s4657_s27  ;;  %1478 = vrot.lane.b32.xlu0 %v1447_v38, %s4657_s27  ;;  %v1508_v46 = vsel %vm7952_vm8, %v1486_v61, 0  ;;  %v1511_v1 = vsel %vm7953_vm2, %v1487_v22, 0  ;;  %v1514_v52 = vsel %vm7954_vm11, %v1488_v60, 0  ;;  %v1837_v38 = vpop.permute.xlu2 %1836  ;;  %vm7961_vm8 = vmmov %vm7959_vm4  ;;  %vm7725_vm2 = vcmask 1039360  }
 0x1cb   :  { %1482 = vrot.lane.b32.xlu2 %v1449_v47, %s4657_s27  ;;  %1572 = vmatpush.bf16.msra.mxu1 %v1508_v46  ;;  %v1066_v34 = vpop.f32.mrf.mxu3  ;;  %v1040_v4 = vpop.f32.mrf.mxu1  ;;  %v1851_v61 = vrot.slane %v1837_v38, 4  ;;  %vm7962_vm11 = vmmov %vm7958_vm0 }
 0x1cc   :  { %1585 = vmatpush.bf16.msra.mxu2 %v1511_v1  ;;  %1598 = vmatpush.bf16.msra.mxu3 %v1514_v52  ;;  %v5975_v10 = vadd.f32 %v1066_v34, %v5715_v5  ;;  %v5978_v9 = vadd.f32 %v1040_v4, %v5717_v3 }
 0x1ce   :  { %v1029_v17 = vpop.f32.mrf.mxu0  ;;  %v1949_v62 = vld.sshfl [vmem:[#allocation1] sm:$0xff pattern:$0x73625140] }
 0x1cf   :  { %2324 = vst [vmem:[#allocation1] ss:$4 sm:$0xff] %v2322_v41 }
 0x1d0   :  { %v1451_v42 = vpop.permute.xlu0 %1450  ;;  %v5988_v5 = vpop.permute.xlu1 %1405 }
 0x1d1   :  { %v1485_v3 = vsel %vm1484_vm15, %v1451_v42, %v1453_v12  ;;  %4485 = vmatmul.msk.bf16.vlgmr.msra.gmra.mxu1 %vm7957_vm14, %v5988_v5  ;;  %4486 = vmatmul.msk.bf16.vlgmr.msra.gmra.mxu2 %vm7959_vm4, %v5988_v5  ;;  %v1053_v26 = vpop.f32.mrf.mxu2 }
 0x1d2   :  { %1476 = vrot.lane.b32.xlu1 %v1446_v29, %s4657_s27  ;;  %v1505_v35 = vsel %vm7958_vm0, %v1485_v3, 0  ;;  %4487 = vmatmul.msk.bf16.vlgmr.msra.gmra.mxu3 %vm7960_vm5, %v5988_v5  ;;  %v6004_v12 = vadd.f32 %v1053_v26, %v5723_v50 }
 0x1d3   :  { %1848 = vrot.lane.b32.xlu2 %v1833_v20, %s4659_s29  ;;  %1559 = vmatpush.bf16.msra.mxu0 %v1505_v35  ;;  %v1042_v47 = vpop.f32.mrf.mxu1  ;;  %v1068_v59 = vpop.f32.mrf.mxu3 }
 0x1d6   :  { %4484 = vmatmul.msk.bf16.vlgmr.msra.gmra.mxu0 %vm7961_vm8, %v5988_v5 }
 0x1d8   :  { %v1839_v22 = vpop.permute.xlu0 %1838  ;;  %v1835_v60 = vpop.permute.xlu1 %1834 }
 0x1d9   :  { %v1852_v23 = vrot.slane %v1839_v22, 4  ;;  %v1850_v46 = vrot.slane %v1835_v60, 4  ;;  %v1055_v27 = vpop.f32.mrf.mxu2 }
 0x1db   :  { %v1862_v1 = vsel %vm7962_vm11, %v1851_v61, %v1852_v23  ;;  %v1859_v52 = vsel %vm7725_vm2, %v1850_v46, %v1835_v60  ;;  %v1860_v50 = vsel %vm7963_vm6, %v1850_v46, %v1851_v61 }
 0x1dc   :  { %v1863_v43 = vsel %vm7725_vm2, %v1862_v1, %v1839_v22  ;;  %v1861_v28 = vsel %vm7725_vm2, %v1860_v50, %v1837_v38  ;;  %v1874_v34 = vunpack.c.l.b16 %v1859_v52  ;;  %v1875_v4 = vunpack.c.h.b16 %v1859_v52 }
 0x1dd   :  { %v1888_v36 = vunpack.c.l.b16 %v1863_v43  ;;  %v1889_v17 = vunpack.c.h.b16 %v1863_v43  ;;  %v1881_v29 = vunpack.c.l.b16 %v1861_v28  ;;  %v1882_v20 = vunpack.c.h.b16 %v1861_v28 }
 0x1de   :  { %vm6014_vm10 = vcmp.ne.s32.totalorder %v1874_v34, %v4901_v30  ;;  %vm6019_vm14 = vcmp.ne.s32.totalorder %v1875_v4, %v4905_v32 }
 0x1df   :  { %vm1892_vm0 = vcmp.ne.s32.totalorder %v1888_v36, %v4901_v30  ;;  %vm1893_vm4 = vcmp.ne.s32.totalorder %v1889_v17, %v4905_v32  ;;  %vm1885_vm5 = vcmp.ne.s32.totalorder %v1881_v29, %v4901_v30  ;;  %vm1886_vm8 = vcmp.ne.s32.totalorder %v1882_v20, %v4905_v32  ;;  %vm1880_vm13 = vmpackc.low %vm6019_vm14, %vm6014_vm10 }
 0x1e0   :  { %vm1894_vm11 = vmpackc.low %vm1893_vm4, %vm1892_vm0  ;;  %v1937_v60 = vsel %vm1880_vm13, %v4912_v49, 0  ;;  %vm7968_vm13 = vcmask 1043456  }
 0x1e1   :  { %v6028_v35 = vsel %vm1894_vm11, %v4966_v44, 0  ;;  %vm1887_vm6 = vmpackc.low %vm1886_vm8, %vm1885_vm5  ;;  %v1963_v46 = vunpack.c.h.b16 %v1937_v60  ;;  %v1962_v1 = vunpack.c.l.b16 %v1937_v60  ;;  %vm7971_vm8 = vcmask 64512  }
 0x1e2   :  { %v1966_v26 = vunpack.c.l.b16 %v6028_v35  ;;  %v1938_v38 = vsel %vm1887_vm6, %v4925_v7, 0  ;;  %vm7969_vm4 = vmmov %vm7968_vm13 }
 0x1e3   :  { %v1965_v41 = vunpack.c.h.b16 %v1938_v38  ;;  %v1964_v47 = vunpack.c.l.b16 %v1938_v38  ;;  %v1980_v50 = vpack.c.b16 %v1963_v46, %v1963_v46  ;;  %v1979_v27 = vpack.c.b16 %v1962_v1, %v1962_v1  ;;  %vm7970_vm5 = vmmov %vm7969_vm4 }
 0x1e4   :  { %v1983_v59 = vpack.c.b16 %v1966_v26, %v1966_v26  ;;  %vm7972_vm11 = vmmov %vm7971_vm8 }
 0x1e5   :  { %v1982_v61 = vpack.c.b16 %v1965_v41, %v1965_v41  ;;  %v1981_v22 = vpack.c.b16 %v1964_v47, %v1964_v47  ;;  %vm7973_vm6 = vmmov %vm7969_vm4 }
 0x1e6   :  { %2004 = vrot.lane.b32.xlu1 %v1983_v59, %s4660_s12 }
 0x1e7   :  { %2002 = vrot.lane.b32.xlu0 %v1982_v61, %s4660_s12  ;;  %2000 = vrot.lane.b32.xlu2 %v1981_v22, %s4660_s12 }
 0x1ec   :  { %v6040_v52 = vpop.f32.mrf.mxu0 }
 0x1ee   :  { %1998 = vrot.lane.b32.xlu1 %v1980_v50, %s4660_s12 }
 0x1ef   :  { %1951 = vrot.lane.b32.xlu0 %v1949_v62, %s4661_s13  ;;  %1996 = vrot.lane.b32.xlu2 %v1979_v27, %s4660_s12 }
 0x1f4   :  { %v1081_v43 = vpop.f32.mrf.mxu0 }
 0x1fc   :  { %v6044_v28 = vpop.f32.mrf.mxu1 }
 0x202   :  { %v6046_v34 = vpop.f32.mrf.mxu2 }
 0x204   :  { %v1094_v36 = vpop.f32.mrf.mxu1 }
 0x205   :  { %v6048_v4 = vpop.permute.xlu2 %1466 }
 0x20a   :  { %v1107_v17 = vpop.f32.mrf.mxu2 }
 0x20d   :  { %v1841_v29 = vpop.permute.xlu2 %1840 }
 0x20e   :  { %v1853_v20 = vrot.slane %v1841_v29, 4 }
 0x210   :  { %v1864_v42 = vsel %vm7968_vm13, %v1852_v23, %v1853_v20  ;;  %vm7974_vm13 = vmmov %vm7969_vm4 }
 0x211   :  { %v1865_v3 = vsel %vm7725_vm2, %v1864_v42, %v1841_v29 }
 0x212   :  { %v1895_v26 = vunpack.c.l.b16 %v1865_v3  ;;  %v1896_v38 = vunpack.c.h.b16 %v1865_v3 }
 0x214   :  { %vm1899_vm10 = vcmp.ne.s32.totalorder %v1895_v26, %v4901_v30  ;;  %vm1900_vm14 = vcmp.ne.s32.totalorder %v1896_v38, %v4905_v32  ;;  %v6056_v41 = vpop.f32.mrf.mxu0  ;;  %v1967_v26 = vunpack.c.h.b16 %v6028_v35 }
 0x215   :  { %vm1901_vm0 = vmpackc.low %vm1900_vm14, %vm1899_vm10  ;;  %v6054_v62 = vpop.permute.xlu2 %1474  ;;  %v6058_v47 = vpop.f32.mrf.mxu1 }
 0x216   :  { %v1940_v59 = vsel %vm1901_vm0, %v4942_v19, 0  ;;  %vm7975_vm10 = vmmov %vm7969_vm4 }
 0x217   :  { %v1969_v61 = vunpack.c.h.b16 %v1940_v59  ;;  %v1968_v22 = vunpack.c.l.b16 %v1940_v59  ;;  %v6075_v59 = vld.sshfl [vmem:[#allocation1] sm:$0xff pattern:$0x73625140]  ;;  %vm7976_vm14 = vmmov %vm7969_vm4 }
 0x218   :  { %vm7978_vm0 = vmmov %vm7971_vm8 }
 0x219   :  { %v1986_v23 = vpack.c.b16 %v1969_v61, %v1969_v61  ;;  %v1985_v60 = vpack.c.b16 %v1968_v22, %v1968_v22  ;;  %v2750_v61 = vld [vmem:[%s7687_s2] sm:$0x3]  ;;  %v1984_v22 = vpack.c.b16 %v1967_v26, %v1967_v26 }
 0x21a   :  { %v6066_v43 = vpop.f32.mrf.mxu3  ;;  %2752 = vst [vmem:[#allocation1] ss:$4 sm:$0xff] %v2750_v61 }
 0x21b   :  { %2010 = vrot.lane.b32.xlu0 %v1986_v23, %s4660_s12  ;;  %2008 = vrot.lane.b32.xlu2 %v1985_v60, %s4660_s12  ;;  %v6068_v36 = vpop.f32.mrf.mxu2 }
 0x21c   :  { %v1463_v46 = vpop.permute.xlu0 %1462  ;;  %v1465_v1 = vpop.permute.xlu1 %1464 }
 0x21d   :  { %v1491_v50 = vsel %vm1484_vm15, %v1463_v46, %v1465_v1  ;;  %v1492_v27 = vsel %vm1484_vm15, %v1465_v1, %v6048_v4  ;;  %v6070_v17 = vpop.permute.xlu2 %1844  ;;  %v1133_v3 = vpop.f32.mrf.mxu0 }
 0x21e   :  { %v1523_v29 = vsel %vm7969_vm4, %v1491_v50, 0  ;;  %v1526_v42 = vsel %vm7970_vm5, %v1492_v27, 0  ;;  %v1146_v38 = vpop.f32.mrf.mxu1  ;;  %v7708_v23 = vrot.slane %v6070_v17, 4  ;;  %vm7979_vm4 = vmmov %vm7978_vm0 }
 0x21f   :  { %1637 = vmatpush.bf16.msrb.mxu2 %v1523_v29  ;;  %1650 = vmatpush.bf16.msrb.mxu3 %v1526_v42 }
 0x222   :  { %4490 = vmatmul.msk.bf16.vlgmr.msrb.gmra.mxu2 %vm7971_vm8, %v5988_v5  ;;  %4491 = vmatmul.msk.bf16.vlgmr.msrb.gmra.mxu3 %vm7972_vm11, %v5988_v5  ;;  %v1120_v29 = vpop.f32.mrf.mxu3 }
 0x223   :  { %2006 = vrot.lane.b32.xlu0 %v1984_v22, %s4660_s12  ;;  %v1159_v42 = vpop.f32.mrf.mxu2 }
 0x224   :  { %v1843_v35 = vpop.permute.xlu0 %1842  ;;  %v1461_v60 = vpop.permute.xlu1 %1460 }
 0x225   :  { %v1854_v1 = vrot.slane %v1843_v35, 4  ;;  %v1489_v50 = vsel %vm1484_vm15, %v5927_v54, %v1461_v60  ;;  %v1490_v27 = vsel %vm1484_vm15, %v1461_v60, %v1463_v46  ;;  %v6089_v3 = vpop.permute.xlu2 %1482 }
 0x226   :  { %v1517_v26 = vsel %vm7973_vm6, %v1489_v50, 0  ;;  %v1520_v38 = vsel %vm7974_vm13, %v1490_v27, 0  ;;  %v6097_v0 = vpop.f32.mrf.mxu0 }
 0x227   :  { %v1866_v61 = vsel %vm7975_vm10, %v1853_v20, %v1854_v1  ;;  %v1868_v22 = vsel %vm7976_vm14, %v1854_v1, %v7708_v23  ;;  %1611 = vmatpush.bf16.msrb.mxu0 %v1517_v26  ;;  %1624 = vmatpush.bf16.msrb.mxu1 %v1520_v38 }
 0x228   :  { %v1867_v54 = vsel %vm7725_vm2, %v1866_v61, %v1843_v35  ;;  %v1869_v46 = vsel %vm7725_vm2, %v1868_v22, %v6070_v17  ;;  %v6102_v60 = vpop.f32.mrf.mxu1 }
 0x229   :  { %7977 = vst [vmem:[#allocation10_spill] sm:$0xff] %v6102_v60  ;;  %v1902_v50 = vunpack.c.l.b16 %v1867_v54  ;;  %v1903_v29 = vunpack.c.h.b16 %v1867_v54  ;;  %v1909_v27 = vunpack.c.l.b16 %v1869_v46  ;;  %v1910_v20 = vunpack.c.h.b16 %v1869_v46 }
 0x22a   :  { %4488 = vmatmul.msk.bf16.vlgmr.msrb.gmra.mxu0 %vm7978_vm0, %v5988_v5  ;;  %4489 = vmatmul.msk.bf16.vlgmr.msrb.gmra.mxu1 %vm7979_vm4, %v5988_v5  ;;  %vm7980_vm0 = vmmov %vm7976_vm14 }
 0x22b   :  { %vm1906_vm5 = vcmp.ne.s32.totalorder %v1902_v50, %v4901_v30  ;;  %vm1907_vm8 = vcmp.ne.s32.totalorder %v1903_v29, %v4905_v32  ;;  %vm1913_vm11 = vcmp.ne.s32.totalorder %v1909_v27, %v4901_v30  ;;  %vm1914_vm13 = vcmp.ne.s32.totalorder %v1910_v20, %v4905_v32  ;;  %v6115_v38 = vpop.f32.mrf.mxu3 }
 0x22c   :  { %vm1908_vm6 = vmpackc.low %vm1907_vm8, %vm1906_vm5  ;;  %v1471_v35 = vpop.permute.xlu0 %1470  ;;  %v1473_v1 = vpop.permute.xlu1 %1472 }
 0x22d   :  { %v1495_v42 = vsel %vm1484_vm15, %v1471_v35, %v1473_v1  ;;  %v1496_v26 = vsel %vm1484_vm15, %v1473_v1, %v6054_v62  ;;  %vm1915_vm10 = vmpackc.low %vm1914_vm13, %vm1913_vm11  ;;  %v6118_v61 = vsel %vm1908_vm6, %v5107_v15, 0  ;;  %v1849_v22 = vpop.permute.xlu2 %1848 }
 0x22e   :  { %v1535_v54 = vsel %vm7976_vm14, %v1495_v42, 0  ;;  %v1538_v46 = vsel %vm7980_vm0, %v1496_v26, 0  ;;  %v1942_v29 = vsel %vm1915_vm10, %v5080_v58, 0  ;;  %v1857_v27 = vrot.slane %v1849_v22, 4  ;;  %v1185_v23 = vpop.f32.mrf.mxu0  ;;  %vm7981_vm5 = vmmov %vm7979_vm4 }
 0x22f   :  { %v6122_v50 = vpop.f32.mrf.mxu2  ;;  %1689 = vmatpush.bf16.msra.mxu2 %v1535_v54  ;;  %1702 = vmatpush.bf16.msra.mxu3 %v1538_v46  ;;  %v1972_v20 = vunpack.c.l.b16 %v1942_v29  ;;  %v1970_v1 = vunpack.c.l.b16 %v6118_v61  ;;  %v1973_v42 = vunpack.c.h.b16 %v1942_v29  ;;  %vm7982_vm13 = vmmov %vm7980_vm0 }
 0x230   :  { %v1198_v55 = vpop.f32.mrf.mxu1  ;;  %v1930_v21 = vunpack.c.l.b16 %v1857_v27  ;;  %v1931_v25 = vunpack.c.h.b16 %v1857_v27  ;;  %vm7983_vm10 = vmmov %vm7980_vm0 }
 0x231   :  { %v1989_v39 = vpack.c.b16 %v1972_v20, %v1972_v20  ;;  %v1987_v6 = vpack.c.b16 %v1970_v1, %v1970_v1  ;;  %vm7985_vm14 = vmmov %vm7980_vm0 }
 0x232   :  { %4494 = vmatmul.msk.bf16.vlgmr.msra.gmra.mxu2 %vm7979_vm4, %v5988_v5  ;;  %4495 = vmatmul.msk.bf16.vlgmr.msra.gmra.mxu3 %vm7981_vm5, %v5988_v5  ;;  %vm1934_vm8 = vcmp.ne.s32.totalorder %v1930_v21, %v4901_v30  ;;  %vm1935_vm11 = vcmp.ne.s32.totalorder %v1931_v25, %v4905_v32  ;;  %v7984_v25 = vrot.slane %v6070_v17, 4  ;;  %vm7986_vm5 = vmmov %vm7979_vm4 }
 0x233   :  { %2016 = vrot.lane.b32.xlu0 %v1989_v39, %s4660_s12  ;;  %2012 = vrot.lane.b32.xlu1 %v1987_v6, %s4660_s12  ;;  %vm1936_vm6 = vmpackc.low %vm1935_vm11, %vm1934_vm8  ;;  %v1172_v20 = vpop.f32.mrf.mxu3 }
 0x234   :  { %v1847_v23 = vpop.permute.xlu0 %1846  ;;  %v1469_v55 = vpop.permute.xlu1 %1468  ;;  %v1945_v1 = vsel %vm1936_vm6, %v5247_v63, 0  ;;  %v1990_v20 = vpack.c.b16 %v1973_v42, %v1973_v42 }
 0x235   :  { %v1856_v26 = vrot.slane %v1847_v23, 4  ;;  %v1493_v54 = vsel %vm1484_vm15, %v6048_v4, %v1469_v55  ;;  %v1494_v46 = vsel %vm1484_vm15, %v1469_v55, %v1471_v35  ;;  %v1978_v21 = vunpack.c.l.b16 %v1945_v1 }
 0x236   :  { %v1529_v39 = vsel %vm7982_vm13, %v1493_v54, 0  ;;  %v1532_v6 = vsel %vm7983_vm10, %v1494_v46, 0  ;;  %v1971_v1 = vunpack.c.h.b16 %v6118_v61 }
 0x237   :  { %v1211_v11 = vpop.f32.mrf.mxu2  ;;  %v1870_v13 = vsel %vm7985_vm14, %v7984_v25, %v1856_v26  ;;  %v1872_v29 = vsel %vm7980_vm0, %v1856_v26, %v1857_v27  ;;  %1663 = vmatpush.bf16.msra.mxu0 %v1529_v39  ;;  %1676 = vmatpush.bf16.msra.mxu1 %v1532_v6  ;;  %v1995_v55 = vpack.c.b16 %v1978_v21, %v1978_v21  ;;  %vm7995_vm14 = vmmov %vm7980_vm0 }
 0x238   :  { %v1871_v4 = vsel %vm7725_vm2, %v1870_v13, %v1847_v23  ;;  %v1873_v35 = vsel %vm7725_vm2, %v1872_v29, %v1849_v22  ;;  %v6167_v22 = vld.sshfl [vmem:[#allocation1] sm:$0xff pattern:$0x73625140] }
 0x239   :  { %v1916_v16 = vunpack.c.l.b16 %v1871_v4  ;;  %v1917_v54 = vunpack.c.h.b16 %v1871_v4  ;;  %v1923_v60 = vunpack.c.l.b16 %v1873_v35  ;;  %v1924_v46 = vunpack.c.h.b16 %v1873_v35 }
 0x23a   :  { %4492 = vmatmul.msk.bf16.vlgmr.msra.gmra.mxu0 %vm7979_vm4, %v5988_v5  ;;  %4493 = vmatmul.msk.bf16.vlgmr.msra.gmra.mxu1 %vm7986_vm5, %v5988_v5 }
 0x23b   :  { %vm6151_vm8 = vcmp.ne.s32.totalorder %v1916_v16, %v4901_v30  ;;  %vm6156_vm11 = vcmp.ne.s32.totalorder %v1917_v54, %v4905_v32  ;;  %2028 = vrot.lane.b32.xlu0 %v1995_v55, %s4660_s12  ;;  %2018 = vrot.lane.b32.xlu1 %v1990_v20, %s4660_s12  ;;  %vm6163_vm6 = vcmp.ne.s32.totalorder %v1923_v60, %v4901_v30  ;;  %v3183_v16 = vld [vmem:[%s7687_s2] sm:$0x3]  ;;  %v6184_v26 = vpop.f32.mrf.mxu3 }
 0x23c   :  { %vm1922_vm13 = vmpackc.low %vm6156_vm11, %vm6151_vm8  ;;  %v1479_v27 = vpop.permute.xlu0 %1478  ;;  %v1481_v23 = vpop.permute.xlu1 %1480  ;;  %vm6177_vm10 = vcmp.ne.s32.totalorder %v1924_v46, %v4905_v32  ;;  %3185 = vst [vmem:[#allocation1] ss:$4 sm:$0xff] %v3183_v16 }
 0x23d   :  { %v1499_v30 = vsel %vm1484_vm15, %v1479_v27, %v1481_v23  ;;  %v1500_v60 = vsel %vm1484_vm15, %v1481_v23, %v6089_v3  ;;  %v1943_v39 = vsel %vm1922_vm13, %v5214_v37, 0  ;;  %vm1929_vm4 = vmpackc.low %vm6177_vm10, %vm6163_vm6  ;;  %v1988_v3 = vpack.c.b16 %v1971_v1, %v1971_v1 }
 0x23e   :  { %v1547_v6 = vsel %vm7995_vm14, %v1499_v30, 0  ;;  %v1550_v21 = vsel %vm7980_vm0, %v1500_v60, 0  ;;  %v1974_v32 = vunpack.c.l.b16 %v1943_v39  ;;  %v1944_v29 = vsel %vm1929_vm4, %v5220_v14, 0  ;;  %vm7996_vm8 = vmmov %vm7986_vm5 }
 0x23f   :  { %1741 = vmatpush.bf16.msrb.mxu2 %v1547_v6  ;;  %1754 = vmatpush.bf16.msrb.mxu3 %v1550_v21  ;;  %v1977_v4 = vunpack.c.h.b16 %v1944_v29  ;;  %v1976_v20 = vunpack.c.l.b16 %v1944_v29  ;;  %vm7997_vm11 = vmmov %vm7980_vm0  ;;  %vm2030_vm10 = vcmask 7168  }
 0x240   :  { %v1991_v25 = vpack.c.b16 %v1974_v32, %v1974_v32  ;;  %vm7998_vm6 = vmmov %vm7980_vm0  ;;  %v3610_v32 = vld [vmem:[%s7687_s2] sm:$0x3] }
 0x241   :  { %v1993_v13 = vpack.c.b16 %v1976_v20, %v1976_v20  ;;  %vm7999_vm13 = vmmov %vm7986_vm5  ;;  %v2001_v60 = vpop.permute.xlu2 %2000 }
 0x242   :  { %2020 = vrot.lane.b32.xlu2 %v1991_v25, %s4660_s12  ;;  %4498 = vmatmul.msk.bf16.vlgmr.msrb.gmra.mxu2 %vm7986_vm5, %v5988_v5  ;;  %vm8001_vm14 = vmmov %vm7980_vm0 }
 0x243   :  { %2327 = vrot.lane.b32.xlu0 %v6075_v59, %s4651_s4  ;;  %2014 = vrot.lane.b32.xlu1 %v1988_v3, %s4660_s12  ;;  %v1224_v54 = vpop.f32.mrf.mxu3  ;;  %v1994_v59 = vpack.c.b16 %v1977_v4, %v1977_v4  ;;  %vm8002_vm4 = vmmov %vm7980_vm0 }
 0x244   :  { %4499 = vmatmul.msk.bf16.vlgmr.msrb.gmra.mxu3 %vm7996_vm8, %v5988_v5  ;;  %v1477_v61 = vpop.permute.xlu1 %1476 }
 0x245   :  { %v1497_v35 = vsel %vm1484_vm15, %v6054_v62, %v1477_v61  ;;  %v1498_v55 = vsel %vm1484_vm15, %v1477_v61, %v1479_v27  ;;  %vm8000_vm15 = vmmov %vm7986_vm5  ;;  %v1975_v62 = vunpack.c.h.b16 %v1943_v39 }
 0x246   :  { %v1541_v46 = vsel %vm7997_vm11, %v1497_v35, 0  ;;  %v1544_v11 = vsel %vm7998_vm6, %v1498_v55, 0  ;;  %v4037_v55 = vld [vmem:[%s7687_s2] sm:$0x3]  ;;  %vm8003_vm5 = vmmov %vm7980_vm0  ;;  %s4663_s2 = smov 80  }
 0x247   :  { %1715 = vmatpush.bf16.msrb.mxu0 %v1541_v46  ;;  %1728 = vmatpush.bf16.msrb.mxu1 %v1544_v11  ;;  %v1992_v27 = vpack.c.b16 %v1975_v62, %v1975_v62  ;;  %vm8004_vm11 = vmmov %vm7996_vm8 }
 0x248   :  { %vm8005_vm6 = vmmov %vm7996_vm8 }
 0x249   :  { %v1997_v4 = vpop.permute.xlu2 %1996 }
 0x24a   :  { %2026 = vrot.lane.b32.xlu2 %v1994_v59, %s4660_s12  ;;  %4496 = vmatmul.msk.bf16.vlgmr.msrb.gmra.mxu0 %vm7999_vm13, %v5988_v5  ;;  %vm8006_vm13 = vmmov %vm8005_vm6 }
 0x24b   :  { %2691 = vrot.lane.b32.xlu0 %v4912_v49, %s4659_s29  ;;  %2024 = vrot.lane.b32.xlu1 %v1993_v13, %s4660_s12 }
 0x24c   :  { %4497 = vmatmul.msk.bf16.vlgmr.msrb.gmra.mxu1 %vm8000_vm15, %v5988_v5  ;;  %vm8007_vm15 = vmmov %vm7980_vm0 }
 0x24e   :  { %v1574_v17 = vpop.f32.mrf.mxu1 }
 0x24f   :  { %v6217_v16 = vadd.f32 %v1574_v17, %v5978_v9 }
 0x252   :  { %2022 = vrot.lane.b32.xlu2 %v1992_v27, %s4660_s12 }
 0x253   :  { %2699 = vrot.lane.b32.xlu0 %v5107_v15, %s4659_s29  ;;  %2693 = vrot.lane.b32.xlu1 %v4925_v7, %s4659_s29  ;;  %v1561_v23 = vpop.f32.mrf.mxu0 }
 0x254   :  { %v6225_v42 = vadd.f32 %v1561_v23, %v5953_v45  ;;  %v1587_v30 = vpop.f32.mrf.mxu2 }
 0x255   :  { %v1600_v5 = vpop.f32.mrf.mxu3  ;;  %v6228_v1 = vadd.f32 %v1587_v30, %v6004_v12  ;;  %v3186_v12 = vld.sshfl [vmem:[#allocation1] sm:$0xff pattern:$0x73625140] }
 0x256   :  { %v6231_v9 = vadd.f32 %v1600_v5, %v5975_v10  ;;  %v1576_v39 = vpop.f32.mrf.mxu1  ;;  %3612 = vst [vmem:[#allocation1] ss:$4 sm:$0xff] %v3610_v32 }
 0x258   :  { %v6233_v6 = vpop.permute.xlu1 %2004 }
 0x259   :  { %v2003_v21 = vpop.permute.xlu0 %2002 }
 0x25a   :  { %2695 = vrot.lane.b32.xlu2 %v4966_v44, %s4659_s29  ;;  %v2033_v45 = vsel %vm2030_vm10, %v2001_v60, %v2003_v21  ;;  %v2034_v10 = vsel %vm2030_vm10, %v2003_v21, %v6233_v6 }
 0x25b   :  { %2705 = vrot.lane.b32.xlu0 %v5220_v14, %s4659_s29  ;;  %2755 = vrot.lane.b32.xlu1 %v6167_v22, %s4662_s18  ;;  %v2057_v25 = vsel %vm8001_vm14, %v2033_v45, 0  ;;  %v2060_v3 = vsel %vm7980_vm0, %v2034_v10, 0  ;;  %v1563_v29 = vpop.f32.mrf.mxu0  ;;  %vm8008_vm14 = vmmov %vm8005_vm6  ;;  %v1106_v45 = vadd.f32 %v6046_v34, %v5788_v31  ;;  %v1119_v10 = vadd.f32 %v6066_v43, %v5757_v33 }
 0x25c   :  { %2131 = vmatpush.bf16.msra.mxu2 %v2057_v25  ;;  %2144 = vmatpush.bf16.msra.mxu3 %v2060_v3  ;;  %v1589_v61 = vpop.f32.mrf.mxu2  ;;  %v1080_v25 = vadd.f32 %v6040_v52, %v5735_v40  ;;  %v1093_v3 = vadd.f32 %v6044_v28, %v5759_v53 }
 0x25d   :  { %v1602_v22 = vpop.f32.mrf.mxu3  ;;  %v3613_v13 = vld.sshfl [vmem:[#allocation1] sm:$0xff pattern:$0x73625140] }
 0x25e   :  { %4039 = vst [vmem:[#allocation1] ss:$4 sm:$0xff] %v4037_v55 }
 0x260   :  { %v1999_v35 = vpop.permute.xlu1 %1998 }
 0x261   :  { %v6253_v20 = vpop.permute.xlu0 %1951  ;;  %v2031_v54 = vsel %vm2030_vm10, %v1997_v4, %v1999_v35  ;;  %v2032_v46 = vsel %vm2030_vm10, %v1999_v35, %v2001_v60 }
 0x262   :  { %2697 = vrot.lane.b32.xlu2 %v4942_v19, %s4659_s29  ;;  %v2051_v11 = vsel %vm8002_vm4, %v2031_v54, 0  ;;  %v2054_v59 = vsel %vm8003_vm5, %v2032_v46, 0  ;;  %4502 = vmatmul.msk.bf16.vlgmr.msra.gmra.mxu2 %vm7996_vm8, %v6253_v20  ;;  %vm8009_vm4 = vmmov %vm7980_vm0 }
 0x263   :  { %3128 = vrot.lane.b32.xlu0 %v4966_v44, %s4656_s24  ;;  %2701 = vrot.lane.b32.xlu1 %v5080_v58, %s4659_s29  ;;  %vm8010_vm5 = vmmov %vm8005_vm6 }
 0x264   :  { %4503 = vmatmul.msk.bf16.vlgmr.msra.gmra.mxu3 %vm8004_vm11, %v6253_v20  ;;  %2105 = vmatpush.bf16.msra.mxu0 %v2051_v11  ;;  %vm8011_vm8 = vmmov %vm8010_vm5 }
 0x265   :  { %2118 = vmatpush.bf16.msra.mxu1 %v2054_v59  ;;  %vm8012_vm11 = vmmov %vm7980_vm0  ;;  %v4040_v53 = vld.sshfl [vmem:[#allocation1] sm:$0xff pattern:$0x73625140] }
 0x267   :  { %4500 = vmatmul.msk.bf16.vlgmr.msra.gmra.mxu0 %vm8005_vm6, %v6253_v20  ;;  %vm8013_vm6 = vmmov %vm8010_vm5 }
 0x268   :  { %4501 = vmatmul.msk.bf16.vlgmr.msra.gmra.mxu1 %vm8006_vm13, %v6253_v20  ;;  %vm8014_vm13 = vmmov %vm7980_vm0 }
 0x26a   :  { %2703 = vrot.lane.b32.xlu2 %v5214_v37, %s4659_s29 }
 0x26b   :  { %3130 = vrot.lane.b32.xlu0 %v4942_v19, %s4656_s24  ;;  %2707 = vrot.lane.b32.xlu1 %v5247_v63, %s4659_s29 }
 0x272   :  { %3126 = vrot.lane.b32.xlu2 %v4925_v7, %s4656_s24 }
 0x273   :  { %3136 = vrot.lane.b32.xlu0 %v5214_v37, %s4656_s24  ;;  %3124 = vrot.lane.b32.xlu1 %v4912_v49, %s4656_s24 }
 0x275   :  { %v2009_v62 = vpop.permute.xlu2 %2008 }
 0x27a   :  { %3188 = vrot.lane.b32.xlu2 %v3186_v12, %s4663_s2 }
 0x27b   :  { %3553 = vrot.lane.b32.xlu0 %v4925_v7, %s4651_s4  ;;  %3132 = vrot.lane.b32.xlu1 %v5107_v15, %s4656_s24 }
 0x282   :  { %3134 = vrot.lane.b32.xlu2 %v5080_v58, %s4656_s24 }
 0x283   :  { %3615 = vrot.lane.b32.xlu0 %v3613_v13, %s4664_s23  ;;  %3138 = vrot.lane.b32.xlu1 %v5220_v14, %s4656_s24 }
 0x28a   :  { %3140 = vrot.lane.b32.xlu2 %v5247_v63, %s4656_s24 }
 0x28b   :  { %3561 = vrot.lane.b32.xlu0 %v5080_v58, %s4651_s4  ;;  %3555 = vrot.lane.b32.xlu1 %v4966_v44, %s4651_s4 }
 0x28d   :  { %v2011_v17 = vpop.permute.xlu0 %2010 }
 0x28e   :  { %v2037_v27 = vsel %vm2030_vm10, %v2009_v62, %v2011_v17 }
 0x28f   :  { %v2069_v23 = vsel %vm8007_vm15, %v2037_v27, 0  ;;  %vm8015_vm15 = vmmov %vm7980_vm0 }
 0x290   :  { %2183 = vmatpush.bf16.msrb.mxu2 %v2069_v23 }
 0x292   :  { %3551 = vrot.lane.b32.xlu2 %v4912_v49, %s4651_s4 }
 0x293   :  { %3567 = vrot.lane.b32.xlu0 %v5247_v63, %s4651_s4  ;;  %3557 = vrot.lane.b32.xlu1 %v4942_v19, %s4651_s4 }
 0x294   :  { %4506 = vmatmul.msk.bf16.vlgmr.msrb.gmra.mxu2 %vm8008_vm14, %v6253_v20  ;;  %vm8016_vm14 = vmmov %vm7980_vm0 }
 0x295   :  { %v2007_v30 = vpop.permute.xlu0 %2006 }
 0x296   :  { %v2035_v5 = vsel %vm2030_vm10, %v6233_v6, %v2007_v30  ;;  %v2036_v60 = vsel %vm2030_vm10, %v2007_v30, %v2009_v62 }
 0x297   :  { %v2063_v39 = vsel %vm7980_vm0, %v2035_v5, 0  ;;  %v2066_v21 = vsel %vm8009_vm4, %v2036_v60, 0  ;;  %v2341_v5 = vunpack.c.l.b16 %v4966_v44  ;;  %vm8017_vm0 = vmmov %vm8010_vm5 }
 0x298   :  { %2157 = vmatpush.bf16.msrb.mxu0 %v2063_v39  ;;  %2170 = vmatpush.bf16.msrb.mxu1 %v2066_v21  ;;  %v2338_v21 = vunpack.c.h.b16 %v4912_v49 }
 0x299   :  { %v2357_v39 = vpack.c.b16 %v2341_v5, %v2341_v5  ;;  %v4359_v5 = vld [vmem:[%s7689_s3] sm:$0xf] }
 0x29a   :  { %3559 = vrot.lane.b32.xlu2 %v5107_v15, %s4651_s4 }
 0x29b   :  { %3978 = vrot.lane.b32.xlu0 %v4912_v49, %s4653_s10  ;;  %3563 = vrot.lane.b32.xlu1 %v5214_v37, %s4651_s4 }
 0x29c   :  { %4504 = vmatmul.msk.bf16.vlgmr.msrb.gmra.mxu0 %vm8010_vm5, %v6253_v20  ;;  %4505 = vmatmul.msk.bf16.vlgmr.msrb.gmra.mxu1 %vm8011_vm8, %v6253_v20  ;;  %v2021_v6 = vpop.permute.xlu2 %2020  ;;  %vm8018_vm5 = vmmov %vm8009_vm4 }
 0x29d   :  { %vm8019_vm8 = vmmov %vm8009_vm4 }
 0x2a2   :  { %3565 = vrot.lane.b32.xlu2 %v5220_v14, %s4651_s4  ;;  %s4665_s4 = smov 64  }
 0x2a3   :  { %3986 = vrot.lane.b32.xlu0 %v5107_v15, %s4653_s10  ;;  %3980 = vrot.lane.b32.xlu1 %v4925_v7, %s4653_s10 }
 0x2a4   :  { %v6342_v43 = vpop.permute.xlu2 %2026 }
 0x2a5   :  { %v2017_v12 = vpop.permute.xlu0 %2016  ;;  %v2013_v32 = vpop.permute.xlu1 %2012 }
 0x2a6   :  { %v2038_v29 = vsel %vm2030_vm10, %v2011_v17, %v2013_v32  ;;  %v1639_v61 = vpop.f32.mrf.mxu2  ;;  %v1652_v22 = vpop.f32.mrf.mxu3 }
 0x2a7   :  { %v2072_v4 = vsel %vm8012_vm11, %v2038_v29, 0  ;;  %v6338_v35 = vadd.f32 %v1639_v61, %v1106_v45  ;;  %v6340_v31 = vadd.f32 %v1652_v22, %v1119_v10  ;;  %v1613_v34 = vpop.f32.mrf.mxu0  ;;  %v1626_v33 = vpop.f32.mrf.mxu1  ;;  %v2339_v45 = vunpack.c.l.b16 %v4925_v7  ;;  %vm8020_vm11 = vmmov %vm8017_vm0 }
 0x2a8   :  { %v6344_v55 = vadd.f32 %v1613_v34, %v1080_v25  ;;  %v6346_v40 = vadd.f32 %v1626_v33, %v1093_v3  ;;  %2196 = vmatpush.bf16.msrb.mxu3 %v2072_v4  ;;  %v1158_v10 = vadd.f32 %v6068_v36, %v5881_v2  ;;  %v1171_v25 = vadd.f32 %v6115_v38, %v5849_v18 }
 0x2a9   :  { %v2340_v61 = vunpack.c.h.b16 %v4925_v7  ;;  %v1132_v22 = vadd.f32 %v6056_v41, %v5803_v51  ;;  %v1145_v4 = vadd.f32 %v6058_v47, %v5851_v48  ;;  %v2354_v47 = vpack.c.b16 %v2338_v21, %v2338_v21 }
 0x2aa   :  { %3982 = vrot.lane.b32.xlu2 %v4966_v44, %s4653_s10 }
 0x2ab   :  { %3992 = vrot.lane.b32.xlu0 %v5220_v14, %s4653_s10  ;;  %4042 = vrot.lane.b32.xlu1 %v4040_v53, %s4665_s4 }
 0x2ac   :  { %4507 = vmatmul.msk.bf16.vlgmr.msrb.gmra.mxu3 %vm8013_vm6, %v6253_v20  ;;  %v2023_v60 = vpop.permute.xlu2 %2022  ;;  %vm8021_vm6 = vmmov %vm8017_vm0 }
 0x2ad   :  { %v2029_v52 = vpop.permute.xlu0 %2028  ;;  %v2019_v28 = vpop.permute.xlu1 %2018  ;;  %v2043_v3 = vsel %vm2030_vm10, %v2021_v6, %v2023_v60 }
 0x2ae   :  { %v2046_v54 = vsel %vm2030_vm10, %v6342_v43, %v2029_v52  ;;  %v2041_v46 = vsel %vm2030_vm10, %v2017_v12, %v2019_v28  ;;  %v2042_v11 = vsel %vm2030_vm10, %v2019_v28, %v2021_v6  ;;  %v1641_v59 = vpop.f32.mrf.mxu2  ;;  %v1654_v13 = vpop.f32.mrf.mxu3  ;;  %v2087_v51 = vsel %vm8019_vm8, %v2043_v3, 0 }
 0x2af   :  { %v2096_v62 = vsel %vm8014_vm13, %v2046_v54, 0  ;;  %v2081_v17 = vsel %vm8015_vm15, %v2041_v46, 0  ;;  %v2084_v27 = vsel %vm8016_vm14, %v2042_v11, 0  ;;  %v1615_v23 = vpop.f32.mrf.mxu0  ;;  %v1628_v30 = vpop.f32.mrf.mxu1  ;;  %vm8022_vm13 = vmmov %vm8017_vm0  ;;  %v2355_v28 = vpack.c.b16 %v2339_v45, %v2339_v45 }
 0x2b0   :  { %2235 = vmatpush.bf16.msra.mxu2 %v2081_v17  ;;  %2248 = vmatpush.bf16.msra.mxu3 %v2084_v27  ;;  %vm8023_vm15 = vmmov %vm8009_vm4  ;;  %v2356_v54 = vpack.c.b16 %v2340_v61, %v2340_v61  ;;  %v2342_v45 = vunpack.c.h.b16 %v4966_v44  ;;  %v2345_v3 = vunpack.c.l.b16 %v5107_v15  ;;  %v8031_v44 = vld [vmem:[#allocation10_spill] sm:$0xff] }
 0x2b1   :  { %vm8024_vm14 = vmmov %vm8009_vm4 }
 0x2b2   :  { %3984 = vrot.lane.b32.xlu2 %v4942_v19, %s4653_s10  ;;  %v2374_v52 = vsel %vm8024_vm14, %v2354_v47, 0 }
 0x2b3   :  { %3988 = vrot.lane.b32.xlu1 %v5080_v58, %s4653_s10  ;;  %4510 = vmatmul.msk.bf16.vlgmr.msra.gmra.mxu2 %vm8017_vm0, %v6253_v20  ;;  %vm8025_vm0 = vmmov %vm8009_vm4 }
 0x2b4   :  { %2300 = vmatpush.bf16.msrb.mxu3 %v2096_v62  ;;  %vm8028_vm8 = vmmov %vm8025_vm0 }
 0x2b5   :  { %v2015_v29 = vpop.permute.xlu1 %2014  ;;  %v2380_v21 = vsel %vm8028_vm8, %v2356_v54, 0  ;;  %vm8034_vm14 = vmmov %vm8025_vm0  ;;  %v2349_v54 = vunpack.c.l.b16 %v5214_v37 }
 0x2b6   :  { %v2039_v49 = vsel %vm2030_vm10, %v2013_v32, %v2015_v29  ;;  %v2040_v34 = vsel %vm2030_vm10, %v2015_v29, %v2017_v12  ;;  %v1691_v33 = vpop.f32.mrf.mxu2  ;;  %v1704_v2 = vpop.f32.mrf.mxu3  ;;  %v2344_v12 = vunpack.c.h.b16 %v4942_v19  ;;  %v2383_v32 = vsel %vm8023_vm15, %v2357_v39, 0  ;;  %vm8033_vm15 = vmmov %vm8021_vm6 }
 0x2b7   :  { %v2075_v36 = vsel %vm8009_vm4, %v2039_v49, 0  ;;  %v2078_v18 = vsel %vm8018_vm5, %v2040_v34, 0  ;;  %v6384_v38 = vadd.f32 %v1691_v33, %v1158_v10  ;;  %v6386_v6 = vadd.f32 %v1704_v2, %v1171_v25  ;;  %v1665_v7 = vpop.f32.mrf.mxu0  ;;  %v1678_v53 = vpop.f32.mrf.mxu1  ;;  %vm8026_vm4 = vmmov %vm8025_vm0 }
 0x2b8   :  { %v6389_v41 = vadd.f32 %v1665_v7, %v1132_v22  ;;  %v6391_v48 = vadd.f32 %v1678_v53, %v1145_v4  ;;  %2209 = vmatpush.bf16.msra.mxu0 %v2075_v36  ;;  %2222 = vmatpush.bf16.msra.mxu1 %v2078_v18  ;;  %v2360_v39 = vpack.c.b16 %v2344_v12, %v2344_v12  ;;  %vm8027_vm5 = vmmov %vm8025_vm0  ;;  %v2343_v25 = vunpack.c.l.b16 %v4942_v19 }
 0x2b9   :  { %v1210_v10 = vadd.f32 %v6122_v50, %v5947_v56  ;;  %v1223_v29 = vadd.f32 %v6184_v26, %v5923_v8  ;;  %v1184_v22 = vadd.f32 %v6097_v0, %v5893_v24  ;;  %v1197_v33 = vadd.f32 %v8031_v44, %v5925_v57  ;;  %vm8037_vm8 = vmmov %vm8025_vm0 }
 0x2ba   :  { %3990 = vrot.lane.b32.xlu2 %v5214_v37, %s4653_s10  ;;  %v2358_v56 = vpack.c.b16 %v2342_v45, %v2342_v45  ;;  %v2359_v36 = vpack.c.b16 %v2343_v25, %v2343_v25  ;;  %v2361_v18 = vpack.c.b16 %v2345_v3, %v2345_v3  ;;  %v2348_v0 = vunpack.c.h.b16 %v5080_v58 }
 0x2bb   :  { %3994 = vrot.lane.b32.xlu1 %v5247_v63, %s4653_s10  ;;  %4508 = vmatmul.msk.bf16.vlgmr.msra.gmra.mxu0 %vm8020_vm11, %v6253_v20  ;;  %vm8030_vm11 = vmmov %vm8025_vm0 }
 0x2bc   :  { %2261 = vmatpush.bf16.msrb.mxu0 %v2087_v51  ;;  %4509 = vmatmul.msk.bf16.vlgmr.msra.gmra.mxu1 %vm8021_vm6, %v6253_v20  ;;  %v2386_v24 = vsel %vm8034_vm14, %v2358_v56, 0  ;;  %v2389_v57 = vsel %vm8025_vm0, %v2359_v36, 0  ;;  %v2364_v47 = vpack.c.b16 %v2348_v0, %v2348_v0  ;;  %v8055_v36 = vld [vmem:[#allocation2_spill] sm:$0xff]  ;;  %v2353_v0 = vunpack.c.l.b16 %v5247_v63 }
 0x2bd   :  { %4511 = vmatmul.msk.bf16.vlgmr.msra.gmra.mxu3 %vm8022_vm13, %v6253_v20  ;;  %v2025_v46 = vpop.permute.xlu1 %2024  ;;  %vm8032_vm13 = vmmov %vm8021_vm6 }
 0x2be   :  { %2467 = vmatpush.bf16.msra.mxu3 %v2383_v32  ;;  %v2044_v11 = vsel %vm2030_vm10, %v2023_v60, %v2025_v46  ;;  %v2045_v59 = vsel %vm2030_vm10, %v2025_v46, %v6342_v43  ;;  %v1693_v13 = vpop.f32.mrf.mxu2  ;;  %v1706_v62 = vpop.f32.mrf.mxu3  ;;  %v2377_v60 = vsel %vm8027_vm5, %v2355_v28, 0  ;;  %vm8029_vm10 = vmmov %vm8021_vm6  ;;  %v2392_v43 = vsel %vm8030_vm11, %v2360_v39, 0  ;;  %v8038_v46 = vld [vmem:[#allocation8_spill] sm:$0xff] }
 0x2bf   :  { %v2090_v17 = vsel %vm8025_vm0, %v2044_v11, 0  ;;  %v2093_v27 = vsel %vm8026_vm4, %v2045_v59, 0  ;;  %v1667_v23 = vpop.f32.mrf.mxu0  ;;  %v1680_v30 = vpop.f32.mrf.mxu1  ;;  %vm8035_vm4 = vmmov %vm8025_vm0  ;;  %v2347_v28 = vunpack.c.l.b16 %v5080_v58  ;;  %v2365_v62 = vpack.c.b16 %v2349_v54, %v2349_v54 }
 0x2c0   :  { %2428 = vmatpush.bf16.msra.mxu0 %v2374_v52  ;;  %2274 = vmatpush.bf16.msrb.mxu1 %v2090_v17  ;;  %v2395_v26 = vsel %vm8035_vm4, %v2361_v18, 0  ;;  %v6448_v32 = vpop.permute.xlu0 %2327  ;;  %vm8036_vm5 = vmmov %vm8021_vm6  ;;  %v2346_v52 = vunpack.c.h.b16 %v5107_v15  ;;  %v4648_v17 = vld [vmem:[%s7686_s1 + $0x11] ss:$2 sm:$0xff]  ;;  %v2352_v15 = vunpack.c.h.b16 %v5220_v14  ;;  %v4649_v23 = vld [vmem:[%s7686_s1 + $0x1] ss:$2 sm:$0xff]  ;;  %v6482_v39 = vpop.permute.xlu2 %2695 }
 0x2c1   :  { %2287 = vmatpush.bf16.msrb.mxu2 %v2093_v27  ;;  %v2363_v13 = vpack.c.b16 %v2347_v28, %v2347_v28  ;;  %v6463_v27 = vadd.s32 1, %v4648_v17  ;;  %v6475_v30 = vadd.s32 1, %v4649_v23  ;;  %vm8043_vm14 = vmmov %vm8036_vm5 }
 0x2c2   :  { %4362 = vperm.xlu2 %4613, %v4359_v5   ;;  %v2362_v59 = vpack.c.b16 %v2346_v52, %v2346_v52  ;;  %vm8046_vm4 = vmmov %vm8025_vm0 }
 0x2c3   :  { %v2407_v45 = vsel %vm8046_vm4, %v2365_v62, 0 }
 0x2c4   :  { %2441 = vmatpush.bf16.msra.mxu1 %v2377_v60  ;;  %4514 = vmatmul.msk.bf16.vlgmr.msrb.gmra.mxu2 %vm8029_vm10, %v6253_v20  ;;  %vm8039_vm10 = vcmp.ge.s32.totalorder %v8038_v46, 0  ;;  %v8045_v60 = vmov 0  }
 0x2c5   :  { %2454 = vmatpush.bf16.msra.mxu2 %v2380_v21  ;;  %vm2645_vm11 = vmand %vm5252_vm9, %vm8039_vm10  ;;  %v6467_v58 = vpop.permute.xlu1 %2693 }
 0x2c6   :  { %v1743_v61 = vpop.f32.mrf.mxu2 }
 0x2c7   :  { %v6428_v4 = vadd.f32 %v1743_v61, %v1210_v10  ;;  %v1756_v49 = vpop.f32.mrf.mxu3  ;;  %v1717_v34 = vpop.f32.mrf.mxu0  ;;  %v2710_v10 = vrot.slane %v6467_v58, 4  ;;  %v2368_v61 = vpack.c.b16 %v2352_v15, %v2352_v15 }
 0x2c8   :  { %v6432_v2 = vadd.f32 %v1756_v49, %v1223_v29  ;;  %v6434_v19 = vadd.f32 %v1717_v34, %v1184_v22  ;;  %v2711_v49 = vrot.slane %v6482_v39, 4  ;;  %v2692_v34 = vpop.permute.xlu0 %2691  ;;  %v2698_v23 = vpop.permute.xlu2 %2697 }
 0x2c9   :  { %2506 = vmatpush.bf16.msrb.mxu2 %v2392_v43  ;;  %v1730_v50 = vpop.f32.mrf.mxu1  ;;  %v2401_v43 = vsel %vm8025_vm0, %v2363_v13, 0  ;;  %v2416_v18 = vsel %vm8046_vm4, %v2368_v61, 0  ;;  %v2369_v13 = vpack.c.b16 %v2353_v0, %v2353_v0 }
 0x2ca   :  { %v6436_v8 = vadd.f32 %v1730_v50, %v1197_v33  ;;  %v2350_v33 = vunpack.c.h.b16 %v5214_v37  ;;  %v2351_v37 = vunpack.c.l.b16 %v5220_v14 }
 0x2cb   :  { %4512 = vmatmul.msk.bf16.vlgmr.msrb.gmra.mxu0 %vm8021_vm6, %v6253_v20  ;;  %vm2647_vm6 = vmand %vm2645_vm11, %vm1780_vm12 }
 0x2cc   :  { %4513 = vmatmul.msk.bf16.vlgmr.msrb.gmra.mxu1 %vm8032_vm13, %v6253_v20  ;;  %2480 = vmatpush.bf16.msrb.mxu0 %v2386_v24  ;;  %vm8041_vm13 = vmmov %vm8036_vm5  ;;  %v6485_v21 = vsel %vm2647_vm6, 1, %v8045_v60  ;;  %vm7722_vm6 = vcmp.ge.s32.totalorder %v6475_v30, 0  ;;  %v2367_v54 = vpack.c.b16 %v2351_v37, %v2351_v37 }
 0x2cd   :  { %4515 = vmatmul.msk.bf16.vlgmr.msrb.gmra.mxu3 %vm8033_vm15, %v6253_v20  ;;  %2493 = vmatpush.bf16.msrb.mxu1 %v2389_v57  ;;  %v2404_v20 = vsel %vm8037_vm8, %v2364_v47, 0  ;;  %vm8042_vm15 = vmmov %vm8036_vm5  ;;  %vm7723_vm8 = vcmp.lt.s32.totalorder %v6463_v27, 32  ;;  %v2653_v25 = vperm.slane %v6485_v21, 2  ;;  %v2654_v3 = vperm.slane %v6485_v21, 3  ;;  %v6583_v50 = vpop.permute.xlu1 %2755 }
 0x2ce   :  { %2519 = vmatpush.bf16.msrb.mxu3 %v2395_v26  ;;  %v1745_v7 = vpop.f32.mrf.mxu2  ;;  %vm8044_vm12 = vmmov %vm8025_vm0  ;;  %v2651_v14 = vperm.slane %v6485_v21, 0  ;;  %v2652_v63 = vperm.slane %v6485_v21, 1 }
 0x2cf   :  { %v1758_v53 = vpop.f32.mrf.mxu3  ;;  %v1719_v51 = vpop.f32.mrf.mxu0  ;;  %v2398_v5 = vsel %vm8044_vm12, %v2362_v59, 0  ;;  %v2366_v7 = vpack.c.b16 %v2350_v33, %v2350_v33  ;;  %v2709_v59 = vrot.slane %v2692_v34, 4  ;;  %v2712_v33 = vrot.slane %v2698_v23, 4 }
 0x2d0   :  { %v6554_v62 = vpop.permute.xlu0 %2699 }
 0x2d1   :  { %v1732_v12 = vpop.f32.mrf.mxu1 }
 0x2d4   :  { %4518 = vmatmul.msk.bf16.vlgmr.msra.gmra.mxu2 %vm8036_vm5, %v6448_v32  ;;  %vm7724_vm5 = vcmp.ge.s32.totalorder %v6463_v27, 0 }
 0x2d5   :  { %2558 = vmatpush.bf16.msra.mxu2 %v2404_v20  ;;  %vm3506_vm10 = vmand %vm4735_vm7, %vm7724_vm5  ;;  %vm6514_vm7 = vcmp.eq.s32.totalorder %v2654_v3, 1 }
 0x2d6   :  { %vm6500_vm11 = vmand %vm3506_vm10, %vm7723_vm8  ;;  %vm7721_vm10 = vcmp.lt.s32.totalorder %v6475_v30, 32 }
 0x2db   :  { %4516 = vmatmul.msk.bf16.vlgmr.msra.gmra.mxu0 %vm8041_vm13, %v6448_v32  ;;  %vm8050_vm13 = vmmov %vm8025_vm0  ;;  %vm8057_vm0 = vcmask 64512  }
 0x2dc   :  { %4517 = vmatmul.msk.bf16.vlgmr.msra.gmra.mxu1 %vm8042_vm15, %v6448_v32  ;;  %2532 = vmatpush.bf16.msra.mxu0 %v2398_v5  ;;  %v2720_v44 = vsel %vm8050_vm13, %v2710_v10, %v2711_v49  ;;  %vm6510_vm15 = vcmp.eq.s32.totalorder %v2653_v25, 1 }
 0x2dd   :  { %4519 = vmatmul.msk.bf16.vlgmr.msra.gmra.mxu3 %vm8043_vm14, %v6448_v32  ;;  %2545 = vmatpush.bf16.msra.mxu1 %v2401_v43  ;;  %vm8056_vm14 = vnez %v8055_v36  ;;  %vm2684_vm13 = vmpackc.low %vm6514_vm7, %vm6510_vm15  ;;  %v2721_v24 = vsel %vm7725_vm2, %v2720_v44, %v6482_v39  ;;  %vm6556_vm15 = vcmp.eq.s32.totalorder %v2651_v14, 1  ;;  %vm6560_vm7 = vcmp.eq.s32.totalorder %v2652_v63, 1  ;;  %v6624_v39 = vpop.permute.xlu2 %2703 }
 0x2de   :  { %2571 = vmatpush.bf16.msra.mxu3 %v2407_v45  ;;  %vm3505_vm12 = vmand %vm8056_vm14, %vm7722_vm6  ;;  %v2743_v46 = vsel %vm2684_vm13, %v2721_v24, 0  ;;  %v2657_v43 = vperm.slane %v6485_v21, 6  ;;  %v2658_v45 = vperm.slane %v6485_v21, 7 }
 0x2df   :  { %vm6536_vm14 = vmand %vm3505_vm12, %vm7721_vm10  ;;  %v2768_v24 = vunpack.c.h.b16 %v2743_v46 }
 0x2e0   :  { %vm8064_vm12 = vmmov %vm8046_vm4 }
 0x2e1   :  { %vm8065_vm4 = vmmov %vm8057_vm0 }
 0x2e2   :  { %vm8066_vm13 = vmmov %vm8057_vm0 }
 0x2e3   :  { %vm8067_vm10 = vmmov %vm8064_vm12 }
 0x2e4   :  { %4522 = vmatmul.msk.bf16.vlgmr.msrb.gmra.mxu2 %vm8057_vm0, %v6448_v32  ;;  %v2107_v57 = vpop.f32.mrf.mxu0  ;;  %v2410_v17 = vsel %vm8067_vm10, %v2366_v7, 0  ;;  %vm8068_vm6 = vmmov %vm8067_vm10  ;;  %v8072_v7 = vld [vmem:[#allocation9_spill] sm:$0xff] }
 0x2e5   :  { %2610 = vmatpush.bf16.msrb.mxu2 %v2416_v18  ;;  %v2120_v26 = vpop.f32.mrf.mxu1  ;;  %v6543_v51 = vadd.f32 %v2107_v57, %v6225_v42  ;;  %v2133_v12 = vpop.f32.mrf.mxu2  ;;  %v2413_v15 = vsel %vm8068_vm6, %v2367_v54, 0  ;;  %vm8069_vm8 = vmmov %vm8068_vm6  ;;  %vm2674_vm6 = vcmp.eq.s32.totalorder %v2658_v45, 1  ;;  %v2655_v57 = vperm.slane %v6485_v21, 4 }
 0x2e6   :  { %v6546_v47 = vadd.f32 %v2120_v26, %v6217_v16  ;;  %v6549_v52 = vadd.f32 %v2133_v12, %v6228_v1  ;;  %v2718_v1 = vsel %vm8064_vm12, %v2709_v59, %v2710_v10  ;;  %v2419_v5 = vsel %vm8069_vm8, %v2369_v13, 0  ;;  %vm2683_vm12 = vmpackc.low %vm6560_vm7, %vm6556_vm15  ;;  %v2702_v42 = vpop.permute.xlu1 %2701 }
 0x2e7   :  { %v2146_v20 = vpop.f32.mrf.mxu3  ;;  %v2713_v10 = vrot.slane %v6554_v62, 4  ;;  %v2719_v25 = vsel %vm7725_vm2, %v2718_v1, %v6467_v58  ;;  %vm2673_vm8 = vcmp.eq.s32.totalorder %v2657_v43, 1  ;;  %vm8070_vm15 = vmmov %vm8057_vm0  ;;  %v2656_v26 = vperm.slane %v6485_v21, 5 }
 0x2e8   :  { %v6552_v28 = vadd.f32 %v2146_v20, %v6231_v9  ;;  %v2767_v9 = vunpack.c.l.b16 %v2743_v46  ;;  %v2742_v56 = vsel %vm2683_vm12, %v2719_v25, 0  ;;  %vm8071_vm7 = vmmov %vm8067_vm10  ;;  %v2784_v54 = vpack.c.b16 %v2768_v24, %v2768_v24 }
 0x2e9   :  { %v2724_v36 = vsel %vm8067_vm10, %v2712_v33, %v2713_v10  ;;  %v2765_v18 = vunpack.c.l.b16 %v2742_v56  ;;  %v2766_v37 = vunpack.c.h.b16 %v2742_v56  ;;  %vm6599_vm12 = vcmp.eq.s32.totalorder %v2655_v57, 1 }
 0x2ea   :  { %v2783_v61 = vpack.c.b16 %v2767_v9, %v2767_v9  ;;  %v2725_v0 = vsel %vm7725_vm2, %v2724_v36, %v6554_v62 }
 0x2eb   :  { %4520 = vmatmul.msk.bf16.vlgmr.msrb.gmra.mxu0 %vm8057_vm0, %v6448_v32  ;;  %vm2686_vm0 = vmpackc.low %vm2674_vm6, %vm2673_vm8  ;;  %v2781_v12 = vpack.c.b16 %v2765_v18, %v2765_v18  ;;  %v2782_v20 = vpack.c.b16 %v2766_v37, %v2766_v37  ;;  %vm6603_vm8 = vcmp.eq.s32.totalorder %v2656_v26, 1  ;;  %vm8079_vm6 = vcmp.lt.s32.totalorder %v8072_v7, 32 }
 0x2ec   :  { %4521 = vmatmul.msk.bf16.vlgmr.msrb.gmra.mxu1 %vm8065_vm4, %v6448_v32  ;;  %2584 = vmatpush.bf16.msrb.mxu0 %v2410_v17  ;;  %v2109_v3 = vpop.f32.mrf.mxu0  ;;  %v2807_v58 = vsel %vm8071_vm7, %v2783_v61, 0  ;;  %vm8073_vm4 = vcmp.ge.s32.totalorder %v8072_v7, 0  ;;  %v2745_v63 = vsel %vm2686_vm0, %v2725_v0, 0 }
 0x2ed   :  { %4523 = vmatmul.msk.bf16.vlgmr.msrb.gmra.mxu3 %vm8066_vm13, %v6448_v32  ;;  %2597 = vmatpush.bf16.msrb.mxu1 %v2413_v15  ;;  %v2122_v29 = vpop.f32.mrf.mxu1  ;;  %v2135_v34 = vpop.f32.mrf.mxu2  ;;  %vm2646_vm13 = vmand %vm5339_vm1, %vm8073_vm4  ;;  %v2771_v46 = vunpack.c.l.b16 %v2745_v63  ;;  %v2714_v15 = vrot.slane %v2702_v42, 4 }
 0x2ee   :  { %2623 = vmatpush.bf16.msrb.mxu3 %v2419_v5  ;;  %vm2648_vm10 = vmand %vm2646_vm13, %vm8079_vm6  ;;  %v2708_v14 = vpop.permute.xlu1 %2707 }
 0x2ef   :  { %v2148_v44 = vpop.f32.mrf.mxu3  ;;  %vm2685_vm13 = vmpackc.low %vm6603_vm8, %vm6599_vm12  ;;  %v2787_v45 = vpack.c.b16 %v2771_v46, %v2771_v46  ;;  %vm8089_vm12 = vcmp.lt.s32.totalorder %v6463_v27, 32 }
 0x2f4   :  { %4526 = vmatmul.msk.bf16.vlgmr.msra.gmra.mxu2 %vm8070_vm15, %v6448_v32  ;;  %vm8080_vm15 = vmmov %vm8071_vm7  ;;  %vm8081_vm7 = vcmask 64512  }
 0x2f5   :  { %2881 = vmatpush.bf16.msra.mxu2 %v2807_v58  ;;  %v2722_v21 = vsel %vm8080_vm15, %v2711_v49, %v2712_v33  ;;  %vm8082_vm0 = vmmov %vm8081_vm7  ;;  %v6627_v49 = vsel %vm2648_vm10, 1, %v8045_v60  ;;  %v2772_v33 = vunpack.c.h.b16 %v2745_v63 }
 0x2f6   :  { %vm8083_vm4 = vmmov %vm8082_vm0  ;;  %v2661_v5 = vperm.slane %v6627_v49, 2  ;;  %v2662_v43 = vperm.slane %v6627_v49, 3  ;;  %v2659_v36 = vperm.slane %v6627_v49, 0  ;;  %v2660_v58 = vperm.slane %v6627_v49, 1 }
 0x2f7   :  { %vm8084_vm5 = vmmov %vm8080_vm15  ;;  %vm8087_vm15 = vcmask 1039360   ;;  %v2788_v24 = vpack.c.b16 %v2772_v33, %v2772_v33  ;;  %v2665_v59 = vperm.slane %v6627_v49, 6  ;;  %v2666_v13 = vperm.slane %v6627_v49, 7 }
 0x2f8   :  { %v2801_v16 = vsel %vm8084_vm5, %v2781_v12, 0  ;;  %vm8085_vm2 = vmmov %vm8084_vm5  ;;  %v2723_v17 = vsel %vm8087_vm15, %v2722_v21, %v2698_v23  ;;  %v2715_v23 = vrot.slane %v6624_v39, 4 }
 0x2f9   :  { %v2804_v1 = vsel %vm8085_vm2, %v2782_v20, 0  ;;  %vm8086_vm6 = vmmov %vm8085_vm2  ;;  %vm8088_vm2 = vcmp.ge.s32.totalorder %v6463_v27, 0  ;;  %v2744_v3 = vsel %vm2685_vm13, %v2723_v17, 0  ;;  %vm6654_vm13 = vcmp.eq.s32.totalorder %v2659_v36, 1  ;;  %v2706_v20 = vpop.permute.xlu0 %2705 }
 0x2fa   :  { %v2810_v9 = vsel %vm8086_vm6, %v2784_v54, 0  ;;  %vm3933_vm5 = vmand %vm5339_vm1, %vm8088_vm2  ;;  %v2769_v34 = vunpack.c.l.b16 %v2744_v3  ;;  %v2770_v44 = vunpack.c.h.b16 %v2744_v3  ;;  %vm6658_vm2 = vcmp.eq.s32.totalorder %v2660_v58, 1 }
 0x2fb   :  { %4524 = vmatmul.msk.bf16.vlgmr.msra.gmra.mxu0 %vm8081_vm7, %v6448_v32  ;;  %vm6639_vm8 = vmand %vm3933_vm5, %vm8089_vm12  ;;  %vm2677_vm7 = vcmp.eq.s32.totalorder %v2661_v5, 1  ;;  %v2716_v46 = vrot.slane %v2706_v20, 4 }
 0x2fc   :  { %4525 = vmatmul.msk.bf16.vlgmr.msra.gmra.mxu1 %vm8082_vm0, %v6448_v32  ;;  %2855 = vmatpush.bf16.msra.mxu0 %v2801_v16  ;;  %vm8092_vm10 = vmmov %vm8086_vm6  ;;  %vm2678_vm0 = vcmp.eq.s32.totalorder %v2662_v43, 1  ;;  %v2785_v18 = vpack.c.b16 %v2769_v34, %v2769_v34  ;;  %v2786_v0 = vpack.c.b16 %v2770_v44, %v2770_v44 }
 0x2fd   :  { %4527 = vmatmul.msk.bf16.vlgmr.msra.gmra.mxu3 %vm8083_vm4, %v6448_v32  ;;  %2868 = vmatpush.bf16.msra.mxu1 %v2804_v1  ;;  %v2728_v29 = vsel %vm8092_vm10, %v2714_v15, %v2715_v23  ;;  %vm8093_vm1 = vmmov %vm8086_vm6 }
 0x2fe   :  { %2894 = vmatpush.bf16.msra.mxu3 %v2810_v9  ;;  %v2819_v61 = vsel %vm8093_vm1, %v2787_v45, 0  ;;  %vm2688_vm6 = vmpackc.low %vm2678_vm0, %vm2677_vm7  ;;  %v2729_v56 = vsel %vm8087_vm15, %v2728_v29, %v6624_v39  ;;  %v2663_v29 = vperm.slane %v6627_v49, 4 }
 0x2ff   :  { %v2747_v37 = vsel %vm2688_vm6, %v2729_v56, 0  ;;  %vm8098_vm5 = vmmov %vm8093_vm1 }
 0x300   :  { %v2726_v7 = vsel %vm8098_vm5, %v2713_v10, %v2714_v15  ;;  %vm8099_vm12 = vmmov %vm8083_vm4  ;;  %v2775_v63 = vunpack.c.l.b16 %v2747_v37  ;;  %vm6681_vm5 = vcmp.eq.s32.totalorder %v2665_v59, 1  ;;  %v8113_v15 = vld [vmem:[#allocation4_spill] sm:$0xff]  ;;  %v2776_v3 = vunpack.c.h.b16 %v2747_v37 }
 0x301   :  { %vm8100_vm10 = vmmov %vm8083_vm4  ;;  %v2727_v10 = vsel %vm8087_vm15, %v2726_v7, %v2702_v42  ;;  %v6729_v7 = vpop.permute.xlu0 %3128 }
 0x302   :  { %vm8101_vm7 = vmmov %vm8083_vm4  ;;  %v2791_v21 = vpack.c.b16 %v2775_v63, %v2775_v63 }
 0x303   :  { %vm8102_vm0 = vmmov %vm8093_vm1 }
 0x304   :  { %4530 = vmatmul.msk.bf16.vlgmr.msrb.gmra.mxu2 %vm8083_vm4, %v6448_v32  ;;  %v2813_v12 = vsel %vm8102_vm0, %v2785_v18, 0  ;;  %vm8103_vm4 = vmmov %vm8102_vm0 }
 0x305   :  { %2933 = vmatpush.bf16.msrb.mxu2 %v2819_v61  ;;  %v2816_v54 = vsel %vm8103_vm4, %v2786_v0, 0  ;;  %vm8104_vm1 = vmmov %vm8102_vm0  ;;  %v2664_v61 = vperm.slane %v6627_v49, 5  ;;  %v2792_v0 = vpack.c.b16 %v2776_v3, %v2776_v3 }
 0x306   :  { %v2822_v62 = vsel %vm8104_vm1, %v2788_v24, 0  ;;  %vm2687_vm6 = vmpackc.low %vm6658_vm2, %vm6654_vm13 }
 0x307   :  { %v2746_v16 = vsel %vm2687_vm6, %v2727_v10, 0  ;;  %vm8109_vm13 = vmmov %vm8102_vm0 }
 0x308   :  { %vm8110_vm2 = vmmov %vm8101_vm7  ;;  %v2773_v5 = vunpack.c.l.b16 %v2746_v16  ;;  %v2774_v43 = vunpack.c.h.b16 %v2746_v16 }
 0x309   :  { %vm8115_vm6 = vmmov %vm8087_vm15  ;;  %vm8116_vm15 = vcmp.lt.s32.totalorder %v6475_v30, 32 }
 0x30a   :  { %v2789_v44 = vpack.c.b16 %v2773_v5, %v2773_v5  ;;  %v2790_v36 = vpack.c.b16 %v2774_v43, %v2774_v43 }
 0x30b   :  { %4528 = vmatmul.msk.bf16.vlgmr.msrb.gmra.mxu0 %vm8099_vm12, %v6448_v32  ;;  %vm6685_vm12 = vcmp.eq.s32.totalorder %v2666_v13, 1 }
 0x30c   :  { %4529 = vmatmul.msk.bf16.vlgmr.msrb.gmra.mxu1 %vm8100_vm10, %v6448_v32  ;;  %2907 = vmatpush.bf16.msrb.mxu0 %v2813_v12  ;;  %vm8111_vm10 = vmmov %vm8102_vm0  ;;  %vm8114_vm0 = vnez %v8113_v15 }
 0x30d   :  { %4531 = vmatmul.msk.bf16.vlgmr.msrb.gmra.mxu3 %vm8101_vm7, %v6448_v32  ;;  %v2717_v32 = vrot.slane %v2708_v14, 4  ;;  %2920 = vmatpush.bf16.msrb.mxu1 %v2816_v54  ;;  %v2831_v17 = vsel %vm8111_vm10, %v2791_v21, 0  ;;  %vm8112_vm7 = vcmp.ge.s32.totalorder %v6475_v30, 0  ;;  %vm2690_vm1 = vmpackc.low %vm6685_vm12, %vm6681_vm5  ;;  %vm6709_vm5 = vcmp.eq.s32.totalorder %v2663_v29, 1 }
 0x30e   :  { %2946 = vmatpush.bf16.msrb.mxu3 %v2822_v62  ;;  %vm3076_vm4 = vmand %vm8114_vm0, %vm8112_vm7  ;;  %vm6719_vm12 = vcmp.eq.s32.totalorder %v2664_v61, 1  ;;  %v3144_v62 = vrot.slane %v6729_v7, 4 }
 0x30f   :  { %v2732_v42 = vsel %vm8109_vm13, %v2716_v46, %v2717_v32  ;;  %vm3080_vm13 = vmand %vm3076_vm4, %vm8116_vm15  ;;  %v3125_v32 = vpop.permute.xlu1 %3124 }
 0x310   :  { %v2733_v45 = vsel %vm8115_vm6, %v2732_v42, %v2708_v14  ;;  %v6727_v26 = vsel %vm3080_vm13, 1, %v8045_v60  ;;  %vm2689_vm15 = vmpackc.low %vm6719_vm12, %vm6709_vm5  ;;  %vm8128_vm13 = vcmask 1039360  }
 0x311   :  { %v2749_v33 = vsel %vm2690_vm1, %v2733_v45, 0  ;;  %v3086_v12 = vperm.slane %v6727_v26, 2  ;;  %v3087_v54 = vperm.slane %v6727_v26, 3  ;;  %v3142_v45 = vrot.slane %v3125_v32, 4 }
 0x312   :  { %v2779_v14 = vunpack.c.l.b16 %v2749_v33  ;;  %v2780_v43 = vunpack.c.h.b16 %v2749_v33  ;;  %v3084_v3 = vperm.slane %v6727_v26, 0  ;;  %v3085_v29 = vperm.slane %v6727_v26, 1 }
 0x313   :  { %vm6752_vm5 = vcmp.eq.s32.totalorder %v3087_v54, 1 }
 0x314   :  { %4534 = vmatmul.msk.bf16.vlgmr.msra.gmra.mxu2 %vm8110_vm2, %v6583_v50  ;;  %vm8121_vm2 = vmmov %vm8111_vm10  ;;  %vm8122_vm10 = vcmask 64512   ;;  %v2795_v10 = vpack.c.b16 %v2779_v14, %v2779_v14  ;;  %v3131_v14 = vpop.permute.xlu0 %3130 }
 0x315   :  { %2985 = vmatpush.bf16.msra.mxu2 %v2831_v17  ;;  %vm8123_vm7 = vmmov %vm8122_vm10 }
 0x316   :  { %vm8124_vm0 = vmmov %vm8123_vm7 }
 0x317   :  { %v2185_v34 = vpop.f32.mrf.mxu2  ;;  %vm8125_vm4 = vmmov %vm8121_vm2 }
 0x318   :  { %v6707_v56 = vadd.f32 %v2185_v34, %v6338_v35  ;;  %v2730_v35 = vsel %vm8121_vm2, %v2715_v23, %v2716_v46  ;;  %vm8126_vm1 = vmmov %vm8121_vm2  ;;  %vm6748_vm2 = vcmp.eq.s32.totalorder %v3086_v12, 1 }
 0x319   :  { %v2159_v58 = vpop.f32.mrf.mxu0  ;;  %v2172_v18 = vpop.f32.mrf.mxu1  ;;  %v2828_v39 = vsel %vm8126_vm1, %v2790_v36, 0  ;;  %vm8127_vm6 = vmmov %vm8126_vm1  ;;  %v2731_v63 = vsel %vm8128_vm13, %v2730_v35, %v2706_v20  ;;  %v2796_v36 = vpack.c.b16 %v2780_v43, %v2780_v43  ;;  %vm6779_vm13 = vcmp.eq.s32.totalorder %v3085_v29, 1 }
 0x31a   :  { %v6714_v37 = vadd.f32 %v2159_v58, %v6344_v55  ;;  %v6717_v49 = vadd.f32 %v2172_v18, %v6346_v40  ;;  %v2825_v55 = vsel %vm8125_vm4, %v2789_v44, 0  ;;  %v3127_v40 = vpop.permute.xlu2 %3126  ;;  %v2834_v23 = vsel %vm8127_vm6, %v2792_v0, 0  ;;  %vm8133_vm12 = vmmov %vm8126_vm1  ;;  %v6771_v0 = vpop.permute.xlu1 %3132 }
 0x31b   :  { %4532 = vmatmul.msk.bf16.vlgmr.msra.gmra.mxu0 %vm8122_vm10, %v6583_v50  ;;  %v3143_v13 = vrot.slane %v3127_v40, 4  ;;  %v2748_v21 = vsel %vm2689_vm15, %v2731_v63, 0  ;;  %vm8134_vm10 = vmmov %vm8124_vm0  ;;  %vm8136_vm4 = vcmask 793600   ;;  %vm6775_vm15 = vcmp.eq.s32.totalorder %v3084_v3, 1 }
 0x31c   :  { %4533 = vmatmul.msk.bf16.vlgmr.msra.gmra.mxu1 %vm8123_vm7, %v6583_v50  ;;  %2959 = vmatpush.bf16.msra.mxu0 %v2825_v55  ;;  %vm8135_vm7 = vmmov %vm8126_vm1  ;;  %v2777_v17 = vunpack.c.l.b16 %v2748_v21  ;;  %v2778_v15 = vunpack.c.h.b16 %v2748_v21  ;;  %v3091_v63 = vperm.slane %v6727_v26, 7  ;;  %v3146_v12 = vrot.slane %v6771_v0, 4 }
 0x31d   :  { %4535 = vmatmul.msk.bf16.vlgmr.msra.gmra.mxu3 %vm8124_vm0, %v6583_v50  ;;  %2972 = vmatpush.bf16.msra.mxu1 %v2828_v39  ;;  %v3153_v9 = vsel %vm8133_vm12, %v3143_v13, %v3144_v62  ;;  %v2843_v42 = vsel %vm8135_vm7, %v2795_v10, 0  ;;  %vm3117_vm0 = vmpackc.low %vm6752_vm5, %vm6748_vm2  ;;  %v3151_v18 = vsel %vm8126_vm1, %v3142_v45, %v3143_v13  ;;  %v3089_v43 = vperm.slane %v6727_v26, 5 }
 0x31e   :  { %2998 = vmatpush.bf16.msra.mxu3 %v2834_v23  ;;  %v3154_v5 = vsel %vm8136_vm4, %v3153_v9, %v6729_v7  ;;  %v2793_v61 = vpack.c.b16 %v2777_v17, %v2777_v17  ;;  %v2794_v34 = vpack.c.b16 %v2778_v15, %v2778_v15  ;;  %vm8137_vm6 = vmmov %vm8134_vm10  ;;  %v3090_v23 = vperm.slane %v6727_v26, 6 }
 0x31f   :  { %v2187_v59 = vpop.f32.mrf.mxu2  ;;  %v3176_v44 = vsel %vm3117_vm0, %v3154_v5, 0  ;;  %vm8142_vm2 = vmmov %vm8137_vm6  ;;  %v3088_v15 = vperm.slane %v6727_v26, 4 }
 0x320   :  { %v3200_v58 = vunpack.c.l.b16 %v3176_v44  ;;  %vm8143_vm5 = vmmov %vm8142_vm2  ;;  %v3145_v59 = vrot.slane %v3131_v14, 4 }
 0x321   :  { %v2161_v46 = vpop.f32.mrf.mxu0  ;;  %v2174_v16 = vpop.f32.mrf.mxu1  ;;  %vm8144_vm12 = vmmov %vm8126_vm1 }
 0x322   :  { %v2837_v57 = vsel %vm8144_vm12, %v2793_v61, 0  ;;  %vm8146_vm7 = vmmov %vm8126_vm1  ;;  %v3216_v54 = vpack.c.b16 %v3200_v58, %v3200_v58  ;;  %v6812_v16 = vpop.permute.xlu2 %3188 }
 0x323   :  { %v2846_v55 = vsel %vm8146_vm7, %v2796_v36, 0  ;;  %vm8147_vm0 = vmmov %vm8136_vm4 }
 0x324   :  { %4538 = vmatmul.msk.bf16.vlgmr.msrb.gmra.mxu2 %vm8134_vm10, %v6583_v50  ;;  %vm8145_vm10 = vmmov %vm8126_vm1  ;;  %v3152_v39 = vsel %vm8147_vm0, %v3151_v18, %v3127_v40  ;;  %vm6801_vm1 = vcmp.eq.s32.totalorder %v3090_v23, 1 }
 0x325   :  { %3037 = vmatpush.bf16.msrb.mxu2 %v2843_v42  ;;  %v2840_v35 = vsel %vm8145_vm10, %v2794_v34, 0  ;;  %vm3116_vm4 = vmpackc.low %vm6779_vm13, %vm6775_vm15  ;;  %v3201_v42 = vunpack.c.h.b16 %v3176_v44 }
 0x326   :  { %v3175_v32 = vsel %vm3116_vm4, %v3152_v39, 0  ;;  %vm8153_vm15 = vmmov %vm8143_vm5  ;;  %vm6837_vm4 = vcmp.eq.s32.totalorder %v3088_v15, 1 }
 0x327   :  { %v3198_v20 = vunpack.c.l.b16 %v3175_v32  ;;  %v3199_v9 = vunpack.c.h.b16 %v3175_v32  ;;  %v3217_v36 = vpack.c.b16 %v3201_v42, %v3201_v42 }
 0x329   :  { %v3214_v34 = vpack.c.b16 %v3198_v20, %v3198_v20  ;;  %v3215_v44 = vpack.c.b16 %v3199_v9, %v3199_v9 }
 0x32b   :  { %4536 = vmatmul.msk.bf16.vlgmr.msrb.gmra.mxu0 %vm8137_vm6, %v6583_v50  ;;  %vm6805_vm6 = vcmp.eq.s32.totalorder %v3091_v63, 1 }
 0x32c   :  { %4537 = vmatmul.msk.bf16.vlgmr.msrb.gmra.mxu1 %vm8142_vm2, %v6583_v50  ;;  %3011 = vmatpush.bf16.msrb.mxu0 %v2837_v57  ;;  %vm8152_vm2 = vmmov %vm8146_vm7 }
 0x32d   :  { %4539 = vmatmul.msk.bf16.vlgmr.msrb.gmra.mxu3 %vm8143_vm5, %v6583_v50  ;;  %3024 = vmatpush.bf16.msrb.mxu1 %v2840_v35  ;;  %v3157_v46 = vsel %vm8152_vm2, %v3145_v59, %v3146_v12  ;;  %vm8154_vm13 = vmmov %vm8152_vm2  ;;  %vm8155_vm5 = vcmp.ge.s32.totalorder %v6463_v27, 0 }
 0x32e   :  { %3050 = vmatpush.bf16.msrb.mxu3 %v2846_v55  ;;  %vm3077_vm12 = vmand %vm4917_vm3, %vm8155_vm5  ;;  %vm8158_vm3 = vcmp.lt.s32.totalorder %v6463_v27, 32 }
 0x32f   :  { %v2198_v10 = vpop.f32.mrf.mxu3  ;;  %vm3119_vm10 = vmpackc.low %vm6805_vm6, %vm6801_vm1  ;;  %vm6844_vm1 = vcmp.eq.s32.totalorder %v3089_v43, 1 }
 0x330   :  { %v6799_v13 = vadd.f32 %v2198_v10, %v6340_v31  ;;  %v3240_v31 = vsel %vm8154_vm13, %v3216_v54, 0  ;;  %vm8157_vm7 = vmmov %vm8147_vm0 }
 0x331   :  { %v3158_v17 = vsel %vm8157_vm7, %v3157_v46, %v6771_v0  ;;  %vm3081_vm0 = vmand %vm3077_vm12, %vm8158_vm3  ;;  %vm8170_vm3 = vcmask 793600  }
 0x332   :  { %v3178_v29 = vsel %vm3119_vm10, %v3158_v17, 0  ;;  %vm8163_vm6 = vmmov %vm8152_vm2  ;;  %v6852_v33 = vsel %vm3081_vm0, 1, %v8045_v60 }
 0x333   :  { %v3155_v27 = vsel %vm8163_vm6, %v3144_v62, %v3145_v59  ;;  %v3204_v57 = vunpack.c.l.b16 %v3178_v29  ;;  %vm8164_vm2 = vmmov %vm8153_vm15  ;;  %v3135_v62 = vpop.permute.xlu2 %3134  ;;  %v3094_v39 = vperm.slane %v6852_v33, 2  ;;  %v3095_v23 = vperm.slane %v6852_v33, 3 }
 0x334   :  { %4542 = vmatmul.msk.bf16.vlgmr.msra.gmra.mxu2 %vm8153_vm15, %v6583_v50  ;;  %vm8165_vm15 = vmmov %vm8164_vm2  ;;  %v3156_v55 = vsel %vm8170_vm3, %v3155_v27, %v3131_v14  ;;  %v3147_v32 = vrot.slane %v3135_v62, 4  ;;  %v3205_v15 = vunpack.c.h.b16 %v3178_v29 }
 0x335   :  { %3314 = vmatpush.bf16.msra.mxu2 %v3240_v31  ;;  %vm8166_vm13 = vmmov %vm8164_vm2  ;;  %v3220_v10 = vpack.c.b16 %v3204_v57, %v3204_v57  ;;  %vm6876_vm0 = vcmp.eq.s32.totalorder %v3094_v39, 1 }
 0x336   :  { %v2237_v5 = vpop.f32.mrf.mxu2  ;;  %vm8167_vm5 = vmmov %vm8163_vm6 }
 0x337   :  { %v2200_v45 = vpop.f32.mrf.mxu3  ;;  %v6830_v3 = vadd.f32 %v2237_v5, %v6384_v38  ;;  %vm8168_vm12 = vmmov %vm8167_vm5  ;;  %v3221_v38 = vpack.c.b16 %v3205_v15, %v3205_v15 }
 0x338   :  { %v2211_v61 = vpop.f32.mrf.mxu0  ;;  %v3237_v7 = vsel %vm8168_vm12, %v3215_v44, 0  ;;  %vm8169_vm10 = vmmov %vm8167_vm5 }
 0x339   :  { %v6835_v58 = vadd.f32 %v2211_v61, %v6389_v41  ;;  %v2224_v18 = vpop.f32.mrf.mxu1  ;;  %v6854_v41 = vpop.permute.xlu0 %3136  ;;  %v3243_v35 = vsel %vm8169_vm10, %v3217_v36, 0  ;;  %vm3118_vm7 = vmpackc.low %vm6844_vm1, %vm6837_vm4  ;;  %vm6880_vm4 = vcmp.eq.s32.totalorder %v3095_v23, 1  ;;  %v3092_v61 = vperm.slane %v6852_v33, 0 }
 0x33a   :  { %v6842_v26 = vadd.f32 %v2224_v18, %v6391_v48  ;;  %v3234_v48 = vsel %vm8167_vm5, %v3214_v34, 0  ;;  %v3148_v63 = vrot.slane %v6854_v41, 4  ;;  %v3177_v46 = vsel %vm3118_vm7, %v3156_v55, 0  ;;  %vm8175_vm1 = vmmov %vm8167_vm5 }
 0x33b   :  { %4540 = vmatmul.msk.bf16.vlgmr.msra.gmra.mxu0 %vm8164_vm2, %v6583_v50  ;;  %vm8176_vm6 = vmmov %vm8164_vm2  ;;  %v3202_v9 = vunpack.c.l.b16 %v3177_v46  ;;  %v3203_v42 = vunpack.c.h.b16 %v3177_v46  ;;  %v3093_v34 = vperm.slane %v6852_v33, 1  ;;  %vm6914_vm10 = vcmp.eq.s32.totalorder %v3092_v61, 1 }
 0x33c   :  { %4541 = vmatmul.msk.bf16.vlgmr.msra.gmra.mxu1 %vm8165_vm15, %v6583_v50  ;;  %3288 = vmatpush.bf16.msra.mxu0 %v3234_v48  ;;  %v3161_v20 = vsel %vm8175_vm1, %v3147_v32, %v3148_v63  ;;  %vm8177_vm2 = vmmov %vm8175_vm1  ;;  %v3097_v61 = vperm.slane %v6852_v33, 5 }
 0x33d   :  { %4543 = vmatmul.msk.bf16.vlgmr.msra.gmra.mxu3 %vm8166_vm13, %v6583_v50  ;;  %3301 = vmatpush.bf16.msra.mxu1 %v3237_v7  ;;  %vm3121_vm15 = vmpackc.low %vm6880_vm4, %vm6876_vm0  ;;  %v3218_v44 = vpack.c.b16 %v3202_v9, %v3202_v9  ;;  %v3219_v36 = vpack.c.b16 %v3203_v42, %v3203_v42  ;;  %v6910_v7 = vpop.permute.xlu1 %3138  ;;  %vm6918_vm7 = vcmp.eq.s32.totalorder %v3093_v34, 1 }
 0x33e   :  { %3327 = vmatpush.bf16.msra.mxu3 %v3243_v35  ;;  %v2239_v54 = vpop.f32.mrf.mxu2  ;;  %vm8178_vm13 = vmmov %vm8170_vm3  ;;  %v3149_v39 = vrot.slane %v6910_v7, 4 }
 0x33f   :  { %v3162_v17 = vsel %vm8178_vm13, %v3161_v20, %v6854_v41  ;;  %vm8179_vm5 = vmmov %vm8175_vm1  ;;  %v3249_v0 = vsel %vm8175_vm1, %v3219_v36, 0  ;;  %v3098_v54 = vperm.slane %v6852_v33, 6  ;;  %v6992_v41 = vsel %vm6536_vm14, 1, %v8045_v60 }
 0x340   :  { %v2250_v59 = vpop.f32.mrf.mxu3  ;;  %v2213_v21 = vpop.f32.mrf.mxu0  ;;  %v3180_v18 = vsel %vm3121_vm15, %v3162_v17, 0  ;;  %vm8180_vm12 = vmmov %vm8176_vm6 }
 0x341   :  { %v6874_v40 = vadd.f32 %v2250_v59, %v6386_v6  ;;  %v2226_v31 = vpop.f32.mrf.mxu1  ;;  %v3252_v6 = vsel %vm8177_vm2, %v3220_v10, 0  ;;  %v3208_v48 = vunpack.c.l.b16 %v3180_v18  ;;  %vm8185_vm3 = vmmov %vm8176_vm6  ;;  %v3099_v10 = vperm.slane %v6852_v33, 7 }
 0x342   :  { %vm8186_vm0 = vmmov %vm8185_vm3  ;;  %v3209_v17 = vunpack.c.h.b16 %v3180_v18 }
 0x343   :  { %vm8187_vm4 = vmmov %vm8175_vm1  ;;  %v3224_v59 = vpack.c.b16 %v3208_v48, %v3208_v48 }
 0x344   :  { %4546 = vmatmul.msk.bf16.vlgmr.msrb.gmra.mxu2 %vm8176_vm6, %v6583_v50  ;;  %vm8188_vm6 = vmmov %vm8175_vm1 }
 0x345   :  { %3366 = vmatpush.bf16.msrb.mxu2 %v3252_v6  ;;  %v3255_v55 = vsel %vm8188_vm6, %v3221_v38, 0  ;;  %vm3120_vm2 = vmpackc.low %vm6918_vm7, %vm6914_vm10 }
 0x346   :  { %vm8189_vm15 = vmmov %vm8178_vm13 }
 0x347   :  { %v2289_v5 = vpop.f32.mrf.mxu2  ;;  %vm8190_vm13 = vmmov %vm8175_vm1 }
 0x348   :  { %v2252_v43 = vpop.f32.mrf.mxu3  ;;  %v6897_v45 = vadd.f32 %v2289_v5, %v6428_v4  ;;  %v2263_v24 = vpop.f32.mrf.mxu0  ;;  %v3159_v4 = vsel %vm8179_vm5, %v3146_v12, %v3147_v32  ;;  %vm6941_vm5 = vcmp.eq.s32.totalorder %v3098_v54, 1  ;;  %vm8195_vm10 = vmmov %vm8186_vm0 }
 0x349   :  { %v6902_v27 = vadd.f32 %v2263_v24, %v6434_v19  ;;  %v2276_v57 = vpop.f32.mrf.mxu1  ;;  %v3141_v12 = vpop.permute.xlu2 %3140  ;;  %vm8196_vm7 = vmmov %vm8175_vm1  ;;  %v3096_v43 = vperm.slane %v6852_v33, 4  ;;  %vm6972_vm1 = vcmp.eq.s32.totalorder %v3097_v61, 1  ;;  %v3511_v61 = vperm.slane %v6992_v41, 0 }
 0x34a   :  { %v6905_v29 = vadd.f32 %v2276_v57, %v6436_v8  ;;  %v3246_v8 = vsel %vm8187_vm4, %v3218_v44, 0  ;;  %v3150_v21 = vrot.slane %v3141_v12, 4  ;;  %v3264_v9 = vsel %vm8196_vm7, %v3224_v59, 0 }
 0x34b   :  { %4544 = vmatmul.msk.bf16.vlgmr.msrb.gmra.mxu0 %vm8180_vm12, %v6583_v50  ;;  %vm6945_vm12 = vcmp.eq.s32.totalorder %v3099_v10, 1  ;;  %v3225_v57 = vpack.c.b16 %v3209_v17, %v3209_v17  ;;  %vm6968_vm4 = vcmp.eq.s32.totalorder %v3096_v43, 1 }
 0x34c   :  { %4545 = vmatmul.msk.bf16.vlgmr.msrb.gmra.mxu1 %vm8185_vm3, %v6583_v50  ;;  %3340 = vmatpush.bf16.msrb.mxu0 %v3246_v8  ;;  %v3165_v20 = vsel %vm8190_vm13, %v3149_v39, %v3150_v21  ;;  %vm3123_vm3 = vmpackc.low %vm6945_vm12, %vm6941_vm5  ;;  %v6979_v8 = vpop.permute.xlu1 %3555 }
 0x34d   :  { %4547 = vmatmul.msk.bf16.vlgmr.msrb.gmra.mxu3 %vm8186_vm0, %v6583_v50  ;;  %3353 = vmatpush.bf16.msrb.mxu1 %v3249_v0  ;;  %v3160_v50 = vsel %vm8189_vm15, %v3159_v4, %v3135_v62  ;;  %vm8197_vm0 = vmmov %vm8189_vm15  ;;  %v3571_v53 = vrot.slane %v6979_v8, 4 }
 0x34e   :  { %3379 = vmatpush.bf16.msrb.mxu3 %v3255_v55  ;;  %v3179_v14 = vsel %vm3120_vm2, %v3160_v50, 0  ;;  %v3166_v15 = vsel %vm8197_vm0, %v3165_v20, %v3141_v12  ;;  %vm8202_vm2 = vmmov %vm8195_vm10  ;;  %v3554_v12 = vpop.permute.xlu0 %3553 }
 0x34f   :  { %v2291_v23 = vpop.f32.mrf.mxu2  ;;  %v3207_v42 = vunpack.c.h.b16 %v3179_v14  ;;  %v3182_v18 = vsel %vm3123_vm3, %v3166_v15, 0  ;;  %vm8203_vm15 = vmmov %vm8202_vm2  ;;  %v3570_v59 = vrot.slane %v3554_v12, 4 }
 0x350   :  { %v2302_v32 = vpop.f32.mrf.mxu3  ;;  %v2265_v31 = vpop.f32.mrf.mxu0  ;;  %vm8204_vm13 = vmmov %vm8202_vm2  ;;  %v3514_v23 = vperm.slane %v6992_v41, 3 }
 0x351   :  { %v6938_v46 = vadd.f32 %v2302_v32, %v6432_v2  ;;  %v2278_v1 = vpop.f32.mrf.mxu1  ;;  %v3206_v2 = vunpack.c.l.b16 %v3179_v14  ;;  %v3223_v38 = vpack.c.b16 %v3207_v42, %v3207_v42  ;;  %vm8205_vm5 = vmmov %vm8188_vm6  ;;  %v3552_v6 = vpop.permute.xlu2 %3551  ;;  %v3213_v42 = vunpack.c.h.b16 %v3182_v18 }
 0x352   :  { %vm8206_vm12 = vmmov %vm8205_vm5  ;;  %v3569_v15 = vrot.slane %v3552_v6, 4 }
 0x353   :  { %v3222_v24 = vpack.c.b16 %v3206_v2, %v3206_v2  ;;  %v3261_v0 = vsel %vm8206_vm12, %v3223_v38, 0  ;;  %vm3122_vm7 = vmpackc.low %vm6972_vm1, %vm6968_vm4  ;;  %v3229_v33 = vpack.c.b16 %v3213_v42, %v3213_v42  ;;  %vm7043_vm12 = vcmp.eq.s32.totalorder %v3511_v61, 1 }
 0x354   :  { %4550 = vmatmul.msk.bf16.vlgmr.msra.gmra.mxu2 %vm8195_vm10, %v6812_v16  ;;  %vm8207_vm10 = vmmov %vm8205_vm5  ;;  %v3516_v61 = vperm.slane %v6992_v41, 5 }
 0x355   :  { %3418 = vmatpush.bf16.msra.mxu2 %v3264_v9  ;;  %vm8208_vm3 = vmmov %vm8197_vm0  ;;  %vm7011_vm0 = vcmp.eq.s32.totalorder %v3514_v23, 1 }
 0x356   :  { %vm8213_vm4 = vmmov %vm8205_vm5 }
 0x357   :  { %v2456_v5 = vpop.f32.mrf.mxu2  ;;  %v3580_v20 = vsel %vm8213_vm4, %v3570_v59, %v3571_v53  ;;  %vm8214_vm1 = vmmov %vm8202_vm2 }
 0x358   :  { %v2304_v34 = vpop.f32.mrf.mxu3  ;;  %v6960_v44 = vadd.f32 %v2456_v5, %v6549_v52  ;;  %v2430_v36 = vpop.f32.mrf.mxu0  ;;  %v3163_v52 = vsel %vm8188_vm6, %v3148_v63, %v3149_v39  ;;  %v3267_v63 = vsel %vm8207_vm10, %v3225_v57, 0  ;;  %v3513_v39 = vperm.slane %v6992_v41, 2  ;;  %vm8215_vm6 = vmmov %vm8213_vm4 }
 0x359   :  { %v6963_v48 = vadd.f32 %v2430_v36, %v6543_v51  ;;  %v2443_v4 = vpop.f32.mrf.mxu1  ;;  %v3212_v51 = vunpack.c.l.b16 %v3182_v18  ;;  %v3164_v55 = vsel %vm8208_vm3, %v3163_v52, %v6910_v7  ;;  %v3512_v34 = vperm.slane %v6992_v41, 1  ;;  %vm8224_vm3 = vmmov %vm8214_vm1 }
 0x35a   :  { %v6966_v35 = vadd.f32 %v2443_v4, %v6546_v47  ;;  %v3258_v47 = vsel %vm8205_vm5, %v3222_v24, 0  ;;  %v3181_v31 = vsel %vm3122_vm7, %v3164_v55, 0  ;;  %vm7007_vm14 = vcmp.eq.s32.totalorder %v3513_v39, 1  ;;  %vm8218_vm5 = vmmov %vm8214_vm1 }
 0x35b   :  { %4548 = vmatmul.msk.bf16.vlgmr.msra.gmra.mxu0 %vm8202_vm2, %v6812_v16  ;;  %v3228_v10 = vpack.c.b16 %v3212_v51, %v3212_v51  ;;  %v3210_v62 = vunpack.c.l.b16 %v3181_v31  ;;  %v3211_v9 = vunpack.c.h.b16 %v3181_v31  ;;  %vm3544_vm2 = vmpackc.low %vm7011_vm0, %vm7007_vm14  ;;  %v7039_v51 = vpop.permute.xlu1 %3557  ;;  %vm7047_vm10 = vcmp.eq.s32.totalorder %v3512_v34, 1 }
 0x35c   :  { %4549 = vmatmul.msk.bf16.vlgmr.msra.gmra.mxu1 %vm8203_vm15, %v6812_v16  ;;  %3392 = vmatpush.bf16.msra.mxu0 %v3258_v47  ;;  %vm8216_vm15 = vcmask 785408   ;;  %vm8223_vm7 = vmmov %vm8214_vm1  ;;  %v3572_v23 = vrot.slane %v7039_v51, 4 }
 0x35d   :  { %4551 = vmatmul.msk.bf16.vlgmr.msra.gmra.mxu3 %vm8204_vm13, %v6812_v16  ;;  %3405 = vmatpush.bf16.msra.mxu1 %v3261_v0  ;;  %v3581_v2 = vsel %vm8216_vm15, %v3580_v20, %v6979_v8  ;;  %v3226_v36 = vpack.c.b16 %v3210_v62, %v3210_v62  ;;  %v3227_v24 = vpack.c.b16 %v3211_v9, %v3211_v9  ;;  %vm8217_vm13 = vmmov %vm8213_vm4  ;;  %v7083_v62 = vpop.permute.xlu0 %3615  ;;  %v7129_v8 = vsel %vm6500_vm11, 1, %v8045_v60 }
 0x35e   :  { %3431 = vmatpush.bf16.msra.mxu3 %v3267_v63  ;;  %v3603_v38 = vsel %vm3544_vm2, %v3581_v2, 0  ;;  %v3578_v52 = vsel %vm8217_vm13, %v3569_v15, %v3570_v59  ;;  %vm8225_vm14 = vmmov %vm8213_vm4  ;;  %v7057_v63 = vpop.permute.xlu2 %3559 }
 0x35f   :  { %v2458_v50 = vpop.f32.mrf.mxu2  ;;  %vm8226_vm0 = vmmov %vm8213_vm4  ;;  %v3573_v31 = vrot.slane %v7057_v63, 4  ;;  %v3628_v42 = vunpack.c.h.b16 %v3603_v38 }
 0x360   :  { %v2469_v54 = vpop.f32.mrf.mxu3  ;;  %v2432_v21 = vpop.f32.mrf.mxu0  ;;  %v3273_v0 = vsel %vm8226_vm0, %v3227_v24, 0  ;;  %vm8227_vm4 = vmmov %vm8226_vm0 }
 0x361   :  { %v7005_v32 = vadd.f32 %v2469_v54, %v6552_v28  ;;  %v2445_v1 = vpop.f32.mrf.mxu1  ;;  %v3276_v28 = vsel %vm8215_vm6, %v3228_v10, 0  ;;  %v3279_v55 = vsel %vm8227_vm4, %v3229_v33, 0  ;;  %vm3543_vm6 = vmpackc.low %vm7047_vm10, %vm7043_vm12  ;;  %v3517_v54 = vperm.slane %v6992_v41, 6 }
 0x362   :  { %v3518_v10 = vperm.slane %v6992_v41, 7  ;;  %vm8229_vm2 = vmmov %vm8226_vm0  ;;  %v3644_v33 = vpack.c.b16 %v3628_v42, %v3628_v42 }
 0x363   :  { %v3584_v20 = vsel %vm8229_vm2, %v3572_v23, %v3573_v31  ;;  %vm8235_vm12 = vmmov %vm8226_vm0 }
 0x364   :  { %4554 = vmatmul.msk.bf16.vlgmr.msrb.gmra.mxu2 %vm8214_vm1, %v6812_v16  ;;  %vm8228_vm1 = vmmov %vm8216_vm15  ;;  %vm7075_vm15 = vcmp.eq.s32.totalorder %v3517_v54, 1  ;;  %vm7079_vm13 = vcmp.eq.s32.totalorder %v3518_v10, 1 }
 0x365   :  { %3470 = vmatpush.bf16.msrb.mxu2 %v3276_v28  ;;  %v3579_v39 = vsel %vm8228_vm1, %v3578_v52, %v3554_v12  ;;  %vm3546_vm10 = vmpackc.low %vm7079_vm13, %vm7075_vm15 }
 0x366   :  { %v3602_v7 = vsel %vm3543_vm6, %v3579_v39, 0  ;;  %vm8244_vm2 = vmmov %vm8226_vm0 }
 0x367   :  { %v2508_v17 = vpop.f32.mrf.mxu2  ;;  %v3625_v9 = vunpack.c.l.b16 %v3602_v7  ;;  %v3626_v2 = vunpack.c.h.b16 %v3602_v7  ;;  %vm8245_vm15 = vmmov %vm8226_vm0 }
 0x368   :  { %v2471_v5 = vpop.f32.mrf.mxu3  ;;  %v7028_v43 = vadd.f32 %v2508_v17, %v6707_v56  ;;  %v2482_v57 = vpop.f32.mrf.mxu0  ;;  %v3627_v56 = vunpack.c.l.b16 %v3603_v38  ;;  %vm8246_vm13 = vmmov %vm8226_vm0 }
 0x369   :  { %v7033_v4 = vadd.f32 %v2482_v57, %v6714_v37  ;;  %v2495_v19 = vpop.f32.mrf.mxu1  ;;  %v3515_v5 = vperm.slane %v6992_v41, 4  ;;  %v3641_v57 = vpack.c.b16 %v3625_v9, %v3625_v9  ;;  %v3642_v38 = vpack.c.b16 %v3626_v2, %v3626_v2 }
 0x36a   :  { %v7036_v18 = vadd.f32 %v2495_v19, %v6717_v49  ;;  %v3270_v49 = vsel %vm8225_vm14, %v3226_v36, 0  ;;  %v3643_v59 = vpack.c.b16 %v3627_v56, %v3627_v56  ;;  %vm7109_vm14 = vcmp.eq.s32.totalorder %v3516_v61, 1 }
 0x36b   :  { %4552 = vmatmul.msk.bf16.vlgmr.msrb.gmra.mxu0 %vm8218_vm5, %v6812_v16  ;;  %vm8234_vm5 = vmmov %vm8224_vm3 }
 0x36c   :  { %4553 = vmatmul.msk.bf16.vlgmr.msrb.gmra.mxu1 %vm8223_vm7, %v6812_v16  ;;  %3444 = vmatpush.bf16.msrb.mxu0 %v3270_v49  ;;  %vm8236_vm7 = vmmov %vm8228_vm1  ;;  %v7116_v49 = vpop.permute.xlu1 %3563 }
 0x36d   :  { %4555 = vmatmul.msk.bf16.vlgmr.msrb.gmra.mxu3 %vm8224_vm3, %v6812_v16  ;;  %3457 = vmatpush.bf16.msrb.mxu1 %v3273_v0  ;;  %v3585_v17 = vsel %vm8236_vm7, %v3584_v20, %v7057_v63  ;;  %vm7105_vm3 = vcmp.eq.s32.totalorder %v3515_v5, 1  ;;  %vm8241_vm4 = vmmov %vm8234_vm5  ;;  %v3664_v0 = vsel %vm8245_vm15, %v3642_v38, 0  ;;  %v3575_v22 = vrot.slane %v7116_v49, 4 }
 0x36e   :  { %3483 = vmatpush.bf16.msrb.mxu3 %v3279_v55  ;;  %v3605_v19 = vsel %vm3546_vm10, %v3585_v17, 0  ;;  %vm8242_vm1 = vmmov %vm8241_vm4  ;;  %v3670_v55 = vsel %vm8246_vm13, %v3644_v33, 0  ;;  %v3520_v5 = vperm.slane %v7129_v8, 1 }
 0x36f   :  { %v2510_v50 = vpop.f32.mrf.mxu2  ;;  %vm8243_vm6 = vmmov %vm8242_vm1  ;;  %v3632_v42 = vunpack.c.h.b16 %v3605_v19 }
 0x370   :  { %v2521_v21 = vpop.f32.mrf.mxu3  ;;  %v2484_v12 = vpop.f32.mrf.mxu0  ;;  %v3522_v50 = vperm.slane %v7129_v8, 3 }
 0x371   :  { %v7070_v1 = vadd.f32 %v2521_v21, %v6799_v13  ;;  %v2497_v14 = vpop.f32.mrf.mxu1  ;;  %v3667_v13 = vsel %vm8235_vm12, %v3643_v59, 0  ;;  %vm8247_vm12 = vmmov %vm8236_vm7  ;;  %v3648_v41 = vpack.c.b16 %v3632_v42, %v3632_v42 }
 0x372   :  { %vm7148_vm10 = vcmp.eq.s32.totalorder %v3522_v50, 1  ;;  %vm8252_vm7 = vmmov %vm8226_vm0 }
 0x374   :  { %4558 = vmatmul.msk.bf16.vlgmr.msra.gmra.mxu2 %vm8234_vm5, %v6812_v16  ;;  %vm3545_vm5 = vmpackc.low %vm7109_vm14, %vm7105_vm3 }
 0x375   :  { %3741 = vmatpush.bf16.msra.mxu2 %v3667_v13  ;;  %vm8253_vm3 = vmmov %vm8242_vm1 }
 0x376   :  { %vm8254_vm14 = vmmov %vm8226_vm0 }
 0x377   :  { %v2560_v15 = vpop.f32.mrf.mxu2  ;;  %vm8260_vm15 = vmmov %vm8253_vm3 }
 0x378   :  { %v2523_v34 = vpop.f32.mrf.mxu3  ;;  %v7097_v36 = vadd.f32 %v2560_v15, %v6830_v3  ;;  %v2534_v24 = vpop.f32.mrf.mxu0  ;;  %v3582_v3 = vsel %vm8226_vm0, %v3571_v53, %v3572_v23  ;;  %v3521_v23 = vperm.slane %v7129_v8, 2  ;;  %v3519_v15 = vperm.slane %v7129_v8, 0  ;;  %vm8261_vm13 = vmmov %vm8253_vm3 }
 0x379   :  { %v7100_v52 = vadd.f32 %v2534_v24, %v6835_v58  ;;  %v2547_v56 = vpop.f32.mrf.mxu1  ;;  %v3631_v58 = vunpack.c.l.b16 %v3605_v19  ;;  %v3562_v53 = vpop.permute.xlu0 %3561  ;;  %v3583_v39 = vsel %vm8247_vm12, %v3582_v3, %v7039_v51 }
 0x37a   :  { %v7103_v47 = vadd.f32 %v2547_v56, %v6842_v26  ;;  %v3661_v26 = vsel %vm8244_vm2, %v3641_v57, 0  ;;  %v3574_v21 = vrot.slane %v3562_v53, 4  ;;  %v3604_v7 = vsel %vm3545_vm5, %v3583_v39, 0  ;;  %vm8262_vm5 = vmmov %vm8253_vm3  ;;  %v7245_v3 = vpop.permute.xlu1 %3980 }
 0x37b   :  { %4556 = vmatmul.msk.bf16.vlgmr.msra.gmra.mxu0 %vm8241_vm4, %v6812_v16  ;;  %v3647_v59 = vpack.c.b16 %v3631_v58, %v3631_v58  ;;  %vm7144_vm11 = vcmp.eq.s32.totalorder %v3521_v23, 1  ;;  %v3629_v13 = vunpack.c.l.b16 %v3604_v7  ;;  %v3630_v9 = vunpack.c.h.b16 %v3604_v7  ;;  %vm8255_vm4 = vmmov %vm8247_vm12 }
 0x37c   :  { %4557 = vmatmul.msk.bf16.vlgmr.msra.gmra.mxu1 %vm8242_vm1, %v6812_v16  ;;  %3715 = vmatpush.bf16.msra.mxu0 %v3661_v26  ;;  %v3588_v28 = vsel %vm8252_vm7, %v3574_v21, %v3575_v22  ;;  %vm3548_vm0 = vmpackc.low %vm7148_vm10, %vm7144_vm11  ;;  %vm7175_vm1 = vcmp.eq.s32.totalorder %v3519_v15, 1  ;;  %v3525_v39 = vperm.slane %v7129_v8, 6  ;;  %v3523_v15 = vperm.slane %v7129_v8, 4 }
 0x37d   :  { %4559 = vmatmul.msk.bf16.vlgmr.msra.gmra.mxu3 %vm8243_vm6, %v6812_v16  ;;  %3728 = vmatpush.bf16.msra.mxu1 %v3664_v0  ;;  %v3589_v2 = vsel %vm8255_vm4, %v3588_v28, %v7116_v49  ;;  %v3645_v24 = vpack.c.b16 %v3629_v13, %v3629_v13  ;;  %v3646_v57 = vpack.c.b16 %v3630_v9, %v3630_v9  ;;  %vm7179_vm6 = vcmp.eq.s32.totalorder %v3520_v5, 1  ;;  %vm8263_vm12 = vmmov %vm8244_vm2 }
 0x37e   :  { %3754 = vmatpush.bf16.msra.mxu3 %v3670_v55  ;;  %v3607_v38 = vsel %vm3548_vm0, %v3589_v2, 0  ;;  %vm8264_vm11 = vmmov %vm8244_vm2  ;;  %v7194_v55 = vpop.permute.xlu2 %3565  ;;  %v3524_v5 = vperm.slane %v7129_v8, 5 }
 0x37f   :  { %v2562_v54 = vpop.f32.mrf.mxu2  ;;  %v3676_v0 = vsel %vm8264_vm11, %v3646_v57, 0  ;;  %vm8265_vm10 = vmmov %vm8244_vm2  ;;  %v3636_v9 = vunpack.c.h.b16 %v3607_v38 }
 0x380   :  { %v2573_v10 = vpop.f32.mrf.mxu3  ;;  %v2536_v14 = vpop.f32.mrf.mxu0  ;;  %v3682_v63 = vsel %vm8265_vm10, %v3648_v41, 0  ;;  %vm3547_vm7 = vmpackc.low %vm7179_vm6, %vm7175_vm1 }
 0x381   :  { %v7142_v12 = vadd.f32 %v2573_v10, %v6874_v40  ;;  %v2549_v20 = vpop.f32.mrf.mxu1  ;;  %v3679_v40 = vsel %vm8254_vm14, %v3647_v59, 0  ;;  %v3568_v26 = vpop.permute.xlu0 %3567  ;;  %v3576_v59 = vrot.slane %v7194_v55, 4  ;;  %vm7208_vm14 = vcmp.eq.s32.totalorder %v3525_v39, 1  ;;  %vm8272_vm1 = vmmov %vm8262_vm5 }
 0x382   :  { %v3577_v23 = vrot.slane %v3568_v26, 4  ;;  %vm8273_vm6 = vmmov %vm8244_vm2 }
 0x383   :  { %vm8278_vm10 = vmmov %vm8272_vm1 }
 0x384   :  { %4562 = vmatmul.msk.bf16.vlgmr.msrb.gmra.mxu2 %vm8253_vm3, %v6812_v16  ;;  %vm8266_vm3 = vmmov %vm8255_vm4 }
 0x385   :  { %3793 = vmatpush.bf16.msrb.mxu2 %v3679_v40  ;;  %vm8271_vm4 = vmmov %vm8244_vm2 }
 0x386   :  { %v3592_v51 = vsel %vm8271_vm4, %v3576_v59, %v3577_v23  ;;  %vm8277_vm11 = vmmov %vm8271_vm4 }
 0x387   :  { %v2612_v17 = vpop.f32.mrf.mxu2 }
 0x388   :  { %v2575_v61 = vpop.f32.mrf.mxu3  ;;  %v7167_v34 = vadd.f32 %v2612_v17, %v6897_v45  ;;  %v2586_v33 = vpop.f32.mrf.mxu0  ;;  %v3586_v45 = vsel %vm8244_vm2, %v3573_v31, %v3574_v21 }
 0x389   :  { %v7170_v56 = vadd.f32 %v2586_v33, %v6902_v27  ;;  %v2599_v37 = vpop.f32.mrf.mxu1  ;;  %v3635_v27 = vunpack.c.l.b16 %v3607_v38  ;;  %v3587_v31 = vsel %vm8266_vm3, %v3586_v45, %v3562_v53 }
 0x38a   :  { %v7173_v19 = vadd.f32 %v2599_v37, %v6905_v29  ;;  %v3673_v29 = vsel %vm8263_vm12, %v3645_v24, 0  ;;  %v3606_v7 = vsel %vm3547_vm7, %v3587_v31, 0  ;;  %v3652_v37 = vpack.c.b16 %v3636_v9, %v3636_v9 }
 0x38b   :  { %4560 = vmatmul.msk.bf16.vlgmr.msrb.gmra.mxu0 %vm8260_vm15, %v6812_v16  ;;  %v3651_v54 = vpack.c.b16 %v3635_v27, %v3635_v27  ;;  %v3634_v40 = vunpack.c.h.b16 %v3606_v7  ;;  %vm8274_vm15 = vmmov %vm8266_vm3  ;;  %vm8276_vm12 = vcmp.lt.s32.totalorder %v6475_v30, 32  ;;  %vm7249_vm7 = vcmp.eq.s32.totalorder %v3523_v15, 1 }
 0x38c   :  { %4561 = vmatmul.msk.bf16.vlgmr.msrb.gmra.mxu1 %vm8261_vm13, %v6812_v16  ;;  %3767 = vmatpush.bf16.msrb.mxu0 %v3673_v29  ;;  %v3593_v13 = vsel %vm8274_vm15, %v3592_v51, %v3568_v26  ;;  %vm8275_vm13 = vcmp.ge.s32.totalorder %v6475_v30, 0  ;;  %vm7253_vm3 = vcmp.eq.s32.totalorder %v3524_v5, 1  ;;  %v3997_v26 = vrot.slane %v7245_v3, 4 }
 0x38d   :  { %4563 = vmatmul.msk.bf16.vlgmr.msrb.gmra.mxu3 %vm8262_vm5, %v6812_v16  ;;  %3780 = vmatpush.bf16.msrb.mxu1 %v3676_v0  ;;  %v3526_v16 = vperm.slane %v7129_v8, 7  ;;  %v3691_v28 = vsel %vm8273_vm6, %v3651_v54, 0  ;;  %vm3932_vm5 = vmand %vm5252_vm9, %vm8275_vm13  ;;  %v3650_v24 = vpack.c.b16 %v3634_v40, %v3634_v40  ;;  %v3590_v8 = vsel %vm8277_vm11, %v3575_v22, %v3576_v59  ;;  %v7263_v22 = vpop.permute.xlu2 %3982  ;;  %v3979_v54 = vpop.permute.xlu0 %3978 }
 0x38e   :  { %3806 = vmatpush.bf16.msrb.mxu3 %v3682_v63  ;;  %vm3934_vm9 = vmand %vm3932_vm5, %vm8276_vm12  ;;  %v3591_v29 = vsel %vm8274_vm15, %v3590_v8, %v7194_v55 }
 0x38f   :  { %v2614_v50 = vpop.f32.mrf.mxu2  ;;  %vm7212_vm0 = vcmp.eq.s32.totalorder %v3526_v16, 1  ;;  %v7266_v58 = vsel %vm3934_vm9, 1, %v8045_v60  ;;  %v3998_v16 = vrot.slane %v7263_v22, 4 }
 0x390   :  { %v2625_v10 = vpop.f32.mrf.mxu3  ;;  %v2588_v14 = vpop.f32.mrf.mxu0  ;;  %vm3550_vm2 = vmpackc.low %vm7212_vm0, %vm7208_vm14  ;;  %v3940_v0 = vperm.slane %v7266_v58, 2  ;;  %v3941_v63 = vperm.slane %v7266_v58, 3  ;;  %v3939_v40 = vperm.slane %v7266_v58, 1 }
 0x391   :  { %v7206_v21 = vadd.f32 %v2625_v10, %v6938_v46  ;;  %v2601_v20 = vpop.f32.mrf.mxu1  ;;  %v3633_v46 = vunpack.c.l.b16 %v3606_v7  ;;  %v3609_v57 = vsel %vm3550_vm2, %v3593_v13, 0  ;;  %vm8283_vm14 = vmmov %vm8272_vm1 }
 0x392   :  { %vm8284_vm0 = vmmov %vm8272_vm1  ;;  %vm7285_vm5 = vcmp.eq.s32.totalorder %v3940_v0, 1  ;;  %vm7289_vm12 = vcmp.eq.s32.totalorder %v3941_v63, 1  ;;  %v3640_v53 = vunpack.c.h.b16 %v3609_v57 }
 0x393   :  { %v3649_v61 = vpack.c.b16 %v3633_v46, %v3633_v46  ;;  %vm3549_vm2 = vmpackc.low %vm7253_vm3, %vm7249_vm7  ;;  %vm8294_vm7 = vcmask 777216   ;;  %v3938_v46 = vperm.slane %v7266_v58, 0 }
 0x394   :  { %4566 = vmatmul.msk.bf16.vlgmr.msra.gmra.mxu2 %vm8272_vm1, %v7083_v62  ;;  %vm8285_vm1 = vmmov %vm8271_vm4  ;;  %v3608_v59 = vsel %vm3549_vm2, %v3591_v29, 0 }
 0x395   :  { %3845 = vmatpush.bf16.msra.mxu2 %v3691_v28  ;;  %v3688_v49 = vsel %vm8285_vm1, %v3650_v24, 0  ;;  %vm8286_vm6 = vmmov %vm8285_vm1  ;;  %v3637_v20 = vunpack.c.l.b16 %v3608_v59  ;;  %v3638_v6 = vunpack.c.h.b16 %v3608_v59  ;;  %v3996_v24 = vrot.slane %v3979_v54, 4  ;;  %v3985_v30 = vpop.permute.xlu2 %3984 }
 0x396   :  { %v3694_v45 = vsel %vm8286_vm6, %v3652_v37, 0  ;;  %vm8287_vm13 = vmmov %vm8285_vm1  ;;  %vm7315_vm3 = vcmp.eq.s32.totalorder %v3938_v46, 1 }
 0x397   :  { %v2883_v2 = vpop.f32.mrf.mxu2  ;;  %v4007_v14 = vsel %vm8287_vm13, %v3997_v26, %v3998_v16  ;;  %vm8292_vm9 = vmmov %vm8284_vm0  ;;  %v3654_v15 = vpack.c.b16 %v3638_v6, %v3638_v6 }
 0x398   :  { %v2627_v42 = vpop.f32.mrf.mxu3  ;;  %v7230_v17 = vadd.f32 %v2883_v2, %v6960_v44  ;;  %v2857_v33 = vpop.f32.mrf.mxu0  ;;  %v3639_v44 = vunpack.c.l.b16 %v3609_v57  ;;  %vm8293_vm11 = vmmov %vm8285_vm1  ;;  %v4008_v51 = vsel %vm8294_vm7, %v4007_v14, %v7263_v22  ;;  %v7404_v22 = vsel %vm6639_vm8, 1, %v8045_v60 }
 0x399   :  { %v7235_v38 = vadd.f32 %v2857_v33, %v6963_v48  ;;  %v2870_v41 = vpop.f32.mrf.mxu1  ;;  %v3653_v42 = vpack.c.b16 %v3637_v20, %v3637_v20  ;;  %v3949_v60 = vperm.slane %v7404_v22, 3 }
 0x39a   :  { %v7240_v11 = vadd.f32 %v2870_v41, %v6966_v35  ;;  %v3685_v35 = vsel %vm8271_vm4, %v3649_v61, 0  ;;  %v3655_v31 = vpack.c.b16 %v3639_v44, %v3639_v44  ;;  %v3656_v61 = vpack.c.b16 %v3640_v53, %v3640_v53  ;;  %v7313_v41 = vpop.permute.xlu0 %3986  ;;  %vm8300_vm4 = vmmov %vm8292_vm9 }
 0x39b   :  { %4564 = vmatmul.msk.bf16.vlgmr.msra.gmra.mxu0 %vm8278_vm10, %v7083_v62  ;;  %vm3971_vm10 = vmpackc.low %vm7289_vm12, %vm7285_vm5 }
 0x39c   :  { %4565 = vmatmul.msk.bf16.vlgmr.msra.gmra.mxu1 %vm8283_vm14, %v7083_v62  ;;  %3819 = vmatpush.bf16.msra.mxu0 %v3685_v35  ;;  %v4030_v5 = vsel %vm3971_vm10, %v4008_v51, 0  ;;  %vm7319_vm14 = vcmp.eq.s32.totalorder %v3939_v40, 1  ;;  %vm8306_vm12 = vmmov %vm8294_vm7  ;;  %v3942_v51 = vperm.slane %v7266_v58, 4 }
 0x39d   :  { %4567 = vmatmul.msk.bf16.vlgmr.msra.gmra.mxu3 %vm8284_vm0, %v7083_v62  ;;  %3832 = vmatpush.bf16.msra.mxu1 %v3688_v49  ;;  %vm8299_vm0 = vmmov %vm8285_vm1  ;;  %v3944_v49 = vperm.slane %v7266_v58, 6  ;;  %v4055_v6 = vunpack.c.h.b16 %v4030_v5 }
 0x39e   :  { %3858 = vmatpush.bf16.msra.mxu3 %v3694_v45  ;;  %v4005_v8 = vsel %vm8299_vm0, %v3996_v24, %v3997_v26  ;;  %vm8301_vm1 = vmmov %vm8300_vm4  ;;  %v3945_v45 = vperm.slane %v7266_v58, 7  ;;  %v4000_v26 = vrot.slane %v7313_v41, 4 }
 0x39f   :  { %v2885_v27 = vpop.f32.mrf.mxu2  ;;  %vm8302_vm6 = vmmov %vm8301_vm1 }
 0x3a0   :  { %v2896_v39 = vpop.f32.mrf.mxu3  ;;  %v2859_v50 = vpop.f32.mrf.mxu0  ;;  %vm8303_vm2 = vmmov %vm8299_vm0  ;;  %v4006_v27 = vsel %vm8306_vm12, %v4005_v8, %v7245_v3 }
 0x3a1   :  { %v7280_v23 = vadd.f32 %v2896_v39, %v7005_v32  ;;  %v2872_v10 = vpop.f32.mrf.mxu1  ;;  %v3703_v32 = vsel %vm8293_vm11, %v3655_v31, 0  ;;  %vm8304_vm15 = vmmov %vm8299_vm0  ;;  %v3999_v31 = vrot.slane %v3985_v30, 4  ;;  %vm7351_vm11 = vcmp.eq.s32.totalorder %v3945_v45, 1 }
 0x3a2   :  { %v3700_v48 = vsel %vm8304_vm15, %v3654_v15, 0  ;;  %vm8305_vm13 = vmmov %vm8299_vm0  ;;  %v7345_v10 = vpop.permute.xlu1 %4042 }
 0x3a3   :  { %v3706_v35 = vsel %vm8305_vm13, %v3656_v61, 0  ;;  %vm3970_vm5 = vmpackc.low %vm7319_vm14, %vm7315_vm3 }
 0x3a4   :  { %4570 = vmatmul.msk.bf16.vlgmr.msrb.gmra.mxu2 %vm8292_vm9, %v7083_v62  ;;  %v4029_v54 = vsel %vm3970_vm5, %v4006_v27, 0  ;;  %vm7347_vm9 = vcmp.eq.s32.totalorder %v3944_v49, 1  ;;  %vm8311_vm10 = vmmov %vm8299_vm0  ;;  %v3948_v49 = vperm.slane %v7404_v22, 2 }
 0x3a5   :  { %3897 = vmatpush.bf16.msrb.mxu2 %v3703_v32  ;;  %v4011_v3 = vsel %vm8311_vm10, %v3999_v31, %v4000_v26  ;;  %vm8312_vm7 = vmmov %vm8301_vm1  ;;  %v4052_v7 = vunpack.c.l.b16 %v4029_v54  ;;  %v4053_v32 = vunpack.c.h.b16 %v4029_v54 }
 0x3a6   :  { %vm8313_vm3 = vmmov %vm8299_vm0 }
 0x3a7   :  { %v2935_v28 = vpop.f32.mrf.mxu2  ;;  %vm3973_vm14 = vmpackc.low %vm7351_vm11, %vm7347_vm9 }
 0x3a8   :  { %v2898_v13 = vpop.f32.mrf.mxu3  ;;  %v7305_v9 = vadd.f32 %v2935_v28, %v7028_v43  ;;  %v2909_v2 = vpop.f32.mrf.mxu0  ;;  %vm8314_vm0 = vmmov %vm8306_vm12  ;;  %v3943_v28 = vperm.slane %v7266_v58, 5 }
 0x3a9   :  { %v7308_v57 = vadd.f32 %v2909_v2, %v7033_v4  ;;  %v2922_v33 = vpop.f32.mrf.mxu1  ;;  %v4054_v4 = vunpack.c.l.b16 %v4030_v5  ;;  %v4012_v20 = vsel %vm8314_vm0, %v4011_v3, %v7313_v41  ;;  %v4068_v2 = vpack.c.b16 %v4052_v7, %v4052_v7  ;;  %vm8323_vm5 = vmmov %vm8313_vm3 }
 0x3aa   :  { %v7311_v37 = vadd.f32 %v2922_v33, %v7036_v18  ;;  %v3697_v18 = vsel %vm8303_vm2, %v3653_v42, 0  ;;  %v4032_v13 = vsel %vm3973_vm14, %v4012_v20, 0  ;;  %v4069_v42 = vpack.c.b16 %v4053_v32, %v4053_v32  ;;  %vm8324_vm12 = vmmov %vm8313_vm3 }
 0x3ab   :  { %4568 = vmatmul.msk.bf16.vlgmr.msrb.gmra.mxu0 %vm8300_vm4, %v7083_v62  ;;  %v4070_v63 = vpack.c.b16 %v4054_v4, %v4054_v4  ;;  %v4071_v33 = vpack.c.b16 %v4055_v6, %v4055_v6  ;;  %vm7378_vm4 = vcmp.eq.s32.totalorder %v3942_v51, 1  ;;  %v4058_v43 = vunpack.c.l.b16 %v4032_v13  ;;  %v7399_v4 = vpop.permute.xlu2 %3990  ;;  %vm8325_vm9 = vmmov %vm8313_vm3 }
 0x3ac   :  { %4569 = vmatmul.msk.bf16.vlgmr.msrb.gmra.mxu1 %vm8301_vm1, %v7083_v62  ;;  %3871 = vmatpush.bf16.msrb.mxu0 %v3697_v18  ;;  %vm7382_vm1 = vcmp.eq.s32.totalorder %v3943_v28, 1  ;;  %v4091_v8 = vsel %vm8324_vm12, %v4069_v42, 0  ;;  %vm8326_vm10 = vmmov %vm8314_vm0  ;;  %v4002_v27 = vrot.slane %v7399_v4, 4  ;;  %v4059_v55 = vunpack.c.h.b16 %v4032_v13 }
 0x3ad   :  { %4571 = vmatmul.msk.bf16.vlgmr.msrb.gmra.mxu3 %vm8302_vm6, %v7083_v62  ;;  %3884 = vmatpush.bf16.msrb.mxu1 %v3700_v48  ;;  %vm8319_vm6 = vmmov %vm8303_vm2  ;;  %v4074_v25 = vpack.c.b16 %v4058_v43, %v4058_v43  ;;  %v3946_v7 = vperm.slane %v7404_v22, 0  ;;  %v3947_v32 = vperm.slane %v7404_v22, 1  ;;  %v3952_v43 = vperm.slane %v7404_v22, 6 }
 0x3ae   :  { %3910 = vmatpush.bf16.msrb.mxu3 %v3706_v35  ;;  %vm8320_vm2 = vmmov %vm8312_vm7  ;;  %v4075_v13 = vpack.c.b16 %v4059_v55, %v4059_v55 }
 0x3af   :  { %v2937_v29 = vpop.f32.mrf.mxu2  ;;  %vm8321_vm15 = vmmov %vm8320_vm2 }
 0x3b0   :  { %v2948_v0 = vpop.f32.mrf.mxu3  ;;  %v2911_v50 = vpop.f32.mrf.mxu0  ;;  %vm8322_vm13 = vmmov %vm8320_vm2 }
 0x3b1   :  { %v7343_v39 = vadd.f32 %v2948_v0, %v7070_v1  ;;  %v2924_v59 = vpop.f32.mrf.mxu1  ;;  %v4094_v1 = vsel %vm8313_vm3, %v4070_v63, 0  ;;  %vm3972_vm11 = vmpackc.low %vm7382_vm1, %vm7378_vm4 }
 0x3b2   :  { %vm8327_vm8 = vmmov %vm8313_vm3  ;;  %vm7426_vm3 = vcmp.eq.s32.totalorder %v3949_v60, 1 }
 0x3b3   :  { %vm8332_vm14 = vmmov %vm8320_vm2 }
 0x3b4   :  { %4574 = vmatmul.msk.bf16.vlgmr.msra.gmra.mxu2 %vm8312_vm7, %v7083_v62  ;;  %vm7422_vm7 = vcmp.eq.s32.totalorder %v3948_v49, 1  ;;  %vm8333_vm0 = vmmov %vm8323_vm5 }
 0x3b5   :  { %4168 = vmatpush.bf16.msra.mxu2 %v4094_v1  ;;  %vm3975_vm4 = vmpackc.low %vm7426_vm3, %vm7422_vm7  ;;  %vm7481_vm3 = vcmp.eq.s32.totalorder %v3952_v43, 1 }
 0x3b6   :  { %vm8334_vm1 = vmmov %vm8326_vm10 }
 0x3b7   :  { %v2987_v53 = vpop.f32.mrf.mxu2  ;;  %vm8345_vm7 = vmmov %vm8334_vm1 }
 0x3b8   :  { %v2950_v46 = vpop.f32.mrf.mxu3  ;;  %v7370_v40 = vadd.f32 %v2987_v53, %v7097_v36  ;;  %v2961_v15 = vpop.f32.mrf.mxu0  ;;  %v4009_v36 = vsel %vm8319_vm6, %v3998_v16, %v3999_v31  ;;  %v4097_v16 = vsel %vm8325_vm9, %v4071_v33, 0  ;;  %vm7450_vm6 = vcmp.eq.s32.totalorder %v3946_v7, 1  ;;  %vm8342_vm9 = vmmov %vm8333_vm0 }
 0x3b9   :  { %v7373_v61 = vadd.f32 %v2961_v15, %v7100_v52  ;;  %v2974_v24 = vpop.f32.mrf.mxu1  ;;  %v7389_v52 = vpop.permute.xlu1 %3988  ;;  %v4010_v18 = vsel %vm8326_vm10, %v4009_v36, %v3985_v30  ;;  %vm8344_vm10 = vmmov %vm8333_vm0 }
 0x3ba   :  { %v7376_v5 = vadd.f32 %v2974_v24, %v7103_v47  ;;  %v4088_v47 = vsel %vm8323_vm5, %v4068_v2, 0  ;;  %v4001_v48 = vrot.slane %v7389_v52, 4  ;;  %v4031_v63 = vsel %vm3972_vm11, %v4010_v18, 0  ;;  %vm8340_vm5 = vmmov %vm8322_vm13  ;;  %v3993_v36 = vpop.permute.xlu0 %3992 }
 0x3bb   :  { %4572 = vmatmul.msk.bf16.vlgmr.msra.gmra.mxu0 %vm8320_vm2, %v7083_v62  ;;  %v4056_v59 = vunpack.c.l.b16 %v4031_v63  ;;  %v4057_v14 = vunpack.c.h.b16 %v4031_v63  ;;  %vm7454_vm2 = vcmp.eq.s32.totalorder %v3947_v32, 1  ;;  %vm8341_vm12 = vmmov %vm8340_vm5  ;;  %v4109_v41 = vsel %vm8344_vm10, %v4075_v13, 0 }
 0x3bc   :  { %4573 = vmatmul.msk.bf16.vlgmr.msra.gmra.mxu1 %vm8321_vm15, %v7083_v62  ;;  %4142 = vmatpush.bf16.msra.mxu0 %v4088_v47  ;;  %v4015_v30 = vsel %vm8327_vm8, %v4001_v48, %v4002_v27  ;;  %vm8339_vm15 = vmmov %vm8333_vm0 }
 0x3bd   :  { %4575 = vmatmul.msk.bf16.vlgmr.msra.gmra.mxu3 %vm8322_vm13, %v7083_v62  ;;  %4155 = vmatpush.bf16.msra.mxu1 %v4091_v8  ;;  %v4016_v3 = vsel %vm8334_vm1, %v4015_v30, %v7399_v4  ;;  %v4072_v53 = vpack.c.b16 %v4056_v59, %v4056_v59  ;;  %v4073_v51 = vpack.c.b16 %v4057_v14, %v4057_v14  ;;  %vm8343_vm11 = vmmov %vm8333_vm0  ;;  %v3951_v59 = vperm.slane %v7404_v22, 5 }
 0x3be   :  { %4181 = vmatpush.bf16.msra.mxu3 %v4097_v16  ;;  %v4034_v46 = vsel %vm3975_vm4, %v4016_v3, 0  ;;  %vm3974_vm8 = vmpackc.low %vm7454_vm2, %vm7450_vm6 }
 0x3bf   :  { %v2989_v35 = vpop.f32.mrf.mxu2  ;;  %v4103_v58 = vsel %vm8343_vm11, %v4073_v51, 0  ;;  %vm8350_vm4 = vmmov %vm8340_vm5  ;;  %v4063_v50 = vunpack.c.h.b16 %v4034_v46 }
 0x3c0   :  { %v3000_v45 = vpop.f32.mrf.mxu3  ;;  %v2963_v0 = vpop.f32.mrf.mxu0  ;;  %vm8351_vm1 = vmmov %vm8333_vm0 }
 0x3c1   :  { %v7417_v29 = vadd.f32 %v3000_v45, %v7142_v12  ;;  %v2976_v31 = vpop.f32.mrf.mxu1  ;;  %v4106_v12 = vsel %vm8333_vm0, %v4074_v25, 0  ;;  %v3995_v44 = vpop.permute.xlu1 %3994  ;;  %vm8352_vm2 = vmmov %vm8345_vm7  ;;  %v4079_v51 = vpack.c.b16 %v4063_v50, %v4063_v50 }
 0x3c2   :  { %v4004_v47 = vrot.slane %v3995_v44, 4  ;;  %vm8360_vm11 = vmmov %vm8350_vm4 }
 0x3c3   :  { %vm8361_vm10 = vmmov %vm8333_vm0 }
 0x3c4   :  { %4578 = vmatmul.msk.bf16.vlgmr.msrb.gmra.mxu2 %vm8332_vm14, %v7083_v62 }
 0x3c5   :  { %4220 = vmatpush.bf16.msrb.mxu2 %v4106_v12  ;;  %v3950_v12 = vperm.slane %v7404_v22, 4 }
 0x3c7   :  { %v3039_v1 = vpop.f32.mrf.mxu2 }
 0x3c8   :  { %v3002_v20 = vpop.f32.mrf.mxu3  ;;  %v7442_v6 = vadd.f32 %v3039_v1, %v7167_v34  ;;  %v3013_v28 = vpop.f32.mrf.mxu0  ;;  %v4013_v34 = vsel %vm8339_vm15, %v4000_v26, %v4001_v48  ;;  %v4003_v48 = vrot.slane %v3993_v36, 4  ;;  %vm7509_vm15 = vcmp.eq.s32.totalorder %v3950_v12, 1 }
 0x3c9   :  { %v7445_v2 = vadd.f32 %v3013_v28, %v7170_v56  ;;  %v3026_v42 = vpop.f32.mrf.mxu1  ;;  %v4062_v56 = vunpack.c.l.b16 %v4034_v46  ;;  %v4014_v26 = vsel %vm8345_vm7, %v4013_v34, %v7389_v52  ;;  %vm8363_vm7 = vmmov %vm8333_vm0 }
 0x3ca   :  { %v7448_v15 = vadd.f32 %v3026_v42, %v7173_v19  ;;  %v4100_v19 = vsel %vm8342_vm9, %v4072_v53, 0  ;;  %v4033_v60 = vsel %vm3974_vm8, %v4014_v26, 0  ;;  %v4019_v0 = vsel %vm8333_vm0, %v4003_v48, %v4004_v47  ;;  %vm8359_vm9 = vmmov %vm8350_vm4 }
 0x3cb   :  { %4576 = vmatmul.msk.bf16.vlgmr.msrb.gmra.mxu0 %vm8322_vm13, %v7083_v62  ;;  %v4078_v18 = vpack.c.b16 %v4062_v56, %v4062_v56  ;;  %v4061_v31 = vunpack.c.h.b16 %v4033_v60  ;;  %v4020_v30 = vsel %vm8352_vm2, %v4019_v0, %v3995_v44  ;;  %vm7513_vm13 = vcmp.eq.s32.totalorder %v3951_v59, 1  ;;  %vm8362_vm8 = vmmov %vm8333_vm0 }
 0x3cc   :  { %4577 = vmatmul.msk.bf16.vlgmr.msrb.gmra.mxu1 %vm8340_vm5, %v7083_v62  ;;  %4194 = vmatpush.bf16.msrb.mxu0 %v4100_v19  ;;  %vm8357_vm5 = vmmov %vm8333_vm0  ;;  %v4121_v4 = vsel %vm8363_vm7, %v4079_v51, 0 }
 0x3cd   :  { %4579 = vmatmul.msk.bf16.vlgmr.msrb.gmra.mxu3 %vm8341_vm12, %v7083_v62  ;;  %4207 = vmatpush.bf16.msrb.mxu1 %v4103_v58  ;;  %v3953_v62 = vperm.slane %v7404_v22, 7  ;;  %v4118_v63 = vsel %vm8351_vm1, %v4078_v18, 0  ;;  %v4077_v1 = vpack.c.b16 %v4061_v31, %v4061_v31  ;;  %vm8358_vm12 = vmmov %vm8350_vm4 }
 0x3ce   :  { %4233 = vmatpush.bf16.msrb.mxu3 %v4109_v41  ;;  %vm8365_vm0 = vmmov %vm8350_vm4 }
 0x3cf   :  { %v3041_v8 = vpop.f32.mrf.mxu2  ;;  %vm7485_vm14 = vcmp.eq.s32.totalorder %v3953_v62, 1  ;;  %vm8378_vm7 = vmmov %vm8365_vm0 }
 0x3d0   :  { %v3052_v16 = vpop.f32.mrf.mxu3  ;;  %v3015_v49 = vpop.f32.mrf.mxu0  ;;  %vm3977_vm6 = vmpackc.low %vm7485_vm14, %vm7481_vm3 }
 0x3d1   :  { %v7479_v35 = vadd.f32 %v3052_v16, %v7206_v21  ;;  %v3028_v25 = vpop.f32.mrf.mxu1  ;;  %v4060_v21 = vunpack.c.l.b16 %v4033_v60  ;;  %v4036_v7 = vsel %vm3977_vm6, %v4020_v30, 0  ;;  %vm3976_vm3 = vmpackc.low %vm7513_vm13, %vm7509_vm15 }
 0x3d2   :  { %v4066_v13 = vunpack.c.l.b16 %v4036_v7  ;;  %vm8364_vm14 = vmmov %vm8352_vm2  ;;  %v4067_v43 = vunpack.c.h.b16 %v4036_v7 }
 0x3d3   :  { %v4076_v3 = vpack.c.b16 %v4060_v21, %v4060_v21  ;;  %vm8368_vm6 = vmmov %vm8365_vm0 }
 0x3d4   :  { %4582 = vmatmul.msk.bf16.vlgmr.msra.gmra.mxu2 %vm8350_vm4, %v7345_v10  ;;  %v4082_v24 = vpack.c.b16 %v4066_v13, %v4066_v13  ;;  %vm8366_vm4 = vmmov %vm8351_vm1  ;;  %v4083_v18 = vpack.c.b16 %v4067_v43, %v4067_v43 }
 0x3d5   :  { %4272 = vmatpush.bf16.msra.mxu2 %v4118_v63  ;;  %vm8367_vm1 = vmmov %vm8365_vm0 }
 0x3d6   :  { %v4130_v58 = vsel %vm8366_vm4, %v4082_v24, 0  ;;  %vm8369_vm2 = vmmov %vm8365_vm0 }
 0x3d7   :  { %v3316_v54 = vpop.f32.mrf.mxu2  ;;  %vm8370_vm15 = vmmov %vm8366_vm4 }
 0x3d8   :  { %v3054_v14 = vpop.f32.mrf.mxu3  ;;  %v7501_v55 = vadd.f32 %v3316_v54, %v7230_v17  ;;  %v3290_v32 = vpop.f32.mrf.mxu0  ;;  %v4017_v17 = vsel %vm8357_vm5, %v4002_v27, %v4003_v48  ;;  %vm8371_vm13 = vmmov %vm8366_vm4 }
 0x3d9   :  { %v7504_v20 = vadd.f32 %v3290_v32, %v7235_v38  ;;  %v3303_v53 = vpop.f32.mrf.mxu1  ;;  %v4112_v38 = vsel %vm8361_vm10, %v4076_v3, 0  ;;  %v4018_v27 = vsel %vm8364_vm14, %v4017_v17, %v3993_v36  ;;  %vm8372_vm5 = vmmov %vm8366_vm4 }
 0x3da   :  { %v7507_v28 = vadd.f32 %v3303_v53, %v7240_v11  ;;  %v4115_v11 = vsel %vm8362_vm8, %v4077_v1, 0  ;;  %v4035_v56 = vsel %vm3976_vm3, %v4018_v27, 0  ;;  %vm8376_vm10 = vmmov %vm8365_vm0 }
 0x3db   :  { %4580 = vmatmul.msk.bf16.vlgmr.msra.gmra.mxu0 %vm8358_vm12, %v7345_v10  ;;  %v4064_v41 = vunpack.c.l.b16 %v4035_v56  ;;  %v4065_v26 = vunpack.c.h.b16 %v4035_v56  ;;  %vm8373_vm12 = vmmov %vm8365_vm0 }
 0x3dc   :  { %4581 = vmatmul.msk.bf16.vlgmr.msra.gmra.mxu1 %vm8359_vm9, %v7345_v10  ;;  %4246 = vmatpush.bf16.msra.mxu0 %v4112_v38  ;;  %vm8374_vm9 = vmmov %vm8365_vm0 }
 0x3dd   :  { %4583 = vmatmul.msk.bf16.vlgmr.msra.gmra.mxu3 %vm8360_vm11, %v7345_v10  ;;  %4259 = vmatpush.bf16.msra.mxu1 %v4115_v11  ;;  %v4080_v8 = vpack.c.b16 %v4064_v41, %v4064_v41  ;;  %vm8375_vm11 = vmmov %vm8365_vm0 }
 0x3de   :  { %4285 = vmatpush.bf16.msra.mxu3 %v4121_v4  ;;  %vm8377_vm8 = vmmov %vm8365_vm0 }
 0x3df   :  { %v3318_v42 = vpop.f32.mrf.mxu2  ;;  %vm8379_vm3 = vmmov %vm8365_vm0 }
 0x3e0   :  { %v3329_v33 = vpop.f32.mrf.mxu3  ;;  %v3292_v44 = vpop.f32.mrf.mxu0  ;;  %vm8380_vm14 = vmmov %vm8365_vm0 }
 0x3e1   :  { %v7535_v34 = vadd.f32 %v3329_v33, %v7280_v23  ;;  %v3305_v19 = vpop.f32.mrf.mxu1  ;;  %v4081_v23 = vpack.c.b16 %v4065_v26, %v4065_v26 }
 0x3e3   :  { %v4127_v25 = vsel %vm8371_vm13, %v4081_v23, 0 }
 0x3e4   :  { %4586 = vmatmul.msk.bf16.vlgmr.msrb.gmra.mxu2 %vm8365_vm0, %v7345_v10  ;;  %vm8381_vm0 = vmmov %vm8366_vm4 }
 0x3e5   :  { %4324 = vmatpush.bf16.msrb.mxu2 %v4130_v58  ;;  %vm8382_vm4 = vmmov %vm8381_vm0 }
 0x3e6   :  { %vm8387_vm13 = vmmov %vm8381_vm0 }
 0x3e7   :  { %v3368_v36 = vpop.f32.mrf.mxu2 }
 0x3e8   :  { %v3331_v62 = vpop.f32.mrf.mxu3  ;;  %v7541_v47 = vadd.f32 %v3368_v36, %v7305_v9  ;;  %v3342_v16 = vpop.f32.mrf.mxu0  ;;  %v4124_v9 = vsel %vm8370_vm15, %v4080_v8, 0  ;;  %vm8386_vm15 = vmmov %vm8381_vm0 }
 0x3e9   :  { %v7544_v48 = vadd.f32 %v3342_v16, %v7308_v57  ;;  %v3355_v49 = vpop.f32.mrf.mxu1  ;;  %v4133_v57 = vsel %vm8372_vm5, %v4083_v18, 0  ;;  %vm8388_vm5 = vmmov %vm8381_vm0 }
 0x3ea   :  { %v7547_v60 = vadd.f32 %v3355_v49, %v7311_v37 }
 0x3eb   :  { %4584 = vmatmul.msk.bf16.vlgmr.msrb.gmra.mxu0 %vm8367_vm1, %v7345_v10  ;;  %vm8383_vm1 = vmmov %vm8381_vm0 }
 0x3ec   :  { %4585 = vmatmul.msk.bf16.vlgmr.msrb.gmra.mxu1 %vm8368_vm6, %v7345_v10  ;;  %4298 = vmatpush.bf16.msrb.mxu0 %v4124_v9  ;;  %vm8384_vm6 = vmmov %vm8381_vm0 }
 0x3ed   :  { %4587 = vmatmul.msk.bf16.vlgmr.msrb.gmra.mxu3 %vm8369_vm2, %v7345_v10  ;;  %4311 = vmatpush.bf16.msrb.mxu1 %v4127_v25  ;;  %vm8385_vm2 = vmmov %vm8381_vm0 }
 0x3ee   :  { %4337 = vmatpush.bf16.msrb.mxu3 %v4133_v57 }
 0x3ef   :  { %v3370_v37 = vpop.f32.mrf.mxu2 }
 0x3f0   :  { %v3381_v45 = vpop.f32.mrf.mxu3  ;;  %v3344_v0 = vpop.f32.mrf.mxu0 }
 0x3f1   :  { %v7559_v52 = vadd.f32 %v3381_v45, %v7343_v39  ;;  %v3357_v63 = vpop.f32.mrf.mxu1 }
 0x3f4   :  { %4590 = vmatmul.msk.bf16.vlgmr.msra.gmra.mxu2 %vm8373_vm12, %v7345_v10 }
 0x3f7   :  { %v3420_v21 = vpop.f32.mrf.mxu2 }
 0x3f8   :  { %v3383_v31 = vpop.f32.mrf.mxu3  ;;  %v3499_v30 = vadd.f32 %v3420_v21, %v7370_v40  ;;  %v3394_v50 = vpop.f32.mrf.mxu0 }
 0x3f9   :  { %v3497_v54 = vadd.f32 %v3394_v50, %v7373_v61  ;;  %v3407_v12 = vpop.f32.mrf.mxu1 }
 0x3fa   :  { %v7566_v59 = vadd.f32 %v3407_v12, %v7376_v5 }
 0x3fb   :  { %4588 = vmatmul.msk.bf16.vlgmr.msra.gmra.mxu0 %vm8374_vm9, %v7345_v10 }
 0x3fc   :  { %4589 = vmatmul.msk.bf16.vlgmr.msra.gmra.mxu1 %vm8375_vm11, %v7345_v10 }
 0x3fd   :  { %4591 = vmatmul.msk.bf16.vlgmr.msra.gmra.mxu3 %vm8376_vm10, %v7345_v10 }
 0x3ff   :  { %v3422_v39 = vpop.f32.mrf.mxu2 }
 0x400   :  { %v3433_v14 = vpop.f32.mrf.mxu3  ;;  %v3396_v3 = vpop.f32.mrf.mxu0 }
 0x401   :  { %v7575_v40 = vadd.f32 %v3433_v14, %v7417_v29  ;;  %v3409_v61 = vpop.f32.mrf.mxu1 }
 0x404   :  { %4594 = vmatmul.msk.bf16.vlgmr.msrb.gmra.mxu2 %vm8377_vm8, %v7345_v10 }
 0x407   :  { %v3472_v5 = vpop.f32.mrf.mxu2 }
 0x408   :  { %v3435_v1 = vpop.f32.mrf.mxu3  ;;  %v3503_v7 = vadd.f32 %v3472_v5, %v7442_v6  ;;  %v3446_v32 = vpop.f32.mrf.mxu0 }
 0x409   :  { %v3501_v53 = vadd.f32 %v3446_v32, %v7445_v2  ;;  %v3459_v51 = vpop.f32.mrf.mxu1  ;;  %v7618_v1 = vpop.permute.xlu2 %4362 }
 0x40a   :  { %v7582_v46 = vadd.f32 %v3459_v51, %v7448_v15 }
 0x40b   :  { %4592 = vmatmul.msk.bf16.vlgmr.msrb.gmra.mxu0 %vm8378_vm7, %v7345_v10 }
 0x40c   :  { %4593 = vmatmul.msk.bf16.vlgmr.msrb.gmra.mxu1 %vm8379_vm3, %v7345_v10 }
 0x40d   :  { %4595 = vmatmul.msk.bf16.vlgmr.msrb.gmra.mxu3 %vm8380_vm14, %v7345_v10 }
 0x40f   :  { %v3474_v29 = vpop.f32.mrf.mxu2 }
 0x410   :  { %v3485_v22 = vpop.f32.mrf.mxu3  ;;  %v3448_v17 = vpop.f32.mrf.mxu0 }
 0x411   :  { %v7591_v6 = vadd.f32 %v3485_v22, %v7479_v35  ;;  %v3461_v2 = vpop.f32.mrf.mxu1 }
 0x417   :  { %v3743_v13 = vpop.f32.mrf.mxu2 }
 0x418   :  { %v3487_v38 = vpop.f32.mrf.mxu3  ;;  %v3918_v15 = vadd.f32 %v3743_v13, %v7501_v55  ;;  %v3717_v11 = vpop.f32.mrf.mxu0 }
 0x419   :  { %v3916_v4 = vadd.f32 %v3717_v11, %v7504_v20  ;;  %v3730_v27 = vpop.f32.mrf.mxu1 }
 0x41a   :  { %v3917_v39 = vadd.f32 %v3730_v27, %v7507_v28 }
 0x41f   :  { %v3745_v42 = vpop.f32.mrf.mxu2 }
 0x420   :  { %v3756_v24 = vpop.f32.mrf.mxu3  ;;  %v3719_v33 = vpop.f32.mrf.mxu0 }
 0x421   :  { %v3732_v44 = vpop.f32.mrf.mxu1 }
 0x427   :  { %v3795_v10 = vpop.f32.mrf.mxu2 }
 0x428   :  { %v3758_v56 = vpop.f32.mrf.mxu3  ;;  %v7596_v19 = vadd.f32 %v3795_v10, %v7541_v47  ;;  %v3769_v35 = vpop.f32.mrf.mxu0 }
 0x429   :  { %v3920_v58 = vadd.f32 %v3769_v35, %v7544_v48  ;;  %v3782_v41 = vpop.f32.mrf.mxu1 }
 0x42f   :  { %v3797_v26 = vpop.f32.mrf.mxu2 }
 0x430   :  { %v7599_v43 = vpop.f32.mrf.mxu3  ;;  %v3771_v55 = vpop.f32.mrf.mxu0 }
 0x431   :  { %v3784_v36 = vpop.f32.mrf.mxu1 }
 0x437   :  { %v3847_v20 = vpop.f32.mrf.mxu2 }
 0x438   :  { %v3810_v62 = vpop.f32.mrf.mxu3  ;;  %v7601_v8 = vadd.f32 %v3847_v20, %v3499_v30  ;;  %v3821_v23 = vpop.f32.mrf.mxu0 }
 0x439   :  { %v7603_v16 = vadd.f32 %v3821_v23, %v3497_v54  ;;  %v7605_v18 = vpop.f32.mrf.mxu1 }
 0x43f   :  { %v3849_v47 = vpop.f32.mrf.mxu2 }
 0x440   :  { %v7607_v49 = vpop.f32.mrf.mxu3  ;;  %v3823_v9 = vpop.f32.mrf.mxu0 }
 0x441   :  { %v3836_v48 = vpop.f32.mrf.mxu1 }
 0x447   :  { %v3899_v25 = vpop.f32.mrf.mxu2 }
 0x448   :  { %v3862_v57 = vpop.f32.mrf.mxu3  ;;  %v7609_v37 = vadd.f32 %v3899_v25, %v3503_v7  ;;  %v3873_v45 = vpop.f32.mrf.mxu0 }
 0x449   :  { %v7611_v0 = vadd.f32 %v3873_v45, %v3501_v53  ;;  %v7613_v63 = vpop.f32.mrf.mxu1  ;;  %v3919_v53 = vadd.f32 %v3756_v24, %v7535_v34  ;;  %v3921_v24 = vadd.f32 %v3782_v41, %v7547_v60  ;;  %v3923_v60 = vadd.f32 %v7599_v43, %v7559_v52 }
 0x44f   :  { %v3901_v21 = vpop.f32.mrf.mxu2 }
 0x450   :  { %v7615_v31 = vpop.f32.mrf.mxu3  ;;  %v3875_v30 = vpop.f32.mrf.mxu0 }
 0x451   :  { %v3888_v50 = vpop.f32.mrf.mxu1 }
 0x452   :  { %v3925_v50 = vadd.f32 %v7605_v18, %v7566_v59  ;;  %v3927_v59 = vadd.f32 %v7607_v49, %v7575_v40 }
 0x457   :  { %v4170_v54 = vpop.f32.mrf.mxu2 }
 0x458   :  { %v3914_v12 = vpop.f32.mrf.mxu3  ;;  %v4144_v14 = vpop.f32.mrf.mxu0  ;;  %v4345_v51 = vadd.f32 %v4170_v54, %v3918_v15 }
 0x459   :  { %v4343_v3 = vadd.f32 %v4144_v14, %v3916_v4  ;;  %v4157_v61 = vpop.f32.mrf.mxu1 }
 0x45a   :  { %v4344_v5 = vadd.f32 %v4157_v61, %v3917_v39  ;;  %v4367_v13 = vadd.f32 %v7618_v1, %v4345_v51 }
 0x45b   :  { %v4365_v7 = vadd.f32 %v7618_v1, %v4343_v3 }
 0x45c   :  { %v4366_v32 = vadd.f32 %v7618_v1, %v4344_v5 }
 0x45e   :  { %4614 = vtanh.f32 %v4366_v32 }
 0x45f   :  { %v4172_v29 = vpop.f32.mrf.mxu2  ;;  %4616 = vtanh.f32 %v4365_v7 }
 0x460   :  { %v4183_v22 = vpop.f32.mrf.mxu3  ;;  %v4146_v2 = vpop.f32.mrf.mxu0 }
 0x461   :  { %v4346_v17 = vadd.f32 %v4183_v22, %v3919_v53  ;;  %v4159_v28 = vpop.f32.mrf.mxu1 }
 0x463   :  { %v4368_v38 = vadd.f32 %v7618_v1, %v4346_v17 }
 0x464   :  { %v4615_v11 = vpop.eup %4614 }
 0x465   :  { %4618 = vtanh.f32 %v4368_v38  ;;  %v4413_v4 = vrot.slane %v4615_v11, 4  ;;  %v4617_v27 = vpop.eup %4616 }
 0x466   :  { %4620 = vtanh.f32 %v4367_v13 }
 0x467   :  { %v4222_v42 = vpop.f32.mrf.mxu2  ;;  %v4421_v34 = vsel %vm8381_vm0, %v4617_v27, %v4413_v4  ;;  %v3929_v4 = vadd.f32 %v7613_v63, %v7582_v46  ;;  %v3931_v46 = vadd.f32 %v7615_v31, %v7591_v6 }
 0x468   :  { %v4185_v15 = vpop.f32.mrf.mxu3  ;;  %4437 = vst [vmem:[%s7690_s5] sm:$0xff] %v4421_v34  ;;  %v4196_v33 = vpop.f32.mrf.mxu0 }
 0x469   :  { %v4347_v44 = vadd.f32 %v4196_v33, %v3920_v58  ;;  %v4209_v10 = vpop.f32.mrf.mxu1  ;;  %v4349_v58 = vadd.f32 %v4222_v42, %v7596_v19 }
 0x46a   :  { %v4348_v35 = vadd.f32 %v4209_v10, %v3921_v24 }
 0x46b   :  { %v4619_v56 = vpop.eup %4618  ;;  %v4369_v36 = vadd.f32 %v7618_v1, %v4347_v44  ;;  %v4371_v25 = vadd.f32 %v7618_v1, %v4349_v58 }
 0x46c   :  { %v4414_v26 = vrot.slane %v4619_v56, 4  ;;  %v4621_v55 = vpop.eup %4620  ;;  %v4370_v20 = vadd.f32 %v7618_v1, %v4348_v35 }
 0x46e   :  { %v4422_v62 = vsel %vm8382_vm4, %v4621_v55, %v4414_v26  ;;  %4622 = vtanh.f32 %v4370_v20 }
 0x46f   :  { %4438 = vst [vmem:[%s7690_s5 + $0x8] sm:$0xff] %v4422_v62  ;;  %v4224_v41 = vpop.f32.mrf.mxu2  ;;  %4624 = vtanh.f32 %v4369_v36 }
 0x470   :  { %v4235_v23 = vpop.f32.mrf.mxu3  ;;  %v4198_v9 = vpop.f32.mrf.mxu0 }
 0x471   :  { %v4350_v47 = vadd.f32 %v4235_v23, %v3923_v60  ;;  %v4211_v48 = vpop.f32.mrf.mxu1 }
 0x473   :  { %v4372_v57 = vadd.f32 %v7618_v1, %v4350_v47 }
 0x474   :  { %v4623_v45 = vpop.eup %4622 }
 0x475   :  { %4626 = vtanh.f32 %v4372_v57  ;;  %v4415_v52 = vrot.slane %v4623_v45, 4  ;;  %v4625_v43 = vpop.eup %4624 }
 0x476   :  { %4628 = vtanh.f32 %v4371_v25 }
 0x477   :  { %v4274_v21 = vpop.f32.mrf.mxu2  ;;  %v4423_v30 = vsel %vm8383_vm1, %v4625_v43, %v4415_v52 }
 0x478   :  { %v4237_v19 = vpop.f32.mrf.mxu3  ;;  %4439 = vst [vmem:[%s7690_s5 + $0x10] sm:$0xff] %v4423_v30  ;;  %v4248_v54 = vpop.f32.mrf.mxu0 }
 0x479   :  { %v4351_v12 = vadd.f32 %v4248_v54, %v7603_v16  ;;  %v4261_v39 = vpop.f32.mrf.mxu1  ;;  %v4353_v16 = vadd.f32 %v4274_v21, %v7601_v8 }
 0x47a   :  { %v4352_v3 = vadd.f32 %v4261_v39, %v3925_v50 }
 0x47b   :  { %v4627_v14 = vpop.eup %4626  ;;  %v4373_v7 = vadd.f32 %v7618_v1, %v4351_v12  ;;  %v4375_v2 = vadd.f32 %v7618_v1, %v4353_v16 }
 0x47c   :  { %v4416_v61 = vrot.slane %v4627_v14, 4  ;;  %v4629_v5 = vpop.eup %4628  ;;  %v4374_v32 = vadd.f32 %v7618_v1, %v4352_v3 }
 0x47e   :  { %v4424_v53 = vsel %vm8384_vm6, %v4629_v5, %v4416_v61  ;;  %4630 = vtanh.f32 %v4374_v32 }
 0x47f   :  { %4440 = vst [vmem:[%s7690_s5 + $0x18] sm:$0xff] %v4424_v53  ;;  %v4276_v18 = vpop.f32.mrf.mxu2  ;;  %4632 = vtanh.f32 %v4373_v7 }
 0x480   :  { %v4287_v51 = vpop.f32.mrf.mxu3  ;;  %v4250_v22 = vpop.f32.mrf.mxu0 }
 0x481   :  { %v4354_v29 = vadd.f32 %v4287_v51, %v3927_v59  ;;  %v4263_v17 = vpop.f32.mrf.mxu1 }
 0x483   :  { %v4376_v28 = vadd.f32 %v7618_v1, %v4354_v29 }
 0x484   :  { %v4631_v13 = vpop.eup %4630 }
 0x485   :  { %4634 = vtanh.f32 %v4376_v28  ;;  %v4417_v40 = vrot.slane %v4631_v13, 4  ;;  %v4633_v49 = vpop.eup %4632 }
 0x486   :  { %4636 = vtanh.f32 %v4375_v2 }
 0x487   :  { %v4326_v38 = vpop.f32.mrf.mxu2  ;;  %v4425_v11 = vsel %vm8385_vm2, %v4633_v49, %v4417_v40 }
 0x488   :  { %v4289_v8 = vpop.f32.mrf.mxu3  ;;  %4441 = vst [vmem:[%s7690_s5 + $0x20] sm:$0xff] %v4425_v11  ;;  %v4300_v27 = vpop.f32.mrf.mxu0 }
 0x489   :  { %v4355_v42 = vadd.f32 %v4300_v27, %v7611_v0  ;;  %v4313_v34 = vpop.f32.mrf.mxu1  ;;  %v4357_v0 = vadd.f32 %v4326_v38, %v7609_v37 }
 0x48a   :  { %v4356_v24 = vadd.f32 %v4313_v34, %v3929_v4 }
 0x48b   :  { %v4635_v15 = vpop.eup %4634  ;;  %v4377_v10 = vadd.f32 %v7618_v1, %v4355_v42  ;;  %v4379_v62 = vadd.f32 %v7618_v1, %v4357_v0 }
 0x48c   :  { %v4418_v33 = vrot.slane %v4635_v15, 4  ;;  %v4637_v44 = vpop.eup %4636  ;;  %v4378_v56 = vadd.f32 %v7618_v1, %v4356_v24 }
 0x48e   :  { %v4426_v35 = vsel %vm8386_vm15, %v4637_v44, %v4418_v33  ;;  %4638 = vtanh.f32 %v4378_v56 }
 0x48f   :  { %4442 = vst [vmem:[%s7690_s5 + $0x28] sm:$0xff] %v4426_v35  ;;  %v4328_v63 = vpop.f32.mrf.mxu2  ;;  %4640 = vtanh.f32 %v4377_v10 }
 0x490   :  { %v4339_v26 = vpop.f32.mrf.mxu3  ;;  %v4302_v36 = vpop.f32.mrf.mxu0 }
 0x491   :  { %v4358_v55 = vadd.f32 %v4339_v26, %v3931_v46  ;;  %v4315_v20 = vpop.f32.mrf.mxu1 }
 0x493   :  { %v4380_v60 = vadd.f32 %v7618_v1, %v4358_v55 }
 0x494   :  { %v4639_v58 = vpop.eup %4638 }
 0x495   :  { %4642 = vtanh.f32 %v4380_v60  ;;  %v4419_v6 = vrot.slane %v4639_v58, 4  ;;  %v4641_v31 = vpop.eup %4640 }
 0x496   :  { %4644 = vtanh.f32 %v4379_v62 }
 0x497   :  { %v4427_v41 = vsel %vm8387_vm13, %v4641_v31, %v4419_v6 }
 0x498   :  { %v4341_v23 = vpop.f32.mrf.mxu3  ;;  %4443 = vst [vmem:[%s7690_s5 + $0x30] sm:$0xff] %v4427_v41 }
 0x49b   :  { %v4643_v37 = vpop.eup %4642 }
 0x49c   :  { %v4420_v47 = vrot.slane %v4643_v37, 4  ;;  %v4645_v9 = vpop.eup %4644 }
 0x49e   :  { %v4428_v48 = vsel %vm8388_vm5, %v4645_v9, %v4420_v47 }
 0x49f   :  { %4444 = vst [vmem:[%s7690_s5 + $0x38] sm:$0xff] %v4428_v48 }

</bundles_post_ra>
